<compile_context>
chip_gen: v6e
topology: v6e:2x2x1
jax: 0.10.0
libtpu: 0.0.40
codegen_flags: <defaults>
</compile_context>

<pallas_src>
import jax
import jax.numpy as jnp
from jax.experimental import pallas as pl
from jax.experimental.pallas import tpu as pltpu

DIMS = [789, 800, 1000, 800, 600, 400, 300, 1]
N_LAYERS = len(DIMS) - 1


def _pad_to(n: int, m: int) -> int:
    return ((n + m - 1) // m) * m


# Per-layer padded extents.
COLS      = [_pad_to(DIMS[l + 1], 128) for l in range(N_LAYERS)]  # out feats (lane dim)
VMEM_ROWS = [_pad_to(DIMS[l],     128) for l in range(N_LAYERS)]  # contraction dim in VMEM
HBM_ROWS  = [_pad_to(DIMS[l],      16) for l in range(N_LAYERS)]  # contraction dim in HBM
IN_P      = VMEM_ROWS[0]             # 896  (padded input feature width)
OUT_P     = COLS[-1]                 # 128  (padded output width)
BIAS_ROWS = _pad_to(N_LAYERS, 8)     # 8
BIAS_COLS = max(COLS)                # 1024


def evalnet_kernel(x_ref, b_ref, *rest):
    """Fused 7-layer tanh MLP with layer-streamed weights.

    x_ref : [Bp, IN_P]       f32  (zero-padded input activations)
    b_ref : [8, 1024]        f32  (row l = layer-l bias, zero-padded)
    rest  : w0..w6 HBM refs  bf16 [HBM_ROWS[l], COLS[l]] (memory_space=pl.ANY),
            out_ref          f32  [Bp, OUT_P],
            w0..w6 scratch   bf16 VMEM [VMEM_ROWS[l], COLS[l]],
            sem              DMA semaphores, shape (N_LAYERS,)
    """
    w_hbm  = rest[:N_LAYERS]
    out_ref = rest[N_LAYERS]
    w_scr  = rest[N_LAYERS + 1: 2 * N_LAYERS + 1]
    sem    = rest[2 * N_LAYERS + 1]

    # Zero the scratch rows the DMA will not fill (HBM_ROWS[l]:VMEM_ROWS[l]).
    # The matching activation columns are zero, but uninitialized VMEM may hold
    # NaN/Inf bit patterns and 0*NaN = NaN, so these rows must be real zeros.
    # All offsets/sizes are multiples of 16 -> cheap aligned vector stores.
    for l in range(N_LAYERS):
        r16, r128, c = HBM_ROWS[l], VMEM_ROWS[l], COLS[l]
        if r16 < r128:
            w_scr[l][r16:, :] = jnp.zeros((r128 - r16, c), jnp.bfloat16)

    # Issue every weight DMA up front (deep prefetch).  We wait per layer below,
    # so layer-l compute overlaps the in-flight DMAs of layers l+1..6.
    copies = []
    for l in range(N_LAYERS):
        cp = pltpu.make_async_copy(w_hbm[l], w_scr[l].at[:HBM_ROWS[l], :], sem.at[l])
        cp.start()
        copies.append(cp)

    h = x_ref[...]                                             # f32 activations
    for l in range(N_LAYERS):
        copies[l].wait()                                       # layer-l weights ready
        w = w_scr[l][...]                                      # bf16 [VMEM_ROWS, COLS]
        b = b_ref[l:l + 1, :COLS[l]]                           # f32 [1, COLS] (broadcasts)
        acc = jnp.dot(h.astype(jnp.bfloat16), w,
                      preferred_element_type=jnp.float32)      # MXU bf16 x bf16 -> f32
        h = jnp.tanh(acc + b)                                  # zero padding stays zero
    out_ref[...] = h.astype(out_ref.dtype)


def init_params(key):
    """Xavier-uniform weights (stored as [in, out]), zero biases (f32)."""
    weights, biases = [], []
    for i in range(N_LAYERS):
        fan_in, fan_out = DIMS[i], DIMS[i + 1]
        key, sub = jax.random.split(key)
        a = (6.0 / (fan_in + fan_out)) ** 0.5
        weights.append(jax.random.uniform(sub, (fan_in, fan_out), jnp.float32, -a, a))
        biases.append(jnp.zeros((fan_out,), jnp.float32))
    return weights, biases


def pack_params(weights, biases):
    """One-time packing (outside the per-call path).

    Weights -> bf16, zero-padded to [pad16(fan_in), pad128(fan_out)] (minimal
    realizable HBM footprint); biases -> one (8, 1024) f32 array.
    """
    w_hbm = []
    for i in range(N_LAYERS):
        fin, fout = DIMS[i], DIMS[i + 1]
        w = (jnp.zeros((HBM_ROWS[i], COLS[i]), jnp.bfloat16)
             .at[:fin, :fout].set(weights[i].astype(jnp.bfloat16)))
        w_hbm.append(w)
    b_packed = jnp.zeros((BIAS_ROWS, BIAS_COLS), jnp.float32)
    for i in range(N_LAYERS):
        b_packed = b_packed.at[i, :DIMS[i + 1]].set(biases[i])
    return tuple(w_hbm), b_packed


@jax.jit
def evalnet_forward(x, w_hbm, b_packed):
    """x: [B, 789] f32 -> [B, 1] f32.  w_hbm/b_packed from pack_params().

    HBM-bound on the ~6.9 MB weight stream: batching requests up to Bp~128-256
    at the call site is essentially free and amortizes the fixed weight DMA.
    """
    B = x.shape[0]
    Bp = _pad_to(max(B, 8), 8)
    x_pad = jnp.zeros((Bp, IN_P), jnp.float32).at[:B, :DIMS[0]].set(x)

    vmem_spec = pl.BlockSpec(memory_space=pltpu.MemorySpace.VMEM)
    hbm_spec = pl.BlockSpec(memory_space=pl.ANY)
    out_pad = pl.pallas_call(
        evalnet_kernel,
        out_shape=jax.ShapeDtypeStruct((Bp, OUT_P), jnp.float32),
        in_specs=[vmem_spec, vmem_spec] + [hbm_spec] * N_LAYERS,
        out_specs=vmem_spec,
        scratch_shapes=[pltpu.VMEM((VMEM_ROWS[l], COLS[l]), jnp.bfloat16)
                        for l in range(N_LAYERS)]
                       + [pltpu.SemaphoreType.DMA((N_LAYERS,))],
        compiler_params=pltpu.CompilerParams(vmem_limit_bytes=16 << 20),
    )(x_pad, b_packed, *w_hbm)
    return out_pad[:B, :DIMS[-1]]


def evalnet_reference_f32(x, weights, biases):
    h = x
    for w, b in zip(weights, biases):
        h = jnp.tanh(h @ w + b)
    return h


def evalnet_reference_bf16(x, weights, biases):
    """Pure-JAX reference doing the same bf16 matmuls / f32 accumulation."""
    h = x
    for w, b in zip(weights, biases):
        h = jnp.tanh(jnp.dot(h.astype(jnp.bfloat16), w.astype(jnp.bfloat16),
                             preferred_element_type=jnp.float32) + b)
    return h


if __name__ == "__main__":
    key = jax.random.PRNGKey(0)
    pkey, xkey = jax.random.split(key)
    weights, biases = init_params(pkey)
    w_hbm, b_packed = pack_params(weights, biases)   # one-time, outside forward

    B = 2
    x = jax.random.normal(xkey, (B, DIMS[0]), jnp.float32)

    out = evalnet_forward(x, w_hbm, b_packed)
    out = jax.block_until_ready(out)
    assert out.shape == (B, 1), out.shape

    # Tight check against a reference computing the identical bf16 matmuls.
    ref_bf16 = evalnet_reference_bf16(x, weights, biases)
    assert jnp.allclose(out, ref_bf16, atol=2e-3, rtol=2e-3), (out, ref_bf16)

    # Looser semantic check vs the full-f32 reference (bf16 weight quantization).
    ref_f32 = evalnet_reference_f32(x, weights, biases)
    assert jnp.allclose(out, ref_f32, atol=5e-2, rtol=0.0), (out, ref_f32)

    print("KERNEL_OK")
</pallas_src>

<mosaic_0001>
module attributes {stable_mosaic.version = 11 : i64} {
  func.func @evalnet_kernel(%arg0: memref<8x896xf32, #tpu.memory_space<vmem>>, %arg1: memref<8x1024xf32, #tpu.memory_space<vmem>>, %arg2: memref<800x896xbf16, #tpu.memory_space<any>>, %arg3: memref<800x1024xbf16, #tpu.memory_space<any>>, %arg4: memref<1008x896xbf16, #tpu.memory_space<any>>, %arg5: memref<800x640xbf16, #tpu.memory_space<any>>, %arg6: memref<608x512xbf16, #tpu.memory_space<any>>, %arg7: memref<400x384xbf16, #tpu.memory_space<any>>, %arg8: memref<304x128xbf16, #tpu.memory_space<any>>, %arg9: memref<8x128xf32, #tpu.memory_space<vmem>>, %arg10: memref<896x896xbf16, #tpu.memory_space<vmem>>, %arg11: memref<896x1024xbf16, #tpu.memory_space<vmem>>, %arg12: memref<1024x896xbf16, #tpu.memory_space<vmem>>, %arg13: memref<896x640xbf16, #tpu.memory_space<vmem>>, %arg14: memref<640x512xbf16, #tpu.memory_space<vmem>>, %arg15: memref<512x384xbf16, #tpu.memory_space<vmem>>, %arg16: memref<384x128xbf16, #tpu.memory_space<vmem>>, %arg17: memref<7x!tpu.dma_semaphore, #tpu.memory_space<semaphore_mem>>) attributes {dimension_semantics = [], scalar_prefetch = 0 : i64, scratch_operands = 8 : i64, tpu.core_type = #tpu.core_type<tc>} {
    %cst = arith.constant 0.000000e+00 : bf16
    %0 = vector.broadcast %cst : bf16 to vector<96x896xbf16>
    %c800 = arith.constant 800 : index
    %c0 = arith.constant 0 : index
    %1 = vector.load %arg10[%c800, %c0] : memref<896x896xbf16, #tpu.memory_space<vmem>>, vector<96x896xbf16>
    tpu.vector_store %arg10[%c800, %c0], %0 {strides = array<i32>} : memref<896x896xbf16, #tpu.memory_space<vmem>>, vector<96x896xbf16>,
    %cst_0 = arith.constant 0.000000e+00 : bf16
    %2 = vector.broadcast %cst_0 : bf16 to vector<96x1024xbf16>
    %c800_1 = arith.constant 800 : index
    %c0_2 = arith.constant 0 : index
    %3 = vector.load %arg11[%c800_1, %c0_2] : memref<896x1024xbf16, #tpu.memory_space<vmem>>, vector<96x1024xbf16>
    tpu.vector_store %arg11[%c800_1, %c0_2], %2 {strides = array<i32>} : memref<896x1024xbf16, #tpu.memory_space<vmem>>, vector<96x1024xbf16>,
    %cst_3 = arith.constant 0.000000e+00 : bf16
    %4 = vector.broadcast %cst_3 : bf16 to vector<16x896xbf16>
    %c1008 = arith.constant 1008 : index
    %c0_4 = arith.constant 0 : index
    %5 = vector.load %arg12[%c1008, %c0_4] : memref<1024x896xbf16, #tpu.memory_space<vmem>>, vector<16x896xbf16>
    tpu.vector_store %arg12[%c1008, %c0_4], %4 {strides = array<i32>} : memref<1024x896xbf16, #tpu.memory_space<vmem>>, vector<16x896xbf16>,
    %cst_5 = arith.constant 0.000000e+00 : bf16
    %6 = vector.broadcast %cst_5 : bf16 to vector<96x640xbf16>
    %c800_6 = arith.constant 800 : index
    %c0_7 = arith.constant 0 : index
    %7 = vector.load %arg13[%c800_6, %c0_7] : memref<896x640xbf16, #tpu.memory_space<vmem>>, vector<96x640xbf16>
    tpu.vector_store %arg13[%c800_6, %c0_7], %6 {strides = array<i32>} : memref<896x640xbf16, #tpu.memory_space<vmem>>, vector<96x640xbf16>,
    %cst_8 = arith.constant 0.000000e+00 : bf16
    %8 = vector.broadcast %cst_8 : bf16 to vector<32x512xbf16>
    %c608 = arith.constant 608 : index
    %c0_9 = arith.constant 0 : index
    %9 = vector.load %arg14[%c608, %c0_9] : memref<640x512xbf16, #tpu.memory_space<vmem>>, vector<32x512xbf16>
    tpu.vector_store %arg14[%c608, %c0_9], %8 {strides = array<i32>} : memref<640x512xbf16, #tpu.memory_space<vmem>>, vector<32x512xbf16>,
    %cst_10 = arith.constant 0.000000e+00 : bf16
    %10 = vector.broadcast %cst_10 : bf16 to vector<112x384xbf16>
    %c400 = arith.constant 400 : index
    %c0_11 = arith.constant 0 : index
    %11 = vector.load %arg15[%c400, %c0_11] : memref<512x384xbf16, #tpu.memory_space<vmem>>, vector<112x384xbf16>
    tpu.vector_store %arg15[%c400, %c0_11], %10 {strides = array<i32>} : memref<512x384xbf16, #tpu.memory_space<vmem>>, vector<112x384xbf16>,
    %cst_12 = arith.constant 0.000000e+00 : bf16
    %12 = vector.broadcast %cst_12 : bf16 to vector<80x128xbf16>
    %c304 = arith.constant 304 : index
    %c0_13 = arith.constant 0 : index
    %13 = vector.load %arg16[%c304, %c0_13] : memref<384x128xbf16, #tpu.memory_space<vmem>>, vector<80x128xbf16>
    tpu.vector_store %arg16[%c304, %c0_13], %12 {strides = array<i32>} : memref<384x128xbf16, #tpu.memory_space<vmem>>, vector<80x128xbf16>,
    %c0_i32 = arith.constant 0 : i32
    %c0_i32_14 = arith.constant 0 : i32
    %c0_i32_15 = arith.constant 0 : i32
    %14 = tpu.memref_slice %arg10[%c0_i32_14, %c0_i32_15] : memref<896x896xbf16, #tpu.memory_space<vmem>> -> memref<800x896xbf16, #tpu.memory_space<vmem>>
    %15 = tpu.memref_slice %arg17[%c0_i32] : memref<7x!tpu.dma_semaphore, #tpu.memory_space<semaphore_mem>> -> memref<1x!tpu.dma_semaphore, #tpu.memory_space<semaphore_mem>>
    %16 = tpu.memref_squeeze %15 : memref<1x!tpu.dma_semaphore, #tpu.memory_space<semaphore_mem>> -> memref<!tpu.dma_semaphore, #tpu.memory_space<semaphore_mem>>
    tpu.enqueue_dma source(%arg2 : memref<800x896xbf16, #tpu.memory_space<any>>) target(%14 : memref<800x896xbf16, #tpu.memory_space<vmem>>) target_semaphore(%16 : memref<!tpu.dma_semaphore, #tpu.memory_space<semaphore_mem>>)
    %c1_i32 = arith.constant 1 : i32
    %c0_i32_16 = arith.constant 0 : i32
    %c0_i32_17 = arith.constant 0 : i32
    %17 = tpu.memref_slice %arg11[%c0_i32_16, %c0_i32_17] : memref<896x1024xbf16, #tpu.memory_space<vmem>> -> memref<800x1024xbf16, #tpu.memory_space<vmem>>
    %18 = tpu.memref_slice %arg17[%c1_i32] : memref<7x!tpu.dma_semaphore, #tpu.memory_space<semaphore_mem>> -> memref<1x!tpu.dma_semaphore, #tpu.memory_space<semaphore_mem>>
    %19 = tpu.memref_squeeze %18 : memref<1x!tpu.dma_semaphore, #tpu.memory_space<semaphore_mem>> -> memref<!tpu.dma_semaphore, #tpu.memory_space<semaphore_mem>>
    tpu.enqueue_dma source(%arg3 : memref<800x1024xbf16, #tpu.memory_space<any>>) target(%17 : memref<800x1024xbf16, #tpu.memory_space<vmem>>) target_semaphore(%19 : memref<!tpu.dma_semaphore, #tpu.memory_space<semaphore_mem>>)
    %c2_i32 = arith.constant 2 : i32
    %c0_i32_18 = arith.constant 0 : i32
    %c0_i32_19 = arith.constant 0 : i32
    %20 = tpu.memref_slice %arg12[%c0_i32_18, %c0_i32_19] : memref<1024x896xbf16, #tpu.memory_space<vmem>> -> memref<1008x896xbf16, #tpu.memory_space<vmem>>
    %21 = tpu.memref_slice %arg17[%c2_i32] : memref<7x!tpu.dma_semaphore, #tpu.memory_space<semaphore_mem>> -> memref<1x!tpu.dma_semaphore, #tpu.memory_space<semaphore_mem>>
    %22 = tpu.memref_squeeze %21 : memref<1x!tpu.dma_semaphore, #tpu.memory_space<semaphore_mem>> -> memref<!tpu.dma_semaphore, #tpu.memory_space<semaphore_mem>>
    tpu.enqueue_dma source(%arg4 : memref<1008x896xbf16, #tpu.memory_space<any>>) target(%20 : memref<1008x896xbf16, #tpu.memory_space<vmem>>) target_semaphore(%22 : memref<!tpu.dma_semaphore, #tpu.memory_space<semaphore_mem>>)
    %c3_i32 = arith.constant 3 : i32
    %c0_i32_20 = arith.constant 0 : i32
    %c0_i32_21 = arith.constant 0 : i32
    %23 = tpu.memref_slice %arg13[%c0_i32_20, %c0_i32_21] : memref<896x640xbf16, #tpu.memory_space<vmem>> -> memref<800x640xbf16, #tpu.memory_space<vmem>>
    %24 = tpu.memref_slice %arg17[%c3_i32] : memref<7x!tpu.dma_semaphore, #tpu.memory_space<semaphore_mem>> -> memref<1x!tpu.dma_semaphore, #tpu.memory_space<semaphore_mem>>
    %25 = tpu.memref_squeeze %24 : memref<1x!tpu.dma_semaphore, #tpu.memory_space<semaphore_mem>> -> memref<!tpu.dma_semaphore, #tpu.memory_space<semaphore_mem>>
    tpu.enqueue_dma source(%arg5 : memref<800x640xbf16, #tpu.memory_space<any>>) target(%23 : memref<800x640xbf16, #tpu.memory_space<vmem>>) target_semaphore(%25 : memref<!tpu.dma_semaphore, #tpu.memory_space<semaphore_mem>>)
    %c4_i32 = arith.constant 4 : i32
    %c0_i32_22 = arith.constant 0 : i32
    %c0_i32_23 = arith.constant 0 : i32
    %26 = tpu.memref_slice %arg14[%c0_i32_22, %c0_i32_23] : memref<640x512xbf16, #tpu.memory_space<vmem>> -> memref<608x512xbf16, #tpu.memory_space<vmem>>
    %27 = tpu.memref_slice %arg17[%c4_i32] : memref<7x!tpu.dma_semaphore, #tpu.memory_space<semaphore_mem>> -> memref<1x!tpu.dma_semaphore, #tpu.memory_space<semaphore_mem>>
    %28 = tpu.memref_squeeze %27 : memref<1x!tpu.dma_semaphore, #tpu.memory_space<semaphore_mem>> -> memref<!tpu.dma_semaphore, #tpu.memory_space<semaphore_mem>>
    tpu.enqueue_dma source(%arg6 : memref<608x512xbf16, #tpu.memory_space<any>>) target(%26 : memref<608x512xbf16, #tpu.memory_space<vmem>>) target_semaphore(%28 : memref<!tpu.dma_semaphore, #tpu.memory_space<semaphore_mem>>)
    %c5_i32 = arith.constant 5 : i32
    %c0_i32_24 = arith.constant 0 : i32
    %c0_i32_25 = arith.constant 0 : i32
    %29 = tpu.memref_slice %arg15[%c0_i32_24, %c0_i32_25] : memref<512x384xbf16, #tpu.memory_space<vmem>> -> memref<400x384xbf16, #tpu.memory_space<vmem>>
    %30 = tpu.memref_slice %arg17[%c5_i32] : memref<7x!tpu.dma_semaphore, #tpu.memory_space<semaphore_mem>> -> memref<1x!tpu.dma_semaphore, #tpu.memory_space<semaphore_mem>>
    %31 = tpu.memref_squeeze %30 : memref<1x!tpu.dma_semaphore, #tpu.memory_space<semaphore_mem>> -> memref<!tpu.dma_semaphore, #tpu.memory_space<semaphore_mem>>
    tpu.enqueue_dma source(%arg7 : memref<400x384xbf16, #tpu.memory_space<any>>) target(%29 : memref<400x384xbf16, #tpu.memory_space<vmem>>) target_semaphore(%31 : memref<!tpu.dma_semaphore, #tpu.memory_space<semaphore_mem>>)
    %c6_i32 = arith.constant 6 : i32
    %c0_i32_26 = arith.constant 0 : i32
    %c0_i32_27 = arith.constant 0 : i32
    %32 = tpu.memref_slice %arg16[%c0_i32_26, %c0_i32_27] : memref<384x128xbf16, #tpu.memory_space<vmem>> -> memref<304x128xbf16, #tpu.memory_space<vmem>>
    %33 = tpu.memref_slice %arg17[%c6_i32] : memref<7x!tpu.dma_semaphore, #tpu.memory_space<semaphore_mem>> -> memref<1x!tpu.dma_semaphore, #tpu.memory_space<semaphore_mem>>
    %34 = tpu.memref_squeeze %33 : memref<1x!tpu.dma_semaphore, #tpu.memory_space<semaphore_mem>> -> memref<!tpu.dma_semaphore, #tpu.memory_space<semaphore_mem>>
    tpu.enqueue_dma source(%arg8 : memref<304x128xbf16, #tpu.memory_space<any>>) target(%32 : memref<304x128xbf16, #tpu.memory_space<vmem>>) target_semaphore(%34 : memref<!tpu.dma_semaphore, #tpu.memory_space<semaphore_mem>>)
    %c0_28 = arith.constant 0 : index
    %c0_29 = arith.constant 0 : index
    %35 = vector.load %arg0[%c0_28, %c0_29] : memref<8x896xf32, #tpu.memory_space<vmem>>, vector<8x896xf32>
    %c0_i32_30 = arith.constant 0 : i32
    %c0_i32_31 = arith.constant 0 : i32
    %c0_i32_32 = arith.constant 0 : i32
    %36 = tpu.memref_slice %arg10[%c0_i32_31, %c0_i32_32] : memref<896x896xbf16, #tpu.memory_space<vmem>> -> memref<800x896xbf16, #tpu.memory_space<vmem>>
    %37 = tpu.memref_slice %arg17[%c0_i32_30] : memref<7x!tpu.dma_semaphore, #tpu.memory_space<semaphore_mem>> -> memref<1x!tpu.dma_semaphore, #tpu.memory_space<semaphore_mem>>
    %38 = tpu.memref_squeeze %37 : memref<1x!tpu.dma_semaphore, #tpu.memory_space<semaphore_mem>> -> memref<!tpu.dma_semaphore, #tpu.memory_space<semaphore_mem>>
    tpu.wait_dma2 semaphore(%38 : memref<!tpu.dma_semaphore, #tpu.memory_space<semaphore_mem>>) src(%arg2 : memref<800x896xbf16, #tpu.memory_space<any>>) dst(%36 : memref<800x896xbf16, #tpu.memory_space<vmem>>)
    %c0_33 = arith.constant 0 : index
    %c0_34 = arith.constant 0 : index
    %39 = vector.load %arg10[%c0_33, %c0_34] : memref<896x896xbf16, #tpu.memory_space<vmem>>, vector<896x896xbf16>
    %c0_35 = arith.constant 0 : index
    %c0_36 = arith.constant 0 : index
    %40 = vector.load %arg1[%c0_35, %c0_36] : memref<8x1024xf32, #tpu.memory_space<vmem>>, vector<1x896xf32>
    %41 = arith.truncf %35 : vector<8x896xf32> to vector<8x896xbf16>
    %cst_37 = arith.constant dense<0.000000e+00> : vector<8x896xf32>
    %42 = tpu.matmul %41, %39, %cst_37 {dimension_numbers = #tpu.dot_dimension_numbers<[1], [0], [0], [1], [0, 0, 1, 1], [], []>} : vector<8x896xbf16>, vector<896x896xbf16>, vector<8x896xf32> -> vector<8x896xf32>
    %43 = vector.broadcast %40 : vector<1x896xf32> to vector<8x896xf32>
    %44 = arith.addf %42, %43 : vector<8x896xf32>
    %45 = math.tanh %44 : vector<8x896xf32>
    %c1_i32_38 = arith.constant 1 : i32
    %c0_i32_39 = arith.constant 0 : i32
    %c0_i32_40 = arith.constant 0 : i32
    %46 = tpu.memref_slice %arg11[%c0_i32_39, %c0_i32_40] : memref<896x1024xbf16, #tpu.memory_space<vmem>> -> memref<800x1024xbf16, #tpu.memory_space<vmem>>
    %47 = tpu.memref_slice %arg17[%c1_i32_38] : memref<7x!tpu.dma_semaphore, #tpu.memory_space<semaphore_mem>> -> memref<1x!tpu.dma_semaphore, #tpu.memory_space<semaphore_mem>>
    %48 = tpu.memref_squeeze %47 : memref<1x!tpu.dma_semaphore, #tpu.memory_space<semaphore_mem>> -> memref<!tpu.dma_semaphore, #tpu.memory_space<semaphore_mem>>
    tpu.wait_dma2 semaphore(%48 : memref<!tpu.dma_semaphore, #tpu.memory_space<semaphore_mem>>) src(%arg3 : memref<800x1024xbf16, #tpu.memory_space<any>>) dst(%46 : memref<800x1024xbf16, #tpu.memory_space<vmem>>)
    %c0_41 = arith.constant 0 : index
    %c0_42 = arith.constant 0 : index
    %49 = vector.load %arg11[%c0_41, %c0_42] : memref<896x1024xbf16, #tpu.memory_space<vmem>>, vector<896x1024xbf16>
    %c1 = arith.constant 1 : index
    %c0_43 = arith.constant 0 : index
    %50 = vector.load %arg1[%c1, %c0_43] : memref<8x1024xf32, #tpu.memory_space<vmem>>, vector<1x1024xf32>
    %51 = arith.truncf %45 : vector<8x896xf32> to vector<8x896xbf16>
    %cst_44 = arith.constant dense<0.000000e+00> : vector<8x1024xf32>
    %52 = tpu.matmul %51, %49, %cst_44 {dimension_numbers = #tpu.dot_dimension_numbers<[1], [0], [0], [1], [0, 0, 1, 1], [], []>} : vector<8x896xbf16>, vector<896x1024xbf16>, vector<8x1024xf32> -> vector<8x1024xf32>
    %53 = vector.broadcast %50 : vector<1x1024xf32> to vector<8x1024xf32>
    %54 = arith.addf %52, %53 : vector<8x1024xf32>
    %55 = math.tanh %54 : vector<8x1024xf32>
    %c2_i32_45 = arith.constant 2 : i32
    %c0_i32_46 = arith.constant 0 : i32
    %c0_i32_47 = arith.constant 0 : i32
    %56 = tpu.memref_slice %arg12[%c0_i32_46, %c0_i32_47] : memref<1024x896xbf16, #tpu.memory_space<vmem>> -> memref<1008x896xbf16, #tpu.memory_space<vmem>>
    %57 = tpu.memref_slice %arg17[%c2_i32_45] : memref<7x!tpu.dma_semaphore, #tpu.memory_space<semaphore_mem>> -> memref<1x!tpu.dma_semaphore, #tpu.memory_space<semaphore_mem>>
    %58 = tpu.memref_squeeze %57 : memref<1x!tpu.dma_semaphore, #tpu.memory_space<semaphore_mem>> -> memref<!tpu.dma_semaphore, #tpu.memory_space<semaphore_mem>>
    tpu.wait_dma2 semaphore(%58 : memref<!tpu.dma_semaphore, #tpu.memory_space<semaphore_mem>>) src(%arg4 : memref<1008x896xbf16, #tpu.memory_space<any>>) dst(%56 : memref<1008x896xbf16, #tpu.memory_space<vmem>>)
    %c0_48 = arith.constant 0 : index
    %c0_49 = arith.constant 0 : index
    %59 = vector.load %arg12[%c0_48, %c0_49] : memref<1024x896xbf16, #tpu.memory_space<vmem>>, vector<1024x896xbf16>
    %c2 = arith.constant 2 : index
    %c0_50 = arith.constant 0 : index
    %60 = vector.load %arg1[%c2, %c0_50] : memref<8x1024xf32, #tpu.memory_space<vmem>>, vector<1x896xf32>
    %61 = arith.truncf %55 : vector<8x1024xf32> to vector<8x1024xbf16>
    %cst_51 = arith.constant dense<0.000000e+00> : vector<8x896xf32>
    %62 = tpu.matmul %61, %59, %cst_51 {dimension_numbers = #tpu.dot_dimension_numbers<[1], [0], [0], [1], [0, 0, 1, 1], [], []>} : vector<8x1024xbf16>, vector<1024x896xbf16>, vector<8x896xf32> -> vector<8x896xf32>
    %63 = vector.broadcast %60 : vector<1x896xf32> to vector<8x896xf32>
    %64 = arith.addf %62, %63 : vector<8x896xf32>
    %65 = math.tanh %64 : vector<8x896xf32>
    %c3_i32_52 = arith.constant 3 : i32
    %c0_i32_53 = arith.constant 0 : i32
    %c0_i32_54 = arith.constant 0 : i32
    %66 = tpu.memref_slice %arg13[%c0_i32_53, %c0_i32_54] : memref<896x640xbf16, #tpu.memory_space<vmem>> -> memref<800x640xbf16, #tpu.memory_space<vmem>>
    %67 = tpu.memref_slice %arg17[%c3_i32_52] : memref<7x!tpu.dma_semaphore, #tpu.memory_space<semaphore_mem>> -> memref<1x!tpu.dma_semaphore, #tpu.memory_space<semaphore_mem>>
    %68 = tpu.memref_squeeze %67 : memref<1x!tpu.dma_semaphore, #tpu.memory_space<semaphore_mem>> -> memref<!tpu.dma_semaphore, #tpu.memory_space<semaphore_mem>>
    tpu.wait_dma2 semaphore(%68 : memref<!tpu.dma_semaphore, #tpu.memory_space<semaphore_mem>>) src(%arg5 : memref<800x640xbf16, #tpu.memory_space<any>>) dst(%66 : memref<800x640xbf16, #tpu.memory_space<vmem>>)
    %c0_55 = arith.constant 0 : index
    %c0_56 = arith.constant 0 : index
    %69 = vector.load %arg13[%c0_55, %c0_56] : memref<896x640xbf16, #tpu.memory_space<vmem>>, vector<896x640xbf16>
    %c3 = arith.constant 3 : index
    %c0_57 = arith.constant 0 : index
    %70 = vector.load %arg1[%c3, %c0_57] : memref<8x1024xf32, #tpu.memory_space<vmem>>, vector<1x640xf32>
    %71 = arith.truncf %65 : vector<8x896xf32> to vector<8x896xbf16>
    %cst_58 = arith.constant dense<0.000000e+00> : vector<8x640xf32>
    %72 = tpu.matmul %71, %69, %cst_58 {dimension_numbers = #tpu.dot_dimension_numbers<[1], [0], [0], [1], [0, 0, 1, 1], [], []>} : vector<8x896xbf16>, vector<896x640xbf16>, vector<8x640xf32> -> vector<8x640xf32>
    %73 = vector.broadcast %70 : vector<1x640xf32> to vector<8x640xf32>
    %74 = arith.addf %72, %73 : vector<8x640xf32>
    %75 = math.tanh %74 : vector<8x640xf32>
    %c4_i32_59 = arith.constant 4 : i32
    %c0_i32_60 = arith.constant 0 : i32
    %c0_i32_61 = arith.constant 0 : i32
    %76 = tpu.memref_slice %arg14[%c0_i32_60, %c0_i32_61] : memref<640x512xbf16, #tpu.memory_space<vmem>> -> memref<608x512xbf16, #tpu.memory_space<vmem>>
    %77 = tpu.memref_slice %arg17[%c4_i32_59] : memref<7x!tpu.dma_semaphore, #tpu.memory_space<semaphore_mem>> -> memref<1x!tpu.dma_semaphore, #tpu.memory_space<semaphore_mem>>
    %78 = tpu.memref_squeeze %77 : memref<1x!tpu.dma_semaphore, #tpu.memory_space<semaphore_mem>> -> memref<!tpu.dma_semaphore, #tpu.memory_space<semaphore_mem>>
    tpu.wait_dma2 semaphore(%78 : memref<!tpu.dma_semaphore, #tpu.memory_space<semaphore_mem>>) src(%arg6 : memref<608x512xbf16, #tpu.memory_space<any>>) dst(%76 : memref<608x512xbf16, #tpu.memory_space<vmem>>)
    %c0_62 = arith.constant 0 : index
    %c0_63 = arith.constant 0 : index
    %79 = vector.load %arg14[%c0_62, %c0_63] : memref<640x512xbf16, #tpu.memory_space<vmem>>, vector<640x512xbf16>
    %c4 = arith.constant 4 : index
    %c0_64 = arith.constant 0 : index
    %80 = vector.load %arg1[%c4, %c0_64] : memref<8x1024xf32, #tpu.memory_space<vmem>>, vector<1x512xf32>
    %81 = arith.truncf %75 : vector<8x640xf32> to vector<8x640xbf16>
    %cst_65 = arith.constant dense<0.000000e+00> : vector<8x512xf32>
    %82 = tpu.matmul %81, %79, %cst_65 {dimension_numbers = #tpu.dot_dimension_numbers<[1], [0], [0], [1], [0, 0, 1, 1], [], []>} : vector<8x640xbf16>, vector<640x512xbf16>, vector<8x512xf32> -> vector<8x512xf32>
    %83 = vector.broadcast %80 : vector<1x512xf32> to vector<8x512xf32>
    %84 = arith.addf %82, %83 : vector<8x512xf32>
    %85 = math.tanh %84 : vector<8x512xf32>
    %c5_i32_66 = arith.constant 5 : i32
    %c0_i32_67 = arith.constant 0 : i32
    %c0_i32_68 = arith.constant 0 : i32
    %86 = tpu.memref_slice %arg15[%c0_i32_67, %c0_i32_68] : memref<512x384xbf16, #tpu.memory_space<vmem>> -> memref<400x384xbf16, #tpu.memory_space<vmem>>
    %87 = tpu.memref_slice %arg17[%c5_i32_66] : memref<7x!tpu.dma_semaphore, #tpu.memory_space<semaphore_mem>> -> memref<1x!tpu.dma_semaphore, #tpu.memory_space<semaphore_mem>>
    %88 = tpu.memref_squeeze %87 : memref<1x!tpu.dma_semaphore, #tpu.memory_space<semaphore_mem>> -> memref<!tpu.dma_semaphore, #tpu.memory_space<semaphore_mem>>
    tpu.wait_dma2 semaphore(%88 : memref<!tpu.dma_semaphore, #tpu.memory_space<semaphore_mem>>) src(%arg7 : memref<400x384xbf16, #tpu.memory_space<any>>) dst(%86 : memref<400x384xbf16, #tpu.memory_space<vmem>>)
    %c0_69 = arith.constant 0 : index
    %c0_70 = arith.constant 0 : index
    %89 = vector.load %arg15[%c0_69, %c0_70] : memref<512x384xbf16, #tpu.memory_space<vmem>>, vector<512x384xbf16>
    %c5 = arith.constant 5 : index
    %c0_71 = arith.constant 0 : index
    %90 = vector.load %arg1[%c5, %c0_71] : memref<8x1024xf32, #tpu.memory_space<vmem>>, vector<1x384xf32>
    %91 = arith.truncf %85 : vector<8x512xf32> to vector<8x512xbf16>
    %cst_72 = arith.constant dense<0.000000e+00> : vector<8x384xf32>
    %92 = tpu.matmul %91, %89, %cst_72 {dimension_numbers = #tpu.dot_dimension_numbers<[1], [0], [0], [1], [0, 0, 1, 1], [], []>} : vector<8x512xbf16>, vector<512x384xbf16>, vector<8x384xf32> -> vector<8x384xf32>
    %93 = vector.broadcast %90 : vector<1x384xf32> to vector<8x384xf32>
    %94 = arith.addf %92, %93 : vector<8x384xf32>
    %95 = math.tanh %94 : vector<8x384xf32>
    %c6_i32_73 = arith.constant 6 : i32
    %c0_i32_74 = arith.constant 0 : i32
    %c0_i32_75 = arith.constant 0 : i32
    %96 = tpu.memref_slice %arg16[%c0_i32_74, %c0_i32_75] : memref<384x128xbf16, #tpu.memory_space<vmem>> -> memref<304x128xbf16, #tpu.memory_space<vmem>>
    %97 = tpu.memref_slice %arg17[%c6_i32_73] : memref<7x!tpu.dma_semaphore, #tpu.memory_space<semaphore_mem>> -> memref<1x!tpu.dma_semaphore, #tpu.memory_space<semaphore_mem>>
    %98 = tpu.memref_squeeze %97 : memref<1x!tpu.dma_semaphore, #tpu.memory_space<semaphore_mem>> -> memref<!tpu.dma_semaphore, #tpu.memory_space<semaphore_mem>>
    tpu.wait_dma2 semaphore(%98 : memref<!tpu.dma_semaphore, #tpu.memory_space<semaphore_mem>>) src(%arg8 : memref<304x128xbf16, #tpu.memory_space<any>>) dst(%96 : memref<304x128xbf16, #tpu.memory_space<vmem>>)
    %c0_76 = arith.constant 0 : index
    %c0_77 = arith.constant 0 : index
    %99 = vector.load %arg16[%c0_76, %c0_77] : memref<384x128xbf16, #tpu.memory_space<vmem>>, vector<384x128xbf16>
    %c6 = arith.constant 6 : index
    %c0_78 = arith.constant 0 : index
    %100 = vector.load %arg1[%c6, %c0_78] : memref<8x1024xf32, #tpu.memory_space<vmem>>, vector<1x128xf32>
    %101 = arith.truncf %95 : vector<8x384xf32> to vector<8x384xbf16>
    %cst_79 = arith.constant dense<0.000000e+00> : vector<8x128xf32>
    %102 = tpu.matmul %101, %99, %cst_79 {dimension_numbers = #tpu.dot_dimension_numbers<[1], [0], [0], [1], [0, 0, 1, 1], [], []>} : vector<8x384xbf16>, vector<384x128xbf16>, vector<8x128xf32> -> vector<8x128xf32>
    %103 = vector.broadcast %100 : vector<1x128xf32> to vector<8x128xf32>
    %104 = arith.addf %102, %103 : vector<8x128xf32>
    %105 = math.tanh %104 : vector<8x128xf32>
    %c0_80 = arith.constant 0 : index
    %c0_81 = arith.constant 0 : index
    %106 = vector.load %arg9[%c0_80, %c0_81] : memref<8x128xf32, #tpu.memory_space<vmem>>, vector<8x128xf32>
    tpu.vector_store %arg9[%c0_80, %c0_81], %105 {strides = array<i32>} : memref<8x128xf32, #tpu.memory_space<vmem>>, vector<8x128xf32>,
    return
  }
}

</mosaic_0001>

<bundles_post_ra>
// kernel: evalnet_forward.1
= control target key start
LH: loop header
LB: loop body
LE: loop exit
PB: predicated region body
PF: predicated region fallthrough
CT: control target
= control target key end

     0   :  { %14 = vsyncpa [#allocation11], 0  ;;  %s19616_s30 = smov [#allocation10]   ;;  %s20437_s0 = inlined_call_operand.vmem [shape: f32[8,896], index: 0, kind: input, shape index: {}]   ;;  %s20438_s1 = inlined_call_operand.hbm [shape: f32[8,1024], index: 1, kind: input, shape index: {}]   ;;  %s20439_s2 = inlined_call_operand.hbm [shape: bf16[800,896], index: 2, kind: input, shape index: {}]   ;;  %s20440_s3 = inlined_call_operand.hbm [shape: bf16[800,1024], index: 3, kind: input, shape index: {}]   ;;  %s20441_s4 = inlined_call_operand.hbm [shape: bf16[1008,896], index: 4, kind: input, shape index: {}]   ;;  %s20442_s5 = inlined_call_operand.hbm [shape: bf16[800,640], index: 5, kind: input, shape index: {}]   ;;  %s20443_s6 = inlined_call_operand.hbm [shape: bf16[608,512], index: 6, kind: input, shape index: {}]   ;;  %s20444_s7 = inlined_call_operand.hbm [shape: bf16[400,384], index: 7, kind: input, shape index: {}]   ;;  %s20445_s8 = inlined_call_operand.hbm [shape: bf16[304,128], index: 8, kind: input, shape index: {}]   ;;  %s20446_s9 = inlined_call_operand.vmem [shape: f32[8,128], index: 9, kind: output, shape index: {}]  }
   0x1   :  { %s23_s10 = sshll.u32 %s19616_s30, 4  ;;  %s24_s10 = int_to_ptr.vmem [resolvable:$true] %s23_s10 }
   0x2   :  { %s19448_s11 = scalar_lea.vmem %s24_s10, 1024  ;;  %p19453_p1 = scmp.lt.s32.totalorder %s24_s10, %s24_s10 }
   0x3   :  { %p19449_p0 = scmp.ne.s32.totalorder %s24_s10, %s19448_s11  ;;  %p19454_p2 = scmp.lt.s32.totalorder %s19448_s11, %s19448_s11 }
   0x5   :  { %p19455_p3 = por %p19454_p2, %p19453_p1 }
   0x7   :  { %p19456_p4 = pnand %p19455_p3, %p19449_p0 }
   0x9   :  { %19459 = shalt.err (!%p19456_p4)
}
   0xa   :  { %26 = dma.hbm_to_vmem [thread:$0]  %s20438_s1, 1024, %s24_s10, [#allocation11]  }
   0xb   :  { %19600 = dma.done.wait [#allocation11], 1024  }
   0xc   :  { %19601 = vsyncadd [#allocation11], 4294966272  ;;  %v19617_v0 = vmov 0   ;;  %s19618_s1 = smov [#allocation2]   ;;  %s19619_s15 = smov [#allocation3]  }
   0xd   :  { %31 = vst [vmem:[#allocation2 + $0xaf0] sm:$0xff] %v19617_v0  ;;  %32 = vst [vmem:[#allocation2 + $0xaf8] sm:$0xff] %v19617_v0  ;;  %s224_s14 = sshll.u32 %s19618_s1, 4  ;;  %s236_s16 = sshll.u32 %s19619_s15, 4  ;;  %s225_s14 = int_to_ptr.vmem [resolvable:$true] %s224_s14  ;;  %s237_s16 = int_to_ptr.vmem [resolvable:$true] %s236_s16 }
   0xe   :  { %33 = vst [vmem:[#allocation2 + $0xb00] sm:$0xff] %v19617_v0  ;;  %34 = vst [vmem:[#allocation2 + $0xb08] sm:$0xf] %v19617_v0  ;;  %s19468_s17 = scalar_lea.vmem %s225_s14, 44800  ;;  %s19472_s18 = scalar_lea.vmem %s225_s14, 50176 }
   0xf   :  { %35 = vst [vmem:[#allocation2 + $0xb0c] sm:$0xff] %v19617_v0  ;;  %36 = vst [vmem:[#allocation2 + $0xb14] sm:$0xff] %v19617_v0  ;;  %p19469_p5 = scmp.ne.s32.totalorder %s225_s14, %s19468_s17  ;;  %p19473_p6 = scmp.lt.s32.totalorder %s225_s14, %s225_s14 }
  0x10   :  { %37 = vst [vmem:[#allocation2 + $0xb1c] sm:$0xff] %v19617_v0  ;;  %38 = vst [vmem:[#allocation2 + $0xb24] sm:$0xf] %v19617_v0  ;;  %p19474_p7 = scmp.lt.s32.totalorder %s19472_s18, %s19468_s17 }
  0x11   :  { %39 = vst [vmem:[#allocation2 + $0xb28] sm:$0xff] %v19617_v0  ;;  %40 = vst [vmem:[#allocation2 + $0xb30] sm:$0xff] %v19617_v0 }
  0x12   :  { %41 = vst [vmem:[#allocation2 + $0xb38] sm:$0xff] %v19617_v0  ;;  %42 = vst [vmem:[#allocation2 + $0xb40] sm:$0xf] %v19617_v0  ;;  %p19475_p8 = por %p19474_p7, %p19473_p6 }
  0x13   :  { %43 = vst [vmem:[#allocation2 + $0xb44] sm:$0xff] %v19617_v0  ;;  %44 = vst [vmem:[#allocation2 + $0xb4c] sm:$0xff] %v19617_v0 }
  0x14   :  { %45 = vst [vmem:[#allocation2 + $0xb54] sm:$0xff] %v19617_v0  ;;  %46 = vst [vmem:[#allocation2 + $0xb5c] sm:$0xf] %v19617_v0  ;;  %p19476_p9 = pnand %p19475_p8, %p19469_p5 }
  0x15   :  { %47 = vst [vmem:[#allocation2 + $0xb60] sm:$0xff] %v19617_v0  ;;  %48 = vst [vmem:[#allocation2 + $0xb68] sm:$0xff] %v19617_v0 }
  0x16   :  { %49 = vst [vmem:[#allocation2 + $0xb70] sm:$0xff] %v19617_v0  ;;  %50 = vst [vmem:[#allocation2 + $0xb78] sm:$0xf] %v19617_v0 }
  0x17   :  { %51 = vst [vmem:[#allocation2 + $0xb7c] sm:$0xff] %v19617_v0  ;;  %52 = vst [vmem:[#allocation2 + $0xb84] sm:$0xff] %v19617_v0 }
  0x18   :  { %53 = vst [vmem:[#allocation2 + $0xb8c] sm:$0xff] %v19617_v0  ;;  %54 = vst [vmem:[#allocation2 + $0xb94] sm:$0xf] %v19617_v0 }
  0x19   :  { %55 = vst [vmem:[#allocation2 + $0xb98] sm:$0xff] %v19617_v0  ;;  %56 = vst [vmem:[#allocation2 + $0xba0] sm:$0xff] %v19617_v0 }
  0x1a   :  { %57 = vst [vmem:[#allocation2 + $0xba8] sm:$0xff] %v19617_v0  ;;  %58 = vst [vmem:[#allocation2 + $0xbb0] sm:$0xf] %v19617_v0 }
  0x1b   :  { %59 = vst [vmem:[#allocation2 + $0xbb4] sm:$0xff] %v19617_v0  ;;  %60 = vst [vmem:[#allocation2 + $0xbbc] sm:$0xff] %v19617_v0 }
  0x1c   :  { %61 = vst [vmem:[#allocation2 + $0xbc4] sm:$0xff] %v19617_v0  ;;  %62 = vst [vmem:[#allocation2 + $0xbcc] sm:$0xf] %v19617_v0 }
  0x1d   :  { %63 = vst [vmem:[#allocation2 + $0xbd0] sm:$0xff] %v19617_v0  ;;  %64 = vst [vmem:[#allocation2 + $0xbd8] sm:$0xff] %v19617_v0 }
  0x1e   :  { %65 = vst [vmem:[#allocation2 + $0xbe0] sm:$0xff] %v19617_v0  ;;  %66 = vst [vmem:[#allocation2 + $0xbe8] sm:$0xf] %v19617_v0 }
  0x1f   :  { %67 = vst [vmem:[#allocation2 + $0xbec] sm:$0xff] %v19617_v0  ;;  %68 = vst [vmem:[#allocation2 + $0xbf4] sm:$0xff] %v19617_v0 }
  0x20   :  { %69 = vst [vmem:[#allocation2 + $0xbfc] sm:$0xff] %v19617_v0  ;;  %70 = vst [vmem:[#allocation2 + $0xc04] sm:$0xf] %v19617_v0 }
  0x21   :  { %71 = vst [vmem:[#allocation2 + $0xc08] sm:$0xff] %v19617_v0  ;;  %72 = vst [vmem:[#allocation2 + $0xc10] sm:$0xff] %v19617_v0 }
  0x22   :  { %73 = vst [vmem:[#allocation2 + $0xc18] sm:$0xff] %v19617_v0  ;;  %74 = vst [vmem:[#allocation2 + $0xc20] sm:$0xf] %v19617_v0 }
  0x23   :  { %75 = vst [vmem:[#allocation2 + $0xc24] sm:$0xff] %v19617_v0  ;;  %76 = vst [vmem:[#allocation2 + $0xc2c] sm:$0xff] %v19617_v0 }
  0x24   :  { %77 = vst [vmem:[#allocation2 + $0xc34] sm:$0xff] %v19617_v0  ;;  %78 = vst [vmem:[#allocation2 + $0xc3c] sm:$0xf] %v19617_v0 }
  0x25   :  { %79 = vst [vmem:[#allocation3 + $0xc80] sm:$0xff] %v19617_v0  ;;  %80 = vst [vmem:[#allocation3 + $0xc88] sm:$0xff] %v19617_v0 }
  0x26   :  { %81 = vst [vmem:[#allocation3 + $0xc90] sm:$0xff] %v19617_v0  ;;  %82 = vst [vmem:[#allocation3 + $0xc98] sm:$0xff] %v19617_v0 }
  0x27   :  { %83 = vst [vmem:[#allocation3 + $0xca0] sm:$0xff] %v19617_v0  ;;  %84 = vst [vmem:[#allocation3 + $0xca8] sm:$0xff] %v19617_v0 }
  0x28   :  { %85 = vst [vmem:[#allocation3 + $0xcb0] sm:$0xff] %v19617_v0  ;;  %86 = vst [vmem:[#allocation3 + $0xcb8] sm:$0xff] %v19617_v0 }
  0x29   :  { %87 = vst [vmem:[#allocation3 + $0xcc0] sm:$0xff] %v19617_v0  ;;  %88 = vst [vmem:[#allocation3 + $0xcc8] sm:$0xff] %v19617_v0 }
  0x2a   :  { %89 = vst [vmem:[#allocation3 + $0xcd0] sm:$0xff] %v19617_v0  ;;  %90 = vst [vmem:[#allocation3 + $0xcd8] sm:$0xff] %v19617_v0 }
  0x2b   :  { %91 = vst [vmem:[#allocation3 + $0xce0] sm:$0xff] %v19617_v0  ;;  %92 = vst [vmem:[#allocation3 + $0xce8] sm:$0xff] %v19617_v0 }
  0x2c   :  { %93 = vst [vmem:[#allocation3 + $0xcf0] sm:$0xff] %v19617_v0  ;;  %94 = vst [vmem:[#allocation3 + $0xcf8] sm:$0xff] %v19617_v0 }
  0x2d   :  { %95 = vst [vmem:[#allocation3 + $0xd00] sm:$0xff] %v19617_v0  ;;  %96 = vst [vmem:[#allocation3 + $0xd08] sm:$0xff] %v19617_v0 }
  0x2e   :  { %97 = vst [vmem:[#allocation3 + $0xd10] sm:$0xff] %v19617_v0  ;;  %98 = vst [vmem:[#allocation3 + $0xd18] sm:$0xff] %v19617_v0 }
  0x2f   :  { %99 = vst [vmem:[#allocation3 + $0xd20] sm:$0xff] %v19617_v0  ;;  %100 = vst [vmem:[#allocation3 + $0xd28] sm:$0xff] %v19617_v0 }
  0x30   :  { %101 = vst [vmem:[#allocation3 + $0xd30] sm:$0xff] %v19617_v0  ;;  %102 = vst [vmem:[#allocation3 + $0xd38] sm:$0xff] %v19617_v0 }
  0x31   :  { %103 = vst [vmem:[#allocation3 + $0xd40] sm:$0xff] %v19617_v0  ;;  %104 = vst [vmem:[#allocation3 + $0xd48] sm:$0xff] %v19617_v0 }
  0x32   :  { %105 = vst [vmem:[#allocation3 + $0xd50] sm:$0xff] %v19617_v0  ;;  %106 = vst [vmem:[#allocation3 + $0xd58] sm:$0xff] %v19617_v0 }
  0x33   :  { %107 = vst [vmem:[#allocation3 + $0xd60] sm:$0xff] %v19617_v0  ;;  %108 = vst [vmem:[#allocation3 + $0xd68] sm:$0xff] %v19617_v0 }
  0x34   :  { %109 = vst [vmem:[#allocation3 + $0xd70] sm:$0xff] %v19617_v0  ;;  %110 = vst [vmem:[#allocation3 + $0xd78] sm:$0xff] %v19617_v0 }
  0x35   :  { %111 = vst [vmem:[#allocation3 + $0xd80] sm:$0xff] %v19617_v0  ;;  %112 = vst [vmem:[#allocation3 + $0xd88] sm:$0xff] %v19617_v0 }
  0x36   :  { %113 = vst [vmem:[#allocation3 + $0xd90] sm:$0xff] %v19617_v0  ;;  %114 = vst [vmem:[#allocation3 + $0xd98] sm:$0xff] %v19617_v0 }
  0x37   :  { %115 = vst [vmem:[#allocation3 + $0xda0] sm:$0xff] %v19617_v0  ;;  %116 = vst [vmem:[#allocation3 + $0xda8] sm:$0xff] %v19617_v0 }
  0x38   :  { %117 = vst [vmem:[#allocation3 + $0xdb0] sm:$0xff] %v19617_v0  ;;  %118 = vst [vmem:[#allocation3 + $0xdb8] sm:$0xff] %v19617_v0 }
  0x39   :  { %119 = vst [vmem:[#allocation3 + $0xdc0] sm:$0xff] %v19617_v0  ;;  %120 = vst [vmem:[#allocation3 + $0xdc8] sm:$0xff] %v19617_v0 }
  0x3a   :  { %121 = vst [vmem:[#allocation3 + $0xdd0] sm:$0xff] %v19617_v0  ;;  %122 = vst [vmem:[#allocation3 + $0xdd8] sm:$0xff] %v19617_v0 }
  0x3b   :  { %123 = vst [vmem:[#allocation3 + $0xde0] sm:$0xff] %v19617_v0  ;;  %124 = vst [vmem:[#allocation3 + $0xde8] sm:$0xff] %v19617_v0 }
  0x3c   :  { %125 = vst [vmem:[#allocation3 + $0xdf0] sm:$0xff] %v19617_v0  ;;  %126 = vst [vmem:[#allocation3 + $0xdf8] sm:$0xff] %v19617_v0 }
  0x3d   :  { %127 = vst [vmem:[#allocation4 + $0xdc8] sm:$0xff] %v19617_v0  ;;  %128 = vst [vmem:[#allocation4 + $0xdd0] sm:$0xff] %v19617_v0 }
  0x3e   :  { %129 = vst [vmem:[#allocation4 + $0xdd8] sm:$0xff] %v19617_v0  ;;  %130 = vst [vmem:[#allocation4 + $0xde0] sm:$0xf] %v19617_v0 }
  0x3f   :  { %131 = vst [vmem:[#allocation4 + $0xde4] sm:$0xff] %v19617_v0  ;;  %132 = vst [vmem:[#allocation4 + $0xdec] sm:$0xff] %v19617_v0 }
  0x40   :  { %133 = vst [vmem:[#allocation4 + $0xdf4] sm:$0xff] %v19617_v0  ;;  %134 = vst [vmem:[#allocation4 + $0xdfc] sm:$0xf] %v19617_v0 }
  0x41   :  { %135 = vst [vmem:[#allocation5 + $0x7d0] sm:$0xff] %v19617_v0  ;;  %136 = vst [vmem:[#allocation5 + $0x7d8] sm:$0xff] %v19617_v0 }
  0x42   :  { %137 = vst [vmem:[#allocation5 + $0x7e0] sm:$0xf] %v19617_v0  ;;  %138 = vst [vmem:[#allocation5 + $0x7e4] sm:$0xff] %v19617_v0 }
  0x43   :  { %139 = vst [vmem:[#allocation5 + $0x7ec] sm:$0xff] %v19617_v0  ;;  %140 = vst [vmem:[#allocation5 + $0x7f4] sm:$0xf] %v19617_v0 }
  0x44   :  { %141 = vst [vmem:[#allocation5 + $0x7f8] sm:$0xff] %v19617_v0  ;;  %142 = vst [vmem:[#allocation5 + $0x800] sm:$0xff] %v19617_v0 }
  0x45   :  { %143 = vst [vmem:[#allocation5 + $0x808] sm:$0xf] %v19617_v0  ;;  %144 = vst [vmem:[#allocation5 + $0x80c] sm:$0xff] %v19617_v0 }
  0x46   :  { %145 = vst [vmem:[#allocation5 + $0x814] sm:$0xff] %v19617_v0  ;;  %146 = vst [vmem:[#allocation5 + $0x81c] sm:$0xf] %v19617_v0 }
  0x47   :  { %147 = vst [vmem:[#allocation5 + $0x820] sm:$0xff] %v19617_v0  ;;  %148 = vst [vmem:[#allocation5 + $0x828] sm:$0xff] %v19617_v0 }
  0x48   :  { %149 = vst [vmem:[#allocation5 + $0x830] sm:$0xf] %v19617_v0  ;;  %150 = vst [vmem:[#allocation5 + $0x834] sm:$0xff] %v19617_v0 }
  0x49   :  { %151 = vst [vmem:[#allocation5 + $0x83c] sm:$0xff] %v19617_v0  ;;  %152 = vst [vmem:[#allocation5 + $0x844] sm:$0xf] %v19617_v0 }
  0x4a   :  { %153 = vst [vmem:[#allocation5 + $0x848] sm:$0xff] %v19617_v0  ;;  %154 = vst [vmem:[#allocation5 + $0x850] sm:$0xff] %v19617_v0 }
  0x4b   :  { %155 = vst [vmem:[#allocation5 + $0x858] sm:$0xf] %v19617_v0  ;;  %156 = vst [vmem:[#allocation5 + $0x85c] sm:$0xff] %v19617_v0 }
  0x4c   :  { %157 = vst [vmem:[#allocation5 + $0x864] sm:$0xff] %v19617_v0  ;;  %158 = vst [vmem:[#allocation5 + $0x86c] sm:$0xf] %v19617_v0 }
  0x4d   :  { %159 = vst [vmem:[#allocation5 + $0x870] sm:$0xff] %v19617_v0  ;;  %160 = vst [vmem:[#allocation5 + $0x878] sm:$0xff] %v19617_v0 }
  0x4e   :  { %161 = vst [vmem:[#allocation5 + $0x880] sm:$0xf] %v19617_v0  ;;  %162 = vst [vmem:[#allocation5 + $0x884] sm:$0xff] %v19617_v0 }
  0x4f   :  { %163 = vst [vmem:[#allocation5 + $0x88c] sm:$0xff] %v19617_v0  ;;  %164 = vst [vmem:[#allocation5 + $0x894] sm:$0xf] %v19617_v0 }
  0x50   :  { %165 = vst [vmem:[#allocation5 + $0x898] sm:$0xff] %v19617_v0  ;;  %166 = vst [vmem:[#allocation5 + $0x8a0] sm:$0xff] %v19617_v0 }
  0x51   :  { %167 = vst [vmem:[#allocation5 + $0x8a8] sm:$0xf] %v19617_v0  ;;  %168 = vst [vmem:[#allocation5 + $0x8ac] sm:$0xff] %v19617_v0 }
  0x52   :  { %169 = vst [vmem:[#allocation5 + $0x8b4] sm:$0xff] %v19617_v0  ;;  %170 = vst [vmem:[#allocation5 + $0x8bc] sm:$0xf] %v19617_v0 }
  0x53   :  { %171 = vst [vmem:[#allocation6 + $0x4c0] sm:$0xff] %v19617_v0  ;;  %172 = vst [vmem:[#allocation6 + $0x4c8] sm:$0xff] %v19617_v0 }
  0x54   :  { %173 = vst [vmem:[#allocation6 + $0x4d0] sm:$0xff] %v19617_v0  ;;  %174 = vst [vmem:[#allocation6 + $0x4d8] sm:$0xff] %v19617_v0 }
  0x55   :  { %175 = vst [vmem:[#allocation6 + $0x4e0] sm:$0xff] %v19617_v0  ;;  %176 = vst [vmem:[#allocation6 + $0x4e8] sm:$0xff] %v19617_v0 }
  0x56   :  { %177 = vst [vmem:[#allocation6 + $0x4f0] sm:$0xff] %v19617_v0  ;;  %178 = vst [vmem:[#allocation6 + $0x4f8] sm:$0xff] %v19617_v0 }
  0x57   :  { %179 = vst [vmem:[#allocation7 + $0x258] sm:$0xff] %v19617_v0  ;;  %180 = vst [vmem:[#allocation7 + $0x260] sm:$0xf] %v19617_v0 }
  0x58   :  { %181 = vst [vmem:[#allocation7 + $0x264] sm:$0xff] %v19617_v0  ;;  %182 = vst [vmem:[#allocation7 + $0x26c] sm:$0xf] %v19617_v0 }
  0x59   :  { %183 = vst [vmem:[#allocation7 + $0x270] sm:$0xff] %v19617_v0  ;;  %184 = vst [vmem:[#allocation7 + $0x278] sm:$0xf] %v19617_v0 }
  0x5a   :  { %185 = vst [vmem:[#allocation7 + $0x27c] sm:$0xff] %v19617_v0  ;;  %186 = vst [vmem:[#allocation7 + $0x284] sm:$0xf] %v19617_v0 }
  0x5b   :  { %187 = vst [vmem:[#allocation7 + $0x288] sm:$0xff] %v19617_v0  ;;  %188 = vst [vmem:[#allocation7 + $0x290] sm:$0xf] %v19617_v0 }
  0x5c   :  { %189 = vst [vmem:[#allocation7 + $0x294] sm:$0xff] %v19617_v0  ;;  %190 = vst [vmem:[#allocation7 + $0x29c] sm:$0xf] %v19617_v0 }
  0x5d   :  { %191 = vst [vmem:[#allocation7 + $0x2a0] sm:$0xff] %v19617_v0  ;;  %192 = vst [vmem:[#allocation7 + $0x2a8] sm:$0xf] %v19617_v0 }
  0x5e   :  { %193 = vst [vmem:[#allocation7 + $0x2ac] sm:$0xff] %v19617_v0  ;;  %194 = vst [vmem:[#allocation7 + $0x2b4] sm:$0xf] %v19617_v0 }
  0x5f   :  { %195 = vst [vmem:[#allocation7 + $0x2b8] sm:$0xff] %v19617_v0  ;;  %196 = vst [vmem:[#allocation7 + $0x2c0] sm:$0xf] %v19617_v0 }
  0x60   :  { %197 = vst [vmem:[#allocation7 + $0x2c4] sm:$0xff] %v19617_v0  ;;  %198 = vst [vmem:[#allocation7 + $0x2cc] sm:$0xf] %v19617_v0 }
  0x61   :  { %199 = vst [vmem:[#allocation7 + $0x2d0] sm:$0xff] %v19617_v0  ;;  %200 = vst [vmem:[#allocation7 + $0x2d8] sm:$0xf] %v19617_v0 }
  0x62   :  { %201 = vst [vmem:[#allocation7 + $0x2dc] sm:$0xff] %v19617_v0  ;;  %202 = vst [vmem:[#allocation7 + $0x2e4] sm:$0xf] %v19617_v0 }
  0x63   :  { %203 = vst [vmem:[#allocation7 + $0x2e8] sm:$0xff] %v19617_v0  ;;  %204 = vst [vmem:[#allocation7 + $0x2f0] sm:$0xf] %v19617_v0 }
  0x64   :  { %205 = vst [vmem:[#allocation7 + $0x2f4] sm:$0xff] %v19617_v0  ;;  %206 = vst [vmem:[#allocation7 + $0x2fc] sm:$0xf] %v19617_v0 }
  0x65   :  { %207 = vst [vmem:[#allocation8 + $0x98] sm:$0xf] %v19617_v0  ;;  %208 = vst [vmem:[#allocation8 + $0x9c] sm:$0xf] %v19617_v0 }
  0x66   :  { %209 = vst [vmem:[#allocation8 + $0xa0] sm:$0xf] %v19617_v0  ;;  %210 = vst [vmem:[#allocation8 + $0xa4] sm:$0xf] %v19617_v0 }
  0x67   :  { %211 = vst [vmem:[#allocation8 + $0xa8] sm:$0xf] %v19617_v0  ;;  %212 = vst [vmem:[#allocation8 + $0xac] sm:$0xf] %v19617_v0 }
  0x68   :  { %213 = vst [vmem:[#allocation8 + $0xb0] sm:$0xf] %v19617_v0  ;;  %214 = vst [vmem:[#allocation8 + $0xb4] sm:$0xf] %v19617_v0 }
  0x69   :  { %215 = vst [vmem:[#allocation8 + $0xb8] sm:$0xf] %v19617_v0  ;;  %216 = vst [vmem:[#allocation8 + $0xbc] sm:$0xf] %v19617_v0 }
  0x6a   :  { %19479 = shalt.err (!%p19476_p9)  }
  0x6b   :  { %227 = dma.hbm_to_vmem [thread:$0]  %s20439_s2, 44800, %s225_s14, [#allocation9] }
  0x6c   :  { %s19488_s21 = scalar_lea.vmem %s237_s16, 51200  ;;  %s19492_s22 = scalar_lea.vmem %s237_s16, 57344 }
  0x6d   :  { %p19489_p10 = scmp.ne.s32.totalorder %s237_s16, %s19488_s21  ;;  %p19493_p11 = scmp.lt.s32.totalorder %s237_s16, %s237_s16 }
  0x6e   :  { %p19494_p12 = scmp.lt.s32.totalorder %s19492_s22, %s19488_s21 }
  0x70   :  { %p19495_p13 = por %p19494_p12, %p19493_p11 }
  0x72   :  { %p19496_p0 = pnand %p19495_p13, %p19489_p10 }
  0x74   :  { %19499 = shalt.err (!%p19496_p0)  }
  0x75   :  { %239 = dma.hbm_to_vmem [thread:$0]  %s20440_s3, 51200, %s237_s16, [#allocation9 + $0x1]  ;;  %v19875_v1 = vld [vmem:[%s20437_s0] sm:$0xff]  ;;  %v19880_v2 = vld [vmem:[%s20437_s0 + $0x8] sm:$0xff]  ;;  %v19885_v3 = vld [vmem:[%s20437_s0 + $0x10] sm:$0xff] }
  0x76   :  { %s19620_s25 = smov [#allocation4]   ;;  %s19621_s27 = smov [#allocation5]   ;;  %v303_v4 = vld [vmem:[%s20437_s0 + $0x18] sm:$0xff]  ;;  %v19893_v5 = vld [vmem:[%s20437_s0 + $0x20] sm:$0xff]  ;;  %v19898_v6 = vld [vmem:[%s20437_s0 + $0x28] sm:$0xff] }
  0x77   :  { %s248_s26 = sshll.u32 %s19620_s25, 4  ;;  %s260_s28 = sshll.u32 %s19621_s27, 4  ;;  %s249_s26 = int_to_ptr.vmem [resolvable:$true] %s248_s26  ;;  %s261_s28 = int_to_ptr.vmem [resolvable:$true] %s260_s28 }
  0x78   :  { %s19508_s17 = scalar_lea.vmem %s249_s26, 56448  ;;  %s19512_s18 = scalar_lea.vmem %s249_s26, 57344 }
  0x79   :  { %p19509_p1 = scmp.ne.s32.totalorder %s249_s26, %s19508_s17  ;;  %p19513_p2 = scmp.lt.s32.totalorder %s249_s26, %s249_s26 }
  0x7a   :  { %p19514_p3 = scmp.lt.s32.totalorder %s19512_s18, %s19508_s17 }
  0x7c   :  { %p19515_p4 = por %p19514_p3, %p19513_p2 }
  0x7e   :  { %p19516_p5 = pnand %p19515_p4, %p19509_p1 }
  0x80   :  { %19519 = shalt.err (!%p19516_p5)  }
  0x81   :  { %251 = dma.hbm_to_vmem [thread:$0]  %s20441_s4, 56448, %s249_s26, [#allocation9 + $0x2]  ;;  %v19906_v7 = vld [vmem:[%s20437_s0 + $0x30] sm:$0xff] }
  0x82   :  { %s19528_s23 = scalar_lea.vmem %s261_s28, 32000  ;;  %s19532_s24 = scalar_lea.vmem %s261_s28, 35840 }
  0x83   :  { %p19529_p6 = scmp.ne.s32.totalorder %s261_s28, %s19528_s23  ;;  %p19533_p7 = scmp.lt.s32.totalorder %s261_s28, %s261_s28 }
  0x84   :  { %p19534_p8 = scmp.lt.s32.totalorder %s19532_s24, %s19528_s23 }
  0x86   :  { %p19535_p9 = por %p19534_p8, %p19533_p7 }
  0x88   :  { %p19536_p10 = pnand %p19535_p9, %p19529_p6 }
  0x8a   :  { %19539 = shalt.err (!%p19536_p10)  }
  0x8b   :  { %263 = dma.hbm_to_vmem [thread:$0]  %s20442_s5, 32000, %s261_s28, [#allocation9 + $0x3] }
  0x8c   :  { %s19622_s29 = smov [#allocation6]   ;;  %s19623_s4 = smov [#allocation7]  }
  0x8d   :  { %s272_s30 = sshll.u32 %s19622_s29, 4  ;;  %s284_s26 = sshll.u32 %s19623_s4, 4  ;;  %s273_s30 = int_to_ptr.vmem [resolvable:$true] %s272_s30  ;;  %s285_s26 = int_to_ptr.vmem [resolvable:$true] %s284_s26 }
  0x8e   :  { %s19548_s0 = scalar_lea.vmem %s273_s30, 19456  ;;  %s19552_s2 = scalar_lea.vmem %s273_s30, 20480 }
  0x8f   :  { %p19549_p11 = scmp.ne.s32.totalorder %s273_s30, %s19548_s0  ;;  %p19553_p12 = scmp.lt.s32.totalorder %s273_s30, %s273_s30 }
  0x90   :  { %p19554_p13 = scmp.lt.s32.totalorder %s19552_s2, %s19548_s0 }
  0x92   :  { %p19555_p0 = por %p19554_p13, %p19553_p12 }
  0x94   :  { %p19556_p1 = pnand %p19555_p0, %p19549_p11 }
  0x96   :  { %19559 = shalt.err (!%p19556_p1)  }
  0x97   :  { %275 = dma.hbm_to_vmem [thread:$0]  %s20443_s6, 19456, %s273_s30, [#allocation9 + $0x4] }
  0x98   :  { %s19568_s12 = scalar_lea.vmem %s285_s26, 9600  ;;  %s19572_s5 = scalar_lea.vmem %s285_s26, 12288 }
  0x99   :  { %p19569_p2 = scmp.ne.s32.totalorder %s285_s26, %s19568_s12  ;;  %p19573_p3 = scmp.lt.s32.totalorder %s285_s26, %s285_s26 }
  0x9a   :  { %p19574_p4 = scmp.lt.s32.totalorder %s19572_s5, %s19568_s12 }
  0x9c   :  { %p19575_p5 = por %p19574_p4, %p19573_p3 }
  0x9e   :  { %p19576_p6 = pnand %p19575_p5, %p19569_p2 }
  0xa0   :  { %19579 = shalt.err (!%p19576_p6)  }
  0xa1   :  { %287 = dma.hbm_to_vmem [thread:$0]  %s20444_s7, 9600, %s285_s26, [#allocation9 + $0x5] }
  0xa2   :  { %s19624_s13 = smov [#allocation8]  }
  0xa3   :  { %s296_s1 = sshll.u32 %s19624_s13, 4  ;;  %s297_s1 = int_to_ptr.vmem [resolvable:$true] %s296_s1 }
  0xa4   :  { %s19588_s14 = scalar_lea.vmem %s297_s1, 2432  ;;  %s19592_s15 = scalar_lea.vmem %s297_s1, 3072 }
  0xa5   :  { %p19589_p7 = scmp.ne.s32.totalorder %s297_s1, %s19588_s14  ;;  %p19593_p8 = scmp.lt.s32.totalorder %s297_s1, %s297_s1 }
  0xa6   :  { %p19594_p9 = scmp.lt.s32.totalorder %s19592_s15, %s19588_s14 }
  0xa8   :  { %p19595_p10 = por %p19594_p9, %p19593_p8 }
  0xaa   :  { %p19596_p11 = pnand %p19595_p10, %p19589_p7 }
  0xac   :  { %19599 = shalt.err (!%p19596_p11)  }
  0xad   :  { %299 = dma.hbm_to_vmem [thread:$0]  %s20445_s8, 2432, %s297_s1, [#allocation9 + $0x6] }
  0xae   :  { %19602 = dma.done.wait [#allocation9], 44800 }
  0xaf   :  { %19603 = vsyncadd [#allocation9], 4294922496  ;;  %v19922_v8 = vpack.c.bf16 %v19880_v2, %v19880_v2  ;;  %v19924_v9 = vpack.c.bf16 %v303_v4, %v303_v4  ;;  %v17386_v10 = vld [vmem:[#allocation2 + $0x18c] ss:$28 sps:$4 sm:$0xff]   ;;  %v17392_v14 = vld [vmem:[#allocation2 + $0x154] ss:$28 sps:$4 sm:$0xff]  }
  0xb0   :  { %v17388_v11 = vld [vmem:[#allocation2 + $0x50c] ss:$28 sps:$4 sm:$0xff]   ;;  %2821 = vmatprep.subr.bf16.mxu0 %v17386_v10  ;;  %v17394_v15 = vld [vmem:[#allocation2 + $0x4d4] ss:$28 sps:$4 sm:$0xff]   ;;  %v17398_v18 = vld [vmem:[#allocation2 + $0x11c] ss:$28 sps:$4 sm:$0xff]  }
  0xb1   :  { %2853 = vmatprep.mubr.bf16.mxu0 %v19922_v8  ;;  %2894 = vmatprep.mubr.bf16.mxu1 %v19924_v9  ;;  %v17390_v12 = vld [vmem:[#allocation2 + $0x188] ss:$28 sps:$4 sm:$0xff]   ;;  %v17396_v16 = vld [vmem:[#allocation2 + $0x150] ss:$28 sps:$4 sm:$0xff]   ;;  %v17400_v19 = vld [vmem:[#allocation2 + $0x49c] ss:$28 sps:$4 sm:$0xff]  }
  0xb2   :  { %v17391_v13 = vld [vmem:[#allocation2 + $0x508] ss:$28 sps:$4 sm:$0xff]   ;;  %2862 = vmatprep.subr.bf16.mxu1 %v17388_v11  ;;  %2822 = vmatpush1.bf16.msra.mxu0 %v17390_v12  ;;  %v17397_v17 = vld [vmem:[#allocation2 + $0x4d0] ss:$28 sps:$4 sm:$0xff]   ;;  %v17402_v20 = vld [vmem:[#allocation2 + $0x118] ss:$28 sps:$4 sm:$0xff]  }
  0xb3   :  { %2863 = vmatpush1.bf16.msra.mxu1 %v17391_v13  ;;  %2823 = vmatprep.subr.bf16.mxu0 %v17392_v14  ;;  %v17403_v21 = vld [vmem:[#allocation2 + $0x498] ss:$28 sps:$4 sm:$0xff]   ;;  %v17404_v22 = vld [vmem:[#allocation2 + $0xe4] ss:$28 sps:$4 sm:$0xff]   ;;  %v17410_v26 = vld [vmem:[#allocation2 + $0xac] ss:$28 sps:$4 sm:$0xff]  }
  0xb4   :  { %2864 = vmatprep.subr.bf16.mxu1 %v17394_v15  ;;  %v17406_v23 = vld [vmem:[#allocation2 + $0x464] ss:$28 sps:$4 sm:$0xff]   ;;  %v17412_v27 = vld [vmem:[#allocation2 + $0x42c] ss:$28 sps:$4 sm:$0xff]   ;;  %v17416_v30 = vld [vmem:[#allocation2 + $0x74] ss:$28 sps:$4 sm:$0xff]  }
  0xb5   :  { %v17408_v24 = vld [vmem:[#allocation2 + $0xe0] ss:$28 sps:$4 sm:$0xff]   ;;  %v17414_v28 = vld [vmem:[#allocation2 + $0xa8] ss:$28 sps:$4 sm:$0xff]   ;;  %v17418_v31 = vld [vmem:[#allocation2 + $0x3f4] ss:$28 sps:$4 sm:$0xff]  }
  0xb6   :  { %2824 = vmatpush1.bf16.msra.mxu0 %v17396_v16  ;;  %v17409_v25 = vld [vmem:[#allocation2 + $0x460] ss:$28 sps:$4 sm:$0xff]   ;;  %v17415_v29 = vld [vmem:[#allocation2 + $0x428] ss:$28 sps:$4 sm:$0xff]   ;;  %v17420_v32 = vld [vmem:[#allocation2 + $0x70] ss:$28 sps:$4 sm:$0xff]  }
  0xb7   :  { %2865 = vmatpush1.bf16.msra.mxu1 %v17397_v17  ;;  %2825 = vmatprep.subr.bf16.mxu0 %v17398_v18  ;;  %v17421_v33 = vld [vmem:[#allocation2 + $0x3f0] ss:$28 sps:$4 sm:$0xff]   ;;  %v17422_v34 = vld [vmem:[#allocation2 + $0x3c] ss:$28 sps:$4 sm:$0xff]   ;;  %v17428_v38 = vld [vmem:[#allocation2 + $0x4] ss:$28 sps:$4 sm:$0xff]  }
  0xb8   :  { %2866 = vmatprep.subr.bf16.mxu1 %v17400_v19  ;;  %v17424_v35 = vld [vmem:[#allocation2 + $0x3bc] ss:$28 sps:$4 sm:$0xff]   ;;  %v17430_v39 = vld [vmem:[#allocation2 + $0x384] ss:$28 sps:$4 sm:$0xff]   ;;  %v17434_v42 = vld [vmem:[#allocation2 + $0x34c] ss:$28 sps:$4 sm:$0xff]  }
  0xb9   :  { %v17426_v36 = vld [vmem:[#allocation2 + $0x38] ss:$28 sps:$4 sm:$0xff]   ;;  %v17432_v40 = vld [vmem:[#allocation2] ss:$28 sps:$4 sm:$0xff]   ;;  %v17436_v43 = vld [vmem:[#allocation2 + $0x6cc] ss:$28 sps:$4 sm:$0xff]  }
  0xba   :  { %2826 = vmatpush1.bf16.msra.mxu0 %v17402_v20  ;;  %v17427_v37 = vld [vmem:[#allocation2 + $0x3b8] ss:$28 sps:$4 sm:$0xff]   ;;  %v17433_v41 = vld [vmem:[#allocation2 + $0x380] ss:$28 sps:$4 sm:$0xff]   ;;  %v17438_v44 = vld [vmem:[#allocation2 + $0x348] ss:$28 sps:$4 sm:$0xff]   ;;  %v19930_v20 = vpack.c.bf16 %v19875_v1, %v19875_v1 }
  0xbb   :  { %2867 = vmatpush1.bf16.msra.mxu1 %v17403_v21  ;;  %2827 = vmatprep.subr.bf16.mxu0 %v17404_v22  ;;  %v17439_v45 = vld [vmem:[#allocation2 + $0x6c8] ss:$28 sps:$4 sm:$0xff]   ;;  %v17440_v46 = vld [vmem:[#allocation2 + $0x314] ss:$28 sps:$4 sm:$0xff]   ;;  %v17446_v50 = vld [vmem:[#allocation2 + $0x2dc] ss:$28 sps:$4 sm:$0xff]  }
  0xbc   :  { %2868 = vmatprep.subr.bf16.mxu1 %v17406_v23  ;;  %v17442_v47 = vld [vmem:[#allocation2 + $0x694] ss:$28 sps:$4 sm:$0xff]   ;;  %v17448_v51 = vld [vmem:[#allocation2 + $0x65c] ss:$28 sps:$4 sm:$0xff]   ;;  %v17452_v54 = vld [vmem:[#allocation2 + $0x2a4] ss:$28 sps:$4 sm:$0xff]   ;;  %v19934_v23 = vpack.c.bf16 %v19885_v3, %v19885_v3 }
  0xbd   :  { %v17444_v48 = vld [vmem:[#allocation2 + $0x310] ss:$28 sps:$4 sm:$0xff]   ;;  %v17450_v52 = vld [vmem:[#allocation2 + $0x2d8] ss:$28 sps:$4 sm:$0xff]   ;;  %v17454_v55 = vld [vmem:[#allocation2 + $0x624] ss:$28 sps:$4 sm:$0xff]  }
  0xbe   :  { %2828 = vmatpush1.bf16.msra.mxu0 %v17408_v24  ;;  %v17445_v49 = vld [vmem:[#allocation2 + $0x690] ss:$28 sps:$4 sm:$0xff]   ;;  %v17451_v53 = vld [vmem:[#allocation2 + $0x658] ss:$28 sps:$4 sm:$0xff]   ;;  %v17456_v56 = vld [vmem:[#allocation2 + $0x2a0] ss:$28 sps:$4 sm:$0xff]  }
  0xbf   :  { %2869 = vmatpush1.bf16.msra.mxu1 %v17409_v25  ;;  %2829 = vmatprep.subr.bf16.mxu0 %v17410_v26  ;;  %v17457_v57 = vld [vmem:[#allocation2 + $0x620] ss:$28 sps:$4 sm:$0xff]   ;;  %v17458_v58 = vld [vmem:[#allocation2 + $0x26c] ss:$28 sps:$4 sm:$0xff]   ;;  %v17464_v62 = vld [vmem:[#allocation2 + $0x234] ss:$28 sps:$4 sm:$0xff]   ;;  %v19938_v26 = vpack.c.bf16 %v19898_v6, %v19898_v6 }
  0xc0   :  { %2870 = vmatprep.subr.bf16.mxu1 %v17412_v27  ;;  %v17460_v59 = vld [vmem:[#allocation2 + $0x5ec] ss:$28 sps:$4 sm:$0xff]   ;;  %v17466_v63 = vld [vmem:[#allocation2 + $0x5b4] ss:$28 sps:$4 sm:$0xff]   ;;  %v17470_v10 = vld [vmem:[#allocation2 + $0x1fc] ss:$28 sps:$4 sm:$0xff]  }
  0xc1   :  { %v17462_v60 = vld [vmem:[#allocation2 + $0x268] ss:$28 sps:$4 sm:$0xff]   ;;  %v17468_v2 = vld [vmem:[#allocation2 + $0x230] ss:$28 sps:$4 sm:$0xff]   ;;  %v17472_v11 = vld [vmem:[#allocation2 + $0x57c] ss:$28 sps:$4 sm:$0xff]  }
  0xc2   :  { %2830 = vmatpush1.bf16.msra.mxu0 %v17414_v28  ;;  %v17463_v61 = vld [vmem:[#allocation2 + $0x5e8] ss:$28 sps:$4 sm:$0xff]   ;;  %v17469_v4 = vld [vmem:[#allocation2 + $0x5b0] ss:$28 sps:$4 sm:$0xff]   ;;  %v17474_v12 = vld [vmem:[#allocation2 + $0x1f8] ss:$28 sps:$4 sm:$0xff]  }
  0xc3   :  { %2871 = vmatpush1.bf16.msra.mxu1 %v17415_v29  ;;  %2831 = vmatprep.subr.bf16.mxu0 %v17416_v30  ;;  %v17475_v13 = vld [vmem:[#allocation2 + $0x578] ss:$28 sps:$4 sm:$0xff]   ;;  %v17476_v14 = vld [vmem:[#allocation2 + $0x1c4] ss:$28 sps:$4 sm:$0xff]   ;;  %v17484_v18 = vld [vmem:[#allocation2 + $0x88c] ss:$28 sps:$4 sm:$0xff]  }
  0xc4   :  { %2872 = vmatprep.subr.bf16.mxu1 %v17418_v31  ;;  %v17478_v15 = vld [vmem:[#allocation2 + $0x544] ss:$28 sps:$4 sm:$0xff]   ;;  %v17487_v19 = vld [vmem:[#allocation2 + $0xc0c] ss:$28 sps:$4 sm:$0xff]   ;;  %v17490_v24 = vld [vmem:[#allocation2 + $0x854] ss:$28 sps:$4 sm:$0xff]  }
  0xc5   :  { %v17480_v16 = vld [vmem:[#allocation2 + $0x1c0] ss:$28 sps:$4 sm:$0xff]   ;;  %v17482_v21 = vld [vmem:[#allocation2 + $0x888] ss:$28 sps:$4 sm:$0xff]   ;;  %v17493_v25 = vld [vmem:[#allocation2 + $0xbd4] ss:$28 sps:$4 sm:$0xff]  }
  0xc6   :  { %2832 = vmatpush1.bf16.msra.mxu0 %v17420_v32  ;;  %v17481_v17 = vld [vmem:[#allocation2 + $0x540] ss:$28 sps:$4 sm:$0xff]   ;;  %v17485_v22 = vld [vmem:[#allocation2 + $0xc08] ss:$28 sps:$4 sm:$0xff]   ;;  %v17488_v1 = vld [vmem:[#allocation2 + $0x850] ss:$28 sps:$4 sm:$0xff]  }
  0xc7   :  { %2873 = vmatpush1.bf16.msra.mxu1 %v17421_v33  ;;  %2833 = vmatprep.subr.bf16.mxu0 %v17422_v34  ;;  %v17491_v27 = vld [vmem:[#allocation2 + $0xbd0] ss:$28 sps:$4 sm:$0xff]   ;;  %v17496_v3 = vld [vmem:[#allocation2 + $0x81c] ss:$28 sps:$4 sm:$0xff]   ;;  %v17502_v6 = vld [vmem:[#allocation2 + $0x7e4] ss:$28 sps:$4 sm:$0xff]  }
  0xc8   :  { %2874 = vmatprep.subr.bf16.mxu1 %v17424_v35  ;;  %v17499_v28 = vld [vmem:[#allocation2 + $0xb9c] ss:$28 sps:$4 sm:$0xff]   ;;  %v17505_v31 = vld [vmem:[#allocation2 + $0xb64] ss:$28 sps:$4 sm:$0xff]   ;;  %v17508_v34 = vld [vmem:[#allocation2 + $0x7ac] ss:$28 sps:$4 sm:$0xff]  }
  0xc9   :  { %v17494_v29 = vld [vmem:[#allocation2 + $0x818] ss:$28 sps:$4 sm:$0xff]   ;;  %v17500_v32 = vld [vmem:[#allocation2 + $0x7e0] ss:$28 sps:$4 sm:$0xff]   ;;  %v17511_v35 = vld [vmem:[#allocation2 + $0xb2c] ss:$28 sps:$4 sm:$0xff]  }
  0xca   :  { %2834 = vmatpush1.bf16.msra.mxu0 %v17426_v36  ;;  %v17497_v30 = vld [vmem:[#allocation2 + $0xb98] ss:$28 sps:$4 sm:$0xff]   ;;  %v17503_v33 = vld [vmem:[#allocation2 + $0xb60] ss:$28 sps:$4 sm:$0xff]   ;;  %v17506_v36 = vld [vmem:[#allocation2 + $0x7a8] ss:$28 sps:$4 sm:$0xff]  }
  0xcb   :  { %2875 = vmatpush1.bf16.msra.mxu1 %v17427_v37  ;;  %2835 = vmatprep.subr.bf16.mxu0 %v17428_v38  ;;  %v17509_v37 = vld [vmem:[#allocation2 + $0xb28] ss:$28 sps:$4 sm:$0xff]   ;;  %v17514_v38 = vld [vmem:[#allocation2 + $0x774] ss:$28 sps:$4 sm:$0xff]   ;;  %vm19626_vm0 = vmmov 0  }
  0xcc   :  { %2876 = vmatprep.subr.bf16.mxu1 %v17430_v39  ;;  %v17517_v39 = vld [vmem:[#allocation2 + $0xaf4] ss:$28 sps:$4 sm:$0xff]  }
  0xce   :  { %2836 = vmatpush1.bf16.msra.mxu0 %v17432_v40  ;;  %v17512_v40 = vld [vmem:[#allocation2 + $0x770] ss:$28 sps:$4 sm:$0xff]  }
  0xcf   :  { %2877 = vmatpush1.bf16.msra.mxu1 %v17433_v41  ;;  %2837 = vmatprep.subr.bf16.mxu0 %v17434_v42  ;;  %v17515_v41 = vld [vmem:[#allocation2 + $0xaf0] ss:$28 sps:$4 sm:$0xff]   ;;  %v17520_v42 = vld [vmem:[#allocation2 + $0x73c] ss:$28 sps:$4 sm:$0xff]  }
  0xd0   :  { %2878 = vmatprep.subr.bf16.mxu1 %v17436_v43  ;;  %v17523_v43 = vld [vmem:[#allocation2 + $0xabc] ss:$28 sps:$4 sm:$0xff]  }
  0xd2   :  { %2838 = vmatpush2.bf16.msra.mxu0 %v17438_v44  ;;  %v17518_v44 = vld [vmem:[#allocation2 + $0x738] ss:$28 sps:$4 sm:$0xff]  }
  0xd3   :  { %2879 = vmatpush2.bf16.msra.mxu1 %v17439_v45  ;;  %2839 = vmatprep.subr.bf16.mxu0 %v17440_v46  ;;  %v17521_v45 = vld [vmem:[#allocation2 + $0xab8] ss:$28 sps:$4 sm:$0xff]   ;;  %v17526_v46 = vld [vmem:[#allocation2 + $0x704] ss:$28 sps:$4 sm:$0xff]  }
  0xd4   :  { %2880 = vmatprep.subr.bf16.mxu1 %v17442_v47  ;;  %v17529_v47 = vld [vmem:[#allocation2 + $0xa84] ss:$28 sps:$4 sm:$0xff]  }
  0xd6   :  { %2840 = vmatpush2.bf16.msra.mxu0 %v17444_v48  ;;  %v17524_v48 = vld [vmem:[#allocation2 + $0x700] ss:$28 sps:$4 sm:$0xff]  }
  0xd7   :  { %2881 = vmatpush2.bf16.msra.mxu1 %v17445_v49  ;;  %2841 = vmatprep.subr.bf16.mxu0 %v17446_v50  ;;  %v17527_v49 = vld [vmem:[#allocation2 + $0xa80] ss:$28 sps:$4 sm:$0xff]   ;;  %v17532_v50 = vld [vmem:[#allocation2 + $0xa4c] ss:$28 sps:$4 sm:$0xff]  }
  0xd8   :  { %2882 = vmatprep.subr.bf16.mxu1 %v17448_v51  ;;  %v17535_v51 = vld [vmem:[#allocation2 + $0x194] ss:$28 sps:$4 sm:$0xff]  }
  0xda   :  { %2842 = vmatpush2.bf16.msra.mxu0 %v17450_v52  ;;  %v17530_v52 = vld [vmem:[#allocation2 + $0xa48] ss:$28 sps:$4 sm:$0xff]  }
  0xdb   :  { %2883 = vmatpush2.bf16.msra.mxu1 %v17451_v53  ;;  %2843 = vmatprep.subr.bf16.mxu0 %v17452_v54  ;;  %v17533_v53 = vld [vmem:[#allocation2 + $0x190] ss:$28 sps:$4 sm:$0xff]   ;;  %v19946_v54 = vpack.c.bf16 %v19906_v7, %v19906_v7  ;;  %v17542_v7 = vld [vmem:[#allocation2 + $0x9d8] ss:$28 sps:$4 sm:$0xff]  }
  0xdc   :  { %2884 = vmatprep.subr.bf16.mxu1 %v17454_v55  ;;  %v17538_v55 = vld [vmem:[#allocation2 + $0xa14] ss:$28 sps:$4 sm:$0xff]  }
  0xde   :  { %2844 = vmatpush2.bf16.msra.mxu0 %v17456_v56  ;;  %v17541_v56 = vld [vmem:[#allocation2 + $0x15c] ss:$28 sps:$4 sm:$0xff]  }
  0xdf   :  { %2885 = vmatpush2.bf16.msra.mxu1 %v17457_v57  ;;  %2845 = vmatprep.subr.bf16.mxu0 %v17458_v58  ;;  %v17536_v57 = vld [vmem:[#allocation2 + $0xa10] ss:$28 sps:$4 sm:$0xff]   ;;  %v17539_v58 = vld [vmem:[#allocation2 + $0x158] ss:$28 sps:$4 sm:$0xff]  }
  0xe0   :  { %2886 = vmatprep.subr.bf16.mxu1 %v17460_v59  ;;  %v17544_v59 = vld [vmem:[#allocation2 + $0x9dc] ss:$28 sps:$4 sm:$0xff]  }
  0xe2   :  { %2846 = vmatpush2.bf16.msra.mxu0 %v17462_v60  ;;  %v17547_v60 = vld [vmem:[#allocation2 + $0x124] ss:$28 sps:$4 sm:$0xff]  }
  0xe3   :  { %2887 = vmatpush2.bf16.msra.mxu1 %v17463_v61  ;;  %2847 = vmatprep.subr.bf16.mxu0 %v17464_v62  ;;  %v17545_v61 = vld [vmem:[#allocation2 + $0x120] ss:$28 sps:$4 sm:$0xff]  }
  0xe4   :  { %2888 = vmatprep.subr.bf16.mxu1 %v17466_v63  ;;  %v17550_v62 = vld [vmem:[#allocation2 + $0x9a4] ss:$28 sps:$4 sm:$0xff]   ;;  %v17553_v63 = vld [vmem:[#allocation2 + $0xec] ss:$28 sps:$4 sm:$0xff]  }
  0xe6   :  { %2848 = vmatpush2.bf16.msra.mxu0 %v17468_v2  ;;  %v17548_v2 = vld [vmem:[#allocation2 + $0x9a0] ss:$28 sps:$4 sm:$0xff]  }
  0xe7   :  { %2889 = vmatpush2.bf16.msra.mxu1 %v17469_v4  ;;  %2849 = vmatprep.subr.bf16.mxu0 %v17470_v10  ;;  %v17551_v4 = vld [vmem:[#allocation2 + $0xe8] ss:$28 sps:$4 sm:$0xff]  }
  0xe8   :  { %2890 = vmatprep.subr.bf16.mxu1 %v17472_v11  ;;  %v17556_v10 = vld [vmem:[#allocation2 + $0x96c] ss:$28 sps:$4 sm:$0xff]   ;;  %v17559_v11 = vld [vmem:[#allocation2 + $0xb4] ss:$28 sps:$4 sm:$0xff]  }
  0xea   :  { %2850 = vmatpush2.bf16.msra.mxu0 %v17474_v12  ;;  %v17554_v12 = vld [vmem:[#allocation2 + $0x968] ss:$28 sps:$4 sm:$0xff]  }
  0xeb   :  { %2891 = vmatpush2.bf16.msra.mxu1 %v17475_v13  ;;  %2851 = vmatprep.subr.bf16.mxu0 %v17476_v14  ;;  %v17557_v13 = vld [vmem:[#allocation2 + $0xb0] ss:$28 sps:$4 sm:$0xff]  }
  0xec   :  { %2892 = vmatprep.subr.bf16.mxu1 %v17478_v15  ;;  %v17562_v14 = vld [vmem:[#allocation2 + $0x934] ss:$28 sps:$4 sm:$0xff]   ;;  %v17565_v15 = vld [vmem:[#allocation2 + $0x7c] ss:$28 sps:$4 sm:$0xff]  }
  0xee   :  { %2852 = vmatpush2.bf16.msra.mxu0 %v17480_v16  ;;  %v17560_v16 = vld [vmem:[#allocation2 + $0x930] ss:$28 sps:$4 sm:$0xff]  }
  0xef   :  { %2893 = vmatpush2.bf16.msra.mxu1 %v17481_v17  ;;  %2903 = vmatprep.subr.bf16.mxu0 %v17484_v18  ;;  %v17563_v17 = vld [vmem:[#allocation2 + $0x78] ss:$28 sps:$4 sm:$0xff]  }
  0xf0   :  { %2944 = vmatprep.subr.bf16.mxu1 %v17487_v19  ;;  %v17568_v18 = vld [vmem:[#allocation2 + $0x8fc] ss:$28 sps:$4 sm:$0xff]   ;;  %v17571_v19 = vld [vmem:[#allocation2 + $0x44] ss:$28 sps:$4 sm:$0xff]  }
  0xf1   :  { %2854 = vmatmul.mubr.bf16.vlgmr.msra.gmra.mxu0 %v19930_v20 }
  0xf2   :  { %2895 = vmatmul.mubr.bf16.vlgmr.msra.gmra.mxu1 %v19934_v23  ;;  %2904 = vmatpush1.bf16.msra.mxu0 %v17482_v21  ;;  %v17566_v21 = vld [vmem:[#allocation2 + $0x8f8] ss:$28 sps:$4 sm:$0xff]  }
  0xf3   :  { %2945 = vmatpush1.bf16.msra.mxu1 %v17485_v22  ;;  %2905 = vmatprep.subr.bf16.mxu0 %v17490_v24  ;;  %v17569_v22 = vld [vmem:[#allocation2 + $0x40] ss:$28 sps:$4 sm:$0xff]  }
  0xf4   :  { %2946 = vmatprep.subr.bf16.mxu1 %v17493_v25  ;;  %2976 = vmatprep.mubr.bf16.mxu1 %v19617_v0  ;;  %v17574_v24 = vld [vmem:[#allocation2 + $0x8c4] ss:$28 sps:$4 sm:$0xff]   ;;  %v17577_v25 = vld [vmem:[#allocation2 + $0xc] ss:$28 sps:$4 sm:$0xff]  }
  0xf5   :  { %2935 = vmatprep.mubr.bf16.mxu0 %v19938_v26 }
  0xf6   :  { %2906 = vmatpush1.bf16.msra.mxu0 %v17488_v1  ;;  %v17572_v1 = vld [vmem:[#allocation2 + $0x8c0] ss:$28 sps:$4 sm:$0xff]  }
  0xf7   :  { %2947 = vmatpush1.bf16.msra.mxu1 %v17491_v27  ;;  %2907 = vmatprep.subr.bf16.mxu0 %v17496_v3  ;;  %v17575_v27 = vld [vmem:[#allocation2 + $0x8] ss:$28 sps:$4 sm:$0xff]   ;;  %v17580_v3 = vld [vmem:[#allocation2 + $0x354] ss:$28 sps:$4 sm:$0xff]  }
  0xf8   :  { %2948 = vmatprep.subr.bf16.mxu1 %v17499_v28  ;;  %v17583_v28 = vld [vmem:[#allocation2 + $0x514] ss:$28 sps:$4 sm:$0xff]  }
  0xfa   :  { %2908 = vmatpush1.bf16.msra.mxu0 %v17494_v29  ;;  %v19952_v29 = vpack.c.bf16 %v19893_v5, %v19893_v5  ;;  %v17590_v5 = vld [vmem:[#allocation2 + $0x2e0] ss:$28 sps:$4 sm:$0xff]  }
  0xfb   :  { %2949 = vmatpush1.bf16.msra.mxu1 %v17497_v30  ;;  %2909 = vmatprep.subr.bf16.mxu0 %v17502_v6  ;;  %v17578_v30 = vld [vmem:[#allocation2 + $0x350] ss:$28 sps:$4 sm:$0xff]  }
  0xfc   :  { %2950 = vmatprep.subr.bf16.mxu1 %v17505_v31  ;;  %v17581_v6 = vld [vmem:[#allocation2 + $0x510] ss:$28 sps:$4 sm:$0xff]   ;;  %v17586_v31 = vld [vmem:[#allocation2 + $0x31c] ss:$28 sps:$4 sm:$0xff]  }
  0xfe   :  { %2910 = vmatpush1.bf16.msra.mxu0 %v17500_v32  ;;  %v17589_v32 = vld [vmem:[#allocation2 + $0x4dc] ss:$28 sps:$4 sm:$0xff]  }
  0xff   :  { %2951 = vmatpush1.bf16.msra.mxu1 %v17503_v33  ;;  %2911 = vmatprep.subr.bf16.mxu0 %v17508_v34  ;;  %v17584_v33 = vld [vmem:[#allocation2 + $0x318] ss:$28 sps:$4 sm:$0xff]  }
 0x100   :  { %2952 = vmatprep.subr.bf16.mxu1 %v17511_v35  ;;  %v17587_v34 = vld [vmem:[#allocation2 + $0x4d8] ss:$28 sps:$4 sm:$0xff]   ;;  %v17592_v35 = vld [vmem:[#allocation2 + $0x2e4] ss:$28 sps:$4 sm:$0xff]  }
 0x102   :  { %2912 = vmatpush1.bf16.msra.mxu0 %v17506_v36  ;;  %v17595_v36 = vld [vmem:[#allocation2 + $0x4a4] ss:$28 sps:$4 sm:$0xff]  }
 0x103   :  { %2953 = vmatpush1.bf16.msra.mxu1 %v17509_v37  ;;  %2913 = vmatprep.subr.bf16.mxu0 %v17514_v38  ;;  %v17593_v37 = vld [vmem:[#allocation2 + $0x4a0] ss:$28 sps:$4 sm:$0xff]   ;;  %v17598_v38 = vld [vmem:[#allocation2 + $0x2ac] ss:$28 sps:$4 sm:$0xff]  }
 0x104   :  { %2954 = vmatprep.subr.bf16.mxu1 %v17517_v39  ;;  %v17601_v39 = vld [vmem:[#allocation2 + $0x46c] ss:$28 sps:$4 sm:$0xff]  }
 0x106   :  { %2914 = vmatpush1.bf16.msra.mxu0 %v17512_v40  ;;  %v17596_v40 = vld [vmem:[#allocation2 + $0x2a8] ss:$28 sps:$4 sm:$0xff]  }
 0x107   :  { %2955 = vmatpush1.bf16.msra.mxu1 %v17515_v41  ;;  %2915 = vmatprep.subr.bf16.mxu0 %v17520_v42  ;;  %v17599_v41 = vld [vmem:[#allocation2 + $0x468] ss:$28 sps:$4 sm:$0xff]   ;;  %v17604_v42 = vld [vmem:[#allocation2 + $0x274] ss:$28 sps:$4 sm:$0xff]  }
 0x108   :  { %2956 = vmatprep.subr.bf16.mxu1 %v17523_v43  ;;  %v17607_v43 = vld [vmem:[#allocation2 + $0x434] ss:$28 sps:$4 sm:$0xff]  }
 0x10a   :  { %2916 = vmatpush1.bf16.msra.mxu0 %v17518_v44  ;;  %v17602_v44 = vld [vmem:[#allocation2 + $0x270] ss:$28 sps:$4 sm:$0xff]  }
 0x10b   :  { %2957 = vmatpush1.bf16.msra.mxu1 %v17521_v45  ;;  %2917 = vmatprep.subr.bf16.mxu0 %v17526_v46  ;;  %v17605_v45 = vld [vmem:[#allocation2 + $0x430] ss:$28 sps:$4 sm:$0xff]   ;;  %v17610_v46 = vld [vmem:[#allocation2 + $0x23c] ss:$28 sps:$4 sm:$0xff]  }
 0x10c   :  { %2958 = vmatprep.subr.bf16.mxu1 %v17529_v47  ;;  %v17613_v47 = vld [vmem:[#allocation2 + $0x3fc] ss:$28 sps:$4 sm:$0xff]  }
 0x10e   :  { %2918 = vmatpush1.bf16.msra.mxu0 %v17524_v48  ;;  %v17608_v48 = vld [vmem:[#allocation2 + $0x238] ss:$28 sps:$4 sm:$0xff]  }
 0x10f   :  { %2959 = vmatpush1.bf16.msra.mxu1 %v17527_v49  ;;  %2919 = vmatprep.subr.bf16.mxu0 %v17532_v50  ;;  %v17611_v49 = vld [vmem:[#allocation2 + $0x3f8] ss:$28 sps:$4 sm:$0xff]   ;;  %v17616_v50 = vld [vmem:[#allocation2 + $0x204] ss:$28 sps:$4 sm:$0xff]  }
 0x110   :  { %2985 = vmatprep.subr.bf16.mxu1 %v17535_v51  ;;  %v17619_v51 = vld [vmem:[#allocation2 + $0x3c4] ss:$28 sps:$4 sm:$0xff]  }
 0x112   :  { %2977 = vmatmul.mubr.bf16.vlgmr.msra.gmra.mxu1 %v19946_v54  ;;  %2920 = vmatpush2.bf16.msra.mxu0 %v17530_v52  ;;  %v17614_v52 = vld [vmem:[#allocation2 + $0x200] ss:$28 sps:$4 sm:$0xff]  }
 0x113   :  { %2986 = vmatpush1.bf16.msra.mxu1 %v17533_v53  ;;  %2921 = vmatprep.subr.bf16.mxu0 %v17538_v55  ;;  %v17617_v53 = vld [vmem:[#allocation2 + $0x3c0] ss:$28 sps:$4 sm:$0xff]   ;;  %v17622_v55 = vld [vmem:[#allocation2 + $0x1cc] ss:$28 sps:$4 sm:$0xff]  }
 0x114   :  { %2987 = vmatprep.subr.bf16.mxu1 %v17541_v56  ;;  %3017 = vmatprep.mubr.bf16.mxu1 %v19922_v8  ;;  %v17625_v56 = vld [vmem:[#allocation2 + $0x38c] ss:$28 sps:$4 sm:$0xff]  }
 0x116   :  { %2922 = vmatpush2.bf16.msra.mxu0 %v17536_v57  ;;  %v17620_v57 = vld [vmem:[#allocation2 + $0x1c8] ss:$28 sps:$4 sm:$0xff]  }
 0x117   :  { %2988 = vmatpush1.bf16.msra.mxu1 %v17539_v58  ;;  %2923 = vmatprep.subr.bf16.mxu0 %v17544_v59  ;;  %v17623_v58 = vld [vmem:[#allocation2 + $0x388] ss:$28 sps:$4 sm:$0xff]   ;;  %v17628_v59 = vld [vmem:[#allocation2 + $0x6d4] ss:$28 sps:$4 sm:$0xff]  }
 0x118   :  { %2989 = vmatprep.subr.bf16.mxu1 %v17547_v60  ;;  %v17631_v60 = vld [vmem:[#allocation2 + $0x894] ss:$28 sps:$4 sm:$0xff]  }
 0x11a   :  { %2924 = vmatpush2.bf16.msra.mxu0 %v17542_v7  ;;  %v17626_v7 = vld [vmem:[#allocation2 + $0x6d0] ss:$28 sps:$4 sm:$0xff]  }
 0x11b   :  { %2990 = vmatpush1.bf16.msra.mxu1 %v17545_v61  ;;  %2925 = vmatprep.subr.bf16.mxu0 %v17550_v62  ;;  %v17629_v61 = vld [vmem:[#allocation2 + $0x890] ss:$28 sps:$4 sm:$0xff]   ;;  %v17634_v62 = vld [vmem:[#allocation2 + $0x69c] ss:$28 sps:$4 sm:$0xff]  }
 0x11c   :  { %2991 = vmatprep.subr.bf16.mxu1 %v17553_v63  ;;  %v17637_v63 = vld [vmem:[#allocation2 + $0x85c] ss:$28 sps:$4 sm:$0xff]  }
 0x11e   :  { %2926 = vmatpush2.bf16.msra.mxu0 %v17548_v2  ;;  %v17632_v2 = vld [vmem:[#allocation2 + $0x698] ss:$28 sps:$4 sm:$0xff]  }
 0x11f   :  { %2992 = vmatpush1.bf16.msra.mxu1 %v17551_v4  ;;  %2927 = vmatprep.subr.bf16.mxu0 %v17556_v10  ;;  %v17635_v4 = vld [vmem:[#allocation2 + $0x858] ss:$28 sps:$4 sm:$0xff]   ;;  %v17640_v10 = vld [vmem:[#allocation2 + $0x664] ss:$28 sps:$4 sm:$0xff]  }
 0x120   :  { %2993 = vmatprep.subr.bf16.mxu1 %v17559_v11  ;;  %v17643_v11 = vld [vmem:[#allocation2 + $0x824] ss:$28 sps:$4 sm:$0xff]  }
 0x122   :  { %2928 = vmatpush2.bf16.msra.mxu0 %v17554_v12  ;;  %v17638_v12 = vld [vmem:[#allocation2 + $0x660] ss:$28 sps:$4 sm:$0xff]  }
 0x123   :  { %2994 = vmatpush1.bf16.msra.mxu1 %v17557_v13  ;;  %2929 = vmatprep.subr.bf16.mxu0 %v17562_v14  ;;  %v17641_v13 = vld [vmem:[#allocation2 + $0x820] ss:$28 sps:$4 sm:$0xff]   ;;  %v17646_v14 = vld [vmem:[#allocation2 + $0x62c] ss:$28 sps:$4 sm:$0xff]  }
 0x124   :  { %2995 = vmatprep.subr.bf16.mxu1 %v17565_v15  ;;  %v17649_v15 = vld [vmem:[#allocation2 + $0x7ec] ss:$28 sps:$4 sm:$0xff]  }
 0x126   :  { %2930 = vmatpush2.bf16.msra.mxu0 %v17560_v16  ;;  %v17644_v16 = vld [vmem:[#allocation2 + $0x628] ss:$28 sps:$4 sm:$0xff]  }
 0x127   :  { %2996 = vmatpush1.bf16.msra.mxu1 %v17563_v17  ;;  %2931 = vmatprep.subr.bf16.mxu0 %v17568_v18  ;;  %v17647_v17 = vld [vmem:[#allocation2 + $0x7e8] ss:$28 sps:$4 sm:$0xff]   ;;  %v17652_v18 = vld [vmem:[#allocation2 + $0x5f4] ss:$28 sps:$4 sm:$0xff]  }
 0x128   :  { %2997 = vmatprep.subr.bf16.mxu1 %v17571_v19  ;;  %v17655_v19 = vld [vmem:[#allocation2 + $0x7b4] ss:$28 sps:$4 sm:$0xff]  }
 0x12a   :  { %2932 = vmatpush2.bf16.msra.mxu0 %v17566_v21  ;;  %v17650_v21 = vld [vmem:[#allocation2 + $0x5f0] ss:$28 sps:$4 sm:$0xff]  }
 0x12b   :  { %2998 = vmatpush1.bf16.msra.mxu1 %v17569_v22  ;;  %2933 = vmatprep.subr.bf16.mxu0 %v17574_v24  ;;  %v17653_v22 = vld [vmem:[#allocation2 + $0x7b0] ss:$28 sps:$4 sm:$0xff]   ;;  %v17658_v24 = vld [vmem:[#allocation2 + $0x5bc] ss:$28 sps:$4 sm:$0xff]  }
 0x12c   :  { %2999 = vmatprep.subr.bf16.mxu1 %v17577_v25  ;;  %v17661_v25 = vld [vmem:[#allocation2 + $0x77c] ss:$28 sps:$4 sm:$0xff]  }
 0x12e   :  { %2934 = vmatpush2.bf16.msra.mxu0 %v17572_v1  ;;  %v17656_v1 = vld [vmem:[#allocation2 + $0x5b8] ss:$28 sps:$4 sm:$0xff]  }
 0x12f   :  { %3000 = vmatpush1.bf16.msra.mxu1 %v17575_v27  ;;  %3026 = vmatprep.subr.bf16.mxu0 %v17583_v28  ;;  %v17659_v27 = vld [vmem:[#allocation2 + $0x778] ss:$28 sps:$4 sm:$0xff]   ;;  %v17667_v28 = vld [vmem:[#allocation2 + $0x744] ss:$28 sps:$4 sm:$0xff]  }
 0x130   :  { %3001 = vmatprep.subr.bf16.mxu1 %v17580_v3  ;;  %v17664_v3 = vld [vmem:[#allocation2 + $0x584] ss:$28 sps:$4 sm:$0xff]  }
 0x131   :  { %2936 = vmatmul.mubr.bf16.vlgmr.msra.gmra.mxu0 %v19952_v29 }
 0x132   :  { %3027 = vmatpush1.bf16.msra.mxu0 %v17581_v6  ;;  %3058 = vmatprep.mubr.bf16.mxu0 %v19924_v9  ;;  %v17665_v6 = vld [vmem:[#allocation2 + $0x740] ss:$28 sps:$4 sm:$0xff]  }
 0x133   :  { %3002 = vmatpush2.bf16.msra.mxu1 %v17578_v30  ;;  %3028 = vmatprep.subr.bf16.mxu0 %v17589_v32  ;;  %v17662_v30 = vld [vmem:[#allocation2 + $0x580] ss:$28 sps:$4 sm:$0xff]   ;;  %v17673_v32 = vld [vmem:[#allocation2 + $0x70c] ss:$28 sps:$4 sm:$0xff]  }
 0x134   :  { %3003 = vmatprep.subr.bf16.mxu1 %v17586_v31  ;;  %v17670_v31 = vld [vmem:[#allocation2 + $0x54c] ss:$28 sps:$4 sm:$0xff]  }
 0x136   :  { %3029 = vmatpush1.bf16.msra.mxu0 %v17587_v34  ;;  %v17671_v34 = vld [vmem:[#allocation2 + $0x708] ss:$28 sps:$4 sm:$0xff]  }
 0x137   :  { %3004 = vmatpush2.bf16.msra.mxu1 %v17584_v33  ;;  %3030 = vmatprep.subr.bf16.mxu0 %v17595_v36  ;;  %v17668_v33 = vld [vmem:[#allocation2 + $0x548] ss:$28 sps:$4 sm:$0xff]   ;;  %v17679_v36 = vld [vmem:[#allocation2 + $0xc14] ss:$28 sps:$4 sm:$0xff]  }
 0x138   :  { %3005 = vmatprep.subr.bf16.mxu1 %v17592_v35  ;;  %v17676_v35 = vld [vmem:[#allocation2 + $0xa54] ss:$28 sps:$4 sm:$0xff]  }
 0x13a   :  { %3031 = vmatpush1.bf16.msra.mxu0 %v17593_v37  ;;  %v17677_v37 = vld [vmem:[#allocation2 + $0xc10] ss:$28 sps:$4 sm:$0xff]  }
 0x13b   :  { %3006 = vmatpush2.bf16.msra.mxu1 %v17590_v5  ;;  %3032 = vmatprep.subr.bf16.mxu0 %v17601_v39  ;;  %v17674_v5 = vld [vmem:[#allocation2 + $0xa50] ss:$28 sps:$4 sm:$0xff]   ;;  %v17685_v39 = vld [vmem:[#allocation2 + $0xbdc] ss:$28 sps:$4 sm:$0xff]  }
 0x13c   :  { %3007 = vmatprep.subr.bf16.mxu1 %v17598_v38  ;;  %v17682_v38 = vld [vmem:[#allocation2 + $0xa1c] ss:$28 sps:$4 sm:$0xff]  }
 0x13e   :  { %3033 = vmatpush1.bf16.msra.mxu0 %v17599_v41  ;;  %v17683_v41 = vld [vmem:[#allocation2 + $0xbd8] ss:$28 sps:$4 sm:$0xff]  }
 0x13f   :  { %3008 = vmatpush2.bf16.msra.mxu1 %v17596_v40  ;;  %3034 = vmatprep.subr.bf16.mxu0 %v17607_v43  ;;  %v17680_v40 = vld [vmem:[#allocation2 + $0xa18] ss:$28 sps:$4 sm:$0xff]   ;;  %v17691_v43 = vld [vmem:[#allocation2 + $0xba4] ss:$28 sps:$4 sm:$0xff]  }
 0x140   :  { %3009 = vmatprep.subr.bf16.mxu1 %v17604_v42  ;;  %v17688_v42 = vld [vmem:[#allocation2 + $0x9e4] ss:$28 sps:$4 sm:$0xff]  }
 0x142   :  { %3035 = vmatpush1.bf16.msra.mxu0 %v17605_v45  ;;  %v17689_v45 = vld [vmem:[#allocation2 + $0xba0] ss:$28 sps:$4 sm:$0xff]  }
 0x143   :  { %3010 = vmatpush2.bf16.msra.mxu1 %v17602_v44  ;;  %3036 = vmatprep.subr.bf16.mxu0 %v17613_v47  ;;  %v17686_v44 = vld [vmem:[#allocation2 + $0x9e0] ss:$28 sps:$4 sm:$0xff]   ;;  %v17697_v47 = vld [vmem:[#allocation2 + $0xb6c] ss:$28 sps:$4 sm:$0xff]  }
 0x144   :  { %3011 = vmatprep.subr.bf16.mxu1 %v17610_v46  ;;  %v17694_v46 = vld [vmem:[#allocation2 + $0x9ac] ss:$28 sps:$4 sm:$0xff]  }
 0x146   :  { %3037 = vmatpush1.bf16.msra.mxu0 %v17611_v49  ;;  %v17695_v49 = vld [vmem:[#allocation2 + $0xb68] ss:$28 sps:$4 sm:$0xff]  }
 0x147   :  { %3012 = vmatpush2.bf16.msra.mxu1 %v17608_v48  ;;  %3038 = vmatprep.subr.bf16.mxu0 %v17619_v51  ;;  %v17692_v48 = vld [vmem:[#allocation2 + $0x9a8] ss:$28 sps:$4 sm:$0xff]   ;;  %v17703_v51 = vld [vmem:[#allocation2 + $0xb34] ss:$28 sps:$4 sm:$0xff]  }
 0x148   :  { %3013 = vmatprep.subr.bf16.mxu1 %v17616_v50  ;;  %v17700_v50 = vld [vmem:[#allocation2 + $0x974] ss:$28 sps:$4 sm:$0xff]  }
 0x14a   :  { %3039 = vmatpush1.bf16.msra.mxu0 %v17617_v53  ;;  %v17701_v53 = vld [vmem:[#allocation2 + $0xb30] ss:$28 sps:$4 sm:$0xff]  }
 0x14b   :  { %3014 = vmatpush2.bf16.msra.mxu1 %v17614_v52  ;;  %3040 = vmatprep.subr.bf16.mxu0 %v17625_v56  ;;  %v17698_v52 = vld [vmem:[#allocation2 + $0x970] ss:$28 sps:$4 sm:$0xff]   ;;  %v17709_v56 = vld [vmem:[#allocation2 + $0xafc] ss:$28 sps:$4 sm:$0xff]  }
 0x14c   :  { %3015 = vmatprep.subr.bf16.mxu1 %v17622_v55  ;;  %v17706_v55 = vld [vmem:[#allocation2 + $0x93c] ss:$28 sps:$4 sm:$0xff]  }
 0x14e   :  { %3041 = vmatpush1.bf16.msra.mxu0 %v17623_v58  ;;  %v17707_v58 = vld [vmem:[#allocation2 + $0xaf8] ss:$28 sps:$4 sm:$0xff]  }
 0x14f   :  { %3016 = vmatpush2.bf16.msra.mxu1 %v17620_v57  ;;  %3042 = vmatprep.subr.bf16.mxu0 %v17628_v59  ;;  %v17704_v57 = vld [vmem:[#allocation2 + $0x938] ss:$28 sps:$4 sm:$0xff]   ;;  %v17712_v59 = vld [vmem:[#allocation2 + $0x904] ss:$28 sps:$4 sm:$0xff]  }
 0x150   :  { %3067 = vmatprep.subr.bf16.mxu1 %v17631_v60  ;;  %v17715_v60 = vld [vmem:[#allocation2 + $0xac4] ss:$28 sps:$4 sm:$0xff]  }
 0x152   :  { %3018 = vmatmul.mubr.bf16.vlgmr.msra.gmra.mxu1 %v19930_v20  ;;  %3043 = vmatpush2.bf16.msra.mxu0 %v17626_v7  ;;  %v17710_v7 = vld [vmem:[#allocation2 + $0x900] ss:$28 sps:$4 sm:$0xff]  }
 0x153   :  { %3068 = vmatpush1.bf16.msra.mxu1 %v17629_v61  ;;  %3044 = vmatprep.subr.bf16.mxu0 %v17634_v62  ;;  %v17713_v61 = vld [vmem:[#allocation2 + $0xac0] ss:$28 sps:$4 sm:$0xff]   ;;  %v17718_v62 = vld [vmem:[#allocation2 + $0x8cc] ss:$28 sps:$4 sm:$0xff]  }
 0x154   :  { %3069 = vmatprep.subr.bf16.mxu1 %v17637_v63  ;;  %3099 = vmatprep.mubr.bf16.mxu1 %v19938_v26  ;;  %v17721_v63 = vld [vmem:[#allocation2 + $0xa8c] ss:$28 sps:$4 sm:$0xff]  }
 0x156   :  { %3045 = vmatpush2.bf16.msra.mxu0 %v17632_v2  ;;  %v17716_v2 = vld [vmem:[#allocation2 + $0x8c8] ss:$28 sps:$4 sm:$0xff]  }
 0x157   :  { %3070 = vmatpush1.bf16.msra.mxu1 %v17635_v4  ;;  %3046 = vmatprep.subr.bf16.mxu0 %v17640_v10  ;;  %v17719_v4 = vld [vmem:[#allocation2 + $0xa88] ss:$28 sps:$4 sm:$0xff]   ;;  %v17724_v10 = vld [vmem:[#allocation2 + $0x19c] ss:$28 sps:$4 sm:$0xff]  }
 0x158   :  { %3071 = vmatprep.subr.bf16.mxu1 %v17643_v11  ;;  %v17727_v11 = vld [vmem:[#allocation2 + $0x51c] ss:$28 sps:$4 sm:$0xff]  }
 0x15a   :  { %3047 = vmatpush2.bf16.msra.mxu0 %v17638_v12  ;;  %v17722_v12 = vld [vmem:[#allocation2 + $0x198] ss:$28 sps:$4 sm:$0xff]  }
 0x15b   :  { %3072 = vmatpush1.bf16.msra.mxu1 %v17641_v13  ;;  %3048 = vmatprep.subr.bf16.mxu0 %v17646_v14  ;;  %v17725_v13 = vld [vmem:[#allocation2 + $0x518] ss:$28 sps:$4 sm:$0xff]   ;;  %v17730_v14 = vld [vmem:[#allocation2 + $0x164] ss:$28 sps:$4 sm:$0xff]  }
 0x15c   :  { %3073 = vmatprep.subr.bf16.mxu1 %v17649_v15  ;;  %v17733_v15 = vld [vmem:[#allocation2 + $0x4e4] ss:$28 sps:$4 sm:$0xff]  }
 0x15e   :  { %3049 = vmatpush2.bf16.msra.mxu0 %v17644_v16  ;;  %v17728_v16 = vld [vmem:[#allocation2 + $0x160] ss:$28 sps:$4 sm:$0xff]  }
 0x15f   :  { %3074 = vmatpush1.bf16.msra.mxu1 %v17647_v17  ;;  %3050 = vmatprep.subr.bf16.mxu0 %v17652_v18  ;;  %v17731_v17 = vld [vmem:[#allocation2 + $0x4e0] ss:$28 sps:$4 sm:$0xff]   ;;  %v17736_v18 = vld [vmem:[#allocation2 + $0x12c] ss:$28 sps:$4 sm:$0xff]  }
 0x160   :  { %3075 = vmatprep.subr.bf16.mxu1 %v17655_v19  ;;  %v17739_v19 = vld [vmem:[#allocation2 + $0x4ac] ss:$28 sps:$4 sm:$0xff]  }
 0x162   :  { %3051 = vmatpush2.bf16.msra.mxu0 %v17650_v21  ;;  %v17734_v21 = vld [vmem:[#allocation2 + $0x128] ss:$28 sps:$4 sm:$0xff]  }
 0x163   :  { %3076 = vmatpush1.bf16.msra.mxu1 %v17653_v22  ;;  %3052 = vmatprep.subr.bf16.mxu0 %v17658_v24  ;;  %v770_v22 = vlaneseq  ;;  %v17737_v24 = vld [vmem:[#allocation2 + $0x4a8] ss:$28 sps:$4 sm:$0xff]  }
 0x164   :  { %3077 = vmatprep.subr.bf16.mxu1 %v17661_v25  ;;  %v17742_v25 = vld [vmem:[#allocation2 + $0xf4] ss:$28 sps:$4 sm:$0xff]  }
 0x166   :  { %3053 = vmatpush2.bf16.msra.mxu0 %v17656_v1  ;;  %v17745_v1 = vld [vmem:[#allocation2 + $0x474] ss:$28 sps:$4 sm:$0xff]  }
 0x167   :  { %3078 = vmatpush1.bf16.msra.mxu1 %v17659_v27  ;;  %3054 = vmatprep.subr.bf16.mxu0 %v17664_v3  ;;  %v19964_v27 = vshrl.u32 %v770_v22, 7  ;;  %v17740_v3 = vld [vmem:[#allocation2 + $0xf0] ss:$28 sps:$4 sm:$0xff]  }
 0x168   :  { %3079 = vmatprep.subr.bf16.mxu1 %v17667_v28  ;;  %v17743_v28 = vld [vmem:[#allocation2 + $0x470] ss:$28 sps:$4 sm:$0xff]  }
 0x169   :  { %v17788_v22 = vld [vmem:[#allocation2 + $0x2b0] ss:$28 sps:$4 sm:$0xff]  }
 0x16a   :  { %3055 = vmatpush2.bf16.msra.mxu0 %v17662_v30  ;;  %v17748_v30 = vld [vmem:[#allocation2 + $0xbc] ss:$28 sps:$4 sm:$0xff]  }
 0x16b   :  { %3080 = vmatpush1.bf16.msra.mxu1 %v17665_v6  ;;  %3056 = vmatprep.subr.bf16.mxu0 %v17670_v31  ;;  %v17751_v6 = vld [vmem:[#allocation2 + $0x43c] ss:$28 sps:$4 sm:$0xff]  }
 0x16c   :  { %3081 = vmatprep.subr.bf16.mxu1 %v17673_v32  ;;  %v17746_v31 = vld [vmem:[#allocation2 + $0xb8] ss:$28 sps:$4 sm:$0xff]   ;;  %v19967_v32 = vsub.s32 0, %v19964_v27 }
 0x16e   :  { %3057 = vmatpush2.bf16.msra.mxu0 %v17668_v33  ;;  %v19970_v33 = vsub.s32 1, %v19964_v27 }
 0x16f   :  { %3082 = vmatpush1.bf16.msra.mxu1 %v17671_v34  ;;  %3108 = vmatprep.subr.bf16.mxu0 %v17679_v36  ;;  %v17749_v34 = vld [vmem:[#allocation2 + $0x438] ss:$28 sps:$4 sm:$0xff]   ;;  %v17757_v36 = vld [vmem:[#allocation2 + $0x404] ss:$28 sps:$4 sm:$0xff]  }
 0x170   :  { %3083 = vmatprep.subr.bf16.mxu1 %v17676_v35  ;;  %v17754_v35 = vld [vmem:[#allocation2 + $0x84] ss:$28 sps:$4 sm:$0xff]  }
 0x171   :  { %3059 = vmatmul.mubr.bf16.vlgmr.msra.gmra.mxu0 %v19934_v23 }
 0x172   :  { %3109 = vmatpush1.bf16.msra.mxu0 %v17677_v37  ;;  %3140 = vmatprep.mubr.bf16.mxu0 %v19617_v0  ;;  %v17755_v37 = vld [vmem:[#allocation2 + $0x400] ss:$28 sps:$4 sm:$0xff]  }
 0x173   :  { %3084 = vmatpush2.bf16.msra.mxu1 %v17674_v5  ;;  %3110 = vmatprep.subr.bf16.mxu0 %v17685_v39  ;;  %v17752_v5 = vld [vmem:[#allocation2 + $0x80] ss:$28 sps:$4 sm:$0xff]   ;;  %v17763_v39 = vld [vmem:[#allocation2 + $0x3cc] ss:$28 sps:$4 sm:$0xff]  }
 0x174   :  { %3085 = vmatprep.subr.bf16.mxu1 %v17682_v38  ;;  %v17760_v38 = vld [vmem:[#allocation2 + $0x4c] ss:$28 sps:$4 sm:$0xff]  }
 0x176   :  { %3111 = vmatpush1.bf16.msra.mxu0 %v17683_v41  ;;  %v17761_v41 = vld [vmem:[#allocation2 + $0x3c8] ss:$28 sps:$4 sm:$0xff]  }
 0x177   :  { %3086 = vmatpush2.bf16.msra.mxu1 %v17680_v40  ;;  %3112 = vmatprep.subr.bf16.mxu0 %v17691_v43  ;;  %v17758_v40 = vld [vmem:[#allocation2 + $0x48] ss:$28 sps:$4 sm:$0xff]  }
 0x178   :  { %3087 = vmatprep.subr.bf16.mxu1 %v17688_v42  ;;  %v759_v42 = vld [vmem:[#allocation10] ss:$8 sm:$0xf] }
 0x179   :  { %v760_v43 = vld [vmem:[#allocation10] ss:$8 sm:$0xf0] }
 0x17a   :  { %3113 = vmatpush1.bf16.msra.mxu0 %v17689_v45  ;;  %v17769_v45 = vld [vmem:[#allocation2 + $0x394] ss:$28 sps:$4 sm:$0xff]  }
 0x17b   :  { %3088 = vmatpush2.bf16.msra.mxu1 %v17686_v44  ;;  %3114 = vmatprep.subr.bf16.mxu0 %v17697_v47  ;;  %v17766_v44 = vld [vmem:[#allocation2 + $0x14] ss:$28 sps:$4 sm:$0xff]  }
 0x17c   :  { %3089 = vmatprep.subr.bf16.mxu1 %v17694_v46  ;;  %v17764_v46 = vld [vmem:[#allocation2 + $0x10] ss:$28 sps:$4 sm:$0xff]  }
 0x17d   :  { %v17767_v47 = vld [vmem:[#allocation2 + $0x390] ss:$28 sps:$4 sm:$0xff]  }
 0x17e   :  { %3115 = vmatpush1.bf16.msra.mxu0 %v17695_v49  ;;  %v17772_v49 = vld [vmem:[#allocation2 + $0x35c] ss:$28 sps:$4 sm:$0xff]  }
 0x17f   :  { %3090 = vmatpush2.bf16.msra.mxu1 %v17692_v48  ;;  %3116 = vmatprep.subr.bf16.mxu0 %v17703_v51  ;;  %v19972_v48 = vor.u32 %v760_v43, %v759_v42  ;;  %v17770_v51 = vld [vmem:[#allocation2 + $0x358] ss:$28 sps:$4 sm:$0xff]  }
 0x180   :  { %3091 = vmatprep.subr.bf16.mxu1 %v17700_v50  ;;  %v17775_v50 = vld [vmem:[#allocation2 + $0x6dc] ss:$28 sps:$4 sm:$0xff]  }
 0x181   :  { %v17820_v42 = vld [vmem:[#allocation2 + $0x89c] ss:$28 sps:$4 sm:$0xff]  }
 0x182   :  { %3117 = vmatpush1.bf16.msra.mxu0 %v17701_v53  ;;  %v773_v53 = vrot.slane %v19972_v48, %v19967_v32  ;;  %v17823_v43 = vld [vmem:[#allocation2 + $0xc1c] ss:$28 sps:$4 sm:$0xff]  }
 0x183   :  { %3092 = vmatpush2.bf16.msra.mxu1 %v17698_v52  ;;  %3118 = vmatprep.subr.bf16.mxu0 %v17709_v56  ;;  %v17773_v52 = vld [vmem:[#allocation2 + $0x6d8] ss:$28 sps:$4 sm:$0xff]   ;;  %v17781_v56 = vld [vmem:[#allocation2 + $0x6a4] ss:$28 sps:$4 sm:$0xff]  }
 0x184   :  { %3093 = vmatprep.subr.bf16.mxu1 %v17706_v55  ;;  %v17778_v55 = vld [vmem:[#allocation2 + $0x324] ss:$28 sps:$4 sm:$0xff]  }
 0x186   :  { %3119 = vmatpush1.bf16.msra.mxu0 %v17707_v58  ;;  %v17776_v58 = vld [vmem:[#allocation2 + $0x320] ss:$28 sps:$4 sm:$0xff]  }
 0x187   :  { %3094 = vmatpush2.bf16.msra.mxu1 %v17704_v57  ;;  %3120 = vmatprep.subr.bf16.mxu0 %v17715_v60  ;;  %v777_v57 = vrot.slane %v19972_v48, %v19970_v33 }
 0x188   :  { %3095 = vmatprep.subr.bf16.mxu1 %v17712_v59 }
 0x18a   :  { %3121 = vmatpush1.bf16.msra.mxu0 %v17713_v61 }
 0x18b   :  { %3096 = vmatpush2.bf16.msra.mxu1 %v17710_v7  ;;  %3122 = vmatprep.subr.bf16.mxu0 %v17721_v63  ;;  %v17779_v7 = vld [vmem:[#allocation2 + $0x6a0] ss:$28 sps:$4 sm:$0xff]  }
 0x18c   :  { %3097 = vmatprep.subr.bf16.mxu1 %v17718_v62  ;;  %v17784_v62 = vld [vmem:[#allocation2 + $0x2ec] ss:$28 sps:$4 sm:$0xff]  }
 0x18e   :  { %3123 = vmatpush1.bf16.msra.mxu0 %v17719_v4  ;;  %v17787_v4 = vld [vmem:[#allocation2 + $0x66c] ss:$28 sps:$4 sm:$0xff]  }
 0x18f   :  { %3098 = vmatpush2.bf16.msra.mxu1 %v17716_v2  ;;  %3149 = vmatprep.subr.bf16.mxu0 %v17724_v10 }
 0x190   :  { %3190 = vmatprep.subr.bf16.mxu1 %v17727_v11 }
 0x191   :  { %3141 = vmatmul.mubr.bf16.vlgmr.msra.gmra.mxu0 %v19946_v54 }
 0x192   :  { %3100 = vmatmul.mubr.bf16.vlgmr.msra.gmra.mxu1 %v19952_v29  ;;  %3150 = vmatpush1.bf16.msra.mxu0 %v17722_v12  ;;  %v17782_v12 = vld [vmem:[#allocation2 + $0x2e8] ss:$28 sps:$4 sm:$0xff]  }
 0x193   :  { %3191 = vmatpush1.bf16.msra.mxu1 %v17725_v13  ;;  %3151 = vmatprep.subr.bf16.mxu0 %v17730_v14  ;;  %v17785_v14 = vld [vmem:[#allocation2 + $0x668] ss:$28 sps:$4 sm:$0xff]  }
 0x194   :  { %3192 = vmatprep.subr.bf16.mxu1 %v17733_v15  ;;  %3181 = vmatprep.mubr.bf16.mxu0 %v19922_v8 }
 0x195   :  { %3222 = vmatprep.mubr.bf16.mxu1 %v19924_v9 }
 0x196   :  { %3152 = vmatpush1.bf16.msra.mxu0 %v17728_v16 }
 0x197   :  { %3193 = vmatpush1.bf16.msra.mxu1 %v17731_v17  ;;  %3153 = vmatprep.subr.bf16.mxu0 %v17736_v18  ;;  %v17790_v17 = vld [vmem:[#allocation2 + $0x2b4] ss:$28 sps:$4 sm:$0xff]  }
 0x198   :  { %3194 = vmatprep.subr.bf16.mxu1 %v17739_v19  ;;  %v17793_v19 = vld [vmem:[#allocation2 + $0x634] ss:$28 sps:$4 sm:$0xff]  }
 0x19a   :  { %3154 = vmatpush1.bf16.msra.mxu0 %v17734_v21 }
 0x19b   :  { %3195 = vmatpush1.bf16.msra.mxu1 %v17737_v24  ;;  %3155 = vmatprep.subr.bf16.mxu0 %v17742_v25  ;;  %v17791_v24 = vld [vmem:[#allocation2 + $0x630] ss:$28 sps:$4 sm:$0xff]   ;;  %v17796_v25 = vld [vmem:[#allocation2 + $0x27c] ss:$28 sps:$4 sm:$0xff]  }
 0x19c   :  { %3196 = vmatprep.subr.bf16.mxu1 %v17745_v1  ;;  %v17799_v1 = vld [vmem:[#allocation2 + $0x5fc] ss:$28 sps:$4 sm:$0xff]  }
 0x19e   :  { %3156 = vmatpush1.bf16.msra.mxu0 %v17740_v3  ;;  %v17794_v3 = vld [vmem:[#allocation2 + $0x278] ss:$28 sps:$4 sm:$0xff]  }
 0x19f   :  { %3197 = vmatpush1.bf16.msra.mxu1 %v17743_v28  ;;  %3157 = vmatprep.subr.bf16.mxu0 %v17748_v30  ;;  %v17797_v28 = vld [vmem:[#allocation2 + $0x5f8] ss:$28 sps:$4 sm:$0xff]   ;;  %v17802_v30 = vld [vmem:[#allocation2 + $0x244] ss:$28 sps:$4 sm:$0xff]  }
 0x1a0   :  { %3198 = vmatprep.subr.bf16.mxu1 %v17751_v6  ;;  %v17805_v6 = vld [vmem:[#allocation2 + $0x5c4] ss:$28 sps:$4 sm:$0xff]  }
 0x1a2   :  { %3158 = vmatpush1.bf16.msra.mxu0 %v17746_v31  ;;  %v17800_v31 = vld [vmem:[#allocation2 + $0x240] ss:$28 sps:$4 sm:$0xff]  }
 0x1a3   :  { %3199 = vmatpush1.bf16.msra.mxu1 %v17749_v34  ;;  %3159 = vmatprep.subr.bf16.mxu0 %v17754_v35  ;;  %v17803_v34 = vld [vmem:[#allocation2 + $0x5c0] ss:$28 sps:$4 sm:$0xff]   ;;  %v17808_v35 = vld [vmem:[#allocation2 + $0x20c] ss:$28 sps:$4 sm:$0xff]  }
 0x1a4   :  { %3200 = vmatprep.subr.bf16.mxu1 %v17757_v36  ;;  %v17811_v36 = vld [vmem:[#allocation2 + $0x58c] ss:$28 sps:$4 sm:$0xff]  }
 0x1a6   :  { %3160 = vmatpush1.bf16.msra.mxu0 %v17752_v5  ;;  %v17806_v5 = vld [vmem:[#allocation2 + $0x208] ss:$28 sps:$4 sm:$0xff]  }
 0x1a7   :  { %3201 = vmatpush1.bf16.msra.mxu1 %v17755_v37  ;;  %3161 = vmatprep.subr.bf16.mxu0 %v17760_v38  ;;  %v17809_v37 = vld [vmem:[#allocation2 + $0x588] ss:$28 sps:$4 sm:$0xff]   ;;  %v17814_v38 = vld [vmem:[#allocation2 + $0x1d4] ss:$28 sps:$4 sm:$0xff]  }
 0x1a8   :  { %3202 = vmatprep.subr.bf16.mxu1 %v17763_v39  ;;  %v17817_v39 = vld [vmem:[#allocation2 + $0x554] ss:$28 sps:$4 sm:$0xff]  }
 0x1aa   :  { %3162 = vmatpush1.bf16.msra.mxu0 %v17758_v40  ;;  %v17812_v40 = vld [vmem:[#allocation2 + $0x1d0] ss:$28 sps:$4 sm:$0xff]  }
 0x1ab   :  { %3203 = vmatpush1.bf16.msra.mxu1 %v17761_v41  ;;  %3163 = vmatprep.subr.bf16.mxu0 %v17766_v44  ;;  %v17815_v41 = vld [vmem:[#allocation2 + $0x550] ss:$28 sps:$4 sm:$0xff]   ;;  %v17818_v44 = vld [vmem:[#allocation2 + $0x898] ss:$28 sps:$4 sm:$0xff]  }
 0x1ac   :  { %3204 = vmatprep.subr.bf16.mxu1 %v17769_v45  ;;  %v17821_v45 = vld [vmem:[#allocation2 + $0xc18] ss:$28 sps:$4 sm:$0xff]  }
 0x1ae   :  { %3164 = vmatpush1.bf16.msra.mxu0 %v17764_v46  ;;  %v17826_v46 = vld [vmem:[#allocation2 + $0x864] ss:$28 sps:$4 sm:$0xff]  }
 0x1af   :  { %3205 = vmatpush1.bf16.msra.mxu1 %v17767_v47  ;;  %3165 = vmatprep.subr.bf16.mxu0 %v17772_v49  ;;  %v17829_v47 = vld [vmem:[#allocation2 + $0xbe4] ss:$28 sps:$4 sm:$0xff]  }
 0x1b0   :  { %3206 = vmatprep.subr.bf16.mxu1 %v17775_v50  ;;  %v17824_v50 = vld [vmem:[#allocation2 + $0x860] ss:$28 sps:$4 sm:$0xff]  }
 0x1b1   :  { %v2855_v59 = vpop.f32.mrf.mxu0 }
 0x1b2   :  { %v2896_v60 = vpop.f32.mrf.mxu1  ;;  %v2856_v61 = vadd.f32 %v2855_v59, %v773_v53  ;;  %3166 = vmatpush2.bf16.msra.mxu0 %v17770_v51  ;;  %v17827_v51 = vld [vmem:[#allocation2 + $0xbe0] ss:$28 sps:$4 sm:$0xff]   ;;  %v17835_v53 = vld [vmem:[#allocation2 + $0xbac] ss:$28 sps:$4 sm:$0xff]   ;;  %v17838_v59 = vld [vmem:[#allocation2 + $0x7f4] ss:$28 sps:$4 sm:$0xff]  }
 0x1b3   :  { %3207 = vmatpush2.bf16.msra.mxu1 %v17773_v52  ;;  %v2857_v63 = vpop.f32.mrf.mxu0  ;;  %3167 = vmatprep.subr.bf16.mxu0 %v17778_v55  ;;  %v17832_v52 = vld [vmem:[#allocation2 + $0x82c] ss:$28 sps:$4 sm:$0xff]  }
 0x1b4   :  { %v2898_v2 = vpop.f32.mrf.mxu1  ;;  %3208 = vmatprep.subr.bf16.mxu1 %v17781_v56  ;;  %v2858_v10 = vadd.f32 %v2857_v63, %v777_v57  ;;  %v19978_v11 = vadd.f32 %v2896_v60, %v2856_v61  ;;  %v17830_v57 = vld [vmem:[#allocation2 + $0x828] ss:$28 sps:$4 sm:$0xff]   ;;  %v17841_v60 = vld [vmem:[#allocation2 + $0xb74] ss:$28 sps:$4 sm:$0xff]   ;;  %v17844_v63 = vld [vmem:[#allocation2 + $0x7bc] ss:$28 sps:$4 sm:$0xff]  }
 0x1b5   :  { %v2859_v13 = vpop.f32.mrf.mxu0  ;;  %v17836_v61 = vld [vmem:[#allocation2 + $0x7f0] ss:$28 sps:$4 sm:$0xff]  }
 0x1b6   :  { %v2900_v15 = vpop.f32.mrf.mxu1  ;;  %v19980_v16 = vadd.f32 %v2898_v2, %v2858_v10  ;;  %3168 = vmatpush2.bf16.msra.mxu0 %v17776_v58  ;;  %v17833_v58 = vld [vmem:[#allocation2 + $0xba8] ss:$28 sps:$4 sm:$0xff]   ;;  %v17847_v2 = vld [vmem:[#allocation2 + $0xb3c] ss:$28 sps:$4 sm:$0xff]  }
 0x1b7   :  { %3209 = vmatpush2.bf16.msra.mxu1 %v17779_v7  ;;  %v2860_v18 = vpop.f32.mrf.mxu0  ;;  %3169 = vmatprep.subr.bf16.mxu0 %v17784_v62  ;;  %v17839_v62 = vld [vmem:[#allocation2 + $0xb70] ss:$28 sps:$4 sm:$0xff]   ;;  %v17845_v10 = vld [vmem:[#allocation2 + $0xb38] ss:$28 sps:$4 sm:$0xff]   ;;  %v17853_v13 = vld [vmem:[#allocation2 + $0xb04] ss:$28 sps:$4 sm:$0xff]  }
 0x1b8   :  { %3210 = vmatprep.subr.bf16.mxu1 %v17787_v4  ;;  %v2901_v21 = vpop.f32.mrf.mxu1  ;;  %v17842_v4 = vld [vmem:[#allocation2 + $0x7b8] ss:$28 sps:$4 sm:$0xff]   ;;  %v17851_v15 = vld [vmem:[#allocation2 + $0xb00] ss:$28 sps:$4 sm:$0xff]   ;;  %v17859_v18 = vld [vmem:[#allocation2 + $0xacc] ss:$28 sps:$4 sm:$0xff]  }
 0x1b9   :  { %v17857_v21 = vld [vmem:[#allocation2 + $0xac8] ss:$28 sps:$4 sm:$0xff]  }
 0x1ba   :  { %3170 = vmatpush2.bf16.msra.mxu0 %v17782_v12  ;;  %v17850_v12 = vld [vmem:[#allocation2 + $0x784] ss:$28 sps:$4 sm:$0xff]  }
 0x1bb   :  { %3211 = vmatpush2.bf16.msra.mxu1 %v17785_v14  ;;  %3171 = vmatprep.subr.bf16.mxu0 %v17790_v17  ;;  %v17848_v14 = vld [vmem:[#allocation2 + $0x780] ss:$28 sps:$4 sm:$0xff]   ;;  %v17856_v17 = vld [vmem:[#allocation2 + $0x74c] ss:$28 sps:$4 sm:$0xff]  }
 0x1bc   :  { %3212 = vmatprep.subr.bf16.mxu1 %v17793_v19  ;;  %v17854_v19 = vld [vmem:[#allocation2 + $0x748] ss:$28 sps:$4 sm:$0xff]  }
 0x1be   :  { %3172 = vmatpush2.bf16.msra.mxu0 %v17788_v22  ;;  %v17862_v22 = vld [vmem:[#allocation2 + $0x714] ss:$28 sps:$4 sm:$0xff]  }
 0x1bf   :  { %3213 = vmatpush2.bf16.msra.mxu1 %v17791_v24  ;;  %3173 = vmatprep.subr.bf16.mxu0 %v17796_v25  ;;  %v17865_v24 = vld [vmem:[#allocation2 + $0xa94] ss:$28 sps:$4 sm:$0xff]  }
 0x1c0   :  { %3214 = vmatprep.subr.bf16.mxu1 %v17799_v1  ;;  %v17860_v25 = vld [vmem:[#allocation2 + $0x710] ss:$28 sps:$4 sm:$0xff]  }
 0x1c1   :  { %v17863_v1 = vld [vmem:[#allocation2 + $0xa90] ss:$28 sps:$4 sm:$0xff]  }
 0x1c2   :  { %3174 = vmatpush2.bf16.msra.mxu0 %v17794_v3  ;;  %v17868_v3 = vld [vmem:[#allocation2 + $0xa5c] ss:$28 sps:$4 sm:$0xff]  }
 0x1c3   :  { %3215 = vmatpush2.bf16.msra.mxu1 %v17797_v28  ;;  %3175 = vmatprep.subr.bf16.mxu0 %v17802_v30  ;;  %v17869_v28 = vld [vmem:[#allocation2 + $0x360] ss:$28 sps:$4 sm:$0xff]   ;;  %v17866_v30 = vld [vmem:[#allocation2 + $0xa58] ss:$28 sps:$4 sm:$0xff]  }
 0x1c4   :  { %3216 = vmatprep.subr.bf16.mxu1 %v17805_v6  ;;  %v17870_v6 = vld [vmem:[#allocation2 + $0x1a0] ss:$28 sps:$4 sm:$0xff]  }
 0x1c6   :  { %3176 = vmatpush2.bf16.msra.mxu0 %v17800_v31  ;;  %v17873_v31 = vld [vmem:[#allocation2 + $0xa24] ss:$28 sps:$4 sm:$0xff]  }
 0x1c7   :  { %3217 = vmatpush2.bf16.msra.mxu1 %v17803_v34  ;;  %3177 = vmatprep.subr.bf16.mxu0 %v17808_v35  ;;  %v17874_v34 = vld [vmem:[#allocation2 + $0x328] ss:$28 sps:$4 sm:$0xff]  }
 0x1c8   :  { %3218 = vmatprep.subr.bf16.mxu1 %v17811_v36 }
 0x1ca   :  { %3178 = vmatpush2.bf16.msra.mxu0 %v17806_v5  ;;  %v17871_v5 = vld [vmem:[#allocation2 + $0xa20] ss:$28 sps:$4 sm:$0xff]  }
 0x1cb   :  { %3219 = vmatpush2.bf16.msra.mxu1 %v17809_v37  ;;  %3179 = vmatprep.subr.bf16.mxu0 %v17814_v38  ;;  %v17875_v37 = vld [vmem:[#allocation2 + $0x168] ss:$28 sps:$4 sm:$0xff]  }
 0x1cc   :  { %3220 = vmatprep.subr.bf16.mxu1 %v17817_v39  ;;  %v17878_v39 = vld [vmem:[#allocation2 + $0x9ec] ss:$28 sps:$4 sm:$0xff]  }
 0x1ce   :  { %3180 = vmatpush2.bf16.msra.mxu0 %v17812_v40  ;;  %v17879_v40 = vld [vmem:[#allocation2 + $0x2f0] ss:$28 sps:$4 sm:$0xff]  }
 0x1cf   :  { %3221 = vmatpush2.bf16.msra.mxu1 %v17815_v41  ;;  %3231 = vmatprep.subr.bf16.mxu0 %v17820_v42 }
 0x1d0   :  { %3272 = vmatprep.subr.bf16.mxu1 %v17823_v43 }
 0x1d1   :  { %3182 = vmatmul.mubr.bf16.vlgmr.msra.gmra.mxu0 %v19930_v20 }
 0x1d2   :  { %3223 = vmatmul.mubr.bf16.vlgmr.msra.gmra.mxu1 %v19934_v23  ;;  %v19984_v49 = vpop.f32.mrf.mxu1  ;;  %3232 = vmatpush1.bf16.msra.mxu0 %v17818_v44 }
 0x1d3   :  { %3273 = vmatpush1.bf16.msra.mxu1 %v17821_v45  ;;  %3233 = vmatprep.subr.bf16.mxu0 %v17826_v46  ;;  %v17880_v45 = vld [vmem:[#allocation2 + $0x130] ss:$28 sps:$4 sm:$0xff]  }
 0x1d4   :  { %3274 = vmatprep.subr.bf16.mxu1 %v17829_v47  ;;  %v19986_v55 = vpop.f32.mrf.mxu1  ;;  %3304 = vmatprep.mubr.bf16.mxu1 %v19617_v0  ;;  %v17883_v47 = vld [vmem:[#allocation2 + $0x9b4] ss:$28 sps:$4 sm:$0xff]  }
 0x1d5   :  { %3263 = vmatprep.mubr.bf16.mxu0 %v19938_v26 }
 0x1d6   :  { %v2982_v56 = vpop.f32.mrf.mxu1  ;;  %3234 = vmatpush1.bf16.msra.mxu0 %v17824_v50  ;;  %v17884_v50 = vld [vmem:[#allocation2 + $0x2b8] ss:$28 sps:$4 sm:$0xff]  }
 0x1d7   :  { %3275 = vmatpush1.bf16.msra.mxu1 %v17827_v51  ;;  %3235 = vmatprep.subr.bf16.mxu0 %v17832_v52  ;;  %v17889_v51 = vld [vmem:[#allocation2 + $0x280] ss:$28 sps:$4 sm:$0xff]   ;;  %v17886_v52 = vld [vmem:[#allocation2 + $0x978] ss:$28 sps:$4 sm:$0xff]   ;;  %v17894_v56 = vld [vmem:[#allocation2 + $0x248] ss:$28 sps:$4 sm:$0xff]  }
 0x1d8   :  { %3276 = vmatprep.subr.bf16.mxu1 %v17835_v53  ;;  %v2983_v7 = vpop.f32.mrf.mxu1  ;;  %v17890_v53 = vld [vmem:[#allocation2 + $0xc0] ss:$28 sps:$4 sm:$0xff]  }
 0x1d9   :  { %v17899_v7 = vld [vmem:[#allocation2 + $0x210] ss:$28 sps:$4 sm:$0xff]  }
 0x1da   :  { %3236 = vmatpush1.bf16.msra.mxu0 %v17830_v57  ;;  %v17891_v57 = vld [vmem:[#allocation2 + $0x940] ss:$28 sps:$4 sm:$0xff]  }
 0x1db   :  { %3277 = vmatpush1.bf16.msra.mxu1 %v17833_v58  ;;  %3237 = vmatprep.subr.bf16.mxu0 %v17838_v59  ;;  %v17895_v58 = vld [vmem:[#allocation2 + $0x88] ss:$28 sps:$4 sm:$0xff]  }
 0x1dc   :  { %3278 = vmatprep.subr.bf16.mxu1 %v17841_v60  ;;  %v17898_v60 = vld [vmem:[#allocation2 + $0x90c] ss:$28 sps:$4 sm:$0xff]  }
 0x1de   :  { %3238 = vmatpush1.bf16.msra.mxu0 %v17836_v61 }
 0x1df   :  { %3279 = vmatpush1.bf16.msra.mxu1 %v17839_v62  ;;  %3239 = vmatprep.subr.bf16.mxu0 %v17844_v63  ;;  %v17896_v62 = vld [vmem:[#allocation2 + $0x908] ss:$28 sps:$4 sm:$0xff]   ;;  %v17900_v63 = vld [vmem:[#allocation2 + $0x50] ss:$28 sps:$4 sm:$0xff]  }
 0x1e0   :  { %3280 = vmatprep.subr.bf16.mxu1 %v17847_v2  ;;  %v17903_v2 = vld [vmem:[#allocation2 + $0x8d4] ss:$28 sps:$4 sm:$0xff]  }
 0x1e2   :  { %3240 = vmatpush1.bf16.msra.mxu0 %v17842_v4  ;;  %v17904_v4 = vld [vmem:[#allocation2 + $0x1d8] ss:$28 sps:$4 sm:$0xff]  }
 0x1e3   :  { %3281 = vmatpush1.bf16.msra.mxu1 %v17845_v10  ;;  %3241 = vmatprep.subr.bf16.mxu0 %v17850_v12  ;;  %v17901_v10 = vld [vmem:[#allocation2 + $0x8d0] ss:$28 sps:$4 sm:$0xff]   ;;  %v17905_v12 = vld [vmem:[#allocation2 + $0x18] ss:$28 sps:$4 sm:$0xff]  }
 0x1e4   :  { %3282 = vmatprep.subr.bf16.mxu1 %v17853_v13  ;;  %v17906_v13 = vld [vmem:[#allocation2 + $0x6e0] ss:$28 sps:$4 sm:$0xff]  }
 0x1e6   :  { %3242 = vmatpush1.bf16.msra.mxu0 %v17848_v14  ;;  %v17908_v14 = vld [vmem:[#allocation2 + $0xa60] ss:$28 sps:$4 sm:$0xff]  }
 0x1e7   :  { %3283 = vmatpush1.bf16.msra.mxu1 %v17851_v15  ;;  %3243 = vmatprep.subr.bf16.mxu0 %v17856_v17  ;;  %v17907_v15 = vld [vmem:[#allocation2 + $0x520] ss:$28 sps:$4 sm:$0xff]  }
 0x1e8   :  { %3284 = vmatprep.subr.bf16.mxu1 %v17859_v18  ;;  %v17909_v17 = vld [vmem:[#allocation2 + $0x8a0] ss:$28 sps:$4 sm:$0xff]   ;;  %v17910_v18 = vld [vmem:[#allocation2 + $0x6a8] ss:$28 sps:$4 sm:$0xff]  }
 0x1ea   :  { %3244 = vmatpush1.bf16.msra.mxu0 %v17854_v19  ;;  %v17912_v19 = vld [vmem:[#allocation2 + $0xa28] ss:$28 sps:$4 sm:$0xff]  }
 0x1eb   :  { %3285 = vmatpush1.bf16.msra.mxu1 %v17857_v21  ;;  %3245 = vmatprep.subr.bf16.mxu0 %v17862_v22  ;;  %v17911_v22 = vld [vmem:[#allocation2 + $0x4e8] ss:$28 sps:$4 sm:$0xff]  }
 0x1ec   :  { %3286 = vmatprep.subr.bf16.mxu1 %v17865_v24  ;;  %v17913_v24 = vld [vmem:[#allocation2 + $0x868] ss:$28 sps:$4 sm:$0xff]  }
 0x1ee   :  { %3246 = vmatpush1.bf16.msra.mxu0 %v17860_v25  ;;  %v17914_v25 = vld [vmem:[#allocation2 + $0x670] ss:$28 sps:$4 sm:$0xff]  }
 0x1ef   :  { %3287 = vmatpush1.bf16.msra.mxu1 %v17863_v1  ;;  %3247 = vmatprep.subr.bf16.mxu0 %v17868_v3  ;;  %v17916_v1 = vld [vmem:[#allocation2 + $0x9f0] ss:$28 sps:$4 sm:$0xff]  }
 0x1f0   :  { %17002 = vmatprep.subr.bf16.mxu1 %v17869_v28 }
 0x1f1   :  { %v2937_v35 = vpop.f32.mrf.mxu0 }
 0x1f2   :  { %3305 = vmatmul.mubr.bf16.vlgmr.msra.gmra.mxu1 %v19946_v54  ;;  %v2938_v36 = vadd.f32 %v2937_v35, %v19978_v11  ;;  %3248 = vmatpush2.bf16.msra.mxu0 %v17866_v30  ;;  %v17876_v11 = vld [vmem:[#allocation2 + $0x9e8] ss:$28 sps:$4 sm:$0xff]   ;;  %v17917_v30 = vld [vmem:[#allocation2 + $0x830] ss:$28 sps:$4 sm:$0xff]   ;;  %v17919_v35 = vld [vmem:[#allocation2 + $0x478] ss:$28 sps:$4 sm:$0xff]  }
 0x1f3   :  { %17003 = vmatpush3.bf16.msra.mxu1 %v17870_v6  ;;  %v2939_v38 = vpop.f32.mrf.mxu0  ;;  %3249 = vmatprep.subr.bf16.mxu0 %v17873_v31  ;;  %v17918_v6 = vld [vmem:[#allocation2 + $0x638] ss:$28 sps:$4 sm:$0xff]  }
 0x1f4   :  { %17004 = vmatprep.subr.bf16.mxu1 %v17874_v34  ;;  %v2979_v41 = vadd.f32 %v19984_v49, %v2938_v36  ;;  %v2940_v42 = vadd.f32 %v2939_v38, %v19980_v16  ;;  %3345 = vmatprep.mubr.bf16.mxu1 %v19922_v8  ;;  %v17881_v49 = vld [vmem:[#allocation2 + $0x9b0] ss:$28 sps:$4 sm:$0xff]   ;;  %v17885_v16 = vld [vmem:[#allocation2 + $0xf8] ss:$28 sps:$4 sm:$0xff]   ;;  %v17926_v38 = vld [vmem:[#allocation2 + $0x5c8] ss:$28 sps:$4 sm:$0xff]  }
 0x1f5   :  { %v2941_v43 = vpop.f32.mrf.mxu0  ;;  %v17888_v8 = vld [vmem:[#allocation2 + $0x97c] ss:$28 sps:$4 sm:$0xff]  }
 0x1f6   :  { %17946 = vtanh.f32 %v2979_v41  ;;  %v2981_v44 = vadd.f32 %v19986_v55, %v2940_v42  ;;  %3250 = vmatpush2.bf16.msra.mxu0 %v17871_v5  ;;  %v17893_v55 = vld [vmem:[#allocation2 + $0x944] ss:$28 sps:$4 sm:$0xff]   ;;  %v17920_v31 = vld [vmem:[#allocation2 + $0x9b8] ss:$28 sps:$4 sm:$0xff]   ;;  %v17930_v42 = vld [vmem:[#allocation2 + $0x590] ss:$28 sps:$4 sm:$0xff]  }
 0x1f7   :  { %17005 = vmatpush3.bf16.msra.mxu1 %v17875_v37  ;;  %v2942_v46 = vpop.f32.mrf.mxu0  ;;  %3251 = vmatprep.subr.bf16.mxu0 %v17878_v39  ;;  %v17921_v36 = vld [vmem:[#allocation2 + $0x7f8] ss:$28 sps:$4 sm:$0xff]   ;;  %v17922_v5 = vld [vmem:[#allocation2 + $0x600] ss:$28 sps:$4 sm:$0xff]   ;;  %v17928_v39 = vld [vmem:[#allocation2 + $0x948] ss:$28 sps:$4 sm:$0xff]  }
 0x1f8   :  { %17006 = vmatprep.subr.bf16.mxu1 %v17879_v40  ;;  %17948 = vtanh.f32 %v2981_v44  ;;  %v17925_v37 = vld [vmem:[#allocation2 + $0x7c0] ss:$28 sps:$4 sm:$0xff]   ;;  %v17927_v40 = vld [vmem:[#allocation2 + $0x408] ss:$28 sps:$4 sm:$0xff]   ;;  %v17932_v43 = vld [vmem:[#allocation2 + $0x910] ss:$28 sps:$4 sm:$0xff]  }
 0x1f9   :  { %v17929_v41 = vld [vmem:[#allocation2 + $0x788] ss:$28 sps:$4 sm:$0xff]   ;;  %v20009_v44 = vsub.s32 2, %v19964_v27  ;;  %v17934_v46 = vld [vmem:[#allocation2 + $0x558] ss:$28 sps:$4 sm:$0xff]  }
 0x1fa   :  { %3252 = vmatpush2.bf16.msra.mxu0 %v17876_v11  ;;  %v17931_v11 = vld [vmem:[#allocation2 + $0x3d0] ss:$28 sps:$4 sm:$0xff]  }
 0x1fb   :  { %17007 = vmatpush3.bf16.msra.mxu1 %v17880_v45  ;;  %3253 = vmatprep.subr.bf16.mxu0 %v17883_v47  ;;  %v17933_v45 = vld [vmem:[#allocation2 + $0x750] ss:$28 sps:$4 sm:$0xff]   ;;  %v17936_v47 = vld [vmem:[#allocation2 + $0x8d8] ss:$28 sps:$4 sm:$0xff]  }
 0x1fc   :  { %17008 = vmatprep.subr.bf16.mxu1 %v17884_v50  ;;  %v781_v50 = vrot.slane %v19972_v48, %v20009_v44 }
 0x1fe   :  { %3254 = vmatpush2.bf16.msra.mxu0 %v17881_v49  ;;  %v20014_v49 = vsub.s32 3, %v19964_v27 }
 0x1ff   :  { %17009 = vmatpush3.bf16.msra.mxu1 %v17885_v16  ;;  %3255 = vmatprep.subr.bf16.mxu0 %v17888_v8  ;;  %v17935_v16 = vld [vmem:[#allocation2 + $0x398] ss:$28 sps:$4 sm:$0xff]  }
 0x200   :  { %17010 = vmatprep.subr.bf16.mxu1 %v17889_v51  ;;  %v17937_v8 = vld [vmem:[#allocation2 + $0x718] ss:$28 sps:$4 sm:$0xff]  }
 0x202   :  { %3256 = vmatpush2.bf16.msra.mxu0 %v17886_v52  ;;  %v785_v52 = vrot.slane %v19972_v48, %v20014_v49 }
 0x203   :  { %17011 = vmatpush3.bf16.msra.mxu1 %v17890_v53  ;;  %v19996_v59 = vpop.eup %17946  ;;  %3257 = vmatprep.subr.bf16.mxu0 %v17893_v55  ;;  %v17938_v53 = vld [vmem:[#allocation2 + $0xc20] ss:$28 sps:$4 sm:$0xff]   ;;  %v19625_v55 = vmov 0.0  }
 0x204   :  { %17012 = vmatprep.subr.bf16.mxu1 %v17894_v56 }
 0x205   :  { %v19998_v61 = vpop.eup %17948 }
 0x206   :  { %3258 = vmatpush2.bf16.msra.mxu0 %v17891_v57 }
 0x207   :  { %17013 = vmatpush3.bf16.msra.mxu1 %v17895_v58  ;;  %3259 = vmatprep.subr.bf16.mxu0 %v17898_v60  ;;  %v17939_v60 = vld [vmem:[#allocation2 + $0xbe8] ss:$28 sps:$4 sm:$0xff]  }
 0x208   :  { %17014 = vmatprep.subr.bf16.mxu1 %v17899_v7 }
 0x20a   :  { %3260 = vmatpush2.bf16.msra.mxu0 %v17896_v62 }
 0x20b   :  { %17015 = vmatpush3.bf16.msra.mxu1 %v17900_v63  ;;  %3261 = vmatprep.subr.bf16.mxu0 %v17903_v2  ;;  %v17940_v2 = vld [vmem:[#allocation2 + $0xbb0] ss:$28 sps:$4 sm:$0xff]  }
 0x20c   :  { %17016 = vmatprep.subr.bf16.mxu1 %v17904_v4 }
 0x20e   :  { %3262 = vmatpush2.bf16.msra.mxu0 %v17901_v10  ;;  %v17943_v10 = vld [vmem:[#allocation2 + $0xb08] ss:$28 sps:$4 sm:$0xff]  }
 0x20f   :  { %17017 = vmatpush3.bf16.msra.mxu1 %v17905_v12  ;;  %17024 = vmatprep.subr.bf16.mxu0 %v17906_v13  ;;  %v17944_v12 = vld [vmem:[#allocation2 + $0xad0] ss:$28 sps:$4 sm:$0xff]   ;;  %v17945_v13 = vld [vmem:[#allocation2 + $0xa98] ss:$28 sps:$4 sm:$0xff]  }
 0x210   :  { %17046 = vmatprep.subr.bf16.mxu1 %v17908_v14 }
 0x211   :  { %3264 = vmatmul.mubr.bf16.vlgmr.msra.gmra.mxu0 %v19952_v29 }
 0x212   :  { %3346 = vmatmul.mubr.bf16.vlgmr.msra.gmra.mxu1 %v19930_v20  ;;  %v20002_v21 = vpop.f32.mrf.mxu1  ;;  %17025 = vmatpush3.bf16.msra.mxu0 %v17907_v15  ;;  %v17915_v20 = vld [vmem:[#allocation2 + $0x4b0] ss:$28 sps:$4 sm:$0xff]  }
 0x213   :  { %17047 = vmatpush3.bf16.msra.mxu1 %v17909_v17  ;;  %17026 = vmatprep.subr.bf16.mxu0 %v17910_v18  ;;  %v3020_v51 = vadd.f32 %v20002_v21, %v781_v50 }
 0x214   :  { %17048 = vmatprep.subr.bf16.mxu1 %v17912_v19  ;;  %v20004_v3 = vpop.f32.mrf.mxu1  ;;  %3385 = vmatprep.mubr.bf16.mxu0 %v19924_v9  ;;  %v17924_v9 = vld [vmem:[#allocation2 + $0x980] ss:$28 sps:$4 sm:$0xff]  }
 0x215   :  { %3425 = vmatprep.mubr.bf16.mxu1 %v19938_v26  ;;  %v17923_v26 = vld [vmem:[#allocation2 + $0x440] ss:$28 sps:$4 sm:$0xff]   ;;  %v3022_v57 = vadd.f32 %v20004_v3, %v785_v52 }
 0x216   :  { %v3023_v28 = vpop.f32.mrf.mxu1  ;;  %17027 = vmatpush3.bf16.msra.mxu0 %v17911_v22 }
 0x217   :  { %17049 = vmatpush3.bf16.msra.mxu1 %v17913_v24  ;;  %17028 = vmatprep.subr.bf16.mxu0 %v17914_v25 }
 0x218   :  { %17050 = vmatprep.subr.bf16.mxu1 %v17916_v1  ;;  %v3024_v34 = vpop.f32.mrf.mxu1 }
 0x21a   :  { %17029 = vmatpush3.bf16.msra.mxu0 %v17915_v20 }
 0x21b   :  { %17051 = vmatpush3.bf16.msra.mxu1 %v17917_v30  ;;  %17030 = vmatprep.subr.bf16.mxu0 %v17918_v6  ;;  %v20038_v6 = vsub.s32 4, %v19964_v27 }
 0x21c   :  { %17052 = vmatprep.subr.bf16.mxu1 %v17920_v31 }
 0x21d   :  { %v789_v31 = vrot.slane %v19972_v48, %v20038_v6 }
 0x21e   :  { %17031 = vmatpush3.bf16.msra.mxu0 %v17919_v35 }
 0x21f   :  { %17053 = vmatpush3.bf16.msra.mxu1 %v17921_v36  ;;  %17032 = vmatprep.subr.bf16.mxu0 %v17922_v5 }
 0x220   :  { %17054 = vmatprep.subr.bf16.mxu1 %v17924_v9 }
 0x222   :  { %17033 = vmatpush3.bf16.msra.mxu0 %v17923_v26 }
 0x223   :  { %17055 = vmatpush3.bf16.msra.mxu1 %v17925_v37  ;;  %17034 = vmatprep.subr.bf16.mxu0 %v17926_v38 }
 0x224   :  { %17056 = vmatprep.subr.bf16.mxu1 %v17928_v39 }
 0x226   :  { %17035 = vmatpush3.bf16.msra.mxu0 %v17927_v40 }
 0x227   :  { %17057 = vmatpush3.bf16.msra.mxu1 %v17929_v41  ;;  %17036 = vmatprep.subr.bf16.mxu0 %v17930_v42 }
 0x228   :  { %17058 = vmatprep.subr.bf16.mxu1 %v17932_v43 }
 0x22a   :  { %17037 = vmatpush3.bf16.msra.mxu0 %v17931_v11 }
 0x22b   :  { %17059 = vmatpush3.bf16.msra.mxu1 %v17933_v45  ;;  %17038 = vmatprep.subr.bf16.mxu0 %v17934_v46 }
 0x22c   :  { %17060 = vmatprep.subr.bf16.mxu1 %v17936_v47 }
 0x22e   :  { %17039 = vmatpush3.bf16.msra.mxu0 %v17935_v16 }
 0x22f   :  { %17061 = vmatpush3.bf16.msra.mxu1 %v17937_v8  ;;  %17315 = vmatprep.subr.bf16.mxu0 %v19625_v55 }
 0x231   :  { %v3060_v56 = vpop.f32.mrf.mxu0  ;;  %3386 = vmatmul.mubr.bf16.vlgmr.msra.gmra.mxu0 %v19934_v23  ;;  %v17941_v23 = vld [vmem:[#allocation2 + $0xb78] ss:$28 sps:$4 sm:$0xff]  }
 0x232   :  { %3426 = vmatmul.mubr.bf16.vlgmr.msra.gmra.mxu1 %v19952_v29  ;;  %v3061_v58 = vadd.f32 %v3060_v56, %v3020_v51  ;;  %17316 = vmatpush3.bf16.msra.mxu0 %v17938_v53  ;;  %v17942_v29 = vld [vmem:[#allocation2 + $0xb40] ss:$28 sps:$4 sm:$0xff]  }
 0x233   :  { %17331 = vmatprep.mubr.msk.bf16.mxu0 %vm19626_vm0, %v19625_v55  ;;  %v3062_v7 = vpop.f32.mrf.mxu0  ;;  %17317 = vmatprep.subr.bf16.mxu0 %v19625_v55 }
 0x234   :  { %v3063_v62 = vadd.f32 %v3062_v7, %v3022_v57 }
 0x235   :  { %v3064_v63 = vpop.f32.mrf.mxu0 }
 0x236   :  { %17318 = vmatpush3.bf16.msra.mxu0 %v17939_v60 }
 0x237   :  { %v3065_v4 = vpop.f32.mrf.mxu0  ;;  %17319 = vmatprep.subr.bf16.mxu0 %v19625_v55 }
 0x23a   :  { %17320 = vmatpush3.bf16.msra.mxu0 %v17940_v2 }
 0x23b   :  { %17321 = vmatprep.subr.bf16.mxu0 %v19625_v55 }
 0x23e   :  { %17322 = vmatpush3.bf16.msra.mxu0 %v17941_v23 }
 0x23f   :  { %17323 = vmatprep.subr.bf16.mxu0 %v19625_v55 }
 0x242   :  { %17324 = vmatpush3.bf16.msra.mxu0 %v17942_v29 }
 0x243   :  { %17325 = vmatprep.subr.bf16.mxu0 %v19625_v55 }
 0x246   :  { %17326 = vmatpush3.bf16.msra.mxu0 %v17943_v10 }
 0x247   :  { %17327 = vmatprep.subr.bf16.mxu0 %v19625_v55 }
 0x24a   :  { %17328 = vmatpush3.bf16.msra.mxu0 %v17944_v12 }
 0x24b   :  { %17329 = vmatprep.subr.bf16.mxu0 %v19625_v55 }
 0x24e   :  { %17330 = vmatpush3.bf16.msra.mxu0 %v17945_v13 }
 0x251   :  { %v3142_v15 = vpop.f32.mrf.mxu0  ;;  %17332 = vmatmul.mubr.bf16.vlgmr.msra.gmra.mxu0 %v19946_v54  ;;  %v20041_v54 = vsub.s32 5, %v19964_v27 }
 0x252   :  { %v3101_v14 = vpop.f32.mrf.mxu1 }
 0x253   :  { %v3102_v17 = vadd.f32 %v3101_v14, %v3061_v58  ;;  %v3144_v19 = vpop.f32.mrf.mxu0  ;;  %v793_v34 = vrot.slane %v19972_v48, %v20041_v54 }
 0x254   :  { %v3103_v18 = vpop.f32.mrf.mxu1 }
 0x255   :  { %v3143_v21 = vadd.f32 %v3142_v15, %v3102_v17  ;;  %v3104_v22 = vadd.f32 %v3103_v18, %v3063_v62  ;;  %v3146_v24 = vpop.f32.mrf.mxu0  ;;  %v20052_v17 = vsub.s32 6, %v19964_v27 }
 0x256   :  { %v3105_v25 = vpop.f32.mrf.mxu1 }
 0x257   :  { %17950 = vtanh.f32 %v3143_v21  ;;  %v3145_v1 = vadd.f32 %v3144_v19, %v3104_v22  ;;  %v3147_v3 = vpop.f32.mrf.mxu0  ;;  %v797_v18 = vrot.slane %v19972_v48, %v20052_v17 }
 0x258   :  { %v3106_v28 = vpop.f32.mrf.mxu1 }
 0x259   :  { %17952 = vtanh.f32 %v3145_v1 }
 0x264   :  { %v20033_v20 = vpop.eup %17950 }
 0x266   :  { %v20035_v30 = vpop.eup %17952 }
 0x291   :  { %v3183_v35 = vpop.f32.mrf.mxu0 }
 0x292   :  { %v3224_v36 = vpop.f32.mrf.mxu1  ;;  %v3184_v5 = vadd.f32 %v3183_v35, %v789_v31 }
 0x293   :  { %v3185_v9 = vpop.f32.mrf.mxu0 }
 0x294   :  { %v3226_v26 = vpop.f32.mrf.mxu1  ;;  %v3186_v37 = vadd.f32 %v3185_v9, %v793_v34  ;;  %v3225_v38 = vadd.f32 %v3224_v36, %v3184_v5 }
 0x295   :  { %v3187_v39 = vpop.f32.mrf.mxu0 }
 0x296   :  { %v3228_v40 = vpop.f32.mrf.mxu1  ;;  %v3227_v41 = vadd.f32 %v3226_v26, %v3186_v37 }
 0x297   :  { %v3188_v42 = vpop.f32.mrf.mxu0 }
 0x298   :  { %v3229_v43 = vpop.f32.mrf.mxu1 }
 0x2b2   :  { %v3306_v11 = vpop.f32.mrf.mxu1 }
 0x2b4   :  { %v3308_v45 = vpop.f32.mrf.mxu1 }
 0x2b6   :  { %v3310_v46 = vpop.f32.mrf.mxu1 }
 0x2b8   :  { %v3311_v47 = vpop.f32.mrf.mxu1 }
 0x2d1   :  { %v3265_v50 = vpop.f32.mrf.mxu0 }
 0x2d2   :  { %v17018_v16 = vpop.f32.mrf.mxu1  ;;  %v3266_v8 = vadd.f32 %v3265_v50, %v3225_v38 }
 0x2d3   :  { %v3267_v51 = vpop.f32.mrf.mxu0 }
 0x2d4   :  { %v17019_v52 = vpop.f32.mrf.mxu1  ;;  %v3307_v53 = vadd.f32 %v3306_v11, %v3266_v8  ;;  %v3268_v56 = vadd.f32 %v3267_v51, %v3227_v41 }
 0x2d5   :  { %v3269_v57 = vpop.f32.mrf.mxu0  ;;  %v17020_v19 = vadd.f32 %v17019_v52, %v17018_v16 }
 0x2d6   :  { %v17021_v58 = vpop.f32.mrf.mxu1  ;;  %17954 = vtanh.f32 %v3307_v53  ;;  %v3309_v60 = vadd.f32 %v3308_v45, %v3268_v56 }
 0x2d7   :  { %v3270_v7 = vpop.f32.mrf.mxu0  ;;  %v3348_v22 = vadd.f32 %v17020_v19, %v797_v18 }
 0x2d8   :  { %v17022_v62 = vpop.f32.mrf.mxu1  ;;  %17956 = vtanh.f32 %v3309_v60 }
 0x2e3   :  { %v20047_v63 = vpop.eup %17954 }
 0x2e5   :  { %v20049_v2 = vpop.eup %17956 }
 0x2f1   :  { %v17040_v4 = vpop.f32.mrf.mxu0 }
 0x2f2   :  { %v17062_v23 = vpop.f32.mrf.mxu1 }
 0x2f3   :  { %v17041_v29 = vpop.f32.mrf.mxu0 }
 0x2f4   :  { %v17063_v10 = vpop.f32.mrf.mxu1  ;;  %v17042_v21 = vadd.f32 %v17041_v29, %v17040_v4 }
 0x2f5   :  { %v17043_v12 = vpop.f32.mrf.mxu0  ;;  %v17064_v25 = vadd.f32 %v17063_v10, %v17062_v23 }
 0x2f6   :  { %v17065_v13 = vpop.f32.mrf.mxu1  ;;  %v3388_v24 = vadd.f32 %v17042_v21, %v3348_v22 }
 0x2f7   :  { %v17044_v14 = vpop.f32.mrf.mxu0 }
 0x2f8   :  { %v17066_v15 = vpop.f32.mrf.mxu1  ;;  %v3428_v1 = vadd.f32 %v17064_v25, %v3388_v24 }
 0x311   :  { %v3467_v3 = vpop.f32.mrf.mxu0 }
 0x312   :  { %v3468_v28 = vadd.f32 %v3467_v3, %v3428_v1 }
 0x313   :  { %v17333_v31 = vpop.f32.mrf.mxu0 }
 0x314   :  { %17958 = vtanh.f32 %v3468_v28 }
 0x315   :  { %v3470_v34 = vpop.f32.mrf.mxu0 }
 0x317   :  { %v17334_v35 = vpop.f32.mrf.mxu0 }
 0x321   :  { %v20056_v36 = vpop.eup %17958 }
 0x322   :  { %19604 = dma.done.wait [#allocation9 + $0x1], 51200 }
 0x323   :  { %19605 = vsyncadd [#allocation9 + $0x1], 4294916096  ;;  %v20060_v5 = vpack.c.bf16 %v19998_v61, %v19998_v61  ;;  %v20064_v48 = vpack.c.bf16 %v20035_v30, %v20035_v30  ;;  %v3539_v9 = vld [vmem:[#allocation3 + $0x1c0] sm:$0xff] }
 0x324   :  { %v3543_v26 = vld [vmem:[#allocation3 + $0x1e0] sm:$0xff] }
 0x325   :  { %6255 = vmatprep.mubr.bf16.mxu1 %v20060_v5  ;;  %6296 = vmatprep.mubr.bf16.mxu0 %v20064_v48  ;;  %v3667_v37 = vld [vmem:[#allocation3 + $0x5c0] sm:$0xff]  ;;  %v15596_v38 = vcombine.high %v3539_v9, %v3543_v26  ;;  %v15595_v40 = vcombine.low %v3539_v9, %v3543_v26 }
 0x326   :  { %v3671_v39 = vld [vmem:[#allocation3 + $0x5e0] sm:$0xff] }
 0x327   :  { %v3531_v41 = vld [vmem:[#allocation3 + $0x180] sm:$0xff]  ;;  %v15724_v43 = vcombine.high %v3667_v37, %v3671_v39  ;;  %v15723_v11 = vcombine.low %v3667_v37, %v3671_v39  ;;  %6223 = vmatprep.subr.bf16.mxu1 %v15596_v38 }
 0x328   :  { %v3535_v42 = vld [vmem:[#allocation3 + $0x1a0] sm:$0xff]  ;;  %6224 = vmatpush1.bf16.msra.mxu1 %v15595_v40 }
 0x329   :  { %v15588_v61 = vcombine.high %v3531_v41, %v3535_v42  ;;  %v3659_v45 = vld [vmem:[#allocation3 + $0x580] sm:$0xff]  ;;  %6264 = vmatprep.subr.bf16.mxu0 %v15724_v43  ;;  %v15587_v51 = vcombine.low %v3531_v41, %v3535_v42 }
 0x32a   :  { %v3663_v46 = vld [vmem:[#allocation3 + $0x5a0] sm:$0xff]  ;;  %6265 = vmatpush1.bf16.msra.mxu0 %v15723_v11 }
 0x32b   :  { %v3523_v47 = vld [vmem:[#allocation3 + $0x140] sm:$0xff]  ;;  %v15716_v30 = vcombine.high %v3659_v45, %v3663_v46  ;;  %6225 = vmatprep.subr.bf16.mxu1 %v15588_v61  ;;  %v15715_v52 = vcombine.low %v3659_v45, %v3663_v46 }
 0x32c   :  { %v3527_v50 = vld [vmem:[#allocation3 + $0x160] sm:$0xff]  ;;  %6226 = vmatpush1.bf16.msra.mxu1 %v15587_v51 }
 0x32d   :  { %v3651_v16 = vld [vmem:[#allocation3 + $0x540] sm:$0xff]  ;;  %v15580_v53 = vcombine.high %v3523_v47, %v3527_v50  ;;  %6266 = vmatprep.subr.bf16.mxu0 %v15716_v30  ;;  %v15579_v62 = vcombine.low %v3523_v47, %v3527_v50 }
 0x32e   :  { %v3655_v8 = vld [vmem:[#allocation3 + $0x560] sm:$0xff]  ;;  %6267 = vmatpush1.bf16.msra.mxu0 %v15715_v52 }
 0x32f   :  { %v15708_v56 = vcombine.high %v3651_v16, %v3655_v8  ;;  %v3515_v57 = vld [vmem:[#allocation3 + $0x100] sm:$0xff]  ;;  %6227 = vmatprep.subr.bf16.mxu1 %v15580_v53  ;;  %v15707_v4 = vcombine.low %v3651_v16, %v3655_v8 }
 0x330   :  { %v3519_v58 = vld [vmem:[#allocation3 + $0x120] sm:$0xff]  ;;  %6228 = vmatpush1.bf16.msra.mxu1 %v15579_v62 }
 0x331   :  { %v3643_v60 = vld [vmem:[#allocation3 + $0x500] sm:$0xff]  ;;  %v15572_v23 = vcombine.high %v3515_v57, %v3519_v58  ;;  %6268 = vmatprep.subr.bf16.mxu0 %v15708_v56  ;;  %v15571_v15 = vcombine.low %v3515_v57, %v3519_v58 }
 0x332   :  { %v3647_v7 = vld [vmem:[#allocation3 + $0x520] sm:$0xff]  ;;  %6269 = vmatpush1.bf16.msra.mxu0 %v15707_v4 }
 0x333   :  { %v15700_v29 = vcombine.high %v3643_v60, %v3647_v7  ;;  %v3507_v10 = vld [vmem:[#allocation3 + $0xc0] sm:$0xff]  ;;  %6229 = vmatprep.subr.bf16.mxu1 %v15572_v23  ;;  %v15699_v18 = vcombine.low %v3643_v60, %v3647_v7 }
 0x334   :  { %v3511_v12 = vld [vmem:[#allocation3 + $0xe0] sm:$0xff]  ;;  %6230 = vmatpush1.bf16.msra.mxu1 %v15571_v15 }
 0x335   :  { %v3635_v13 = vld [vmem:[#allocation3 + $0x4c0] sm:$0xff]  ;;  %v15564_v19 = vcombine.high %v3507_v10, %v3511_v12  ;;  %6270 = vmatprep.subr.bf16.mxu0 %v15700_v29  ;;  %v15563_v3 = vcombine.low %v3507_v10, %v3511_v12 }
 0x336   :  { %v3639_v14 = vld [vmem:[#allocation3 + $0x4e0] sm:$0xff]  ;;  %6271 = vmatpush1.bf16.msra.mxu0 %v15699_v18 }
 0x337   :  { %v15692_v21 = vcombine.high %v3635_v13, %v3639_v14  ;;  %v3499_v22 = vld [vmem:[#allocation3 + $0x80] sm:$0xff]  ;;  %6231 = vmatprep.subr.bf16.mxu1 %v15564_v19  ;;  %v15691_v28 = vcombine.low %v3635_v13, %v3639_v14 }
 0x338   :  { %v3503_v24 = vld [vmem:[#allocation3 + $0xa0] sm:$0xff]  ;;  %6232 = vmatpush1.bf16.msra.mxu1 %v15563_v3 }
 0x339   :  { %v3627_v25 = vld [vmem:[#allocation3 + $0x480] sm:$0xff]  ;;  %v15556_v31 = vcombine.high %v3499_v22, %v3503_v24  ;;  %6272 = vmatprep.subr.bf16.mxu0 %v15692_v21  ;;  %v15555_v38 = vcombine.low %v3499_v22, %v3503_v24 }
 0x33a   :  { %v3631_v1 = vld [vmem:[#allocation3 + $0x4a0] sm:$0xff]  ;;  %6273 = vmatpush1.bf16.msra.mxu0 %v15691_v28 }
 0x33b   :  { %v15684_v34 = vcombine.high %v3627_v25, %v3631_v1  ;;  %v3491_v35 = vld [vmem:[#allocation3 + $0x40] sm:$0xff]  ;;  %6233 = vmatprep.subr.bf16.mxu1 %v15556_v31  ;;  %v15683_v39 = vcombine.low %v3627_v25, %v3631_v1 }
 0x33c   :  { %v3495_v9 = vld [vmem:[#allocation3 + $0x60] sm:$0xff]  ;;  %6234 = vmatpush1.bf16.msra.mxu1 %v15555_v38 }
 0x33d   :  { %v3619_v26 = vld [vmem:[#allocation3 + $0x440] sm:$0xff]  ;;  %v15548_v40 = vcombine.high %v3491_v35, %v3495_v9  ;;  %6274 = vmatprep.subr.bf16.mxu0 %v15684_v34  ;;  %v15547_v45 = vcombine.low %v3491_v35, %v3495_v9 }
 0x33e   :  { %v3623_v37 = vld [vmem:[#allocation3 + $0x460] sm:$0xff]  ;;  %6275 = vmatpush1.bf16.msra.mxu0 %v15683_v39 }
 0x33f   :  { %v15676_v41 = vcombine.high %v3619_v26, %v3623_v37  ;;  %v3483_v42 = vld [vmem:[#allocation3] sm:$0xff]  ;;  %6235 = vmatprep.subr.bf16.mxu1 %v15548_v40  ;;  %v15675_v46 = vcombine.low %v3619_v26, %v3623_v37 }
 0x340   :  { %v3487_v43 = vld [vmem:[#allocation3 + $0x20] sm:$0xff]  ;;  %6236 = vmatpush1.bf16.msra.mxu1 %v15547_v45 }
 0x341   :  { %v3611_v11 = vld [vmem:[#allocation3 + $0x400] sm:$0xff]  ;;  %v15540_v47 = vcombine.high %v3483_v42, %v3487_v43  ;;  %6276 = vmatprep.subr.bf16.mxu0 %v15676_v41  ;;  %v15539_v52 = vcombine.low %v3483_v42, %v3487_v43 }
 0x342   :  { %v3615_v61 = vld [vmem:[#allocation3 + $0x420] sm:$0xff]  ;;  %6277 = vmatpush1.bf16.msra.mxu0 %v15675_v46 }
 0x343   :  { %v15668_v30 = vcombine.high %v3611_v11, %v3615_v61  ;;  %v3603_v50 = vld [vmem:[#allocation3 + $0x3c0] sm:$0xff]  ;;  %6237 = vmatprep.subr.bf16.mxu1 %v15540_v47  ;;  %v15667_v53 = vcombine.low %v3611_v11, %v3615_v61 }
 0x344   :  { %v3607_v16 = vld [vmem:[#allocation3 + $0x3e0] sm:$0xff]  ;;  %6238 = vmatpush1.bf16.msra.mxu1 %v15539_v52 }
 0x345   :  { %v3731_v8 = vld [vmem:[#allocation3 + $0x7c0] sm:$0xff]  ;;  %v15660_v56 = vcombine.high %v3603_v50, %v3607_v16  ;;  %6278 = vmatprep.subr.bf16.mxu0 %v15668_v30  ;;  %v15659_v4 = vcombine.low %v3603_v50, %v3607_v16 }
 0x346   :  { %v3735_v51 = vld [vmem:[#allocation3 + $0x7e0] sm:$0xff]  ;;  %6279 = vmatpush1.bf16.msra.mxu0 %v15667_v53 }
 0x347   :  { %v15788_v57 = vcombine.high %v3731_v8, %v3735_v51  ;;  %v3595_v58 = vld [vmem:[#allocation3 + $0x380] sm:$0xff]  ;;  %6239 = vmatprep.subr.bf16.mxu1 %v15660_v56  ;;  %v15787_v23 = vcombine.low %v3731_v8, %v3735_v51 }
 0x348   :  { %v3599_v60 = vld [vmem:[#allocation3 + $0x3a0] sm:$0xff]  ;;  %6240 = vmatpush2.bf16.msra.mxu1 %v15659_v4 }
 0x349   :  { %v3723_v7 = vld [vmem:[#allocation3 + $0x780] sm:$0xff]  ;;  %v15652_v29 = vcombine.high %v3595_v58, %v3599_v60  ;;  %6280 = vmatprep.subr.bf16.mxu0 %v15788_v57  ;;  %v15651_v18 = vcombine.low %v3595_v58, %v3599_v60 }
 0x34a   :  { %v3727_v62 = vld [vmem:[#allocation3 + $0x7a0] sm:$0xff]  ;;  %6281 = vmatpush2.bf16.msra.mxu0 %v15787_v23 }
 0x34b   :  { %v15780_v10 = vcombine.high %v3723_v7, %v3727_v62  ;;  %v3587_v12 = vld [vmem:[#allocation3 + $0x340] sm:$0xff]  ;;  %6241 = vmatprep.subr.bf16.mxu1 %v15652_v29  ;;  %v15779_v19 = vcombine.low %v3723_v7, %v3727_v62 }
 0x34c   :  { %v3591_v13 = vld [vmem:[#allocation3 + $0x360] sm:$0xff]  ;;  %6242 = vmatpush2.bf16.msra.mxu1 %v15651_v18 }
 0x34d   :  { %v3715_v14 = vld [vmem:[#allocation3 + $0x740] sm:$0xff]  ;;  %v15644_v21 = vcombine.high %v3587_v12, %v3591_v13  ;;  %6282 = vmatprep.subr.bf16.mxu0 %v15780_v10  ;;  %v15643_v28 = vcombine.low %v3587_v12, %v3591_v13 }
 0x34e   :  { %v3719_v15 = vld [vmem:[#allocation3 + $0x760] sm:$0xff]  ;;  %6283 = vmatpush2.bf16.msra.mxu0 %v15779_v19 }
 0x34f   :  { %v15772_v22 = vcombine.high %v3715_v14, %v3719_v15  ;;  %v3579_v24 = vld [vmem:[#allocation3 + $0x300] sm:$0xff]  ;;  %6243 = vmatprep.subr.bf16.mxu1 %v15644_v21  ;;  %v15771_v31 = vcombine.low %v3715_v14, %v3719_v15 }
 0x350   :  { %v3583_v25 = vld [vmem:[#allocation3 + $0x320] sm:$0xff]  ;;  %6244 = vmatpush2.bf16.msra.mxu1 %v15643_v28 }
 0x351   :  { %v3707_v1 = vld [vmem:[#allocation3 + $0x700] sm:$0xff]  ;;  %v15636_v34 = vcombine.high %v3579_v24, %v3583_v25  ;;  %6284 = vmatprep.subr.bf16.mxu0 %v15772_v22  ;;  %v15635_v39 = vcombine.low %v3579_v24, %v3583_v25 }
 0x352   :  { %v3711_v3 = vld [vmem:[#allocation3 + $0x720] sm:$0xff]  ;;  %6285 = vmatpush2.bf16.msra.mxu0 %v15771_v31 }
 0x353   :  { %v15764_v35 = vcombine.high %v3707_v1, %v3711_v3  ;;  %v3571_v9 = vld [vmem:[#allocation3 + $0x2c0] sm:$0xff]  ;;  %6245 = vmatprep.subr.bf16.mxu1 %v15636_v34  ;;  %v15763_v40 = vcombine.low %v3707_v1, %v3711_v3  ;;  %v20070_v3 = vpack.c.bf16 %v19996_v59, %v19996_v59  ;;  %v20074_v34 = vpack.c.bf16 %v20033_v20, %v20033_v20 }
 0x354   :  { %v3575_v26 = vld [vmem:[#allocation3 + $0x2e0] sm:$0xff]  ;;  %6246 = vmatpush2.bf16.msra.mxu1 %v15635_v39 }
 0x355   :  { %v3699_v37 = vld [vmem:[#allocation3 + $0x6c0] sm:$0xff]  ;;  %v15628_v41 = vcombine.high %v3571_v9, %v3575_v26  ;;  %6286 = vmatprep.subr.bf16.mxu0 %v15764_v35  ;;  %v15627_v46 = vcombine.low %v3571_v9, %v3575_v26 }
 0x356   :  { %v3703_v38 = vld [vmem:[#allocation3 + $0x6e0] sm:$0xff]  ;;  %6287 = vmatpush2.bf16.msra.mxu0 %v15763_v40 }
 0x357   :  { %v15756_v42 = vcombine.high %v3699_v37, %v3703_v38  ;;  %v3563_v43 = vld [vmem:[#allocation3 + $0x280] sm:$0xff]  ;;  %6247 = vmatprep.subr.bf16.mxu1 %v15628_v41  ;;  %v15755_v47 = vcombine.low %v3699_v37, %v3703_v38  ;;  %v20079_v41 = vpack.c.bf16 %v20049_v2, %v20049_v2 }
 0x358   :  { %v3567_v11 = vld [vmem:[#allocation3 + $0x2a0] sm:$0xff]  ;;  %6248 = vmatpush2.bf16.msra.mxu1 %v15627_v46 }
 0x359   :  { %v3691_v61 = vld [vmem:[#allocation3 + $0x680] sm:$0xff]  ;;  %v15620_v30 = vcombine.high %v3563_v43, %v3567_v11  ;;  %6288 = vmatprep.subr.bf16.mxu0 %v15756_v42  ;;  %v15619_v53 = vcombine.low %v3563_v43, %v3567_v11 }
 0x35a   :  { %v3695_v45 = vld [vmem:[#allocation3 + $0x6a0] sm:$0xff]  ;;  %6289 = vmatpush2.bf16.msra.mxu0 %v15755_v47 }
 0x35b   :  { %v15748_v50 = vcombine.high %v3691_v61, %v3695_v45  ;;  %v3555_v16 = vld [vmem:[#allocation3 + $0x240] sm:$0xff]  ;;  %6249 = vmatprep.subr.bf16.mxu1 %v15620_v30  ;;  %v15747_v56 = vcombine.low %v3691_v61, %v3695_v45 }
 0x35c   :  { %v3559_v8 = vld [vmem:[#allocation3 + $0x260] sm:$0xff]  ;;  %6250 = vmatpush2.bf16.msra.mxu1 %v15619_v53 }
 0x35d   :  { %v3683_v51 = vld [vmem:[#allocation3 + $0x640] sm:$0xff]  ;;  %v15612_v57 = vcombine.high %v3555_v16, %v3559_v8  ;;  %6290 = vmatprep.subr.bf16.mxu0 %v15748_v50  ;;  %v15611_v23 = vcombine.low %v3555_v16, %v3559_v8 }
 0x35e   :  { %v3687_v52 = vld [vmem:[#allocation3 + $0x660] sm:$0xff]  ;;  %6291 = vmatpush2.bf16.msra.mxu0 %v15747_v56 }
 0x35f   :  { %v15740_v58 = vcombine.high %v3683_v51, %v3687_v52  ;;  %v3547_v60 = vld [vmem:[#allocation3 + $0x200] sm:$0xff]  ;;  %6251 = vmatprep.subr.bf16.mxu1 %v15612_v57  ;;  %v15739_v29 = vcombine.low %v3683_v51, %v3687_v52 }
 0x360   :  { %v3551_v7 = vld [vmem:[#allocation3 + $0x220] sm:$0xff]  ;;  %6252 = vmatpush2.bf16.msra.mxu1 %v15611_v23 }
 0x361   :  { %v3675_v62 = vld [vmem:[#allocation3 + $0x600] sm:$0xff]  ;;  %v15604_v10 = vcombine.high %v3547_v60, %v3551_v7  ;;  %6292 = vmatprep.subr.bf16.mxu0 %v15740_v58  ;;  %v15603_v19 = vcombine.low %v3547_v60, %v3551_v7 }
 0x362   :  { %v3679_v4 = vld [vmem:[#allocation3 + $0x620] sm:$0xff]  ;;  %6293 = vmatpush2.bf16.msra.mxu0 %v15739_v29 }
 0x363   :  { %v15732_v12 = vcombine.high %v3675_v62, %v3679_v4  ;;  %v3795_v13 = vld [vmem:[#allocation3 + $0x9c0] sm:$0xff]  ;;  %6253 = vmatprep.subr.bf16.mxu1 %v15604_v10  ;;  %v15731_v21 = vcombine.low %v3675_v62, %v3679_v4 }
 0x364   :  { %v3799_v14 = vld [vmem:[#allocation3 + $0x9e0] sm:$0xff]  ;;  %6254 = vmatpush2.bf16.msra.mxu1 %v15603_v19 }
 0x365   :  { %v3923_v15 = vld [vmem:[#allocation3 + $0xdc0] sm:$0xff]  ;;  %v15852_v22 = vcombine.high %v3795_v13, %v3799_v14  ;;  %6294 = vmatprep.subr.bf16.mxu0 %v15732_v12  ;;  %v15851_v35 = vcombine.low %v3795_v13, %v3799_v14 }
 0x366   :  { %v3927_v18 = vld [vmem:[#allocation3 + $0xde0] sm:$0xff]  ;;  %6295 = vmatpush2.bf16.msra.mxu0 %v15731_v21 }
 0x367   :  { %v15980_v24 = vcombine.high %v3923_v15, %v3927_v18  ;;  %v3787_v25 = vld [vmem:[#allocation3 + $0x980] sm:$0xff]  ;;  %6305 = vmatprep.subr.bf16.mxu1 %v15852_v22  ;;  %v15979_v9 = vcombine.low %v3923_v15, %v3927_v18  ;;  %6256 = vmatmul.mubr.bf16.vlgmr.msra.gmra.mxu1 %v20070_v3 }
 0x368   :  { %v3791_v1 = vld [vmem:[#allocation3 + $0x9a0] sm:$0xff]  ;;  %6306 = vmatpush1.bf16.msra.mxu1 %v15851_v35  ;;  %6337 = vmatprep.mubr.bf16.mxu1 %v20079_v41 }
 0x369   :  { %v3915_v28 = vld [vmem:[#allocation3 + $0xd80] sm:$0xff]  ;;  %v15844_v26 = vcombine.high %v3787_v25, %v3791_v1  ;;  %6346 = vmatprep.subr.bf16.mxu0 %v15980_v24  ;;  %6297 = vmatmul.mubr.bf16.vlgmr.msra.gmra.mxu0 %v20074_v34  ;;  %v15843_v20 = vcombine.low %v3787_v25, %v3791_v1 }
 0x36a   :  { %v3919_v31 = vld [vmem:[#allocation3 + $0xda0] sm:$0xff]  ;;  %6347 = vmatpush1.bf16.msra.mxu0 %v15979_v9  ;;  %6378 = vmatprep.mubr.bf16.mxu0 %v19617_v0 }
 0x36b   :  { %v15972_v37 = vcombine.high %v3915_v28, %v3919_v31  ;;  %v3779_v38 = vld [vmem:[#allocation3 + $0x940] sm:$0xff]  ;;  %6307 = vmatprep.subr.bf16.mxu1 %v15844_v26  ;;  %v15971_v42 = vcombine.low %v3915_v28, %v3919_v31 }
 0x36c   :  { %v3783_v39 = vld [vmem:[#allocation3 + $0x960] sm:$0xff]  ;;  %6308 = vmatpush1.bf16.msra.mxu1 %v15843_v20  ;;  %v3544_v20 = vld [vmem:[#allocation3 + $0x1e8] sm:$0xff] }
 0x36d   :  { %v3907_v59 = vld [vmem:[#allocation3 + $0xd40] sm:$0xff]  ;;  %v15836_v43 = vcombine.high %v3779_v38, %v3783_v39  ;;  %6348 = vmatprep.subr.bf16.mxu0 %v15972_v37  ;;  %v15835_v2 = vcombine.low %v3779_v38, %v3783_v39 }
 0x36e   :  { %v3911_v40 = vld [vmem:[#allocation3 + $0xd60] sm:$0xff]  ;;  %6349 = vmatpush1.bf16.msra.mxu0 %v15971_v42 }
 0x36f   :  { %v15964_v11 = vcombine.high %v3907_v59, %v3911_v40  ;;  %v3771_v61 = vld [vmem:[#allocation3 + $0x900] sm:$0xff]  ;;  %6309 = vmatprep.subr.bf16.mxu1 %v15836_v43  ;;  %v15963_v30 = vcombine.low %v3907_v59, %v3911_v40  ;;  %v3540_v40 = vld [vmem:[#allocation3 + $0x1c8] sm:$0xff] }
 0x370   :  { %v3775_v45 = vld [vmem:[#allocation3 + $0x920] sm:$0xff]  ;;  %6310 = vmatpush1.bf16.msra.mxu1 %v15835_v2  ;;  %v3536_v2 = vld [vmem:[#allocation3 + $0x1a8] sm:$0xff] }
 0x371   :  { %v3899_v46 = vld [vmem:[#allocation3 + $0xd00] sm:$0xff]  ;;  %v15828_v50 = vcombine.high %v3771_v61, %v3775_v45  ;;  %6350 = vmatprep.subr.bf16.mxu0 %v15964_v11  ;;  %v15827_v56 = vcombine.low %v3771_v61, %v3775_v45  ;;  %v15598_v61 = vcombine.high %v3540_v40, %v3544_v20 }
 0x372   :  { %v3903_v47 = vld [vmem:[#allocation3 + $0xd20] sm:$0xff]  ;;  %6351 = vmatpush1.bf16.msra.mxu0 %v15963_v30 }
 0x373   :  { %v15956_v16 = vcombine.high %v3899_v46, %v3903_v47  ;;  %v3763_v8 = vld [vmem:[#allocation3 + $0x8c0] sm:$0xff]  ;;  %6311 = vmatprep.subr.bf16.mxu1 %v15828_v50  ;;  %v15955_v57 = vcombine.low %v3899_v46, %v3903_v47  ;;  %v3532_v47 = vld [vmem:[#allocation3 + $0x188] sm:$0xff]  ;;  %v20086_v50 = vpack.c.bf16 %v20056_v36, %v20056_v36 }
 0x374   :  { %v3767_v51 = vld [vmem:[#allocation3 + $0x8e0] sm:$0xff]  ;;  %6312 = vmatpush1.bf16.msra.mxu1 %v15827_v56  ;;  %v3524_v56 = vld [vmem:[#allocation3 + $0x148] sm:$0xff] }
 0x375   :  { %v3891_v52 = vld [vmem:[#allocation3 + $0xcc0] sm:$0xff]  ;;  %v15820_v58 = vcombine.high %v3763_v8, %v3767_v51  ;;  %6352 = vmatprep.subr.bf16.mxu0 %v15956_v16  ;;  %v15819_v29 = vcombine.low %v3763_v8, %v3767_v51  ;;  %v15597_v16 = vcombine.low %v3540_v40, %v3544_v20  ;;  %v15590_v51 = vcombine.high %v3532_v47, %v3536_v2  ;;  %v3492_v20 = vld [vmem:[#allocation3 + $0x48] sm:$0xff] }
 0x376   :  { %v3895_v53 = vld [vmem:[#allocation3 + $0xce0] sm:$0xff]  ;;  %6353 = vmatpush1.bf16.msra.mxu0 %v15955_v57  ;;  %v3528_v57 = vld [vmem:[#allocation3 + $0x168] sm:$0xff] }
 0x377   :  { %v15948_v60 = vcombine.high %v3891_v52, %v3895_v53  ;;  %v3755_v7 = vld [vmem:[#allocation3 + $0x880] sm:$0xff]  ;;  %6313 = vmatprep.subr.bf16.mxu1 %v15820_v58  ;;  %v15947_v10 = vcombine.low %v3891_v52, %v3895_v53  ;;  %v15582_v36 = vcombine.high %v3524_v56, %v3528_v57 }
 0x378   :  { %v3759_v62 = vld [vmem:[#allocation3 + $0x8a0] sm:$0xff]  ;;  %6314 = vmatpush1.bf16.msra.mxu1 %v15819_v29  ;;  %v3520_v29 = vld [vmem:[#allocation3 + $0x128] sm:$0xff] }
 0x379   :  { %v3883_v4 = vld [vmem:[#allocation3 + $0xc80] sm:$0xff]  ;;  %v15812_v12 = vcombine.high %v3755_v7, %v3759_v62  ;;  %6354 = vmatprep.subr.bf16.mxu0 %v15948_v60  ;;  %v15811_v21 = vcombine.low %v3755_v7, %v3759_v62  ;;  %v15589_v60 = vcombine.low %v3532_v47, %v3536_v2  ;;  %v3484_v2 = vld [vmem:[#allocation3 + $0x8] sm:$0xff] }
 0x37a   :  { %v3887_v23 = vld [vmem:[#allocation3 + $0xca0] sm:$0xff]  ;;  %6355 = vmatpush1.bf16.msra.mxu0 %v15947_v10 }
 0x37b   :  { %v15940_v13 = vcombine.high %v3883_v4, %v3887_v23  ;;  %v3747_v14 = vld [vmem:[#allocation3 + $0x840] sm:$0xff]  ;;  %6315 = vmatprep.subr.bf16.mxu1 %v15812_v12  ;;  %v15939_v22 = vcombine.low %v3883_v4, %v3887_v23  ;;  %v3516_v23 = vld [vmem:[#allocation3 + $0x108] sm:$0xff]  ;;  %v15581_v12 = vcombine.low %v3524_v56, %v3528_v57 }
 0x37c   :  { %v3751_v15 = vld [vmem:[#allocation3 + $0x860] sm:$0xff]  ;;  %6316 = vmatpush1.bf16.msra.mxu1 %v15811_v21  ;;  %v3512_v21 = vld [vmem:[#allocation3 + $0xe8] sm:$0xff] }
 0x37d   :  { %v3875_v18 = vld [vmem:[#allocation3 + $0xc40] sm:$0xff]  ;;  %v15804_v24 = vcombine.high %v3747_v14, %v3751_v15  ;;  %6356 = vmatprep.subr.bf16.mxu0 %v15940_v13  ;;  %v15803_v9 = vcombine.low %v3747_v14, %v3751_v15  ;;  %v15574_v14 = vcombine.high %v3516_v23, %v3520_v29  ;;  %v3672_v56 = vld [vmem:[#allocation3 + $0x5e8] sm:$0xff] }
 0x37e   :  { %v3879_v19 = vld [vmem:[#allocation3 + $0xc60] sm:$0xff]  ;;  %6357 = vmatpush1.bf16.msra.mxu0 %v15939_v22  ;;  %v3604_v57 = vld [vmem:[#allocation3 + $0x3c8] sm:$0xff] }
 0x37f   :  { %v15932_v25 = vcombine.high %v3875_v18, %v3879_v19  ;;  %v3739_v1 = vld [vmem:[#allocation3 + $0x800] sm:$0xff]  ;;  %6317 = vmatprep.subr.bf16.mxu1 %v15804_v24  ;;  %v15931_v26 = vcombine.low %v3875_v18, %v3879_v19  ;;  %v3508_v19 = vld [vmem:[#allocation3 + $0xc8] sm:$0xff]  ;;  %v15573_v24 = vcombine.low %v3516_v23, %v3520_v29  ;;  %v20092_v29 = vpack.c.bf16 %v20047_v63, %v20047_v63 }
 0x380   :  { %v3743_v28 = vld [vmem:[#allocation3 + $0x820] sm:$0xff]  ;;  %6318 = vmatpush1.bf16.msra.mxu1 %v15803_v9  ;;  %v3504_v9 = vld [vmem:[#allocation3 + $0xa8] sm:$0xff] }
 0x381   :  { %v3867_v31 = vld [vmem:[#allocation3 + $0xc00] sm:$0xff]  ;;  %v15796_v37 = vcombine.high %v3739_v1, %v3743_v28  ;;  %6358 = vmatprep.subr.bf16.mxu0 %v15932_v25  ;;  %v15795_v42 = vcombine.low %v3739_v1, %v3743_v28  ;;  %v15566_v1 = vcombine.high %v3508_v19, %v3512_v21  ;;  %v3664_v23 = vld [vmem:[#allocation3 + $0x5a8] sm:$0xff] }
 0x382   :  { %v3871_v35 = vld [vmem:[#allocation3 + $0xc20] sm:$0xff]  ;;  %6359 = vmatpush1.bf16.msra.mxu0 %v15931_v26 }
 0x383   :  { %v15924_v38 = vcombine.high %v3867_v31, %v3871_v35  ;;  %v3859_v39 = vld [vmem:[#allocation3 + $0xbc0] sm:$0xff]  ;;  %6319 = vmatprep.subr.bf16.mxu1 %v15796_v37  ;;  %v15923_v43 = vcombine.low %v3867_v31, %v3871_v35  ;;  %v3500_v35 = vld [vmem:[#allocation3 + $0x88] sm:$0xff]  ;;  %v15565_v37 = vcombine.low %v3508_v19, %v3512_v21 }
 0x384   :  { %v3863_v59 = vld [vmem:[#allocation3 + $0xbe0] sm:$0xff]  ;;  %6320 = vmatpush1.bf16.msra.mxu1 %v15795_v42  ;;  %v3496_v42 = vld [vmem:[#allocation3 + $0x68] sm:$0xff] }
 0x385   :  { %v15916_v11 = vcombine.high %v3859_v39, %v3863_v59  ;;  %6360 = vmatprep.subr.bf16.mxu0 %v15924_v38  ;;  %v3851_v45 = vld [vmem:[#allocation3 + $0xb80] sm:$0xff]  ;;  %v15915_v30 = vcombine.low %v3859_v39, %v3863_v59  ;;  %v15558_v39 = vcombine.high %v3500_v35, %v3504_v9  ;;  %v3652_v19 = vld [vmem:[#allocation3 + $0x548] sm:$0xff] }
 0x386   :  { %v3855_v46 = vld [vmem:[#allocation3 + $0xba0] sm:$0xff]  ;;  %6361 = vmatpush1.bf16.msra.mxu0 %v15923_v43  ;;  %v3656_v21 = vld [vmem:[#allocation3 + $0x568] sm:$0xff] }
 0x387   :  { %6321 = vmatprep.subr.bf16.mxu1 %v15916_v11  ;;  %v15908_v8 = vcombine.high %v3851_v45, %v3855_v46  ;;  %6387 = vmatprep.subr.bf16.mxu0 %v15598_v61  ;;  %v3843_v52 = vld [vmem:[#allocation3 + $0xb40] sm:$0xff]  ;;  %v15907_v58 = vcombine.low %v3851_v45, %v3855_v46  ;;  %v15557_v11 = vcombine.low %v3500_v35, %v3504_v9  ;;  %v3648_v35 = vld [vmem:[#allocation3 + $0x528] sm:$0xff] }
 0x388   :  { %v3847_v53 = vld [vmem:[#allocation3 + $0xb60] sm:$0xff]  ;;  %6322 = vmatpush2.bf16.msra.mxu1 %v15915_v30  ;;  %v15550_v45 = vcombine.high %v3492_v20, %v3496_v42  ;;  %v3488_v30 = vld [vmem:[#allocation3 + $0x28] sm:$0xff] }
 0x389   :  { %6379 = vmatmul.mubr.bf16.vlgmr.msra.gmra.mxu0 %v20086_v50  ;;  %6323 = vmatprep.subr.bf16.mxu1 %v15908_v8  ;;  %v15900_v7 = vcombine.high %v3843_v52, %v3847_v53  ;;  %v3835_v62 = vld [vmem:[#allocation3 + $0xb00] sm:$0xff]  ;;  %v15899_v10 = vcombine.low %v3843_v52, %v3847_v53  ;;  %v15549_v8 = vcombine.low %v3492_v20, %v3496_v42  ;;  %v3668_v53 = vld [vmem:[#allocation3 + $0x5c8] sm:$0xff] }
 0x38a   :  { %6388 = vmatpush1.bf16.msra.mxu0 %v15597_v16  ;;  %v3839_v4 = vld [vmem:[#allocation3 + $0xb20] sm:$0xff]  ;;  %6419 = vmatprep.mubr.bf16.mxu0 %v20060_v5  ;;  %v15542_v52 = vcombine.high %v3484_v2, %v3488_v30  ;;  %v3580_v9 = vld [vmem:[#allocation3 + $0x308] sm:$0xff] }
 0x38b   :  { %6389 = vmatprep.subr.bf16.mxu0 %v15590_v51  ;;  %v15892_v13 = vcombine.high %v3835_v62, %v3839_v4  ;;  %v3827_v15 = vld [vmem:[#allocation3 + $0xac0] sm:$0xff]  ;;  %v15891_v22 = vcombine.low %v3835_v62, %v3839_v4  ;;  %v3660_v4 = vld [vmem:[#allocation3 + $0x588] sm:$0xff] }
 0x38c   :  { %6324 = vmatpush2.bf16.msra.mxu1 %v15907_v58  ;;  %v3831_v18 = vld [vmem:[#allocation3 + $0xae0] sm:$0xff]  ;;  %v3608_v58 = vld [vmem:[#allocation3 + $0x3e8] sm:$0xff] }
 0x38d   :  { %6325 = vmatprep.subr.bf16.mxu1 %v15900_v7  ;;  %v15884_v25 = vcombine.high %v3827_v15, %v3831_v18  ;;  %v3819_v28 = vld [vmem:[#allocation3 + $0xa80] sm:$0xff]  ;;  %v15883_v26 = vcombine.low %v3827_v15, %v3831_v18  ;;  %v15541_v7 = vcombine.low %v3484_v2, %v3488_v30  ;;  %v15662_v62 = vcombine.high %v3604_v57, %v3608_v58  ;;  %v3640_v20 = vld [vmem:[#allocation3 + $0x4e8] sm:$0xff] }
 0x38e   :  { %6390 = vmatpush1.bf16.msra.mxu0 %v15589_v60  ;;  %v3823_v31 = vld [vmem:[#allocation3 + $0xaa0] sm:$0xff]  ;;  %v15718_v15 = vcombine.high %v3660_v4, %v3664_v23  ;;  %v3572_v42 = vld [vmem:[#allocation3 + $0x2c8] sm:$0xff] }
 0x38f   :  { %6391 = vmatprep.subr.bf16.mxu0 %v15582_v36  ;;  %v15876_v38 = vcombine.high %v3819_v28, %v3823_v31  ;;  %v3811_v59 = vld [vmem:[#allocation3 + $0xa40] sm:$0xff]  ;;  %v15875_v43 = vcombine.low %v3819_v28, %v3823_v31  ;;  %v15726_v36 = vcombine.high %v3668_v53, %v3672_v56  ;;  %v3644_v31 = vld [vmem:[#allocation3 + $0x508] sm:$0xff] }
 0x390   :  { %6326 = vmatpush2.bf16.msra.mxu1 %v15899_v10  ;;  %v3815_v40 = vld [vmem:[#allocation3 + $0xa60] sm:$0xff]  ;;  %v3596_v10 = vld [vmem:[#allocation3 + $0x388] sm:$0xff] }
 0x391   :  { %6327 = vmatprep.subr.bf16.mxu1 %v15892_v13  ;;  %v15868_v61 = vcombine.high %v3811_v59, %v3815_v40  ;;  %v3803_v46 = vld [vmem:[#allocation3 + $0xa00] sm:$0xff]  ;;  %v15867_v16 = vcombine.low %v3811_v59, %v3815_v40  ;;  %v15725_v13 = vcombine.low %v3668_v53, %v3672_v56  ;;  %v3636_v40 = vld [vmem:[#allocation3 + $0x4c8] sm:$0xff] }
 0x392   :  { %6392 = vmatpush1.bf16.msra.mxu0 %v15581_v12  ;;  %v3807_v47 = vld [vmem:[#allocation3 + $0xa20] sm:$0xff]  ;;  %v3600_v12 = vld [vmem:[#allocation3 + $0x3a8] sm:$0xff] }
 0x393   :  { %6393 = vmatprep.subr.bf16.mxu0 %v15574_v14  ;;  %v15860_v51 = vcombine.high %v3803_v46, %v3807_v47  ;;  %v15859_v60 = vcombine.low %v3803_v46, %v3807_v47  ;;  %v15661_v14 = vcombine.low %v3604_v57, %v3608_v58  ;;  %v15654_v18 = vcombine.high %v3596_v10, %v3600_v12  ;;  %v3628_v47 = vld [vmem:[#allocation3 + $0x488] sm:$0xff] }
 0x394   :  { %6328 = vmatpush2.bf16.msra.mxu1 %v15891_v22  ;;  %v3588_v22 = vld [vmem:[#allocation3 + $0x348] sm:$0xff]  ;;  %v15653_v63 = vcombine.low %v3596_v10, %v3600_v12 }
 0x395   :  { %6329 = vmatprep.subr.bf16.mxu1 %v15884_v25  ;;  %v15717_v25 = vcombine.low %v3660_v4, %v3664_v23  ;;  %v3632_v2 = vld [vmem:[#allocation3 + $0x4a8] sm:$0xff] }
 0x396   :  { %6394 = vmatpush1.bf16.msra.mxu0 %v15573_v24  ;;  %v3592_v24 = vld [vmem:[#allocation3 + $0x368] sm:$0xff] }
 0x397   :  { %6395 = vmatprep.subr.bf16.mxu0 %v15566_v1  ;;  %v15710_v1 = vcombine.high %v3652_v19, %v3656_v21  ;;  %v15646_v28 = vcombine.high %v3588_v22, %v3592_v24  ;;  %v3564_v30 = vld [vmem:[#allocation3 + $0x288] sm:$0xff] }
 0x398   :  { %6330 = vmatpush2.bf16.msra.mxu1 %v15883_v26  ;;  %v3584_v26 = vld [vmem:[#allocation3 + $0x328] sm:$0xff] }
 0x399   :  { %6331 = vmatprep.subr.bf16.mxu1 %v15876_v38  ;;  %v15645_v38 = vcombine.low %v3588_v22, %v3592_v24  ;;  %v15638_v59 = vcombine.high %v3580_v9, %v3584_v26  ;;  %v3620_v56 = vld [vmem:[#allocation3 + $0x448] sm:$0xff] }
 0x39a   :  { %6396 = vmatpush1.bf16.msra.mxu0 %v15565_v37  ;;  %v15709_v37 = vcombine.low %v3652_v19, %v3656_v21  ;;  %v3624_v57 = vld [vmem:[#allocation3 + $0x468] sm:$0xff] }
 0x39b   :  { %6397 = vmatprep.subr.bf16.mxu0 %v15558_v39  ;;  %v15702_v39 = vcombine.high %v3644_v31, %v3648_v35  ;;  %v3556_v58 = vld [vmem:[#allocation3 + $0x248] sm:$0xff] }
 0x39c   :  { %6332 = vmatpush2.bf16.msra.mxu1 %v15875_v43  ;;  %v3576_v43 = vld [vmem:[#allocation3 + $0x2e8] sm:$0xff] }
 0x39d   :  { %6333 = vmatprep.subr.bf16.mxu1 %v15868_v61  ;;  %v15637_v61 = vcombine.low %v3580_v9, %v3584_v26  ;;  %v15630_v46 = vcombine.high %v3572_v42, %v3576_v43  ;;  %v3612_v23 = vld [vmem:[#allocation3 + $0x408] sm:$0xff] }
 0x39e   :  { %6398 = vmatpush1.bf16.msra.mxu0 %v15557_v11  ;;  %v15701_v11 = vcombine.low %v3644_v31, %v3648_v35  ;;  %v3616_v10 = vld [vmem:[#allocation3 + $0x428] sm:$0xff] }
 0x39f   :  { %6399 = vmatprep.subr.bf16.mxu0 %v15550_v45  ;;  %v15694_v45 = vcombine.high %v3636_v40, %v3640_v20  ;;  %v3548_v12 = vld [vmem:[#allocation3 + $0x208] sm:$0xff] }
 0x3a0   :  { %6334 = vmatpush2.bf16.msra.mxu1 %v15867_v16  ;;  %v3568_v16 = vld [vmem:[#allocation3 + $0x2a8] sm:$0xff] }
 0x3a1   :  { %6335 = vmatprep.subr.bf16.mxu1 %v15860_v51  ;;  %v15629_v51 = vcombine.low %v3572_v42, %v3576_v43  ;;  %v15622_v53 = vcombine.high %v3564_v30, %v3568_v16  ;;  %v3732_v21 = vld [vmem:[#allocation3 + $0x7c8] sm:$0xff] }
 0x3a2   :  { %6400 = vmatpush1.bf16.msra.mxu0 %v15549_v8  ;;  %v15693_v8 = vcombine.low %v3636_v40, %v3640_v20  ;;  %v3736_v22 = vld [vmem:[#allocation3 + $0x7e8] sm:$0xff] }
 0x3a3   :  { %6401 = vmatprep.subr.bf16.mxu0 %v15542_v52  ;;  %v15686_v52 = vcombine.high %v3628_v47, %v3632_v2  ;;  %v3796_v24 = vld [vmem:[#allocation3 + $0x9c8] sm:$0xff] }
 0x3a4   :  { %6336 = vmatpush2.bf16.msra.mxu1 %v15859_v60  ;;  %v3560_v60 = vld [vmem:[#allocation3 + $0x268] sm:$0xff] }
 0x3a5   :  { %6428 = vmatprep.subr.bf16.mxu1 %v15726_v36  ;;  %v15621_v36 = vcombine.low %v3564_v30, %v3568_v16  ;;  %v15614_v4 = vcombine.high %v3556_v58, %v3560_v60  ;;  %v3724_v35 = vld [vmem:[#allocation3 + $0x788] sm:$0xff] }
 0x3a6   :  { %6402 = vmatpush1.bf16.msra.mxu0 %v15541_v7  ;;  %v15685_v7 = vcombine.low %v3628_v47, %v3632_v2  ;;  %v3728_v9 = vld [vmem:[#allocation3 + $0x7a8] sm:$0xff] }
 0x3a7   :  { %6403 = vmatprep.subr.bf16.mxu0 %v15662_v62  ;;  %6338 = vmatmul.mubr.bf16.vlgmr.msra.gmra.mxu1 %v20092_v29  ;;  %v15678_v62 = vcombine.high %v3620_v56, %v3624_v57  ;;  %v3788_v26 = vld [vmem:[#allocation3 + $0x988] sm:$0xff] }
 0x3a8   :  { %6429 = vmatpush1.bf16.msra.mxu1 %v15725_v13  ;;  %6460 = vmatprep.mubr.bf16.mxu1 %v20064_v48  ;;  %v3552_v13 = vld [vmem:[#allocation3 + $0x228] sm:$0xff] }
 0x3a9   :  { %6430 = vmatprep.subr.bf16.mxu1 %v15718_v15  ;;  %v15613_v15 = vcombine.low %v3556_v58, %v3560_v60  ;;  %v15606_v19 = vcombine.high %v3548_v12, %v3552_v13  ;;  %v3716_v20 = vld [vmem:[#allocation3 + $0x748] sm:$0xff] }
 0x3aa   :  { %6404 = vmatpush2.bf16.msra.mxu0 %v15661_v14  ;;  %v15677_v14 = vcombine.low %v3620_v56, %v3624_v57  ;;  %v3720_v42 = vld [vmem:[#allocation3 + $0x768] sm:$0xff] }
 0x3ab   :  { %6405 = vmatprep.subr.bf16.mxu0 %v15654_v18  ;;  %v15670_v18 = vcombine.high %v3612_v23, %v3616_v10  ;;  %v3780_v43 = vld [vmem:[#allocation3 + $0x948] sm:$0xff] }
 0x3ac   :  { %6431 = vmatpush1.bf16.msra.mxu1 %v15717_v25  ;;  %v3800_v25 = vld [vmem:[#allocation3 + $0x9e8] sm:$0xff] }
 0x3ad   :  { %6432 = vmatprep.subr.bf16.mxu1 %v15710_v1  ;;  %v15605_v1 = vcombine.low %v3548_v12, %v3552_v13  ;;  %v15854_v31 = vcombine.high %v3796_v24, %v3800_v25  ;;  %v3708_v2 = vld [vmem:[#allocation3 + $0x708] sm:$0xff] }
 0x3ae   :  { %6406 = vmatpush2.bf16.msra.mxu0 %v15653_v63  ;;  %v15669_v63 = vcombine.low %v3612_v23, %v3616_v10  ;;  %v3712_v30 = vld [vmem:[#allocation3 + $0x728] sm:$0xff] }
 0x3af   :  { %6407 = vmatprep.subr.bf16.mxu0 %v15646_v28  ;;  %v15790_v28 = vcombine.high %v3732_v21, %v3736_v22  ;;  %v3772_v16 = vld [vmem:[#allocation3 + $0x908] sm:$0xff] }
 0x3b0   :  { %6433 = vmatpush1.bf16.msra.mxu1 %v15709_v37  ;;  %v3792_v37 = vld [vmem:[#allocation3 + $0x9a8] sm:$0xff] }
 0x3b1   :  { %6434 = vmatprep.subr.bf16.mxu1 %v15702_v39  ;;  %v15853_v39 = vcombine.low %v3796_v24, %v3800_v25  ;;  %v15846_v40 = vcombine.high %v3788_v26, %v3792_v37  ;;  %v3700_v57 = vld [vmem:[#allocation3 + $0x6c8] sm:$0xff] }
 0x3b2   :  { %6408 = vmatpush2.bf16.msra.mxu0 %v15645_v38  ;;  %v15789_v38 = vcombine.low %v3732_v21, %v3736_v22  ;;  %v3704_v58 = vld [vmem:[#allocation3 + $0x6e8] sm:$0xff] }
 0x3b3   :  { %6409 = vmatprep.subr.bf16.mxu0 %v15638_v59  ;;  %v15782_v59 = vcombine.high %v3724_v35, %v3728_v9  ;;  %v3764_v60 = vld [vmem:[#allocation3 + $0x8c8] sm:$0xff] }
 0x3b4   :  { %6435 = vmatpush1.bf16.msra.mxu1 %v15701_v11  ;;  %v3784_v11 = vld [vmem:[#allocation3 + $0x968] sm:$0xff] }
 0x3b5   :  { %6436 = vmatprep.subr.bf16.mxu1 %v15694_v45  ;;  %v15845_v45 = vcombine.low %v3788_v26, %v3792_v37  ;;  %v15838_v47 = vcombine.high %v3780_v43, %v3784_v11  ;;  %v3692_v10 = vld [vmem:[#allocation3 + $0x688] sm:$0xff] }
 0x3b6   :  { %6410 = vmatpush2.bf16.msra.mxu0 %v15637_v61  ;;  %v15781_v61 = vcombine.low %v3724_v35, %v3728_v9  ;;  %v3696_v12 = vld [vmem:[#allocation3 + $0x6a8] sm:$0xff] }
 0x3b7   :  { %6411 = vmatprep.subr.bf16.mxu0 %v15630_v46  ;;  %v15774_v46 = vcombine.high %v3716_v20, %v3720_v42  ;;  %v3756_v13 = vld [vmem:[#allocation3 + $0x888] sm:$0xff] }
 0x3b8   :  { %6437 = vmatpush1.bf16.msra.mxu1 %v15693_v8  ;;  %v3776_v8 = vld [vmem:[#allocation3 + $0x928] sm:$0xff] }
 0x3b9   :  { %6438 = vmatprep.subr.bf16.mxu1 %v15686_v52  ;;  %v15837_v52 = vcombine.low %v3780_v43, %v3784_v11  ;;  %v15830_v56 = vcombine.high %v3772_v16, %v3776_v8  ;;  %v3684_v22 = vld [vmem:[#allocation3 + $0x648] sm:$0xff] }
 0x3ba   :  { %6412 = vmatpush2.bf16.msra.mxu0 %v15629_v51  ;;  %v15773_v51 = vcombine.low %v3716_v20, %v3720_v42  ;;  %v3688_v24 = vld [vmem:[#allocation3 + $0x668] sm:$0xff] }
 0x3bb   :  { %6413 = vmatprep.subr.bf16.mxu0 %v15622_v53  ;;  %v15766_v53 = vcombine.high %v3708_v2, %v3712_v30  ;;  %v3748_v25 = vld [vmem:[#allocation3 + $0x848] sm:$0xff] }
 0x3bc   :  { %6439 = vmatpush1.bf16.msra.mxu1 %v15685_v7  ;;  %v3768_v7 = vld [vmem:[#allocation3 + $0x8e8] sm:$0xff] }
 0x3bd   :  { %6440 = vmatprep.subr.bf16.mxu1 %v15678_v62  ;;  %v15829_v62 = vcombine.low %v3772_v16, %v3776_v8  ;;  %v15822_v23 = vcombine.high %v3764_v60, %v3768_v7  ;;  %v3676_v9 = vld [vmem:[#allocation3 + $0x608] sm:$0xff] }
 0x3be   :  { %6414 = vmatpush2.bf16.msra.mxu0 %v15621_v36  ;;  %v15765_v36 = vcombine.low %v3708_v2, %v3712_v30  ;;  %v3680_v26 = vld [vmem:[#allocation3 + $0x628] sm:$0xff] }
 0x3bf   :  { %6415 = vmatprep.subr.bf16.mxu0 %v15614_v4  ;;  %v15758_v4 = vcombine.high %v3700_v57, %v3704_v58  ;;  %v3740_v37 = vld [vmem:[#allocation3 + $0x808] sm:$0xff] }
 0x3c0   :  { %6441 = vmatpush1.bf16.msra.mxu1 %v15677_v14  ;;  %v3760_v14 = vld [vmem:[#allocation3 + $0x8a8] sm:$0xff] }
 0x3c1   :  { %6442 = vmatprep.subr.bf16.mxu1 %v15670_v18  ;;  %v15821_v18 = vcombine.low %v3764_v60, %v3768_v7  ;;  %v15814_v21 = vcombine.high %v3756_v13, %v3760_v14  ;;  %v3924_v42 = vld [vmem:[#allocation3 + $0xdc8] sm:$0xff] }
 0x3c2   :  { %6416 = vmatpush2.bf16.msra.mxu0 %v15613_v15  ;;  %v15757_v15 = vcombine.low %v3700_v57, %v3704_v58  ;;  %v3928_v43 = vld [vmem:[#allocation3 + $0xde8] sm:$0xff] }
 0x3c3   :  { %6417 = vmatprep.subr.bf16.mxu0 %v15606_v19  ;;  %v15750_v19 = vcombine.high %v3692_v10, %v3696_v12  ;;  %v3860_v11 = vld [vmem:[#allocation3 + $0xbc8] sm:$0xff] }
 0x3c4   :  { %6443 = vmatpush1.bf16.msra.mxu1 %v15669_v63  ;;  %v3752_v63 = vld [vmem:[#allocation3 + $0x868] sm:$0xff] }
 0x3c5   :  { %6444 = vmatprep.subr.bf16.mxu1 %v15790_v28  ;;  %v15813_v28 = vcombine.low %v3756_v13, %v3760_v14  ;;  %v15806_v35 = vcombine.high %v3748_v25, %v3752_v63  ;;  %v3916_v30 = vld [vmem:[#allocation3 + $0xd88] sm:$0xff] }
 0x3c6   :  { %6418 = vmatpush2.bf16.msra.mxu0 %v15605_v1  ;;  %v15749_v1 = vcombine.low %v3692_v10, %v3696_v12  ;;  %v3920_v16 = vld [vmem:[#allocation3 + $0xda8] sm:$0xff] }
 0x3c7   :  { %6469 = vmatprep.subr.bf16.mxu0 %v15854_v31  ;;  %v15742_v31 = vcombine.high %v3684_v22, %v3688_v24  ;;  %v3852_v8 = vld [vmem:[#allocation3 + $0xb88] sm:$0xff] }
 0x3c8   :  { %6445 = vmatpush2.bf16.msra.mxu1 %v15789_v38  ;;  %v3744_v38 = vld [vmem:[#allocation3 + $0x828] sm:$0xff] }
 0x3c9   :  { %6420 = vmatmul.mubr.bf16.vlgmr.msra.gmra.mxu0 %v20070_v3  ;;  %6446 = vmatprep.subr.bf16.mxu1 %v15782_v59  ;;  %v15805_v59 = vcombine.low %v3748_v25, %v3752_v63  ;;  %v15798_v20 = vcombine.high %v3740_v37, %v3744_v38  ;;  %v3908_v58 = vld [vmem:[#allocation3 + $0xd48] sm:$0xff] }
 0x3ca   :  { %6470 = vmatpush1.bf16.msra.mxu0 %v15853_v39  ;;  %6501 = vmatprep.mubr.bf16.mxu0 %v20079_v41  ;;  %v15741_v39 = vcombine.low %v3684_v22, %v3688_v24  ;;  %v3912_v60 = vld [vmem:[#allocation3 + $0xd68] sm:$0xff] }
 0x3cb   :  { %6471 = vmatprep.subr.bf16.mxu0 %v15846_v40  ;;  %v15734_v40 = vcombine.high %v3676_v9, %v3680_v26  ;;  %v3844_v7 = vld [vmem:[#allocation3 + $0xb48] sm:$0xff] }
 0x3cc   :  { %6447 = vmatpush2.bf16.msra.mxu1 %v15781_v61  ;;  %v3864_v61 = vld [vmem:[#allocation3 + $0xbe8] sm:$0xff] }
 0x3cd   :  { %6448 = vmatprep.subr.bf16.mxu1 %v15774_v46  ;;  %v15797_v46 = vcombine.low %v3740_v37, %v3744_v38  ;;  %v15918_v2 = vcombine.high %v3860_v11, %v3864_v61  ;;  %v3900_v12 = vld [vmem:[#allocation3 + $0xd08] sm:$0xff] }
 0x3ce   :  { %6472 = vmatpush1.bf16.msra.mxu0 %v15845_v45  ;;  %v15733_v45 = vcombine.low %v3676_v9, %v3680_v26  ;;  %v3904_v13 = vld [vmem:[#allocation3 + $0xd28] sm:$0xff] }
 0x3cf   :  { %6473 = vmatprep.subr.bf16.mxu0 %v15838_v47  ;;  %v15982_v47 = vcombine.high %v3924_v42, %v3928_v43  ;;  %v3836_v14 = vld [vmem:[#allocation3 + $0xb08] sm:$0xff] }
 0x3d0   :  { %6449 = vmatpush2.bf16.msra.mxu1 %v15773_v51  ;;  %v3856_v51 = vld [vmem:[#allocation3 + $0xba8] sm:$0xff] }
 0x3d1   :  { %6450 = vmatprep.subr.bf16.mxu1 %v15766_v53  ;;  %v15917_v53 = vcombine.low %v3860_v11, %v3864_v61  ;;  %v15910_v57 = vcombine.high %v3852_v8, %v3856_v51  ;;  %v3892_v24 = vld [vmem:[#allocation3 + $0xcc8] sm:$0xff] }
 0x3d2   :  { %6474 = vmatpush1.bf16.msra.mxu0 %v15837_v52  ;;  %v15981_v52 = vcombine.low %v3924_v42, %v3928_v43  ;;  %v3896_v25 = vld [vmem:[#allocation3 + $0xce8] sm:$0xff] }
 0x3d3   :  { %6475 = vmatprep.subr.bf16.mxu0 %v15830_v56  ;;  %v15974_v56 = vcombine.high %v3916_v30, %v3920_v16  ;;  %v3828_v63 = vld [vmem:[#allocation3 + $0xac8] sm:$0xff] }
 0x3d4   :  { %6451 = vmatpush2.bf16.msra.mxu1 %v15765_v36  ;;  %v3848_v36 = vld [vmem:[#allocation3 + $0xb68] sm:$0xff] }
 0x3d5   :  { %6452 = vmatprep.subr.bf16.mxu1 %v15758_v4  ;;  %v15909_v4 = vcombine.low %v3852_v8, %v3856_v51  ;;  %v15902_v10 = vcombine.high %v3844_v7, %v3848_v36  ;;  %v3884_v26 = vld [vmem:[#allocation3 + $0xc88] sm:$0xff] }
 0x3d6   :  { %6476 = vmatpush1.bf16.msra.mxu0 %v15829_v62  ;;  %v15973_v62 = vcombine.low %v3916_v30, %v3920_v16  ;;  %v3888_v37 = vld [vmem:[#allocation3 + $0xca8] sm:$0xff] }
 0x3d7   :  { %6477 = vmatprep.subr.bf16.mxu0 %v15822_v23  ;;  %v15966_v23 = vcombine.high %v3908_v58, %v3912_v60  ;;  %v3820_v38 = vld [vmem:[#allocation3 + $0xa88] sm:$0xff] }
 0x3d8   :  { %6453 = vmatpush2.bf16.msra.mxu1 %v15757_v15  ;;  %v3840_v15 = vld [vmem:[#allocation3 + $0xb28] sm:$0xff] }
 0x3d9   :  { %6454 = vmatprep.subr.bf16.mxu1 %v15750_v19  ;;  %v15901_v19 = vcombine.low %v3844_v7, %v3848_v36  ;;  %v15894_v22 = vcombine.high %v3836_v14, %v3840_v15  ;;  %v3876_v43 = vld [vmem:[#allocation3 + $0xc48] sm:$0xff]  ;;  %v3545_v7 = vld [vmem:[#allocation3 + $0x1f0] sm:$0xff] }
 0x3da   :  { %6478 = vmatpush1.bf16.msra.mxu0 %v15821_v18  ;;  %v15965_v18 = vcombine.low %v3908_v58, %v3912_v60  ;;  %v3880_v11 = vld [vmem:[#allocation3 + $0xc68] sm:$0xff]  ;;  %v3541_v60 = vld [vmem:[#allocation3 + $0x1d0] sm:$0xff] }
 0x3db   :  { %6479 = vmatprep.subr.bf16.mxu0 %v15814_v21  ;;  %v15958_v21 = vcombine.high %v3900_v12, %v3904_v13  ;;  %v3812_v61 = vld [vmem:[#allocation3 + $0xa48] sm:$0xff]  ;;  %v3669_v36 = vld [vmem:[#allocation3 + $0x5d0] sm:$0xff] }
 0x3dc   :  { %6455 = vmatpush2.bf16.msra.mxu1 %v15749_v1  ;;  %v3832_v1 = vld [vmem:[#allocation3 + $0xae8] sm:$0xff] }
 0x3dd   :  { %6456 = vmatprep.subr.bf16.mxu1 %v15742_v31  ;;  %v15893_v31 = vcombine.low %v3836_v14, %v3840_v15  ;;  %v15886_v9 = vcombine.high %v3828_v63, %v3832_v1  ;;  %v3868_v16 = vld [vmem:[#allocation3 + $0xc08] sm:$0xff]  ;;  %v3537_v14 = vld [vmem:[#allocation3 + $0x1b0] sm:$0xff] }
 0x3de   :  { %6480 = vmatpush1.bf16.msra.mxu0 %v15813_v28  ;;  %v15957_v28 = vcombine.low %v3900_v12, %v3904_v13  ;;  %v3872_v8 = vld [vmem:[#allocation3 + $0xc28] sm:$0xff]  ;;  %v3533_v13 = vld [vmem:[#allocation3 + $0x190] sm:$0xff] }
 0x3df   :  { %6481 = vmatprep.subr.bf16.mxu0 %v15806_v35  ;;  %v15950_v35 = vcombine.high %v3892_v24, %v3896_v25  ;;  %v3804_v51 = vld [vmem:[#allocation3 + $0xa08] sm:$0xff]  ;;  %v3661_v15 = vld [vmem:[#allocation3 + $0x590] sm:$0xff] }
 0x3e0   :  { %6457 = vmatpush2.bf16.msra.mxu1 %v15741_v39  ;;  %v3824_v39 = vld [vmem:[#allocation3 + $0xaa8] sm:$0xff] }
 0x3e1   :  { %6458 = vmatprep.subr.bf16.mxu1 %v15734_v40  ;;  %v15885_v40 = vcombine.low %v3828_v63, %v3832_v1  ;;  %v15878_v42 = vcombine.high %v3820_v38, %v3824_v39  ;;  %v3529_v63 = vld [vmem:[#allocation3 + $0x170] sm:$0xff] }
 0x3e2   :  { %6482 = vmatpush1.bf16.msra.mxu0 %v15805_v59  ;;  %v15949_v59 = vcombine.low %v3892_v24, %v3896_v25  ;;  %v3525_v25 = vld [vmem:[#allocation3 + $0x150] sm:$0xff] }
 0x3e3   :  { %6483 = vmatprep.subr.bf16.mxu0 %v15798_v20  ;;  %v15942_v20 = vcombine.high %v3884_v26, %v3888_v37  ;;  %v3653_v1 = vld [vmem:[#allocation3 + $0x550] sm:$0xff] }
 0x3e4   :  { %6459 = vmatpush2.bf16.msra.mxu1 %v15733_v45  ;;  %v3816_v45 = vld [vmem:[#allocation3 + $0xa68] sm:$0xff] }
 0x3e5   :  { %6510 = vmatprep.subr.bf16.mxu1 %v15982_v47  ;;  %v15877_v47 = vcombine.low %v3820_v38, %v3824_v39  ;;  %v15870_v30 = vcombine.high %v3812_v61, %v3816_v45  ;;  %v3521_v38 = vld [vmem:[#allocation3 + $0x130] sm:$0xff] }
 0x3e6   :  { %6484 = vmatpush1.bf16.msra.mxu0 %v15797_v46  ;;  %v15941_v46 = vcombine.low %v3884_v26, %v3888_v37  ;;  %v3517_v37 = vld [vmem:[#allocation3 + $0x110] sm:$0xff] }
 0x3e7   :  { %6485 = vmatprep.subr.bf16.mxu0 %v15918_v2  ;;  %6461 = vmatmul.mubr.bf16.vlgmr.msra.gmra.mxu1 %v20074_v34  ;;  %v15934_v2 = vcombine.high %v3876_v43, %v3880_v11  ;;  %v3645_v39 = vld [vmem:[#allocation3 + $0x510] sm:$0xff] }
 0x3e8   :  { %6511 = vmatpush1.bf16.msra.mxu1 %v15981_v52  ;;  %6542 = vmatprep.mubr.bf16.mxu1 %v19617_v0  ;;  %v3808_v52 = vld [vmem:[#allocation3 + $0xa28] sm:$0xff] }
 0x3e9   :  { %6512 = vmatprep.subr.bf16.mxu1 %v15974_v56  ;;  %v15869_v56 = vcombine.low %v3812_v61, %v3816_v45  ;;  %v15862_v58 = vcombine.high %v3804_v51, %v3808_v52  ;;  %v3513_v61 = vld [vmem:[#allocation3 + $0xf0] sm:$0xff] }
 0x3ea   :  { %6486 = vmatpush2.bf16.msra.mxu0 %v15917_v53  ;;  %v15933_v53 = vcombine.low %v3876_v43, %v3880_v11  ;;  %v3509_v11 = vld [vmem:[#allocation3 + $0xd0] sm:$0xff] }
 0x3eb   :  { %6487 = vmatprep.subr.bf16.mxu0 %v15910_v57  ;;  %v15926_v57 = vcombine.high %v3868_v16, %v3872_v8  ;;  %v3637_v45 = vld [vmem:[#allocation3 + $0x4d0] sm:$0xff] }
 0x3ec   :  { %6513 = vmatpush1.bf16.msra.mxu1 %v15973_v62  ;;  %v3673_v62 = vld [vmem:[#allocation3 + $0x5f0] sm:$0xff] }
 0x3ed   :  { %6514 = vmatprep.subr.bf16.mxu1 %v15966_v23  ;;  %v15861_v23 = vcombine.low %v3804_v51, %v3808_v52  ;;  %v15728_v12 = vcombine.high %v3669_v36, %v3673_v62  ;;  %v3505_v51 = vld [vmem:[#allocation3 + $0xb0] sm:$0xff] }
 0x3ee   :  { %6488 = vmatpush2.bf16.msra.mxu0 %v15909_v4  ;;  %v15925_v4 = vcombine.low %v3868_v16, %v3872_v8  ;;  %v3501_v8 = vld [vmem:[#allocation3 + $0x90] sm:$0xff] }
 0x3ef   :  { %6489 = vmatprep.subr.bf16.mxu0 %v15902_v10  ;;  %v15600_v10 = vcombine.high %v3541_v60, %v3545_v7  ;;  %v3629_v52 = vld [vmem:[#allocation3 + $0x490] sm:$0xff] }
 0x3f0   :  { %6515 = vmatpush1.bf16.msra.mxu1 %v15965_v18  ;;  %v3665_v18 = vld [vmem:[#allocation3 + $0x5b0] sm:$0xff] }
 0x3f1   :  { %6516 = vmatprep.subr.bf16.mxu1 %v15958_v21  ;;  %v15727_v21 = vcombine.low %v3669_v36, %v3673_v62  ;;  %v15720_v24 = vcombine.high %v3661_v15, %v3665_v18  ;;  %v3497_v36 = vld [vmem:[#allocation3 + $0x70] sm:$0xff] }
 0x3f2   :  { %6490 = vmatpush2.bf16.msra.mxu0 %v15901_v19  ;;  %v15599_v19 = vcombine.low %v3541_v60, %v3545_v7  ;;  %v3493_v7 = vld [vmem:[#allocation3 + $0x50] sm:$0xff] }
 0x3f3   :  { %6491 = vmatprep.subr.bf16.mxu0 %v15894_v22  ;;  %v15592_v22 = vcombine.high %v3533_v13, %v3537_v14  ;;  %v3621_v62 = vld [vmem:[#allocation3 + $0x450] sm:$0xff] }
 0x3f4   :  { %6517 = vmatpush1.bf16.msra.mxu1 %v15957_v28  ;;  %v3657_v28 = vld [vmem:[#allocation3 + $0x570] sm:$0xff] }
 0x3f5   :  { %6518 = vmatprep.subr.bf16.mxu1 %v15950_v35  ;;  %v15719_v35 = vcombine.low %v3661_v15, %v3665_v18  ;;  %v15712_v26 = vcombine.high %v3653_v1, %v3657_v28  ;;  %v3489_v15 = vld [vmem:[#allocation3 + $0x30] sm:$0xff] }
 0x3f6   :  { %6492 = vmatpush2.bf16.msra.mxu0 %v15893_v31  ;;  %v15591_v31 = vcombine.low %v3533_v13, %v3537_v14  ;;  %v3485_v14 = vld [vmem:[#allocation3 + $0x10] sm:$0xff] }
 0x3f7   :  { %6493 = vmatprep.subr.bf16.mxu0 %v15886_v9  ;;  %v15584_v9 = vcombine.high %v3525_v25, %v3529_v63  ;;  %v3613_v18 = vld [vmem:[#allocation3 + $0x410] sm:$0xff] }
 0x3f8   :  { %6519 = vmatpush1.bf16.msra.mxu1 %v15949_v59  ;;  %v3649_v59 = vld [vmem:[#allocation3 + $0x530] sm:$0xff] }
 0x3f9   :  { %6520 = vmatprep.subr.bf16.mxu1 %v15942_v20  ;;  %v15711_v20 = vcombine.low %v3653_v1, %v3657_v28  ;;  %v15704_v43 = vcombine.high %v3645_v39, %v3649_v59  ;;  %v3605_v28 = vld [vmem:[#allocation3 + $0x3d0] sm:$0xff] }
 0x3fa   :  { %6494 = vmatpush2.bf16.msra.mxu0 %v15885_v40  ;;  %v15583_v40 = vcombine.low %v3525_v25, %v3529_v63  ;;  %v3932_v25 = vld [vmem:[#allocation10 + $0x1] ss:$8 sm:$0xf] }
 0x3fb   :  { %6495 = vmatprep.subr.bf16.mxu0 %v15878_v42  ;;  %v15576_v42 = vcombine.high %v3517_v37, %v3521_v38  ;;  %v3933_v63 = vld [vmem:[#allocation10 + $0x1] ss:$8 sm:$0xf0] }
 0x3fc   :  { %6521 = vmatpush1.bf16.msra.mxu1 %v15941_v46  ;;  %v3641_v46 = vld [vmem:[#allocation3 + $0x4f0] sm:$0xff] }
 0x3fd   :  { %6522 = vmatprep.subr.bf16.mxu1 %v15934_v2  ;;  %v15703_v2 = vcombine.low %v3645_v39, %v3649_v59  ;;  %v15696_v16 = vcombine.high %v3637_v45, %v3641_v46 }
 0x3fe   :  { %6496 = vmatpush2.bf16.msra.mxu0 %v15877_v47  ;;  %v15575_v47 = vcombine.low %v3517_v37, %v3521_v38  ;;  %v20104_v37 = vor.u32 %v3933_v63, %v3932_v25 }
 0x3ff   :  { %6497 = vmatprep.subr.bf16.mxu0 %v15870_v30  ;;  %v15568_v30 = vcombine.high %v3509_v11, %v3513_v61 }
 0x400   :  { %6523 = vmatpush1.bf16.msra.mxu1 %v15933_v53  ;;  %v3633_v53 = vld [vmem:[#allocation3 + $0x4b0] sm:$0xff] }
 0x401   :  { %6524 = vmatprep.subr.bf16.mxu1 %v15926_v57  ;;  %v15695_v57 = vcombine.low %v3637_v45, %v3641_v46  ;;  %v15688_v60 = vcombine.high %v3629_v52, %v3633_v53 }
 0x402   :  { %6498 = vmatpush2.bf16.msra.mxu0 %v15869_v56  ;;  %v15567_v56 = vcombine.low %v3509_v11, %v3513_v61  ;;  %v3946_v11 = vrot.slane %v20104_v37, %v19967_v32 }
 0x403   :  { %6499 = vmatprep.subr.bf16.mxu0 %v15862_v58  ;;  %v15560_v58 = vcombine.high %v3501_v8, %v3505_v51 }
 0x404   :  { %6525 = vmatpush1.bf16.msra.mxu1 %v15925_v4  ;;  %v3625_v4 = vld [vmem:[#allocation3 + $0x470] sm:$0xff] }
 0x405   :  { %6551 = vmatprep.subr.bf16.mxu1 %v15600_v10  ;;  %v15687_v10 = vcombine.low %v3629_v52, %v3633_v53  ;;  %v15680_v13 = vcombine.high %v3621_v62, %v3625_v4  ;;  %v3721_v52 = vld [vmem:[#allocation3 + $0x770] sm:$0xff] }
 0x406   :  { %6500 = vmatpush2.bf16.msra.mxu0 %v15861_v23  ;;  %v15559_v23 = vcombine.low %v3501_v8, %v3505_v51  ;;  %v3717_v51 = vld [vmem:[#allocation3 + $0x750] sm:$0xff] }
 0x407   :  { %6592 = vmatprep.subr.bf16.mxu0 %v15728_v12  ;;  %6543 = vmatmul.mubr.bf16.vlgmr.msra.gmra.mxu1 %v20086_v50  ;;  %v15552_v12 = vcombine.high %v3493_v7, %v3497_v36 }
 0x408   :  { %6552 = vmatpush1.bf16.msra.mxu1 %v15599_v19  ;;  %6583 = vmatprep.mubr.bf16.mxu1 %v20060_v5  ;;  %v3617_v19 = vld [vmem:[#allocation3 + $0x430] sm:$0xff] }
 0x409   :  { %6502 = vmatmul.mubr.bf16.vlgmr.msra.gmra.mxu0 %v20092_v29  ;;  %6553 = vmatprep.subr.bf16.mxu1 %v15592_v22  ;;  %v15679_v22 = vcombine.low %v3621_v62, %v3625_v4  ;;  %v15672_v1 = vcombine.high %v3613_v18, %v3617_v19  ;;  %v15671_v38 = vcombine.low %v3613_v18, %v3617_v19 }
 0x40a   :  { %6593 = vmatpush1.bf16.msra.mxu0 %v15727_v21  ;;  %6624 = vmatprep.mubr.bf16.mxu0 %v20064_v48  ;;  %v15551_v21 = vcombine.low %v3493_v7, %v3497_v36 }
 0x40b   :  { %6594 = vmatprep.subr.bf16.mxu0 %v15720_v24  ;;  %v15544_v24 = vcombine.high %v3485_v14, %v3489_v15 }
 0x40c   :  { %6554 = vmatpush1.bf16.msra.mxu1 %v15591_v31  ;;  %v3609_v31 = vld [vmem:[#allocation3 + $0x3f0] sm:$0xff] }
 0x40d   :  { %6555 = vmatprep.subr.bf16.mxu1 %v15584_v9  ;;  %v3737_v9 = vld [vmem:[#allocation3 + $0x7f0] sm:$0xff]  ;;  %v15664_v39 = vcombine.high %v3605_v28, %v3609_v31  ;;  %v15663_v61 = vcombine.low %v3605_v28, %v3609_v31 }
 0x40e   :  { %6595 = vmatpush1.bf16.msra.mxu0 %v15719_v35  ;;  %v3733_v35 = vld [vmem:[#allocation3 + $0x7d0] sm:$0xff] }
 0x40f   :  { %6596 = vmatprep.subr.bf16.mxu0 %v15712_v26  ;;  %v15543_v26 = vcombine.low %v3485_v14, %v3489_v15  ;;  %v15792_v59 = vcombine.high %v3733_v35, %v3737_v9  ;;  %v15791_v45 = vcombine.low %v3733_v35, %v3737_v9  ;;  %v3709_v14 = vld [vmem:[#allocation3 + $0x710] sm:$0xff] }
 0x410   :  { %6556 = vmatpush1.bf16.msra.mxu1 %v15583_v40  ;;  %v3597_v40 = vld [vmem:[#allocation3 + $0x390] sm:$0xff] }
 0x411   :  { %6557 = vmatprep.subr.bf16.mxu1 %v15576_v42  ;;  %v3725_v42 = vld [vmem:[#allocation3 + $0x790] sm:$0xff] }
 0x412   :  { %6597 = vmatpush1.bf16.msra.mxu0 %v15711_v20  ;;  %v3601_v20 = vld [vmem:[#allocation3 + $0x3b0] sm:$0xff] }
 0x413   :  { %6598 = vmatprep.subr.bf16.mxu0 %v15704_v43  ;;  %v3729_v43 = vld [vmem:[#allocation3 + $0x7b0] sm:$0xff]  ;;  %v15656_v46 = vcombine.high %v3597_v40, %v3601_v20 }
 0x414   :  { %6558 = vmatpush1.bf16.msra.mxu1 %v15575_v47  ;;  %v3950_v47 = vrot.slane %v20104_v37, %v19970_v33  ;;  %v3713_v15 = vld [vmem:[#allocation3 + $0x730] sm:$0xff] }
 0x415   :  { %6559 = vmatprep.subr.bf16.mxu1 %v15568_v30  ;;  %v3589_v30 = vld [vmem:[#allocation3 + $0x350] sm:$0xff] }
 0x416   :  { %6599 = vmatpush1.bf16.msra.mxu0 %v15703_v2  ;;  %v15784_v2 = vcombine.high %v3725_v42, %v3729_v43  ;;  %v3573_v28 = vld [vmem:[#allocation3 + $0x2d0] sm:$0xff] }
 0x417   :  { %6600 = vmatprep.subr.bf16.mxu0 %v15696_v16  ;;  %v3593_v16 = vld [vmem:[#allocation3 + $0x370] sm:$0xff] }
 0x418   :  { %6560 = vmatpush1.bf16.msra.mxu1 %v15567_v56  ;;  %v15648_v7 = vcombine.high %v3589_v30, %v3593_v16  ;;  %v3577_v31 = vld [vmem:[#allocation3 + $0x2f0] sm:$0xff] }
 0x419   :  { %6561 = vmatprep.subr.bf16.mxu1 %v15560_v58  ;;  %v3701_v35 = vld [vmem:[#allocation3 + $0x6d0] sm:$0xff] }
 0x41a   :  { %6601 = vmatpush1.bf16.msra.mxu0 %v15695_v57  ;;  %v15655_v57 = vcombine.low %v3597_v40, %v3601_v20  ;;  %v3705_v9 = vld [vmem:[#allocation3 + $0x6f0] sm:$0xff] }
 0x41b   :  { %6602 = vmatprep.subr.bf16.mxu0 %v15688_v60  ;;  %v15783_v60 = vcombine.low %v3725_v42, %v3729_v43  ;;  %v3565_v40 = vld [vmem:[#allocation3 + $0x290] sm:$0xff] }
 0x41c   :  { %6562 = vmatpush1.bf16.msra.mxu1 %v15559_v23  ;;  %v15776_v23 = vcombine.high %v3717_v51, %v3721_v52  ;;  %v3569_v20 = vld [vmem:[#allocation3 + $0x2b0] sm:$0xff] }
 0x41d   :  { %6563 = vmatprep.subr.bf16.mxu1 %v15552_v12  ;;  %v3585_v12 = vld [vmem:[#allocation3 + $0x330] sm:$0xff] }
 0x41e   :  { %6603 = vmatpush1.bf16.msra.mxu0 %v15687_v10  ;;  %v3581_v10 = vld [vmem:[#allocation3 + $0x310] sm:$0xff] }
 0x41f   :  { %6604 = vmatprep.subr.bf16.mxu0 %v15680_v13  ;;  %v15640_v25 = vcombine.high %v3581_v10, %v3585_v12  ;;  %v3693_v42 = vld [vmem:[#allocation3 + $0x690] sm:$0xff] }
 0x420   :  { %6564 = vmatpush1.bf16.msra.mxu1 %v15551_v21  ;;  %v15647_v21 = vcombine.low %v3589_v30, %v3593_v16  ;;  %v3697_v43 = vld [vmem:[#allocation3 + $0x6b0] sm:$0xff] }
 0x421   :  { %6565 = vmatprep.subr.bf16.mxu1 %v15544_v24  ;;  %v15775_v24 = vcombine.low %v3717_v51, %v3721_v52  ;;  %v3685_v30 = vld [vmem:[#allocation3 + $0x650] sm:$0xff]  ;;  %v15751_v51 = vcombine.low %v3693_v42, %v3697_v43 }
 0x422   :  { %6605 = vmatpush1.bf16.msra.mxu0 %v15679_v22  ;;  %v3689_v16 = vld [vmem:[#allocation3 + $0x670] sm:$0xff] }
 0x423   :  { %6606 = vmatprep.subr.bf16.mxu0 %v15672_v1  ;;  %v15768_v1 = vcombine.high %v3709_v14, %v3713_v15 }
 0x424   :  { %6566 = vmatpush1.bf16.msra.mxu1 %v15543_v26  ;;  %v15639_v26 = vcombine.low %v3581_v10, %v3585_v12  ;;  %v3797_v10 = vld [vmem:[#allocation3 + $0x9d0] sm:$0xff] }
 0x425   :  { %6567 = vmatprep.subr.bf16.mxu1 %v15664_v39  ;;  %v15632_v39 = vcombine.high %v3573_v28, %v3577_v31  ;;  %v3801_v12 = vld [vmem:[#allocation3 + $0x9f0] sm:$0xff] }
 0x426   :  { %6607 = vmatpush1.bf16.msra.mxu0 %v15671_v38  ;;  %v15767_v38 = vcombine.low %v3709_v14, %v3713_v15  ;;  %v3929_v14 = vld [vmem:[#allocation3 + $0xdf0] sm:$0xff] }
 0x427   :  { %6608 = vmatprep.subr.bf16.mxu0 %v15792_v59  ;;  %v6257_v8 = vpop.f32.mrf.mxu1  ;;  %v15760_v59 = vcombine.high %v3701_v35, %v3705_v9 }
 0x428   :  { %v6258_v53 = vadd.f32 %v6257_v8, %v3946_v11  ;;  %6568 = vmatpush2.bf16.msra.mxu1 %v15663_v61  ;;  %v15631_v11 = vcombine.low %v3573_v28, %v3577_v31  ;;  %v15759_v61 = vcombine.low %v3701_v35, %v3705_v9  ;;  %v15623_v8 = vcombine.low %v3565_v40, %v3569_v20 }
 0x429   :  { %v6298_v56 = vpop.f32.mrf.mxu0  ;;  %v6259_v58 = vpop.f32.mrf.mxu1  ;;  %6569 = vmatprep.subr.bf16.mxu1 %v15656_v46  ;;  %v15752_v46 = vcombine.high %v3693_v42, %v3697_v43  ;;  %v15855_v28 = vcombine.low %v3797_v10, %v3801_v12 }
 0x42a   :  { %6609 = vmatpush2.bf16.msra.mxu0 %v15791_v45  ;;  %v20110_v36 = vadd.f32 %v6298_v56, %v6258_v53  ;;  %v6260_v62 = vadd.f32 %v6259_v58, %v3950_v47  ;;  %v15624_v45 = vcombine.high %v3565_v40, %v3569_v20  ;;  %v3557_v47 = vld [vmem:[#allocation3 + $0x250] sm:$0xff]  ;;  %v15744_v53 = vcombine.high %v3685_v30, %v3689_v16 }
 0x42b   :  { %v6300_v4 = vpop.f32.mrf.mxu0  ;;  %6610 = vmatprep.subr.bf16.mxu0 %v15784_v2  ;;  %v6261_v13 = vpop.f32.mrf.mxu1  ;;  %v3561_v2 = vld [vmem:[#allocation3 + $0x270] sm:$0xff] }
 0x42c   :  { %v20112_v18 = vadd.f32 %v6300_v4, %v6260_v62  ;;  %6570 = vmatpush2.bf16.msra.mxu1 %v15655_v57  ;;  %v15616_v52 = vcombine.high %v3557_v47, %v3561_v2  ;;  %v3549_v56 = vld [vmem:[#allocation3 + $0x210] sm:$0xff]  ;;  %v15743_v62 = vcombine.low %v3685_v30, %v3689_v16 }
 0x42d   :  { %v6302_v19 = vpop.f32.mrf.mxu0  ;;  %v6262_v22 = vpop.f32.mrf.mxu1  ;;  %6571 = vmatprep.subr.bf16.mxu1 %v15648_v7  ;;  %v3553_v57 = vld [vmem:[#allocation3 + $0x230] sm:$0xff]  ;;  %v15615_v7 = vcombine.low %v3557_v47, %v3561_v2 }
 0x42e   :  { %6611 = vmatpush2.bf16.msra.mxu0 %v15783_v60  ;;  %v3677_v58 = vld [vmem:[#allocation3 + $0x610] sm:$0xff]  ;;  %v15608_v4 = vcombine.high %v3549_v56, %v3553_v57  ;;  %v15607_v15 = vcombine.low %v3549_v56, %v3553_v57 }
 0x42f   :  { %v6303_v63 = vpop.f32.mrf.mxu0  ;;  %6612 = vmatprep.subr.bf16.mxu0 %v15776_v23  ;;  %v3681_v60 = vld [vmem:[#allocation3 + $0x630] sm:$0xff] }
 0x430   :  { %6572 = vmatpush2.bf16.msra.mxu1 %v15647_v21  ;;  %v15736_v23 = vcombine.high %v3677_v58, %v3681_v60  ;;  %v3925_v13 = vld [vmem:[#allocation3 + $0xdd0] sm:$0xff]  ;;  %v15735_v19 = vcombine.low %v3677_v58, %v3681_v60  ;;  %v15856_v21 = vcombine.high %v3797_v10, %v3801_v12 }
 0x431   :  { %6573 = vmatprep.subr.bf16.mxu1 %v15640_v25  ;;  %v15984_v22 = vcombine.high %v3925_v13, %v3929_v14  ;;  %v3793_v25 = vld [vmem:[#allocation3 + $0x9b0] sm:$0xff]  ;;  %v15983_v31 = vcombine.low %v3925_v13, %v3929_v14 }
 0x432   :  { %6613 = vmatpush2.bf16.msra.mxu0 %v15775_v24  ;;  %v3789_v24 = vld [vmem:[#allocation3 + $0x990] sm:$0xff] }
 0x433   :  { %6614 = vmatprep.subr.bf16.mxu0 %v15768_v1  ;;  %v3917_v63 = vld [vmem:[#allocation3 + $0xd90] sm:$0xff]  ;;  %v15848_v35 = vcombine.high %v3789_v24, %v3793_v25  ;;  %v15847_v20 = vcombine.low %v3789_v24, %v3793_v25 }
 0x434   :  { %6574 = vmatpush2.bf16.msra.mxu1 %v15639_v26  ;;  %v3921_v1 = vld [vmem:[#allocation3 + $0xdb0] sm:$0xff] }
 0x435   :  { %6575 = vmatprep.subr.bf16.mxu1 %v15632_v39  ;;  %v15976_v9 = vcombine.high %v3917_v63, %v3921_v1  ;;  %v3781_v26 = vld [vmem:[#allocation3 + $0x950] sm:$0xff]  ;;  %v15975_v42 = vcombine.low %v3917_v63, %v3921_v1 }
 0x436   :  { %6615 = vmatpush2.bf16.msra.mxu0 %v15767_v38  ;;  %v3785_v38 = vld [vmem:[#allocation3 + $0x970] sm:$0xff] }
 0x437   :  { %6616 = vmatprep.subr.bf16.mxu0 %v15760_v59  ;;  %v3909_v39 = vld [vmem:[#allocation3 + $0xd50] sm:$0xff]  ;;  %v15840_v43 = vcombine.high %v3781_v26, %v3785_v38  ;;  %v15839_v16 = vcombine.low %v3781_v26, %v3785_v38 }
 0x438   :  { %6576 = vmatpush2.bf16.msra.mxu1 %v15631_v11  ;;  %v3913_v59 = vld [vmem:[#allocation3 + $0xd70] sm:$0xff] }
 0x439   :  { %6577 = vmatprep.subr.bf16.mxu1 %v15624_v45  ;;  %v3773_v45 = vld [vmem:[#allocation3 + $0x910] sm:$0xff] }
 0x43a   :  { %6617 = vmatpush2.bf16.msra.mxu0 %v15759_v61  ;;  %v15968_v61 = vcombine.high %v3909_v39, %v3913_v59  ;;  %v3901_v47 = vld [vmem:[#allocation3 + $0xd10] sm:$0xff] }
 0x43b   :  { %6618 = vmatprep.subr.bf16.mxu0 %v15752_v46  ;;  %v3777_v46 = vld [vmem:[#allocation3 + $0x930] sm:$0xff] }
 0x43c   :  { %6578 = vmatpush2.bf16.msra.mxu1 %v15623_v8  ;;  %v3905_v2 = vld [vmem:[#allocation3 + $0xd30] sm:$0xff]  ;;  %v15967_v8 = vcombine.low %v3909_v39, %v3913_v59 }
 0x43d   :  { %6579 = vmatprep.subr.bf16.mxu1 %v15616_v52  ;;  %v3765_v56 = vld [vmem:[#allocation3 + $0x8d0] sm:$0xff] }
 0x43e   :  { %6619 = vmatpush2.bf16.msra.mxu0 %v15751_v51  ;;  %v15832_v51 = vcombine.high %v3773_v45, %v3777_v46  ;;  %v3769_v57 = vld [vmem:[#allocation3 + $0x8f0] sm:$0xff] }
 0x43f   :  { %6620 = vmatprep.subr.bf16.mxu0 %v15744_v53  ;;  %v15960_v53 = vcombine.high %v3901_v47, %v3905_v2  ;;  %v3893_v58 = vld [vmem:[#allocation3 + $0xcd0] sm:$0xff] }
 0x440   :  { %6580 = vmatpush2.bf16.msra.mxu1 %v15615_v7  ;;  %v3897_v60 = vld [vmem:[#allocation3 + $0xcf0] sm:$0xff]  ;;  %v15831_v7 = vcombine.low %v3773_v45, %v3777_v46 }
 0x441   :  { %6581 = vmatprep.subr.bf16.mxu1 %v15608_v4  ;;  %v15824_v4 = vcombine.high %v3765_v56, %v3769_v57  ;;  %v3757_v10 = vld [vmem:[#allocation3 + $0x890] sm:$0xff] }
 0x442   :  { %6621 = vmatpush2.bf16.msra.mxu0 %v15743_v62  ;;  %v15959_v62 = vcombine.low %v3901_v47, %v3905_v2  ;;  %v3761_v12 = vld [vmem:[#allocation3 + $0x8b0] sm:$0xff]  ;;  %v3542_v47 = vld [vmem:[#allocation3 + $0x1d8] sm:$0xff] }
 0x443   :  { %6622 = vmatprep.subr.bf16.mxu0 %v15736_v23  ;;  %v15952_v23 = vcombine.high %v3893_v58, %v3897_v60  ;;  %v3885_v13 = vld [vmem:[#allocation3 + $0xc90] sm:$0xff]  ;;  %v3546_v2 = vld [vmem:[#allocation3 + $0x1f8] sm:$0xff] }
 0x444   :  { %6582 = vmatpush2.bf16.msra.mxu1 %v15607_v15  ;;  %v3889_v14 = vld [vmem:[#allocation3 + $0xcb0] sm:$0xff]  ;;  %v15823_v15 = vcombine.low %v3765_v56, %v3769_v57  ;;  %v3534_v56 = vld [vmem:[#allocation3 + $0x198] sm:$0xff] }
 0x445   :  { %6633 = vmatprep.subr.bf16.mxu1 %v15856_v21  ;;  %v15816_v21 = vcombine.high %v3757_v10, %v3761_v12  ;;  %v3749_v24 = vld [vmem:[#allocation3 + $0x850] sm:$0xff]  ;;  %v3538_v57 = vld [vmem:[#allocation3 + $0x1b8] sm:$0xff] }
 0x446   :  { %6623 = vmatpush2.bf16.msra.mxu0 %v15735_v19  ;;  %v15951_v19 = vcombine.low %v3893_v58, %v3897_v60  ;;  %v3753_v25 = vld [vmem:[#allocation3 + $0x870] sm:$0xff]  ;;  %v15601_v60 = vcombine.low %v3542_v47, %v3546_v2 }
 0x447   :  { %6674 = vmatprep.subr.bf16.mxu0 %v15984_v22  ;;  %6584 = vmatmul.mubr.bf16.vlgmr.msra.gmra.mxu1 %v20070_v3  ;;  %v15944_v22 = vcombine.high %v3885_v13, %v3889_v14  ;;  %v3877_v63 = vld [vmem:[#allocation3 + $0xc50] sm:$0xff] }
 0x448   :  { %6634 = vmatpush1.bf16.msra.mxu1 %v15855_v28  ;;  %6665 = vmatprep.mubr.bf16.mxu1 %v20079_v41  ;;  %v3881_v1 = vld [vmem:[#allocation3 + $0xc70] sm:$0xff]  ;;  %v15815_v28 = vcombine.low %v3757_v10, %v3761_v12  ;;  %v3526_v12 = vld [vmem:[#allocation3 + $0x158] sm:$0xff] }
 0x449   :  { %v20115_v40 = vpop.f32.mrf.mxu0  ;;  %6625 = vmatmul.mubr.bf16.vlgmr.msra.gmra.mxu0 %v20074_v34  ;;  %6635 = vmatprep.subr.bf16.mxu1 %v15848_v35  ;;  %v15808_v35 = vcombine.high %v3749_v24, %v3753_v25  ;;  %v3741_v26 = vld [vmem:[#allocation3 + $0x810] sm:$0xff] }
 0x44a   :  { %6675 = vmatpush1.bf16.msra.mxu0 %v15983_v31  ;;  %6706 = vmatprep.mubr.bf16.mxu0 %v19617_v0  ;;  %v15943_v31 = vcombine.low %v3885_v13, %v3889_v14  ;;  %v3745_v38 = vld [vmem:[#allocation3 + $0x830] sm:$0xff]  ;;  %v3530_v13 = vld [vmem:[#allocation3 + $0x178] sm:$0xff] }
 0x44b   :  { %v20118_v11 = vpop.f32.mrf.mxu0  ;;  %6676 = vmatprep.subr.bf16.mxu0 %v15976_v9  ;;  %v15936_v9 = vcombine.high %v3877_v63, %v3881_v1  ;;  %v3869_v39 = vld [vmem:[#allocation3 + $0xc10] sm:$0xff] }
 0x44c   :  { %6636 = vmatpush1.bf16.msra.mxu1 %v15847_v20  ;;  %v3873_v59 = vld [vmem:[#allocation3 + $0xc30] sm:$0xff]  ;;  %v15807_v20 = vcombine.low %v3749_v24, %v3753_v25 }
 0x44d   :  { %v6384_v30 = vpop.f32.mrf.mxu0  ;;  %6637 = vmatprep.subr.bf16.mxu1 %v15840_v43  ;;  %v15800_v43 = vcombine.high %v3741_v26, %v3745_v38  ;;  %v3861_v45 = vld [vmem:[#allocation3 + $0xbd0] sm:$0xff] }
 0x44e   :  { %6677 = vmatpush1.bf16.msra.mxu0 %v15975_v42  ;;  %v15935_v42 = vcombine.low %v3877_v63, %v3881_v1  ;;  %v3865_v46 = vld [vmem:[#allocation3 + $0xbf0] sm:$0xff]  ;;  %v15799_v30 = vcombine.low %v3741_v26, %v3745_v38  ;;  %v15586_v63 = vcombine.high %v3526_v12, %v3530_v13 }
 0x44f   :  { %v6385_v52 = vpop.f32.mrf.mxu0  ;;  %6678 = vmatprep.subr.bf16.mxu0 %v15968_v61  ;;  %v15928_v61 = vcombine.high %v3869_v39, %v3873_v59  ;;  %v15919_v58 = vcombine.low %v3861_v45, %v3865_v46  ;;  %v3837_v1 = vld [vmem:[#allocation3 + $0xb10] sm:$0xff] }
 0x450   :  { %6638 = vmatpush1.bf16.msra.mxu1 %v15839_v16  ;;  %v15927_v16 = vcombine.low %v3869_v39, %v3873_v59  ;;  %v3853_v52 = vld [vmem:[#allocation3 + $0xb90] sm:$0xff] }
 0x451   :  { %6639 = vmatprep.subr.bf16.mxu1 %v15832_v51  ;;  %v15602_v51 = vcombine.high %v3542_v47, %v3546_v2  ;;  %v3829_v59 = vld [vmem:[#allocation3 + $0xad0] sm:$0xff]  ;;  %v3502_v2 = vld [vmem:[#allocation3 + $0x98] sm:$0xff] }
 0x452   :  { %6679 = vmatpush1.bf16.msra.mxu0 %v15967_v8  ;;  %v15920_v8 = vcombine.high %v3861_v45, %v3865_v46  ;;  %v3821_v46 = vld [vmem:[#allocation3 + $0xa90] sm:$0xff] }
 0x453   :  { %6680 = vmatprep.subr.bf16.mxu0 %v15960_v53  ;;  %v3857_v53 = vld [vmem:[#allocation3 + $0xbb0] sm:$0xff] }
 0x454   :  { %6640 = vmatpush1.bf16.msra.mxu1 %v15831_v7  ;;  %v15912_v7 = vcombine.high %v3853_v52, %v3857_v53  ;;  %v3825_v47 = vld [vmem:[#allocation3 + $0xab0] sm:$0xff] }
 0x455   :  { %6641 = vmatprep.subr.bf16.mxu1 %v15824_v4  ;;  %v3845_v4 = vld [vmem:[#allocation3 + $0xb50] sm:$0xff] }
 0x456   :  { %6681 = vmatpush1.bf16.msra.mxu0 %v15959_v62  ;;  %v15594_v62 = vcombine.high %v3534_v56, %v3538_v57 }
 0x457   :  { %6682 = vmatprep.subr.bf16.mxu0 %v15952_v23  ;;  %v3849_v23 = vld [vmem:[#allocation3 + $0xb70] sm:$0xff] }
 0x458   :  { %6642 = vmatpush1.bf16.msra.mxu1 %v15823_v15  ;;  %v15911_v15 = vcombine.low %v3853_v52, %v3857_v53  ;;  %v15903_v26 = vcombine.low %v3845_v4, %v3849_v23  ;;  %v3813_v53 = vld [vmem:[#allocation3 + $0xa50] sm:$0xff] }
 0x459   :  { %6643 = vmatprep.subr.bf16.mxu1 %v15816_v21  ;;  %v15593_v21 = vcombine.low %v3534_v56, %v3538_v57  ;;  %v3817_v56 = vld [vmem:[#allocation3 + $0xa70] sm:$0xff]  ;;  %v3494_v57 = vld [vmem:[#allocation3 + $0x58] sm:$0xff] }
 0x45a   :  { %6683 = vmatpush1.bf16.msra.mxu0 %v15951_v19 }
 0x45b   :  { %6684 = vmatprep.subr.bf16.mxu0 %v15944_v22  ;;  %v15904_v22 = vcombine.high %v3845_v4, %v3849_v23  ;;  %v15872_v4 = vcombine.high %v3813_v53, %v3817_v56 }
 0x45c   :  { %6644 = vmatpush1.bf16.msra.mxu1 %v15815_v28  ;;  %v3841_v28 = vld [vmem:[#allocation3 + $0xb30] sm:$0xff] }
 0x45d   :  { %6645 = vmatprep.subr.bf16.mxu1 %v15808_v35  ;;  %v3522_v35 = vld [vmem:[#allocation3 + $0x138] sm:$0xff]  ;;  %v15896_v39 = vcombine.high %v3837_v1, %v3841_v28 }
 0x45e   :  { %6685 = vmatpush1.bf16.msra.mxu0 %v15943_v31  ;;  %v3518_v31 = vld [vmem:[#allocation3 + $0x118] sm:$0xff] }
 0x45f   :  { %6686 = vmatprep.subr.bf16.mxu0 %v15936_v9 }
 0x460   :  { %6646 = vmatpush1.bf16.msra.mxu1 %v15807_v20  ;;  %v3833_v20 = vld [vmem:[#allocation3 + $0xaf0] sm:$0xff] }
 0x461   :  { %6647 = vmatprep.subr.bf16.mxu1 %v15800_v43  ;;  %v15895_v43 = vcombine.low %v3837_v1, %v3841_v28  ;;  %v3606_v1 = vld [vmem:[#allocation3 + $0x3d8] sm:$0xff] }
 0x462   :  { %6687 = vmatpush1.bf16.msra.mxu0 %v15935_v42  ;;  %v3510_v42 = vld [vmem:[#allocation3 + $0xd8] sm:$0xff] }
 0x463   :  { %6688 = vmatprep.subr.bf16.mxu0 %v15928_v61  ;;  %v15577_v61 = vcombine.low %v3518_v31, %v3522_v35  ;;  %v3610_v28 = vld [vmem:[#allocation3 + $0x3f8] sm:$0xff] }
 0x464   :  { %6648 = vmatpush1.bf16.msra.mxu1 %v15799_v30  ;;  %v3506_v30 = vld [vmem:[#allocation3 + $0xb8] sm:$0xff] }
 0x465   :  { %6649 = vmatprep.subr.bf16.mxu1 %v15920_v8  ;;  %v15562_v52 = vcombine.high %v3502_v2, %v3506_v30 }
 0x466   :  { %6689 = vmatpush1.bf16.msra.mxu0 %v15927_v16  ;;  %v15887_v16 = vcombine.low %v3829_v59, %v3833_v20 }
 0x467   :  { %6715 = vmatprep.subr.bf16.mxu0 %v15602_v51  ;;  %v6339_v10 = vpop.f32.mrf.mxu1  ;;  %v15880_v51 = vcombine.high %v3821_v46, %v3825_v47 }
 0x468   :  { %v6340_v14 = vadd.f32 %v6339_v10, %v20110_v36  ;;  %6650 = vmatpush2.bf16.msra.mxu1 %v15919_v58  ;;  %v3498_v58 = vld [vmem:[#allocation3 + $0x78] sm:$0xff]  ;;  %v3805_v10 = vld [vmem:[#allocation3 + $0xa10] sm:$0xff] }
 0x469   :  { %6707 = vmatmul.mubr.bf16.vlgmr.msra.gmra.mxu0 %v20086_v50  ;;  %v6341_v19 = vpop.f32.mrf.mxu1  ;;  %6651 = vmatprep.subr.bf16.mxu1 %v15912_v7  ;;  %v15554_v23 = vcombine.high %v3494_v57, %v3498_v58 }
 0x46a   :  { %6716 = vmatpush1.bf16.msra.mxu0 %v15601_v60  ;;  %v6381_v24 = vadd.f32 %v20115_v40, %v6340_v14  ;;  %v6342_v25 = vadd.f32 %v6341_v19, %v20112_v18  ;;  %6747 = vmatprep.mubr.bf16.mxu0 %v20060_v5  ;;  %v15585_v40 = vcombine.low %v3526_v12, %v3530_v13  ;;  %v3514_v5 = vld [vmem:[#allocation3 + $0xf8] sm:$0xff]  ;;  %v3809_v12 = vld [vmem:[#allocation3 + $0xa30] sm:$0xff] }
 0x46b   :  { %6717 = vmatprep.subr.bf16.mxu0 %v15594_v62  ;;  %v6343_v36 = vpop.f32.mrf.mxu1  ;;  %v15578_v18 = vcombine.high %v3518_v31, %v3522_v35  ;;  %v15570_v45 = vcombine.high %v3510_v42, %v3514_v5  ;;  %v15569_v8 = vcombine.low %v3510_v42, %v3514_v5  ;;  %v15879_v60 = vcombine.low %v3821_v46, %v3825_v47  ;;  %v3486_v14 = vld [vmem:[#allocation3 + $0x18] sm:$0xff] }
 0x46c   :  { %17960 = vtanh.f32 %v6381_v24  ;;  %v6383_v9 = vadd.f32 %v20118_v11, %v6342_v25  ;;  %6652 = vmatpush2.bf16.msra.mxu1 %v15911_v15  ;;  %v15888_v11 = vcombine.high %v3829_v59, %v3833_v20  ;;  %v15561_v62 = vcombine.low %v3502_v2, %v3506_v30  ;;  %v3490_v15 = vld [vmem:[#allocation3 + $0x38] sm:$0xff] }
 0x46d   :  { %v6344_v38 = vpop.f32.mrf.mxu1  ;;  %6653 = vmatprep.subr.bf16.mxu1 %v15904_v22  ;;  %v15871_v19 = vcombine.low %v3813_v53, %v3817_v56  ;;  %v15864_v22 = vcombine.high %v3805_v10, %v3809_v12  ;;  %v15546_v24 = vcombine.high %v3486_v14, %v3490_v15  ;;  %v3670_v25 = vld [vmem:[#allocation3 + $0x5d8] sm:$0xff]  ;;  %v15863_v36 = vcombine.low %v3805_v10, %v3809_v12 }
 0x46e   :  { %6718 = vmatpush1.bf16.msra.mxu0 %v15593_v21  ;;  %17962 = vtanh.f32 %v6383_v9  ;;  %v15553_v21 = vcombine.low %v3494_v57, %v3498_v58  ;;  %v15545_v31 = vcombine.low %v3486_v14, %v3490_v15  ;;  %v15666_v9 = vcombine.high %v3606_v1, %v3610_v28  ;;  %v3666_v38 = vld [vmem:[#allocation3 + $0x5b8] sm:$0xff] }
 0x46f   :  { %6719 = vmatprep.subr.bf16.mxu0 %v15586_v63  ;;  %v3674_v63 = vld [vmem:[#allocation3 + $0x5f8] sm:$0xff]  ;;  %v15665_v59 = vcombine.low %v3606_v1, %v3610_v28 }
 0x470   :  { %6654 = vmatpush2.bf16.msra.mxu1 %v15903_v26  ;;  %v15730_v35 = vcombine.high %v3670_v25, %v3674_v63  ;;  %v3662_v26 = vld [vmem:[#allocation3 + $0x598] sm:$0xff] }
 0x471   :  { %6655 = vmatprep.subr.bf16.mxu1 %v15896_v39  ;;  %v3602_v39 = vld [vmem:[#allocation3 + $0x3b8] sm:$0xff]  ;;  %v15722_v20 = vcombine.high %v3662_v26, %v3666_v38  ;;  %v15721_v46 = vcombine.low %v3662_v26, %v3666_v38 }
 0x472   :  { %6720 = vmatpush1.bf16.msra.mxu0 %v15585_v40  ;;  %v3598_v40 = vld [vmem:[#allocation3 + $0x398] sm:$0xff] }
 0x473   :  { %6721 = vmatprep.subr.bf16.mxu0 %v15578_v18  ;;  %v15729_v18 = vcombine.low %v3670_v25, %v3674_v63  ;;  %v15658_v42 = vcombine.high %v3598_v40, %v3602_v39  ;;  %v3654_v5 = vld [vmem:[#allocation3 + $0x558] sm:$0xff]  ;;  %v15657_v47 = vcombine.low %v3598_v40, %v3602_v39 }
 0x474   :  { %6656 = vmatpush2.bf16.msra.mxu1 %v15895_v43  ;;  %v3658_v43 = vld [vmem:[#allocation3 + $0x578] sm:$0xff] }
 0x475   :  { %6657 = vmatprep.subr.bf16.mxu1 %v15888_v11  ;;  %v3594_v11 = vld [vmem:[#allocation3 + $0x378] sm:$0xff]  ;;  %v15714_v2 = vcombine.high %v3654_v5, %v3658_v43  ;;  %v15713_v57 = vcombine.low %v3654_v5, %v3658_v43 }
 0x476   :  { %6722 = vmatpush1.bf16.msra.mxu0 %v15577_v61  ;;  %v3590_v61 = vld [vmem:[#allocation3 + $0x358] sm:$0xff] }
 0x477   :  { %6723 = vmatprep.subr.bf16.mxu0 %v15570_v45  ;;  %v3586_v53 = vld [vmem:[#allocation3 + $0x338] sm:$0xff]  ;;  %v15649_v58 = vcombine.low %v3590_v61, %v3594_v11 }
 0x478   :  { %6658 = vmatpush2.bf16.msra.mxu1 %v15887_v16  ;;  %v15650_v16 = vcombine.high %v3590_v61, %v3594_v11  ;;  %v3574_v10 = vld [vmem:[#allocation3 + $0x2d8] sm:$0xff] }
 0x479   :  { %v20128_v7 = vpop.eup %17960  ;;  %6659 = vmatprep.subr.bf16.mxu1 %v15880_v51  ;;  %v3650_v51 = vld [vmem:[#allocation3 + $0x538] sm:$0xff] }
 0x47a   :  { %6724 = vmatpush1.bf16.msra.mxu0 %v15569_v8  ;;  %v3646_v8 = vld [vmem:[#allocation3 + $0x518] sm:$0xff] }
 0x47b   :  { %6725 = vmatprep.subr.bf16.mxu0 %v15562_v52  ;;  %v20130_v13 = vpop.eup %17962  ;;  %v3582_v52 = vld [vmem:[#allocation3 + $0x318] sm:$0xff]  ;;  %v15705_v14 = vcombine.low %v3646_v8, %v3650_v51 }
 0x47c   :  { %6660 = vmatpush2.bf16.msra.mxu1 %v15879_v60  ;;  %v15706_v60 = vcombine.high %v3646_v8, %v3650_v51  ;;  %v3578_v12 = vld [vmem:[#allocation3 + $0x2f8] sm:$0xff]  ;;  %v15641_v15 = vcombine.low %v3582_v52, %v3586_v53 }
 0x47d   :  { %6661 = vmatprep.subr.bf16.mxu1 %v15872_v4  ;;  %v3638_v4 = vld [vmem:[#allocation3 + $0x4d8] sm:$0xff]  ;;  %v15633_v28 = vcombine.low %v3574_v10, %v3578_v12 }
 0x47e   :  { %6726 = vmatpush1.bf16.msra.mxu0 %v15561_v62  ;;  %v15642_v62 = vcombine.high %v3582_v52, %v3586_v53  ;;  %v3566_v25 = vld [vmem:[#allocation3 + $0x298] sm:$0xff] }
 0x47f   :  { %6727 = vmatprep.subr.bf16.mxu0 %v15554_v23  ;;  %v3642_v23 = vld [vmem:[#allocation3 + $0x4f8] sm:$0xff] }
 0x480   :  { %6662 = vmatpush2.bf16.msra.mxu1 %v15871_v19  ;;  %v15698_v19 = vcombine.high %v3638_v4, %v3642_v23  ;;  %v3570_v63 = vld [vmem:[#allocation3 + $0x2b8] sm:$0xff]  ;;  %v15697_v1 = vcombine.low %v3638_v4, %v3642_v23  ;;  %v3958_v23 = vrot.slane %v20104_v37, %v20014_v49 }
 0x481   :  { %6663 = vmatprep.subr.bf16.mxu1 %v15864_v22  ;;  %v3630_v22 = vld [vmem:[#allocation3 + $0x498] sm:$0xff]  ;;  %v15625_v39 = vcombine.low %v3566_v25, %v3570_v63 }
 0x482   :  { %6728 = vmatpush1.bf16.msra.mxu0 %v15553_v21  ;;  %v15634_v21 = vcombine.high %v3574_v10, %v3578_v12  ;;  %v3558_v26 = vld [vmem:[#allocation3 + $0x258] sm:$0xff] }
 0x483   :  { %6729 = vmatprep.subr.bf16.mxu0 %v15546_v24  ;;  %v3634_v24 = vld [vmem:[#allocation3 + $0x4b8] sm:$0xff] }
 0x484   :  { %6664 = vmatpush2.bf16.msra.mxu1 %v15863_v36  ;;  %v15690_v36 = vcombine.high %v3630_v22, %v3634_v24  ;;  %v3562_v38 = vld [vmem:[#allocation3 + $0x278] sm:$0xff]  ;;  %v15689_v40 = vcombine.low %v3630_v22, %v3634_v24 }
 0x485   :  { %6756 = vmatprep.subr.bf16.mxu1 %v15730_v35  ;;  %v3622_v35 = vld [vmem:[#allocation3 + $0x458] sm:$0xff]  ;;  %v15617_v11 = vcombine.low %v3558_v26, %v3562_v38 }
 0x486   :  { %6730 = vmatpush1.bf16.msra.mxu0 %v15545_v31  ;;  %v15626_v31 = vcombine.high %v3566_v25, %v3570_v63  ;;  %v3550_v5 = vld [vmem:[#allocation3 + $0x218] sm:$0xff] }
 0x487   :  { %6731 = vmatprep.subr.bf16.mxu0 %v15666_v9  ;;  %6666 = vmatmul.mubr.bf16.vlgmr.msra.gmra.mxu1 %v20092_v29  ;;  %v3626_v9 = vld [vmem:[#allocation3 + $0x478] sm:$0xff] }
 0x488   :  { %6757 = vmatpush1.bf16.msra.mxu1 %v15729_v18  ;;  %6788 = vmatprep.mubr.bf16.mxu1 %v20064_v48  ;;  %v15682_v18 = vcombine.high %v3622_v35, %v3626_v9  ;;  %v3554_v43 = vld [vmem:[#allocation3 + $0x238] sm:$0xff]  ;;  %v15681_v61 = vcombine.low %v3622_v35, %v3626_v9 }
 0x489   :  { %v20133_v45 = vpop.f32.mrf.mxu0  ;;  %6758 = vmatprep.subr.bf16.mxu1 %v15722_v20  ;;  %v3614_v20 = vld [vmem:[#allocation3 + $0x418] sm:$0xff]  ;;  %v15609_v53 = vcombine.low %v3550_v5, %v3554_v43 }
 0x48a   :  { %6732 = vmatpush2.bf16.msra.mxu0 %v15665_v59  ;;  %v15618_v59 = vcombine.high %v3558_v26, %v3562_v38  ;;  %v3798_v8 = vld [vmem:[#allocation3 + $0x9d8] sm:$0xff] }
 0x48b   :  { %v20136_v30 = vpop.f32.mrf.mxu0  ;;  %6733 = vmatprep.subr.bf16.mxu0 %v15658_v42  ;;  %v3618_v42 = vld [vmem:[#allocation3 + $0x438] sm:$0xff] }
 0x48c   :  { %6759 = vmatpush1.bf16.msra.mxu1 %v15721_v46  ;;  %v15674_v46 = vcombine.high %v3614_v20, %v3618_v42  ;;  %v3802_v51 = vld [vmem:[#allocation3 + $0x9f8] sm:$0xff]  ;;  %v15673_v52 = vcombine.low %v3614_v20, %v3618_v42 }
 0x48d   :  { %v6425_v56 = vpop.f32.mrf.mxu0  ;;  %6760 = vmatprep.subr.bf16.mxu1 %v15714_v2  ;;  %v3734_v2 = vld [vmem:[#allocation3 + $0x7d8] sm:$0xff]  ;;  %v15857_v12 = vcombine.low %v3798_v8, %v3802_v51 }
 0x48e   :  { %6734 = vmatpush2.bf16.msra.mxu0 %v15657_v47  ;;  %v15610_v47 = vcombine.high %v3550_v5, %v3554_v43  ;;  %v3794_v4 = vld [vmem:[#allocation3 + $0x9b8] sm:$0xff] }
 0x48f   :  { %v6426_v48 = vpop.f32.mrf.mxu0  ;;  %6735 = vmatprep.subr.bf16.mxu0 %v15650_v16  ;;  %v3738_v16 = vld [vmem:[#allocation3 + $0x7f8] sm:$0xff] }
 0x490   :  { %6761 = vmatpush1.bf16.msra.mxu1 %v15713_v57  ;;  %v15794_v56 = vcombine.high %v3734_v2, %v3738_v16  ;;  %v3954_v57 = vrot.slane %v20104_v37, %v20009_v44  ;;  %v3730_v48 = vld [vmem:[#allocation3 + $0x7b8] sm:$0xff]  ;;  %v15793_v10 = vcombine.low %v3734_v2, %v3738_v16 }
 0x491   :  { %6762 = vmatprep.subr.bf16.mxu1 %v15706_v60  ;;  %v3726_v60 = vld [vmem:[#allocation3 + $0x798] sm:$0xff] }
 0x492   :  { %6736 = vmatpush2.bf16.msra.mxu0 %v15649_v58  ;;  %v15858_v58 = vcombine.high %v3798_v8, %v3802_v51  ;;  %v3722_v22 = vld [vmem:[#allocation3 + $0x778] sm:$0xff] }
 0x493   :  { %6737 = vmatprep.subr.bf16.mxu0 %v15642_v62  ;;  %v3790_v62 = vld [vmem:[#allocation3 + $0x998] sm:$0xff] }
 0x494   :  { %6763 = vmatpush1.bf16.msra.mxu1 %v15705_v14  ;;  %v15786_v14 = vcombine.high %v3726_v60, %v3730_v48  ;;  %v3782_v25 = vld [vmem:[#allocation3 + $0x958] sm:$0xff]  ;;  %v15849_v35 = vcombine.low %v3790_v62, %v3794_v4 }
 0x495   :  { %6764 = vmatprep.subr.bf16.mxu1 %v15698_v19  ;;  %v15850_v19 = vcombine.high %v3790_v62, %v3794_v4  ;;  %v3786_v63 = vld [vmem:[#allocation3 + $0x978] sm:$0xff] }
 0x496   :  { %6738 = vmatpush2.bf16.msra.mxu0 %v15641_v15  ;;  %v6422_v15 = vadd.f32 %v20133_v45, %v3954_v57  ;;  %v15842_v26 = vcombine.high %v3782_v25, %v3786_v63  ;;  %v3710_v38 = vld [vmem:[#allocation3 + $0x718] sm:$0xff]  ;;  %v15841_v20 = vcombine.low %v3782_v25, %v3786_v63 }
 0x497   :  { %6739 = vmatprep.subr.bf16.mxu0 %v15634_v21  ;;  %v3718_v21 = vld [vmem:[#allocation3 + $0x758] sm:$0xff] }
 0x498   :  { %6765 = vmatpush1.bf16.msra.mxu1 %v15697_v1  ;;  %v6424_v1 = vadd.f32 %v20136_v30, %v3958_v23  ;;  %v15778_v45 = vcombine.high %v3718_v21, %v3722_v22  ;;  %v3702_v43 = vld [vmem:[#allocation3 + $0x6d8] sm:$0xff] }
 0x499   :  { %6766 = vmatprep.subr.bf16.mxu1 %v15690_v36  ;;  %v15785_v36 = vcombine.low %v3726_v60, %v3730_v48  ;;  %v3694_v8 = vld [vmem:[#allocation3 + $0x698] sm:$0xff] }
 0x49a   :  { %6740 = vmatpush2.bf16.msra.mxu0 %v15633_v28  ;;  %v3698_v51 = vld [vmem:[#allocation3 + $0x6b8] sm:$0xff] }
 0x49b   :  { %6741 = vmatprep.subr.bf16.mxu0 %v15626_v31  ;;  %v3686_v48 = vld [vmem:[#allocation3 + $0x658] sm:$0xff] }
 0x49c   :  { %6767 = vmatpush1.bf16.msra.mxu1 %v15689_v40  ;;  %v3714_v40 = vld [vmem:[#allocation3 + $0x738] sm:$0xff] }
 0x49d   :  { %6768 = vmatprep.subr.bf16.mxu1 %v15682_v18  ;;  %v3778_v18 = vld [vmem:[#allocation3 + $0x938] sm:$0xff]  ;;  %v15770_v42 = vcombine.high %v3710_v38, %v3714_v40 }
 0x49e   :  { %6742 = vmatpush2.bf16.msra.mxu0 %v15625_v39  ;;  %v3774_v39 = vld [vmem:[#allocation3 + $0x918] sm:$0xff] }
 0x49f   :  { %6743 = vmatprep.subr.bf16.mxu0 %v15618_v59  ;;  %v15834_v5 = vcombine.high %v3774_v39, %v3778_v18  ;;  %v3690_v62 = vld [vmem:[#allocation3 + $0x678] sm:$0xff] }
 0x4a0   :  { %6769 = vmatpush1.bf16.msra.mxu1 %v15681_v61  ;;  %v3706_v61 = vld [vmem:[#allocation3 + $0x6f8] sm:$0xff]  ;;  %v15745_v25 = vcombine.low %v3686_v48, %v3690_v62 }
 0x4a1   :  { %6770 = vmatprep.subr.bf16.mxu1 %v15674_v46  ;;  %v3770_v46 = vld [vmem:[#allocation3 + $0x8f8] sm:$0xff]  ;;  %v15762_v2 = vcombine.high %v3702_v43, %v3706_v61 }
 0x4a2   :  { %6744 = vmatpush2.bf16.msra.mxu0 %v15617_v11  ;;  %v3766_v11 = vld [vmem:[#allocation3 + $0x8d8] sm:$0xff] }
 0x4a3   :  { %6745 = vmatprep.subr.bf16.mxu0 %v15610_v47  ;;  %v15769_v47 = vcombine.low %v3710_v38, %v3714_v40  ;;  %v15826_v16 = vcombine.high %v3766_v11, %v3770_v46  ;;  %v15825_v57 = vcombine.low %v3766_v11, %v3770_v46  ;;  %v3750_v4 = vld [vmem:[#allocation3 + $0x858] sm:$0xff] }
 0x4a4   :  { %6771 = vmatpush1.bf16.msra.mxu1 %v15673_v52  ;;  %v3758_v52 = vld [vmem:[#allocation3 + $0x898] sm:$0xff] }
 0x4a5   :  { %6772 = vmatprep.subr.bf16.mxu1 %v15794_v56  ;;  %v15761_v56 = vcombine.low %v3702_v43, %v3706_v61  ;;  %v3754_v23 = vld [vmem:[#allocation3 + $0x878] sm:$0xff] }
 0x4a6   :  { %6746 = vmatpush2.bf16.msra.mxu0 %v15609_v53  ;;  %v3762_v53 = vld [vmem:[#allocation3 + $0x8b8] sm:$0xff]  ;;  %v15809_v63 = vcombine.low %v3750_v4, %v3754_v23 }
 0x4a7   :  { %6797 = vmatprep.subr.bf16.mxu0 %v15858_v58  ;;  %v6462_v24 = vpop.f32.mrf.mxu1  ;;  %v15754_v58 = vcombine.high %v3694_v8, %v3698_v51  ;;  %v15818_v60 = vcombine.high %v3758_v52, %v3762_v53  ;;  %v3910_v11 = vld [vmem:[#allocation3 + $0xd58] sm:$0xff] }
 0x4a8   :  { %v20144_v28 = vadd.f32 %v6462_v24, %v6422_v15  ;;  %6773 = vmatpush2.bf16.msra.mxu1 %v15793_v10  ;;  %v15753_v10 = vcombine.low %v3694_v8, %v3698_v51  ;;  %v15810_v15 = vcombine.high %v3750_v4, %v3754_v23  ;;  %v3746_v24 = vld [vmem:[#allocation3 + $0x838] sm:$0xff] }
 0x4a9   :  { %6748 = vmatmul.mubr.bf16.vlgmr.msra.gmra.mxu0 %v20070_v3  ;;  %v6464_v31 = vpop.f32.mrf.mxu1  ;;  %6774 = vmatprep.subr.bf16.mxu1 %v15786_v14  ;;  %v15777_v3 = vcombine.low %v3718_v21, %v3722_v22  ;;  %v15746_v14 = vcombine.high %v3686_v48, %v3690_v62  ;;  %v3682_v21 = vld [vmem:[#allocation3 + $0x638] sm:$0xff] }
 0x4aa   :  { %6798 = vmatpush1.bf16.msra.mxu0 %v15857_v12  ;;  %v20147_v9 = vadd.f32 %v6464_v31, %v6424_v1  ;;  %6829 = vmatprep.mubr.bf16.mxu0 %v20079_v41  ;;  %v15833_v41 = vcombine.low %v3774_v39, %v3778_v18  ;;  %v15817_v12 = vcombine.low %v3758_v52, %v3762_v53  ;;  %v3742_v22 = vld [vmem:[#allocation3 + $0x818] sm:$0xff] }
 0x4ab   :  { %6799 = vmatprep.subr.bf16.mxu0 %v15850_v19  ;;  %v6466_v30 = vpop.f32.mrf.mxu1  ;;  %v3678_v19 = vld [vmem:[#allocation3 + $0x618] sm:$0xff]  ;;  %v15801_v40 = vcombine.low %v3742_v22, %v3746_v24 }
 0x4ac   :  { %6775 = vmatpush2.bf16.msra.mxu1 %v15785_v36  ;;  %v15738_v1 = vcombine.high %v3678_v19, %v3682_v21  ;;  %v15802_v36 = vcombine.high %v3742_v22, %v3746_v24  ;;  %v3926_v31 = vld [vmem:[#allocation3 + $0xdd8] sm:$0xff]  ;;  %v15737_v38 = vcombine.low %v3678_v19, %v3682_v21 }
 0x4ad   :  { %v6467_v59 = vpop.f32.mrf.mxu1  ;;  %6776 = vmatprep.subr.bf16.mxu1 %v15778_v45  ;;  %v3862_v45 = vld [vmem:[#allocation3 + $0xbd8] sm:$0xff] }
 0x4ae   :  { %6800 = vmatpush1.bf16.msra.mxu0 %v15849_v35  ;;  %v3930_v35 = vld [vmem:[#allocation3 + $0xdf8] sm:$0xff] }
 0x4af   :  { %6801 = vmatprep.subr.bf16.mxu0 %v15842_v26  ;;  %v3866_v26 = vld [vmem:[#allocation3 + $0xbf8] sm:$0xff]  ;;  %v15986_v30 = vcombine.high %v3926_v31, %v3930_v35 }
 0x4b0   :  { %6777 = vmatpush2.bf16.msra.mxu1 %v15777_v3  ;;  %v15922_v39 = vcombine.high %v3862_v45, %v3866_v26  ;;  %v3918_v18 = vld [vmem:[#allocation3 + $0xd98] sm:$0xff] }
 0x4b1   :  { %6778 = vmatprep.subr.bf16.mxu1 %v15770_v42  ;;  %v3922_v3 = vld [vmem:[#allocation3 + $0xdb8] sm:$0xff]  ;;  %v15985_v42 = vcombine.low %v3926_v31, %v3930_v35 }
 0x4b2   :  { %6802 = vmatpush1.bf16.msra.mxu0 %v15841_v20  ;;  %v3854_v59 = vld [vmem:[#allocation3 + $0xb98] sm:$0xff]  ;;  %v15978_v43 = vcombine.high %v3918_v18, %v3922_v3  ;;  %v15977_v8 = vcombine.low %v3918_v18, %v3922_v3 }
 0x4b3   :  { %6803 = vmatprep.subr.bf16.mxu0 %v15834_v5  ;;  %v3858_v20 = vld [vmem:[#allocation3 + $0xbb8] sm:$0xff]  ;;  %v15921_v5 = vcombine.low %v3862_v45, %v3866_v26 }
 0x4b4   :  { %6779 = vmatpush2.bf16.msra.mxu1 %v15769_v47  ;;  %v15914_v61 = vcombine.high %v3854_v59, %v3858_v20  ;;  %v3914_v46 = vld [vmem:[#allocation3 + $0xd78] sm:$0xff]  ;;  %v15913_v53 = vcombine.low %v3854_v59, %v3858_v20 }
 0x4b5   :  { %6780 = vmatprep.subr.bf16.mxu1 %v15762_v2  ;;  %v3850_v2 = vld [vmem:[#allocation3 + $0xb78] sm:$0xff] }
 0x4b6   :  { %6804 = vmatpush1.bf16.msra.mxu0 %v15833_v41  ;;  %v3846_v41 = vld [vmem:[#allocation3 + $0xb58] sm:$0xff] }
 0x4b7   :  { %6805 = vmatprep.subr.bf16.mxu0 %v15826_v16  ;;  %v3906_v48 = vld [vmem:[#allocation3 + $0xd38] sm:$0xff]  ;;  %v15905_v19 = vcombine.low %v3846_v41, %v3850_v2 }
 0x4b8   :  { %6781 = vmatpush2.bf16.msra.mxu1 %v15761_v56  ;;  %v15970_v56 = vcombine.high %v3910_v11, %v3914_v46  ;;  %v3838_v23 = vld [vmem:[#allocation3 + $0xb18] sm:$0xff] }
 0x4b9   :  { %6782 = vmatprep.subr.bf16.mxu1 %v15754_v58  ;;  %v15906_v58 = vcombine.high %v3846_v41, %v3850_v2  ;;  %v3886_v26 = vld [vmem:[#allocation3 + $0xc98] sm:$0xff] }
 0x4ba   :  { %6806 = vmatpush1.bf16.msra.mxu0 %v15825_v57  ;;  %v3878_v20 = vld [vmem:[#allocation3 + $0xc58] sm:$0xff] }
 0x4bb   :  { %6807 = vmatprep.subr.bf16.mxu0 %v15818_v60  ;;  %v3902_v60 = vld [vmem:[#allocation3 + $0xd18] sm:$0xff] }
 0x4bc   :  { %6783 = vmatpush2.bf16.msra.mxu1 %v15753_v10  ;;  %v3842_v10 = vld [vmem:[#allocation3 + $0xb38] sm:$0xff]  ;;  %v15962_v21 = vcombine.high %v3902_v60, %v3906_v48 }
 0x4bd   :  { %6784 = vmatprep.subr.bf16.mxu1 %v15746_v14  ;;  %v15969_v14 = vcombine.low %v3910_v11, %v3914_v46  ;;  %v15898_v24 = vcombine.high %v3838_v23, %v3842_v10  ;;  %v15897_v31 = vcombine.low %v3838_v23, %v3842_v10  ;;  %v3870_v2 = vld [vmem:[#allocation3 + $0xc18] sm:$0xff] }
 0x4be   :  { %6808 = vmatpush1.bf16.msra.mxu0 %v15817_v12 }
 0x4bf   :  { %6809 = vmatprep.subr.bf16.mxu0 %v15810_v15 }
 0x4c0   :  { %6785 = vmatpush2.bf16.msra.mxu1 %v15745_v25  ;;  %v3894_v25 = vld [vmem:[#allocation3 + $0xcd8] sm:$0xff] }
 0x4c1   :  { %6786 = vmatprep.subr.bf16.mxu1 %v15738_v1  ;;  %v3834_v1 = vld [vmem:[#allocation3 + $0xaf8] sm:$0xff] }
 0x4c2   :  { %6810 = vmatpush1.bf16.msra.mxu0 %v15809_v63  ;;  %v3898_v63 = vld [vmem:[#allocation3 + $0xcf8] sm:$0xff] }
 0x4c3   :  { %6811 = vmatprep.subr.bf16.mxu0 %v15802_v36  ;;  %v15961_v36 = vcombine.low %v3902_v60, %v3906_v48  ;;  %v15954_v35 = vcombine.high %v3894_v25, %v3898_v63 }
 0x4c4   :  { %6787 = vmatpush2.bf16.msra.mxu1 %v15737_v38  ;;  %v3890_v38 = vld [vmem:[#allocation3 + $0xcb8] sm:$0xff] }
 0x4c5   :  { %6838 = vmatprep.subr.bf16.mxu1 %v15986_v30  ;;  %v3826_v30 = vld [vmem:[#allocation3 + $0xab8] sm:$0xff]  ;;  %v15946_v3 = vcombine.high %v3886_v26, %v3890_v38 }
 0x4c6   :  { %6812 = vmatpush1.bf16.msra.mxu0 %v15801_v40  ;;  %v3822_v40 = vld [vmem:[#allocation3 + $0xa98] sm:$0xff] }
 0x4c7   :  { %6813 = vmatprep.subr.bf16.mxu0 %v15922_v39  ;;  %v6544_v47 = vpop.f32.mrf.mxu1  ;;  %6789 = vmatmul.mubr.bf16.vlgmr.msra.gmra.mxu1 %v20074_v34  ;;  %v15953_v39 = vcombine.low %v3894_v25, %v3898_v63  ;;  %v15882_v59 = vcombine.high %v3822_v40, %v3826_v30  ;;  %v15881_v11 = vcombine.low %v3822_v40, %v3826_v30 }
 0x4c8   :  { %6839 = vmatpush1.bf16.msra.mxu1 %v15985_v42  ;;  %6870 = vmatprep.mubr.bf16.mxu1 %v19617_v0  ;;  %v3882_v42 = vld [vmem:[#allocation3 + $0xc78] sm:$0xff] }
 0x4c9   :  { %v6503_v16 = vpop.f32.mrf.mxu0  ;;  %v6546_v52 = vpop.f32.mrf.mxu1  ;;  %6840 = vmatprep.subr.bf16.mxu1 %v15978_v43  ;;  %v3818_v43 = vld [vmem:[#allocation3 + $0xa78] sm:$0xff]  ;;  %v15938_v46 = vcombine.high %v3878_v20, %v3882_v42 }
 0x4ca   :  { %v6504_v51 = vadd.f32 %v6503_v16, %v20144_v28  ;;  %6814 = vmatpush2.bf16.msra.mxu0 %v15921_v5  ;;  %v3814_v5 = vld [vmem:[#allocation3 + $0xa58] sm:$0xff] }
 0x4cb   :  { %v6505_v57 = vpop.f32.mrf.mxu0  ;;  %6815 = vmatprep.subr.bf16.mxu0 %v15914_v61  ;;  %v6548_v4 = vpop.f32.mrf.mxu1  ;;  %v15945_v61 = vcombine.low %v3886_v26, %v3890_v38  ;;  %v15874_v41 = vcombine.high %v3814_v5, %v3818_v43  ;;  %v3874_v16 = vld [vmem:[#allocation3 + $0xc38] sm:$0xff] }
 0x4cc   :  { %v6545_v34 = vadd.f32 %v6544_v47, %v6504_v51  ;;  %v6506_v62 = vadd.f32 %v6505_v57, %v20147_v9  ;;  %6841 = vmatpush1.bf16.msra.mxu1 %v15977_v8  ;;  %v3830_v9 = vld [vmem:[#allocation3 + $0xad8] sm:$0xff]  ;;  %v15930_v57 = vcombine.high %v3870_v2, %v3874_v16  ;;  %v15929_v60 = vcombine.low %v3870_v2, %v3874_v16 }
 0x4cd   :  { %v6507_v12 = vpop.f32.mrf.mxu0  ;;  %v6549_v15 = vpop.f32.mrf.mxu1  ;;  %6842 = vmatprep.subr.bf16.mxu1 %v15970_v56  ;;  %v15890_v45 = vcombine.high %v3830_v9, %v3834_v1  ;;  %v15889_v18 = vcombine.low %v3830_v9, %v3834_v1  ;;  %v3806_v8 = vld [vmem:[#allocation3 + $0xa18] sm:$0xff]  ;;  %v15873_v56 = vcombine.low %v3814_v5, %v3818_v43 }
 0x4ce   :  { %17964 = vtanh.f32 %v6545_v34  ;;  %v6547_v28 = vadd.f32 %v6546_v52, %v6506_v62  ;;  %6816 = vmatpush2.bf16.msra.mxu0 %v15913_v53  ;;  %v3810_v51 = vld [vmem:[#allocation3 + $0xa38] sm:$0xff]  ;;  %v15937_v53 = vcombine.low %v3878_v20, %v3882_v42  ;;  %v3962_v34 = vrot.slane %v20104_v37, %v20038_v6 }
 0x4cf   :  { %v6508_v22 = vpop.f32.mrf.mxu0  ;;  %6817 = vmatprep.subr.bf16.mxu0 %v15906_v58  ;;  %v15866_v58 = vcombine.high %v3806_v8, %v3810_v51  ;;  %v15865_v48 = vcombine.low %v3806_v8, %v3810_v51  ;;  %v3966_v62 = vrot.slane %v20104_v37, %v20041_v54 }
 0x4d0   :  { %17966 = vtanh.f32 %v6547_v28  ;;  %6843 = vmatpush1.bf16.msra.mxu1 %v15969_v14 }
 0x4d1   :  { %6844 = vmatprep.subr.bf16.mxu1 %v15962_v21 }
 0x4d2   :  { %6818 = vmatpush2.bf16.msra.mxu0 %v15905_v19 }
 0x4d3   :  { %6819 = vmatprep.subr.bf16.mxu0 %v15898_v24 }
 0x4d4   :  { %6845 = vmatpush1.bf16.msra.mxu1 %v15961_v36 }
 0x4d5   :  { %6846 = vmatprep.subr.bf16.mxu1 %v15954_v35 }
 0x4d6   :  { %6820 = vmatpush2.bf16.msra.mxu0 %v15897_v31 }
 0x4d7   :  { %6821 = vmatprep.subr.bf16.mxu0 %v15890_v45 }
 0x4d8   :  { %6847 = vmatpush1.bf16.msra.mxu1 %v15953_v39 }
 0x4d9   :  { %6848 = vmatprep.subr.bf16.mxu1 %v15946_v3 }
 0x4da   :  { %6822 = vmatpush2.bf16.msra.mxu0 %v15889_v18 }
 0x4db   :  { %v20154_v47 = vpop.eup %17964  ;;  %6823 = vmatprep.subr.bf16.mxu0 %v15882_v59 }
 0x4dc   :  { %6849 = vmatpush1.bf16.msra.mxu1 %v15945_v61 }
 0x4dd   :  { %v20156_v52 = vpop.eup %17966  ;;  %6850 = vmatprep.subr.bf16.mxu1 %v15938_v46  ;;  %v3970_v46 = vrot.slane %v20104_v37, %v20052_v17 }
 0x4de   :  { %6824 = vmatpush2.bf16.msra.mxu0 %v15881_v11  ;;  %v3973_v11 = vsub.s32 7, %v19964_v27 }
 0x4df   :  { %6825 = vmatprep.subr.bf16.mxu0 %v15874_v41 }
 0x4e0   :  { %6851 = vmatpush1.bf16.msra.mxu1 %v15937_v53  ;;  %v3974_v41 = vrot.slane %v20104_v37, %v3973_v11 }
 0x4e1   :  { %6852 = vmatprep.subr.bf16.mxu1 %v15930_v57 }
 0x4e2   :  { %6826 = vmatpush2.bf16.msra.mxu0 %v15873_v56 }
 0x4e3   :  { %6827 = vmatprep.subr.bf16.mxu0 %v15866_v58 }
 0x4e4   :  { %6853 = vmatpush1.bf16.msra.mxu1 %v15929_v60 }
 0x4e6   :  { %6828 = vmatpush2.bf16.msra.mxu0 %v15865_v48 }
 0x4e7   :  { %6871 = vmatmul.mubr.bf16.vlgmr.msra.gmra.mxu1 %v20086_v50 }
 0x4e9   :  { %6830 = vmatmul.mubr.bf16.vlgmr.msra.gmra.mxu0 %v20092_v29 }
 0x507   :  { %v6585_v4 = vpop.f32.mrf.mxu1 }
 0x508   :  { %v6586_v23 = vadd.f32 %v6585_v4, %v3962_v34 }
 0x509   :  { %v6626_v10 = vpop.f32.mrf.mxu0  ;;  %v6587_v12 = vpop.f32.mrf.mxu1 }
 0x50a   :  { %v6627_v14 = vadd.f32 %v6626_v10, %v6586_v23  ;;  %v6588_v28 = vadd.f32 %v6587_v12, %v3966_v62 }
 0x50b   :  { %v6628_v15 = vpop.f32.mrf.mxu0  ;;  %v6589_v19 = vpop.f32.mrf.mxu1 }
 0x50c   :  { %v6629_v21 = vadd.f32 %v6628_v15, %v6588_v28 }
 0x50d   :  { %v6630_v22 = vpop.f32.mrf.mxu0  ;;  %v6590_v24 = vpop.f32.mrf.mxu1 }
 0x50f   :  { %v6631_v50 = vpop.f32.mrf.mxu0 }
 0x529   :  { %v6708_v25 = vpop.f32.mrf.mxu0 }
 0x52b   :  { %v6710_v29 = vpop.f32.mrf.mxu0 }
 0x52d   :  { %v6712_v63 = vpop.f32.mrf.mxu0 }
 0x52f   :  { %v6713_v9 = vpop.f32.mrf.mxu0 }
 0x547   :  { %v6667_v1 = vpop.f32.mrf.mxu1 }
 0x548   :  { %v6668_v36 = vadd.f32 %v6667_v1, %v6627_v14 }
 0x549   :  { %v6669_v31 = vpop.f32.mrf.mxu1 }
 0x54a   :  { %v6709_v35 = vadd.f32 %v6708_v25, %v6668_v36  ;;  %v6670_v45 = vadd.f32 %v6669_v31, %v6629_v21 }
 0x54b   :  { %v6671_v26 = vpop.f32.mrf.mxu1 }
 0x54c   :  { %17968 = vtanh.f32 %v6709_v35  ;;  %v6711_v38 = vadd.f32 %v6710_v29, %v6670_v45 }
 0x54d   :  { %v6672_v40 = vpop.f32.mrf.mxu1 }
 0x54e   :  { %17970 = vtanh.f32 %v6711_v38 }
 0x559   :  { %v20164_v30 = vpop.eup %17968 }
 0x55b   :  { %v20166_v39 = vpop.eup %17970 }
 0x569   :  { %v6749_v18 = vpop.f32.mrf.mxu0 }
 0x56a   :  { %v6750_v2 = vadd.f32 %v6749_v18, %v3970_v46 }
 0x56b   :  { %v6751_v3 = vpop.f32.mrf.mxu0 }
 0x56c   :  { %v6752_v16 = vadd.f32 %v6751_v3, %v3974_v41 }
 0x56d   :  { %v6753_v59 = vpop.f32.mrf.mxu0 }
 0x56f   :  { %v6754_v20 = vpop.f32.mrf.mxu0 }
 0x587   :  { %v6790_v42 = vpop.f32.mrf.mxu1 }
 0x588   :  { %v6791_v8 = vadd.f32 %v6790_v42, %v6750_v2 }
 0x589   :  { %v6792_v5 = vpop.f32.mrf.mxu1 }
 0x58a   :  { %v6793_v56 = vadd.f32 %v6792_v5, %v6752_v16 }
 0x58b   :  { %v6794_v43 = vpop.f32.mrf.mxu1 }
 0x58d   :  { %v6795_v61 = vpop.f32.mrf.mxu1 }
 0x5a7   :  { %v6872_v51 = vpop.f32.mrf.mxu1 }
 0x5a9   :  { %v6831_v53 = vpop.f32.mrf.mxu0  ;;  %v6874_v58 = vpop.f32.mrf.mxu1 }
 0x5aa   :  { %v6832_v57 = vadd.f32 %v6831_v53, %v6791_v8 }
 0x5ab   :  { %v6833_v60 = vpop.f32.mrf.mxu0  ;;  %v6876_v62 = vpop.f32.mrf.mxu1 }
 0x5ac   :  { %v6873_v48 = vadd.f32 %v6872_v51, %v6832_v57  ;;  %v6834_v34 = vadd.f32 %v6833_v60, %v6793_v56 }
 0x5ad   :  { %v6835_v4 = vpop.f32.mrf.mxu0  ;;  %v6877_v23 = vpop.f32.mrf.mxu1 }
 0x5ae   :  { %17972 = vtanh.f32 %v6873_v48  ;;  %v6875_v27 = vadd.f32 %v6874_v58, %v6834_v34 }
 0x5af   :  { %v6836_v10 = vpop.f32.mrf.mxu0 }
 0x5b0   :  { %17974 = vtanh.f32 %v6875_v27 }
 0x5bb   :  { %v20172_v12 = vpop.eup %17972 }
 0x5bd   :  { %v20174_v37 = vpop.eup %17974 }
 0x5be   :  { %19606 = dma.done.wait [#allocation9 + $0x2], 56448 }
 0x5bf   :  { %19607 = vsyncadd [#allocation9 + $0x2], 4294910848  ;;  %v20178_v14 = vpack.c.bf16 %v20130_v13, %v20130_v13  ;;  %v20182_v28 = vpack.c.bf16 %v20156_v52, %v20156_v52  ;;  %v17976_v15 = vld [vmem:[#allocation4 + $0x18c] ss:$28 sps:$4 sm:$0xff]   ;;  %v17982_v24 = vld [vmem:[#allocation4 + $0x154] ss:$28 sps:$4 sm:$0xff]  }
 0x5c0   :  { %v17978_v19 = vld [vmem:[#allocation4 + $0x50c] ss:$28 sps:$4 sm:$0xff]   ;;  %9755 = vmatprep.subr.bf16.mxu1 %v17976_v15  ;;  %v17984_v50 = vld [vmem:[#allocation4 + $0x4d4] ss:$28 sps:$4 sm:$0xff]   ;;  %v17988_v52 = vld [vmem:[#allocation4 + $0x11c] ss:$28 sps:$4 sm:$0xff]  }
 0x5c1   :  { %9787 = vmatprep.mubr.bf16.mxu1 %v20178_v14  ;;  %9828 = vmatprep.mubr.bf16.mxu0 %v20182_v28  ;;  %v17980_v21 = vld [vmem:[#allocation4 + $0x188] ss:$28 sps:$4 sm:$0xff]   ;;  %v17986_v13 = vld [vmem:[#allocation4 + $0x150] ss:$28 sps:$4 sm:$0xff]   ;;  %v17990_v29 = vld [vmem:[#allocation4 + $0x49c] ss:$28 sps:$4 sm:$0xff]  }
 0x5c2   :  { %v17981_v22 = vld [vmem:[#allocation4 + $0x508] ss:$28 sps:$4 sm:$0xff]   ;;  %9796 = vmatprep.subr.bf16.mxu0 %v17978_v19  ;;  %9756 = vmatpush1.bf16.msra.mxu1 %v17980_v21  ;;  %v17987_v25 = vld [vmem:[#allocation4 + $0x4d0] ss:$28 sps:$4 sm:$0xff]   ;;  %v17992_v63 = vld [vmem:[#allocation4 + $0x118] ss:$28 sps:$4 sm:$0xff]  }
 0x5c3   :  { %9797 = vmatpush1.bf16.msra.mxu0 %v17981_v22  ;;  %9757 = vmatprep.subr.bf16.mxu1 %v17982_v24  ;;  %v17993_v9 = vld [vmem:[#allocation4 + $0x498] ss:$28 sps:$4 sm:$0xff]   ;;  %v17994_v1 = vld [vmem:[#allocation4 + $0xe4] ss:$28 sps:$4 sm:$0xff]   ;;  %v18000_v45 = vld [vmem:[#allocation4 + $0xac] ss:$28 sps:$4 sm:$0xff]  }
 0x5c4   :  { %9798 = vmatprep.subr.bf16.mxu0 %v17984_v50  ;;  %v17996_v36 = vld [vmem:[#allocation4 + $0x464] ss:$28 sps:$4 sm:$0xff]   ;;  %v18002_v26 = vld [vmem:[#allocation4 + $0x42c] ss:$28 sps:$4 sm:$0xff]   ;;  %v18006_v18 = vld [vmem:[#allocation4 + $0x74] ss:$28 sps:$4 sm:$0xff]  }
 0x5c5   :  { %v17998_v31 = vld [vmem:[#allocation4 + $0xe0] ss:$28 sps:$4 sm:$0xff]   ;;  %v18004_v38 = vld [vmem:[#allocation4 + $0xa8] ss:$28 sps:$4 sm:$0xff]   ;;  %v18008_v3 = vld [vmem:[#allocation4 + $0x3f4] ss:$28 sps:$4 sm:$0xff]  }
 0x5c6   :  { %9758 = vmatpush1.bf16.msra.mxu1 %v17986_v13  ;;  %v17999_v35 = vld [vmem:[#allocation4 + $0x460] ss:$28 sps:$4 sm:$0xff]   ;;  %v18005_v40 = vld [vmem:[#allocation4 + $0x428] ss:$28 sps:$4 sm:$0xff]   ;;  %v18010_v59 = vld [vmem:[#allocation4 + $0x70] ss:$28 sps:$4 sm:$0xff]  }
 0x5c7   :  { %9799 = vmatpush1.bf16.msra.mxu0 %v17987_v25  ;;  %9759 = vmatprep.subr.bf16.mxu1 %v17988_v52  ;;  %v18011_v20 = vld [vmem:[#allocation4 + $0x3f0] ss:$28 sps:$4 sm:$0xff]   ;;  %v18012_v42 = vld [vmem:[#allocation4 + $0x3c] ss:$28 sps:$4 sm:$0xff]   ;;  %v18018_v11 = vld [vmem:[#allocation4 + $0x4] ss:$28 sps:$4 sm:$0xff]  }
 0x5c8   :  { %9800 = vmatprep.subr.bf16.mxu0 %v17990_v29  ;;  %v18014_v5 = vld [vmem:[#allocation4 + $0x3bc] ss:$28 sps:$4 sm:$0xff]   ;;  %v18020_v46 = vld [vmem:[#allocation4 + $0x384] ss:$28 sps:$4 sm:$0xff]   ;;  %v18024_v16 = vld [vmem:[#allocation4 + $0x34c] ss:$28 sps:$4 sm:$0xff]  }
 0x5c9   :  { %v18016_v43 = vld [vmem:[#allocation4 + $0x38] ss:$28 sps:$4 sm:$0xff]   ;;  %v18022_v41 = vld [vmem:[#allocation4] ss:$28 sps:$4 sm:$0xff]   ;;  %v18026_v8 = vld [vmem:[#allocation4 + $0x6cc] ss:$28 sps:$4 sm:$0xff]  }
 0x5ca   :  { %9760 = vmatpush1.bf16.msra.mxu1 %v17992_v63  ;;  %v18017_v61 = vld [vmem:[#allocation4 + $0x3b8] ss:$28 sps:$4 sm:$0xff]   ;;  %v18023_v2 = vld [vmem:[#allocation4 + $0x380] ss:$28 sps:$4 sm:$0xff]   ;;  %v18028_v51 = vld [vmem:[#allocation4 + $0x348] ss:$28 sps:$4 sm:$0xff]  }
 0x5cb   :  { %9801 = vmatpush1.bf16.msra.mxu0 %v17993_v9  ;;  %9761 = vmatprep.subr.bf16.mxu1 %v17994_v1  ;;  %v18029_v53 = vld [vmem:[#allocation4 + $0x6c8] ss:$28 sps:$4 sm:$0xff]   ;;  %v18030_v56 = vld [vmem:[#allocation4 + $0x314] ss:$28 sps:$4 sm:$0xff]   ;;  %v18036_v48 = vld [vmem:[#allocation4 + $0x2dc] ss:$28 sps:$4 sm:$0xff]  }
 0x5cc   :  { %9802 = vmatprep.subr.bf16.mxu0 %v17996_v36  ;;  %v18032_v57 = vld [vmem:[#allocation4 + $0x694] ss:$28 sps:$4 sm:$0xff]   ;;  %v18038_v34 = vld [vmem:[#allocation4 + $0x65c] ss:$28 sps:$4 sm:$0xff]   ;;  %v18042_v27 = vld [vmem:[#allocation4 + $0x2a4] ss:$28 sps:$4 sm:$0xff]  }
 0x5cd   :  { %v18034_v58 = vld [vmem:[#allocation4 + $0x310] ss:$28 sps:$4 sm:$0xff]   ;;  %v18040_v62 = vld [vmem:[#allocation4 + $0x2d8] ss:$28 sps:$4 sm:$0xff]   ;;  %v18044_v23 = vld [vmem:[#allocation4 + $0x624] ss:$28 sps:$4 sm:$0xff]  }
 0x5ce   :  { %9762 = vmatpush1.bf16.msra.mxu1 %v17998_v31  ;;  %v18035_v60 = vld [vmem:[#allocation4 + $0x690] ss:$28 sps:$4 sm:$0xff]   ;;  %v18041_v4 = vld [vmem:[#allocation4 + $0x658] ss:$28 sps:$4 sm:$0xff]   ;;  %v18046_v10 = vld [vmem:[#allocation4 + $0x2a0] ss:$28 sps:$4 sm:$0xff]  }
 0x5cf   :  { %9803 = vmatpush1.bf16.msra.mxu0 %v17999_v35  ;;  %9763 = vmatprep.subr.bf16.mxu1 %v18000_v45  ;;  %v18047_v15 = vld [vmem:[#allocation4 + $0x620] ss:$28 sps:$4 sm:$0xff]   ;;  %v18048_v19 = vld [vmem:[#allocation4 + $0x26c] ss:$28 sps:$4 sm:$0xff]   ;;  %v18054_v50 = vld [vmem:[#allocation4 + $0x234] ss:$28 sps:$4 sm:$0xff]  }
 0x5d0   :  { %9804 = vmatprep.subr.bf16.mxu0 %v18002_v26  ;;  %v18050_v21 = vld [vmem:[#allocation4 + $0x5ec] ss:$28 sps:$4 sm:$0xff]   ;;  %v18056_v13 = vld [vmem:[#allocation4 + $0x5b4] ss:$28 sps:$4 sm:$0xff]   ;;  %v18060_v29 = vld [vmem:[#allocation4 + $0x1fc] ss:$28 sps:$4 sm:$0xff]  }
 0x5d1   :  { %v18052_v22 = vld [vmem:[#allocation4 + $0x268] ss:$28 sps:$4 sm:$0xff]   ;;  %v18058_v25 = vld [vmem:[#allocation4 + $0x230] ss:$28 sps:$4 sm:$0xff]   ;;  %v18062_v63 = vld [vmem:[#allocation4 + $0x57c] ss:$28 sps:$4 sm:$0xff]  }
 0x5d2   :  { %9764 = vmatpush1.bf16.msra.mxu1 %v18004_v38  ;;  %v18053_v24 = vld [vmem:[#allocation4 + $0x5e8] ss:$28 sps:$4 sm:$0xff]   ;;  %v18059_v52 = vld [vmem:[#allocation4 + $0x5b0] ss:$28 sps:$4 sm:$0xff]   ;;  %v18064_v9 = vld [vmem:[#allocation4 + $0x1f8] ss:$28 sps:$4 sm:$0xff]  }
 0x5d3   :  { %9805 = vmatpush1.bf16.msra.mxu0 %v18005_v40  ;;  %9765 = vmatprep.subr.bf16.mxu1 %v18006_v18  ;;  %v18065_v1 = vld [vmem:[#allocation4 + $0x578] ss:$28 sps:$4 sm:$0xff]   ;;  %v18066_v36 = vld [vmem:[#allocation4 + $0x1c4] ss:$28 sps:$4 sm:$0xff]   ;;  %v18074_v26 = vld [vmem:[#allocation4 + $0x88c] ss:$28 sps:$4 sm:$0xff]   ;;  %v20188_v40 = vpack.c.bf16 %v20128_v7, %v20128_v7  ;;  %v20192_v18 = vpack.c.bf16 %v20154_v47, %v20154_v47  ;;  %v20200_v7 = vpack.c.bf16 %v20174_v37, %v20174_v37 }
 0x5d4   :  { %9806 = vmatprep.subr.bf16.mxu0 %v18008_v3  ;;  %v18068_v31 = vld [vmem:[#allocation4 + $0x544] ss:$28 sps:$4 sm:$0xff]   ;;  %v18077_v38 = vld [vmem:[#allocation4 + $0xc0c] ss:$28 sps:$4 sm:$0xff]  }
 0x5d5   :  { %v18070_v35 = vld [vmem:[#allocation4 + $0x1c0] ss:$28 sps:$4 sm:$0xff]   ;;  %v18072_v3 = vld [vmem:[#allocation4 + $0x888] ss:$28 sps:$4 sm:$0xff]   ;;  %v18078_v47 = vld [vmem:[#allocation4 + $0x850] ss:$28 sps:$4 sm:$0xff]  }
 0x5d6   :  { %9766 = vmatpush1.bf16.msra.mxu1 %v18010_v59  ;;  %v18071_v45 = vld [vmem:[#allocation4 + $0x540] ss:$28 sps:$4 sm:$0xff]   ;;  %v18075_v59 = vld [vmem:[#allocation4 + $0xc08] ss:$28 sps:$4 sm:$0xff]  }
 0x5d7   :  { %9807 = vmatpush1.bf16.msra.mxu0 %v18011_v20  ;;  %9767 = vmatprep.subr.bf16.mxu1 %v18012_v42  ;;  %v18080_v20 = vld [vmem:[#allocation4 + $0x854] ss:$28 sps:$4 sm:$0xff]   ;;  %v18092_v37 = vld [vmem:[#allocation4 + $0x7e4] ss:$28 sps:$4 sm:$0xff]  }
 0x5d8   :  { %9808 = vmatprep.subr.bf16.mxu0 %v18014_v5  ;;  %v18083_v42 = vld [vmem:[#allocation4 + $0xbd4] ss:$28 sps:$4 sm:$0xff]   ;;  %v20196_v5 = vpack.c.bf16 %v20166_v39, %v20166_v39 }
 0x5d9   :  { %v18084_v39 = vld [vmem:[#allocation4 + $0x818] ss:$28 sps:$4 sm:$0xff]  }
 0x5da   :  { %9768 = vmatpush1.bf16.msra.mxu1 %v18016_v43  ;;  %v18081_v43 = vld [vmem:[#allocation4 + $0xbd0] ss:$28 sps:$4 sm:$0xff]  }
 0x5db   :  { %9809 = vmatpush1.bf16.msra.mxu0 %v18017_v61  ;;  %9769 = vmatprep.subr.bf16.mxu1 %v18018_v11  ;;  %v18086_v61 = vld [vmem:[#allocation4 + $0x81c] ss:$28 sps:$4 sm:$0xff]  }
 0x5dc   :  { %9810 = vmatprep.subr.bf16.mxu0 %v18020_v46  ;;  %v18089_v11 = vld [vmem:[#allocation4 + $0xb9c] ss:$28 sps:$4 sm:$0xff]  }
 0x5dd   :  { %v18087_v46 = vld [vmem:[#allocation4 + $0xb98] ss:$28 sps:$4 sm:$0xff]  }
 0x5de   :  { %9770 = vmatpush1.bf16.msra.mxu1 %v18022_v41  ;;  %v18095_v41 = vld [vmem:[#allocation4 + $0xb64] ss:$28 sps:$4 sm:$0xff]  }
 0x5df   :  { %9811 = vmatpush1.bf16.msra.mxu0 %v18023_v2  ;;  %9771 = vmatprep.subr.bf16.mxu1 %v18024_v16  ;;  %v18090_v2 = vld [vmem:[#allocation4 + $0x7e0] ss:$28 sps:$4 sm:$0xff]  }
 0x5e0   :  { %9812 = vmatprep.subr.bf16.mxu0 %v18026_v8  ;;  %v18093_v16 = vld [vmem:[#allocation4 + $0xb60] ss:$28 sps:$4 sm:$0xff]   ;;  %v18098_v8 = vld [vmem:[#allocation4 + $0x7ac] ss:$28 sps:$4 sm:$0xff]  }
 0x5e2   :  { %9772 = vmatpush2.bf16.msra.mxu1 %v18028_v51  ;;  %v18101_v51 = vld [vmem:[#allocation4 + $0xb2c] ss:$28 sps:$4 sm:$0xff]  }
 0x5e3   :  { %9813 = vmatpush2.bf16.msra.mxu0 %v18029_v53  ;;  %9773 = vmatprep.subr.bf16.mxu1 %v18030_v56  ;;  %v18096_v53 = vld [vmem:[#allocation4 + $0x7a8] ss:$28 sps:$4 sm:$0xff]  }
 0x5e4   :  { %9814 = vmatprep.subr.bf16.mxu0 %v18032_v57  ;;  %v18099_v56 = vld [vmem:[#allocation4 + $0xb28] ss:$28 sps:$4 sm:$0xff]   ;;  %v18104_v57 = vld [vmem:[#allocation4 + $0x774] ss:$28 sps:$4 sm:$0xff]  }
 0x5e6   :  { %9774 = vmatpush2.bf16.msra.mxu1 %v18034_v58  ;;  %v18107_v58 = vld [vmem:[#allocation4 + $0xaf4] ss:$28 sps:$4 sm:$0xff]  }
 0x5e7   :  { %9815 = vmatpush2.bf16.msra.mxu0 %v18035_v60  ;;  %9775 = vmatprep.subr.bf16.mxu1 %v18036_v48  ;;  %v18102_v60 = vld [vmem:[#allocation4 + $0x770] ss:$28 sps:$4 sm:$0xff]  }
 0x5e8   :  { %9816 = vmatprep.subr.bf16.mxu0 %v18038_v34  ;;  %v18105_v48 = vld [vmem:[#allocation4 + $0xaf0] ss:$28 sps:$4 sm:$0xff]   ;;  %v18110_v34 = vld [vmem:[#allocation4 + $0x73c] ss:$28 sps:$4 sm:$0xff]  }
 0x5ea   :  { %9776 = vmatpush2.bf16.msra.mxu1 %v18040_v62  ;;  %v18113_v62 = vld [vmem:[#allocation4 + $0xabc] ss:$28 sps:$4 sm:$0xff]  }
 0x5eb   :  { %9817 = vmatpush2.bf16.msra.mxu0 %v18041_v4  ;;  %9777 = vmatprep.subr.bf16.mxu1 %v18042_v27  ;;  %v18108_v4 = vld [vmem:[#allocation4 + $0x738] ss:$28 sps:$4 sm:$0xff]  }
 0x5ec   :  { %9818 = vmatprep.subr.bf16.mxu0 %v18044_v23  ;;  %v18111_v27 = vld [vmem:[#allocation4 + $0xab8] ss:$28 sps:$4 sm:$0xff]   ;;  %v18116_v23 = vld [vmem:[#allocation4 + $0x704] ss:$28 sps:$4 sm:$0xff]  }
 0x5ee   :  { %9778 = vmatpush2.bf16.msra.mxu1 %v18046_v10  ;;  %v18119_v10 = vld [vmem:[#allocation4 + $0xa84] ss:$28 sps:$4 sm:$0xff]  }
 0x5ef   :  { %9819 = vmatpush2.bf16.msra.mxu0 %v18047_v15  ;;  %9779 = vmatprep.subr.bf16.mxu1 %v18048_v19  ;;  %v18114_v15 = vld [vmem:[#allocation4 + $0x700] ss:$28 sps:$4 sm:$0xff]  }
 0x5f0   :  { %9820 = vmatprep.subr.bf16.mxu0 %v18050_v21  ;;  %v18117_v19 = vld [vmem:[#allocation4 + $0xa80] ss:$28 sps:$4 sm:$0xff]   ;;  %v18122_v21 = vld [vmem:[#allocation4 + $0xa4c] ss:$28 sps:$4 sm:$0xff]  }
 0x5f2   :  { %9780 = vmatpush2.bf16.msra.mxu1 %v18052_v22  ;;  %v18125_v22 = vld [vmem:[#allocation4 + $0xdcc] ss:$28 sps:$4 sm:$0xff]  }
 0x5f3   :  { %9821 = vmatpush2.bf16.msra.mxu0 %v18053_v24  ;;  %9781 = vmatprep.subr.bf16.mxu1 %v18054_v50  ;;  %v18120_v24 = vld [vmem:[#allocation4 + $0xa48] ss:$28 sps:$4 sm:$0xff]  }
 0x5f4   :  { %9822 = vmatprep.subr.bf16.mxu0 %v18056_v13  ;;  %v18123_v50 = vld [vmem:[#allocation4 + $0xdc8] ss:$28 sps:$4 sm:$0xff]   ;;  %v18128_v13 = vld [vmem:[#allocation4 + $0xa14] ss:$28 sps:$4 sm:$0xff]  }
 0x5f6   :  { %9782 = vmatpush2.bf16.msra.mxu1 %v18058_v25  ;;  %v18131_v25 = vld [vmem:[#allocation4 + $0xd94] ss:$28 sps:$4 sm:$0xff]  }
 0x5f7   :  { %9823 = vmatpush2.bf16.msra.mxu0 %v18059_v52  ;;  %9783 = vmatprep.subr.bf16.mxu1 %v18060_v29  ;;  %v18126_v52 = vld [vmem:[#allocation4 + $0xa10] ss:$28 sps:$4 sm:$0xff]  }
 0x5f8   :  { %9824 = vmatprep.subr.bf16.mxu0 %v18062_v63  ;;  %v18129_v29 = vld [vmem:[#allocation4 + $0xd90] ss:$28 sps:$4 sm:$0xff]   ;;  %v18134_v63 = vld [vmem:[#allocation4 + $0x9dc] ss:$28 sps:$4 sm:$0xff]  }
 0x5fa   :  { %9784 = vmatpush2.bf16.msra.mxu1 %v18064_v9  ;;  %v18137_v9 = vld [vmem:[#allocation4 + $0xd5c] ss:$28 sps:$4 sm:$0xff]  }
 0x5fb   :  { %9825 = vmatpush2.bf16.msra.mxu0 %v18065_v1  ;;  %9785 = vmatprep.subr.bf16.mxu1 %v18066_v36  ;;  %v18132_v1 = vld [vmem:[#allocation4 + $0x9d8] ss:$28 sps:$4 sm:$0xff]  }
 0x5fc   :  { %9826 = vmatprep.subr.bf16.mxu0 %v18068_v31  ;;  %v18135_v36 = vld [vmem:[#allocation4 + $0xd58] ss:$28 sps:$4 sm:$0xff]   ;;  %v18140_v31 = vld [vmem:[#allocation4 + $0x9a4] ss:$28 sps:$4 sm:$0xff]  }
 0x5fe   :  { %9786 = vmatpush2.bf16.msra.mxu1 %v18070_v35  ;;  %v18143_v35 = vld [vmem:[#allocation4 + $0xd24] ss:$28 sps:$4 sm:$0xff]  }
 0x5ff   :  { %9827 = vmatpush2.bf16.msra.mxu0 %v18071_v45  ;;  %9837 = vmatprep.subr.bf16.mxu1 %v18074_v26  ;;  %v18138_v45 = vld [vmem:[#allocation4 + $0x9a0] ss:$28 sps:$4 sm:$0xff]  }
 0x600   :  { %9878 = vmatprep.subr.bf16.mxu0 %v18077_v38  ;;  %v18141_v26 = vld [vmem:[#allocation4 + $0xd20] ss:$28 sps:$4 sm:$0xff]   ;;  %v18146_v38 = vld [vmem:[#allocation4 + $0x96c] ss:$28 sps:$4 sm:$0xff]  }
 0x601   :  { %9788 = vmatmul.mubr.bf16.vlgmr.msra.gmra.mxu1 %v20188_v40 }
 0x602   :  { %9829 = vmatmul.mubr.bf16.vlgmr.msra.gmra.mxu0 %v20192_v18  ;;  %9838 = vmatpush1.bf16.msra.mxu1 %v18072_v3  ;;  %v18149_v3 = vld [vmem:[#allocation4 + $0xcec] ss:$28 sps:$4 sm:$0xff]  }
 0x603   :  { %9879 = vmatpush1.bf16.msra.mxu0 %v18075_v59  ;;  %9839 = vmatprep.subr.bf16.mxu1 %v18080_v20  ;;  %v18144_v59 = vld [vmem:[#allocation4 + $0x968] ss:$28 sps:$4 sm:$0xff]  }
 0x604   :  { %9880 = vmatprep.subr.bf16.mxu0 %v18083_v42  ;;  %9869 = vmatprep.mubr.bf16.mxu1 %v20196_v5  ;;  %v18147_v20 = vld [vmem:[#allocation4 + $0xce8] ss:$28 sps:$4 sm:$0xff]   ;;  %v18152_v42 = vld [vmem:[#allocation4 + $0x934] ss:$28 sps:$4 sm:$0xff]  }
 0x605   :  { %9910 = vmatprep.mubr.bf16.mxu0 %v20200_v7 }
 0x606   :  { %9840 = vmatpush1.bf16.msra.mxu1 %v18078_v47  ;;  %v18155_v47 = vld [vmem:[#allocation4 + $0xcb4] ss:$28 sps:$4 sm:$0xff]  }
 0x607   :  { %9881 = vmatpush1.bf16.msra.mxu0 %v18081_v43  ;;  %9841 = vmatprep.subr.bf16.mxu1 %v18086_v61  ;;  %v18150_v43 = vld [vmem:[#allocation4 + $0x930] ss:$28 sps:$4 sm:$0xff]  }
 0x608   :  { %9882 = vmatprep.subr.bf16.mxu0 %v18089_v11  ;;  %v18153_v61 = vld [vmem:[#allocation4 + $0xcb0] ss:$28 sps:$4 sm:$0xff]   ;;  %v18158_v11 = vld [vmem:[#allocation4 + $0x8fc] ss:$28 sps:$4 sm:$0xff]  }
 0x60a   :  { %9842 = vmatpush1.bf16.msra.mxu1 %v18084_v39  ;;  %v18161_v39 = vld [vmem:[#allocation4 + $0xc7c] ss:$28 sps:$4 sm:$0xff]  }
 0x60b   :  { %9883 = vmatpush1.bf16.msra.mxu0 %v18087_v46  ;;  %9843 = vmatprep.subr.bf16.mxu1 %v18092_v37  ;;  %v18156_v46 = vld [vmem:[#allocation4 + $0x8f8] ss:$28 sps:$4 sm:$0xff]  }
 0x60c   :  { %9884 = vmatprep.subr.bf16.mxu0 %v18095_v41  ;;  %v18159_v37 = vld [vmem:[#allocation4 + $0xc78] ss:$28 sps:$4 sm:$0xff]   ;;  %v18164_v41 = vld [vmem:[#allocation4 + $0x8c4] ss:$28 sps:$4 sm:$0xff]  }
 0x60e   :  { %9844 = vmatpush1.bf16.msra.mxu1 %v18090_v2  ;;  %v18167_v2 = vld [vmem:[#allocation4 + $0xc44] ss:$28 sps:$4 sm:$0xff]  }
 0x60f   :  { %9885 = vmatpush1.bf16.msra.mxu0 %v18093_v16  ;;  %9845 = vmatprep.subr.bf16.mxu1 %v18098_v8  ;;  %v18162_v16 = vld [vmem:[#allocation4 + $0x8c0] ss:$28 sps:$4 sm:$0xff]  }
 0x610   :  { %9886 = vmatprep.subr.bf16.mxu0 %v18101_v51  ;;  %v18165_v8 = vld [vmem:[#allocation4 + $0xc40] ss:$28 sps:$4 sm:$0xff]   ;;  %v18170_v51 = vld [vmem:[#allocation4 + $0x194] ss:$28 sps:$4 sm:$0xff]  }
 0x612   :  { %9846 = vmatpush1.bf16.msra.mxu1 %v18096_v53  ;;  %v18173_v53 = vld [vmem:[#allocation4 + $0x514] ss:$28 sps:$4 sm:$0xff]  }
 0x613   :  { %9887 = vmatpush1.bf16.msra.mxu0 %v18099_v56  ;;  %9847 = vmatprep.subr.bf16.mxu1 %v18104_v57  ;;  %v20208_v56 = vpack.c.bf16 %v20164_v30, %v20164_v30  ;;  %v20212_v57 = vpack.c.bf16 %v20172_v12, %v20172_v12  ;;  %v18182_v30 = vld [vmem:[#allocation4 + $0x124] ss:$28 sps:$4 sm:$0xff]  }
 0x614   :  { %9888 = vmatprep.subr.bf16.mxu0 %v18107_v58  ;;  %v18168_v58 = vld [vmem:[#allocation4 + $0x190] ss:$28 sps:$4 sm:$0xff]   ;;  %v18185_v12 = vld [vmem:[#allocation4 + $0x4a4] ss:$28 sps:$4 sm:$0xff]  }
 0x616   :  { %9848 = vmatpush1.bf16.msra.mxu1 %v18102_v60  ;;  %v18171_v60 = vld [vmem:[#allocation4 + $0x510] ss:$28 sps:$4 sm:$0xff]  }
 0x617   :  { %9889 = vmatpush1.bf16.msra.mxu0 %v18105_v48  ;;  %9849 = vmatprep.subr.bf16.mxu1 %v18110_v34  ;;  %v18176_v48 = vld [vmem:[#allocation4 + $0x15c] ss:$28 sps:$4 sm:$0xff]  }
 0x618   :  { %9890 = vmatprep.subr.bf16.mxu0 %v18113_v62  ;;  %v18179_v34 = vld [vmem:[#allocation4 + $0x4dc] ss:$28 sps:$4 sm:$0xff]  }
 0x619   :  { %v18174_v62 = vld [vmem:[#allocation4 + $0x158] ss:$28 sps:$4 sm:$0xff]  }
 0x61a   :  { %9850 = vmatpush1.bf16.msra.mxu1 %v18108_v4  ;;  %v18177_v4 = vld [vmem:[#allocation4 + $0x4d8] ss:$28 sps:$4 sm:$0xff]  }
 0x61b   :  { %9891 = vmatpush1.bf16.msra.mxu0 %v18111_v27  ;;  %9851 = vmatprep.subr.bf16.mxu1 %v18116_v23  ;;  %v18180_v27 = vld [vmem:[#allocation4 + $0x120] ss:$28 sps:$4 sm:$0xff]  }
 0x61c   :  { %9892 = vmatprep.subr.bf16.mxu0 %v18119_v10  ;;  %v18183_v23 = vld [vmem:[#allocation4 + $0x4a0] ss:$28 sps:$4 sm:$0xff]   ;;  %v18188_v10 = vld [vmem:[#allocation4 + $0xec] ss:$28 sps:$4 sm:$0xff]  }
 0x61e   :  { %9852 = vmatpush1.bf16.msra.mxu1 %v18114_v15  ;;  %v18191_v15 = vld [vmem:[#allocation4 + $0x46c] ss:$28 sps:$4 sm:$0xff]  }
 0x61f   :  { %9893 = vmatpush1.bf16.msra.mxu0 %v18117_v19  ;;  %9853 = vmatprep.subr.bf16.mxu1 %v18122_v21  ;;  %v18186_v19 = vld [vmem:[#allocation4 + $0xe8] ss:$28 sps:$4 sm:$0xff]  }
 0x620   :  { %9894 = vmatprep.subr.bf16.mxu0 %v18125_v22  ;;  %v18189_v21 = vld [vmem:[#allocation4 + $0x468] ss:$28 sps:$4 sm:$0xff]   ;;  %v18194_v22 = vld [vmem:[#allocation4 + $0xb4] ss:$28 sps:$4 sm:$0xff]  }
 0x622   :  { %9854 = vmatpush2.bf16.msra.mxu1 %v18120_v24  ;;  %v18197_v24 = vld [vmem:[#allocation4 + $0x434] ss:$28 sps:$4 sm:$0xff]  }
 0x623   :  { %9895 = vmatpush2.bf16.msra.mxu0 %v18123_v50  ;;  %9855 = vmatprep.subr.bf16.mxu1 %v18128_v13  ;;  %v18192_v50 = vld [vmem:[#allocation4 + $0xb0] ss:$28 sps:$4 sm:$0xff]  }
 0x624   :  { %9896 = vmatprep.subr.bf16.mxu0 %v18131_v25  ;;  %v18195_v13 = vld [vmem:[#allocation4 + $0x430] ss:$28 sps:$4 sm:$0xff]   ;;  %v18200_v25 = vld [vmem:[#allocation4 + $0x7c] ss:$28 sps:$4 sm:$0xff]  }
 0x626   :  { %9856 = vmatpush2.bf16.msra.mxu1 %v18126_v52  ;;  %v18203_v52 = vld [vmem:[#allocation4 + $0x3fc] ss:$28 sps:$4 sm:$0xff]  }
 0x627   :  { %9897 = vmatpush2.bf16.msra.mxu0 %v18129_v29  ;;  %9857 = vmatprep.subr.bf16.mxu1 %v18134_v63  ;;  %v18198_v29 = vld [vmem:[#allocation4 + $0x78] ss:$28 sps:$4 sm:$0xff]  }
 0x628   :  { %9898 = vmatprep.subr.bf16.mxu0 %v18137_v9  ;;  %v18201_v63 = vld [vmem:[#allocation4 + $0x3f8] ss:$28 sps:$4 sm:$0xff]   ;;  %v18206_v9 = vld [vmem:[#allocation4 + $0x44] ss:$28 sps:$4 sm:$0xff]  }
 0x62a   :  { %9858 = vmatpush2.bf16.msra.mxu1 %v18132_v1  ;;  %v18209_v1 = vld [vmem:[#allocation4 + $0x3c4] ss:$28 sps:$4 sm:$0xff]  }
 0x62b   :  { %9899 = vmatpush2.bf16.msra.mxu0 %v18135_v36  ;;  %9859 = vmatprep.subr.bf16.mxu1 %v18140_v31  ;;  %v18204_v36 = vld [vmem:[#allocation4 + $0x40] ss:$28 sps:$4 sm:$0xff]  }
 0x62c   :  { %9900 = vmatprep.subr.bf16.mxu0 %v18143_v35  ;;  %v18207_v31 = vld [vmem:[#allocation4 + $0x3c0] ss:$28 sps:$4 sm:$0xff]   ;;  %v18212_v35 = vld [vmem:[#allocation4 + $0xc] ss:$28 sps:$4 sm:$0xff]  }
 0x62e   :  { %9860 = vmatpush2.bf16.msra.mxu1 %v18138_v45  ;;  %v18215_v45 = vld [vmem:[#allocation4 + $0x38c] ss:$28 sps:$4 sm:$0xff]  }
 0x62f   :  { %9901 = vmatpush2.bf16.msra.mxu0 %v18141_v26  ;;  %9861 = vmatprep.subr.bf16.mxu1 %v18146_v38  ;;  %v18210_v26 = vld [vmem:[#allocation4 + $0x8] ss:$28 sps:$4 sm:$0xff]  }
 0x630   :  { %9902 = vmatprep.subr.bf16.mxu0 %v18149_v3  ;;  %v18213_v38 = vld [vmem:[#allocation4 + $0x388] ss:$28 sps:$4 sm:$0xff]   ;;  %v18218_v3 = vld [vmem:[#allocation4 + $0x354] ss:$28 sps:$4 sm:$0xff]  }
 0x632   :  { %9862 = vmatpush2.bf16.msra.mxu1 %v18144_v59  ;;  %v18221_v59 = vld [vmem:[#allocation4 + $0x6d4] ss:$28 sps:$4 sm:$0xff]  }
 0x633   :  { %9903 = vmatpush2.bf16.msra.mxu0 %v18147_v20  ;;  %9863 = vmatprep.subr.bf16.mxu1 %v18152_v42  ;;  %v18216_v20 = vld [vmem:[#allocation4 + $0x350] ss:$28 sps:$4 sm:$0xff]  }
 0x634   :  { %9904 = vmatprep.subr.bf16.mxu0 %v18155_v47  ;;  %v18219_v42 = vld [vmem:[#allocation4 + $0x6d0] ss:$28 sps:$4 sm:$0xff]   ;;  %v18224_v47 = vld [vmem:[#allocation4 + $0x31c] ss:$28 sps:$4 sm:$0xff]  }
 0x636   :  { %9864 = vmatpush2.bf16.msra.mxu1 %v18150_v43  ;;  %v18227_v43 = vld [vmem:[#allocation4 + $0x69c] ss:$28 sps:$4 sm:$0xff]  }
 0x637   :  { %9905 = vmatpush2.bf16.msra.mxu0 %v18153_v61  ;;  %9865 = vmatprep.subr.bf16.mxu1 %v18158_v11  ;;  %v18222_v61 = vld [vmem:[#allocation4 + $0x318] ss:$28 sps:$4 sm:$0xff]  }
 0x638   :  { %9906 = vmatprep.subr.bf16.mxu0 %v18161_v39  ;;  %v18225_v11 = vld [vmem:[#allocation4 + $0x698] ss:$28 sps:$4 sm:$0xff]   ;;  %v18230_v39 = vld [vmem:[#allocation4 + $0x2e4] ss:$28 sps:$4 sm:$0xff]  }
 0x63a   :  { %9866 = vmatpush2.bf16.msra.mxu1 %v18156_v46  ;;  %v18233_v46 = vld [vmem:[#allocation4 + $0x664] ss:$28 sps:$4 sm:$0xff]  }
 0x63b   :  { %9907 = vmatpush2.bf16.msra.mxu0 %v18159_v37  ;;  %9867 = vmatprep.subr.bf16.mxu1 %v18164_v41  ;;  %v18228_v37 = vld [vmem:[#allocation4 + $0x2e0] ss:$28 sps:$4 sm:$0xff]  }
 0x63c   :  { %9908 = vmatprep.subr.bf16.mxu0 %v18167_v2  ;;  %v18231_v41 = vld [vmem:[#allocation4 + $0x660] ss:$28 sps:$4 sm:$0xff]   ;;  %v18236_v2 = vld [vmem:[#allocation4 + $0x2ac] ss:$28 sps:$4 sm:$0xff]  }
 0x63e   :  { %9868 = vmatpush2.bf16.msra.mxu1 %v18162_v16  ;;  %v18239_v16 = vld [vmem:[#allocation4 + $0x62c] ss:$28 sps:$4 sm:$0xff]  }
 0x63f   :  { %9909 = vmatpush2.bf16.msra.mxu0 %v18165_v8  ;;  %9919 = vmatprep.subr.bf16.mxu1 %v18170_v51  ;;  %v18234_v8 = vld [vmem:[#allocation4 + $0x2a8] ss:$28 sps:$4 sm:$0xff]  }
 0x640   :  { %9960 = vmatprep.subr.bf16.mxu0 %v18173_v53  ;;  %v18237_v51 = vld [vmem:[#allocation4 + $0x628] ss:$28 sps:$4 sm:$0xff]   ;;  %v18242_v53 = vld [vmem:[#allocation4 + $0x274] ss:$28 sps:$4 sm:$0xff]  }
 0x641   :  { %9870 = vmatmul.mubr.bf16.vlgmr.msra.gmra.mxu1 %v20208_v56 }
 0x642   :  { %9911 = vmatmul.mubr.bf16.vlgmr.msra.gmra.mxu0 %v20212_v57  ;;  %9920 = vmatpush1.bf16.msra.mxu1 %v18168_v58  ;;  %v18245_v58 = vld [vmem:[#allocation4 + $0x5f4] ss:$28 sps:$4 sm:$0xff]  }
 0x643   :  { %9961 = vmatpush1.bf16.msra.mxu0 %v18171_v60  ;;  %9921 = vmatprep.subr.bf16.mxu1 %v18176_v48  ;;  %v18240_v60 = vld [vmem:[#allocation4 + $0x270] ss:$28 sps:$4 sm:$0xff]  }
 0x644   :  { %9962 = vmatprep.subr.bf16.mxu0 %v18179_v34  ;;  %9951 = vmatprep.mubr.bf16.mxu1 %v20178_v14  ;;  %v18243_v48 = vld [vmem:[#allocation4 + $0x5f0] ss:$28 sps:$4 sm:$0xff]   ;;  %v18248_v34 = vld [vmem:[#allocation4 + $0x23c] ss:$28 sps:$4 sm:$0xff]  }
 0x645   :  { %9992 = vmatprep.mubr.bf16.mxu0 %v20182_v28 }
 0x646   :  { %9922 = vmatpush1.bf16.msra.mxu1 %v18174_v62  ;;  %v18251_v62 = vld [vmem:[#allocation4 + $0x5bc] ss:$28 sps:$4 sm:$0xff]  }
 0x647   :  { %9963 = vmatpush1.bf16.msra.mxu0 %v18177_v4  ;;  %9923 = vmatprep.subr.bf16.mxu1 %v18182_v30  ;;  %v18246_v4 = vld [vmem:[#allocation4 + $0x238] ss:$28 sps:$4 sm:$0xff]  }
 0x648   :  { %9964 = vmatprep.subr.bf16.mxu0 %v18185_v12  ;;  %v18249_v30 = vld [vmem:[#allocation4 + $0x5b8] ss:$28 sps:$4 sm:$0xff]   ;;  %v18254_v12 = vld [vmem:[#allocation4 + $0x204] ss:$28 sps:$4 sm:$0xff]  }
 0x64a   :  { %9924 = vmatpush1.bf16.msra.mxu1 %v18180_v27  ;;  %v18257_v27 = vld [vmem:[#allocation4 + $0x584] ss:$28 sps:$4 sm:$0xff]  }
 0x64b   :  { %9965 = vmatpush1.bf16.msra.mxu0 %v18183_v23  ;;  %9925 = vmatprep.subr.bf16.mxu1 %v18188_v10  ;;  %v18252_v23 = vld [vmem:[#allocation4 + $0x200] ss:$28 sps:$4 sm:$0xff]  }
 0x64c   :  { %9966 = vmatprep.subr.bf16.mxu0 %v18191_v15  ;;  %v18255_v10 = vld [vmem:[#allocation4 + $0x580] ss:$28 sps:$4 sm:$0xff]   ;;  %v18260_v15 = vld [vmem:[#allocation4 + $0x1cc] ss:$28 sps:$4 sm:$0xff]  }
 0x64e   :  { %9926 = vmatpush1.bf16.msra.mxu1 %v18186_v19  ;;  %v18263_v19 = vld [vmem:[#allocation4 + $0x54c] ss:$28 sps:$4 sm:$0xff]  }
 0x64f   :  { %9967 = vmatpush1.bf16.msra.mxu0 %v18189_v21  ;;  %9927 = vmatprep.subr.bf16.mxu1 %v18194_v22  ;;  %v18258_v21 = vld [vmem:[#allocation4 + $0x1c8] ss:$28 sps:$4 sm:$0xff]  }
 0x650   :  { %9968 = vmatprep.subr.bf16.mxu0 %v18197_v24  ;;  %v18261_v22 = vld [vmem:[#allocation4 + $0x548] ss:$28 sps:$4 sm:$0xff]   ;;  %v18266_v24 = vld [vmem:[#allocation4 + $0x894] ss:$28 sps:$4 sm:$0xff]  }
 0x652   :  { %9928 = vmatpush1.bf16.msra.mxu1 %v18192_v50  ;;  %v18269_v50 = vld [vmem:[#allocation4 + $0xc14] ss:$28 sps:$4 sm:$0xff]  }
 0x653   :  { %9969 = vmatpush1.bf16.msra.mxu0 %v18195_v13  ;;  %9929 = vmatprep.subr.bf16.mxu1 %v18200_v25  ;;  %v18264_v13 = vld [vmem:[#allocation4 + $0x890] ss:$28 sps:$4 sm:$0xff]  }
 0x654   :  { %9970 = vmatprep.subr.bf16.mxu0 %v18203_v52  ;;  %v18267_v25 = vld [vmem:[#allocation4 + $0xc10] ss:$28 sps:$4 sm:$0xff]   ;;  %v18272_v52 = vld [vmem:[#allocation4 + $0x85c] ss:$28 sps:$4 sm:$0xff]  }
 0x656   :  { %9930 = vmatpush1.bf16.msra.mxu1 %v18198_v29  ;;  %v18275_v29 = vld [vmem:[#allocation4 + $0xbdc] ss:$28 sps:$4 sm:$0xff]  }
 0x657   :  { %9971 = vmatpush1.bf16.msra.mxu0 %v18201_v63  ;;  %9931 = vmatprep.subr.bf16.mxu1 %v18206_v9  ;;  %v18270_v63 = vld [vmem:[#allocation4 + $0x858] ss:$28 sps:$4 sm:$0xff]  }
 0x658   :  { %9972 = vmatprep.subr.bf16.mxu0 %v18209_v1  ;;  %v18273_v9 = vld [vmem:[#allocation4 + $0xbd8] ss:$28 sps:$4 sm:$0xff]   ;;  %v18278_v1 = vld [vmem:[#allocation4 + $0x824] ss:$28 sps:$4 sm:$0xff]  }
 0x65a   :  { %9932 = vmatpush1.bf16.msra.mxu1 %v18204_v36  ;;  %v18281_v36 = vld [vmem:[#allocation4 + $0xba4] ss:$28 sps:$4 sm:$0xff]  }
 0x65b   :  { %9973 = vmatpush1.bf16.msra.mxu0 %v18207_v31  ;;  %9933 = vmatprep.subr.bf16.mxu1 %v18212_v35  ;;  %v18276_v31 = vld [vmem:[#allocation4 + $0x820] ss:$28 sps:$4 sm:$0xff]  }
 0x65c   :  { %9974 = vmatprep.subr.bf16.mxu0 %v18215_v45  ;;  %v18279_v35 = vld [vmem:[#allocation4 + $0xba0] ss:$28 sps:$4 sm:$0xff]   ;;  %v18284_v45 = vld [vmem:[#allocation4 + $0x7ec] ss:$28 sps:$4 sm:$0xff]  }
 0x65e   :  { %9934 = vmatpush1.bf16.msra.mxu1 %v18210_v26  ;;  %v18287_v26 = vld [vmem:[#allocation4 + $0xb6c] ss:$28 sps:$4 sm:$0xff]  }
 0x65f   :  { %9975 = vmatpush1.bf16.msra.mxu0 %v18213_v38  ;;  %9935 = vmatprep.subr.bf16.mxu1 %v18218_v3  ;;  %v18282_v38 = vld [vmem:[#allocation4 + $0x7e8] ss:$28 sps:$4 sm:$0xff]  }
 0x660   :  { %9976 = vmatprep.subr.bf16.mxu0 %v18221_v59  ;;  %v18285_v3 = vld [vmem:[#allocation4 + $0xb68] ss:$28 sps:$4 sm:$0xff]   ;;  %v18290_v59 = vld [vmem:[#allocation4 + $0x7b4] ss:$28 sps:$4 sm:$0xff]  }
 0x662   :  { %9936 = vmatpush2.bf16.msra.mxu1 %v18216_v20  ;;  %v18293_v20 = vld [vmem:[#allocation4 + $0xb34] ss:$28 sps:$4 sm:$0xff]  }
 0x663   :  { %9977 = vmatpush2.bf16.msra.mxu0 %v18219_v42  ;;  %9937 = vmatprep.subr.bf16.mxu1 %v18224_v47  ;;  %v18288_v42 = vld [vmem:[#allocation4 + $0x7b0] ss:$28 sps:$4 sm:$0xff]  }
 0x664   :  { %9978 = vmatprep.subr.bf16.mxu0 %v18227_v43  ;;  %v18291_v47 = vld [vmem:[#allocation4 + $0xb30] ss:$28 sps:$4 sm:$0xff]   ;;  %v18296_v43 = vld [vmem:[#allocation4 + $0x77c] ss:$28 sps:$4 sm:$0xff]  }
 0x666   :  { %9938 = vmatpush2.bf16.msra.mxu1 %v18222_v61  ;;  %v18299_v61 = vld [vmem:[#allocation4 + $0xafc] ss:$28 sps:$4 sm:$0xff]  }
 0x667   :  { %9979 = vmatpush2.bf16.msra.mxu0 %v18225_v11  ;;  %9939 = vmatprep.subr.bf16.mxu1 %v18230_v39  ;;  %v18294_v11 = vld [vmem:[#allocation4 + $0x778] ss:$28 sps:$4 sm:$0xff]  }
 0x668   :  { %9980 = vmatprep.subr.bf16.mxu0 %v18233_v46  ;;  %v18297_v39 = vld [vmem:[#allocation4 + $0xaf8] ss:$28 sps:$4 sm:$0xff]   ;;  %v18302_v46 = vld [vmem:[#allocation4 + $0x744] ss:$28 sps:$4 sm:$0xff]  }
 0x66a   :  { %9940 = vmatpush2.bf16.msra.mxu1 %v18228_v37  ;;  %v18305_v37 = vld [vmem:[#allocation4 + $0xac4] ss:$28 sps:$4 sm:$0xff]  }
 0x66b   :  { %9981 = vmatpush2.bf16.msra.mxu0 %v18231_v41  ;;  %9941 = vmatprep.subr.bf16.mxu1 %v18236_v2  ;;  %v18300_v41 = vld [vmem:[#allocation4 + $0x740] ss:$28 sps:$4 sm:$0xff]  }
 0x66c   :  { %9982 = vmatprep.subr.bf16.mxu0 %v18239_v16  ;;  %v18303_v2 = vld [vmem:[#allocation4 + $0xac0] ss:$28 sps:$4 sm:$0xff]   ;;  %v18308_v16 = vld [vmem:[#allocation4 + $0x70c] ss:$28 sps:$4 sm:$0xff]  }
 0x66e   :  { %9942 = vmatpush2.bf16.msra.mxu1 %v18234_v8  ;;  %v18311_v8 = vld [vmem:[#allocation4 + $0xa8c] ss:$28 sps:$4 sm:$0xff]  }
 0x66f   :  { %9983 = vmatpush2.bf16.msra.mxu0 %v18237_v51  ;;  %9943 = vmatprep.subr.bf16.mxu1 %v18242_v53  ;;  %v18306_v51 = vld [vmem:[#allocation4 + $0x708] ss:$28 sps:$4 sm:$0xff]  }
 0x670   :  { %9984 = vmatprep.subr.bf16.mxu0 %v18245_v58  ;;  %v18309_v53 = vld [vmem:[#allocation4 + $0xa88] ss:$28 sps:$4 sm:$0xff]   ;;  %v18314_v58 = vld [vmem:[#allocation4 + $0xa54] ss:$28 sps:$4 sm:$0xff]  }
 0x672   :  { %9944 = vmatpush2.bf16.msra.mxu1 %v18240_v60  ;;  %v18317_v60 = vld [vmem:[#allocation4 + $0xdd4] ss:$28 sps:$4 sm:$0xff]  }
 0x673   :  { %9985 = vmatpush2.bf16.msra.mxu0 %v18243_v48  ;;  %9945 = vmatprep.subr.bf16.mxu1 %v18248_v34  ;;  %v18312_v48 = vld [vmem:[#allocation4 + $0xa50] ss:$28 sps:$4 sm:$0xff]  }
 0x674   :  { %9986 = vmatprep.subr.bf16.mxu0 %v18251_v62  ;;  %v18315_v34 = vld [vmem:[#allocation4 + $0xdd0] ss:$28 sps:$4 sm:$0xff]   ;;  %v18320_v62 = vld [vmem:[#allocation4 + $0xa1c] ss:$28 sps:$4 sm:$0xff]  }
 0x676   :  { %9946 = vmatpush2.bf16.msra.mxu1 %v18246_v4  ;;  %v18323_v4 = vld [vmem:[#allocation4 + $0xd9c] ss:$28 sps:$4 sm:$0xff]  }
 0x677   :  { %9987 = vmatpush2.bf16.msra.mxu0 %v18249_v30  ;;  %9947 = vmatprep.subr.bf16.mxu1 %v18254_v12  ;;  %v18318_v30 = vld [vmem:[#allocation4 + $0xa18] ss:$28 sps:$4 sm:$0xff]  }
 0x678   :  { %9988 = vmatprep.subr.bf16.mxu0 %v18257_v27  ;;  %v18321_v12 = vld [vmem:[#allocation4 + $0xd98] ss:$28 sps:$4 sm:$0xff]   ;;  %v18326_v27 = vld [vmem:[#allocation4 + $0x9e4] ss:$28 sps:$4 sm:$0xff]  }
 0x67a   :  { %9948 = vmatpush2.bf16.msra.mxu1 %v18252_v23  ;;  %v18329_v23 = vld [vmem:[#allocation4 + $0xd64] ss:$28 sps:$4 sm:$0xff]  }
 0x67b   :  { %9989 = vmatpush2.bf16.msra.mxu0 %v18255_v10  ;;  %9949 = vmatprep.subr.bf16.mxu1 %v18260_v15  ;;  %v18324_v10 = vld [vmem:[#allocation4 + $0x9e0] ss:$28 sps:$4 sm:$0xff]  }
 0x67c   :  { %9990 = vmatprep.subr.bf16.mxu0 %v18263_v19  ;;  %v18327_v15 = vld [vmem:[#allocation4 + $0xd60] ss:$28 sps:$4 sm:$0xff]   ;;  %v18332_v19 = vld [vmem:[#allocation4 + $0x9ac] ss:$28 sps:$4 sm:$0xff]  }
 0x67e   :  { %9950 = vmatpush2.bf16.msra.mxu1 %v18258_v21  ;;  %v18335_v21 = vld [vmem:[#allocation4 + $0xd2c] ss:$28 sps:$4 sm:$0xff]  }
 0x67f   :  { %9991 = vmatpush2.bf16.msra.mxu0 %v18261_v22  ;;  %10001 = vmatprep.subr.bf16.mxu1 %v18266_v24  ;;  %v18330_v22 = vld [vmem:[#allocation4 + $0x9a8] ss:$28 sps:$4 sm:$0xff]  }
 0x680   :  { %10042 = vmatprep.subr.bf16.mxu0 %v18269_v50  ;;  %v18333_v24 = vld [vmem:[#allocation4 + $0xd28] ss:$28 sps:$4 sm:$0xff]   ;;  %v18338_v50 = vld [vmem:[#allocation4 + $0x974] ss:$28 sps:$4 sm:$0xff]  }
 0x681   :  { %9952 = vmatmul.mubr.bf16.vlgmr.msra.gmra.mxu1 %v20188_v40 }
 0x682   :  { %9993 = vmatmul.mubr.bf16.vlgmr.msra.gmra.mxu0 %v20192_v18  ;;  %10002 = vmatpush1.bf16.msra.mxu1 %v18264_v13  ;;  %v18341_v13 = vld [vmem:[#allocation4 + $0xcf4] ss:$28 sps:$4 sm:$0xff]  }
 0x683   :  { %10043 = vmatpush1.bf16.msra.mxu0 %v18267_v25  ;;  %10003 = vmatprep.subr.bf16.mxu1 %v18272_v52  ;;  %v18336_v25 = vld [vmem:[#allocation4 + $0x970] ss:$28 sps:$4 sm:$0xff]  }
 0x684   :  { %10044 = vmatprep.subr.bf16.mxu0 %v18275_v29  ;;  %10033 = vmatprep.mubr.bf16.mxu1 %v20196_v5  ;;  %v18339_v52 = vld [vmem:[#allocation4 + $0xcf0] ss:$28 sps:$4 sm:$0xff]   ;;  %v18344_v29 = vld [vmem:[#allocation4 + $0x93c] ss:$28 sps:$4 sm:$0xff]  }
 0x685   :  { %10074 = vmatprep.mubr.bf16.mxu0 %v20200_v7 }
 0x686   :  { %10004 = vmatpush1.bf16.msra.mxu1 %v18270_v63  ;;  %v18347_v63 = vld [vmem:[#allocation4 + $0xcbc] ss:$28 sps:$4 sm:$0xff]  }
 0x687   :  { %10045 = vmatpush1.bf16.msra.mxu0 %v18273_v9  ;;  %10005 = vmatprep.subr.bf16.mxu1 %v18278_v1  ;;  %v18342_v9 = vld [vmem:[#allocation4 + $0x938] ss:$28 sps:$4 sm:$0xff]  }
 0x688   :  { %10046 = vmatprep.subr.bf16.mxu0 %v18281_v36  ;;  %v18345_v1 = vld [vmem:[#allocation4 + $0xcb8] ss:$28 sps:$4 sm:$0xff]   ;;  %v18350_v36 = vld [vmem:[#allocation4 + $0x904] ss:$28 sps:$4 sm:$0xff]  }
 0x68a   :  { %10006 = vmatpush1.bf16.msra.mxu1 %v18276_v31  ;;  %v18353_v31 = vld [vmem:[#allocation4 + $0xc84] ss:$28 sps:$4 sm:$0xff]  }
 0x68b   :  { %10047 = vmatpush1.bf16.msra.mxu0 %v18279_v35  ;;  %10007 = vmatprep.subr.bf16.mxu1 %v18284_v45  ;;  %v18348_v35 = vld [vmem:[#allocation4 + $0x900] ss:$28 sps:$4 sm:$0xff]  }
 0x68c   :  { %10048 = vmatprep.subr.bf16.mxu0 %v18287_v26  ;;  %v18351_v45 = vld [vmem:[#allocation4 + $0xc80] ss:$28 sps:$4 sm:$0xff]   ;;  %v18356_v26 = vld [vmem:[#allocation4 + $0x8cc] ss:$28 sps:$4 sm:$0xff]  }
 0x68e   :  { %10008 = vmatpush1.bf16.msra.mxu1 %v18282_v38  ;;  %v18359_v38 = vld [vmem:[#allocation4 + $0xc4c] ss:$28 sps:$4 sm:$0xff]  }
 0x68f   :  { %10049 = vmatpush1.bf16.msra.mxu0 %v18285_v3  ;;  %10009 = vmatprep.subr.bf16.mxu1 %v18290_v59  ;;  %v7404_v3 = vld [vmem:[#allocation10 + $0x2] ss:$8 sm:$0xf] }
 0x690   :  { %10050 = vmatprep.subr.bf16.mxu0 %v18293_v20  ;;  %v7405_v59 = vld [vmem:[#allocation10 + $0x2] ss:$8 sm:$0xf0] }
 0x691   :  { %v18354_v20 = vld [vmem:[#allocation4 + $0x8c8] ss:$28 sps:$4 sm:$0xff]  }
 0x692   :  { %10010 = vmatpush1.bf16.msra.mxu1 %v18288_v42  ;;  %v18357_v42 = vld [vmem:[#allocation4 + $0xc48] ss:$28 sps:$4 sm:$0xff]  }
 0x693   :  { %10051 = vmatpush1.bf16.msra.mxu0 %v18291_v47  ;;  %10011 = vmatprep.subr.bf16.mxu1 %v18296_v43  ;;  %v20222_v47 = vor.u32 %v7405_v59, %v7404_v3  ;;  %v18362_v43 = vld [vmem:[#allocation4 + $0x19c] ss:$28 sps:$4 sm:$0xff]   ;;  %v18404_v3 = vld [vmem:[#allocation4 + $0x14] ss:$28 sps:$4 sm:$0xff]  }
 0x694   :  { %10052 = vmatprep.subr.bf16.mxu0 %v18299_v61  ;;  %v18365_v61 = vld [vmem:[#allocation4 + $0x51c] ss:$28 sps:$4 sm:$0xff]   ;;  %v18407_v59 = vld [vmem:[#allocation4 + $0x394] ss:$28 sps:$4 sm:$0xff]  }
 0x696   :  { %10012 = vmatpush1.bf16.msra.mxu1 %v18294_v11  ;;  %v18360_v11 = vld [vmem:[#allocation4 + $0x198] ss:$28 sps:$4 sm:$0xff]  }
 0x697   :  { %10053 = vmatpush1.bf16.msra.mxu0 %v18297_v39  ;;  %10013 = vmatprep.subr.bf16.mxu1 %v18302_v46  ;;  %v7419_v39 = vrot.slane %v20222_v47, %v19967_v32  ;;  %v18363_v46 = vld [vmem:[#allocation4 + $0x518] ss:$28 sps:$4 sm:$0xff]  }
 0x698   :  { %10054 = vmatprep.subr.bf16.mxu0 %v18305_v37  ;;  %v18368_v37 = vld [vmem:[#allocation4 + $0x164] ss:$28 sps:$4 sm:$0xff]  }
 0x69a   :  { %10014 = vmatpush1.bf16.msra.mxu1 %v18300_v41  ;;  %v18371_v41 = vld [vmem:[#allocation4 + $0x4e4] ss:$28 sps:$4 sm:$0xff]  }
 0x69b   :  { %10055 = vmatpush1.bf16.msra.mxu0 %v18303_v2  ;;  %10015 = vmatprep.subr.bf16.mxu1 %v18308_v16  ;;  %v7423_v2 = vrot.slane %v20222_v47, %v19970_v33  ;;  %v18366_v16 = vld [vmem:[#allocation4 + $0x160] ss:$28 sps:$4 sm:$0xff]  }
 0x69c   :  { %10056 = vmatprep.subr.bf16.mxu0 %v18311_v8 }
 0x69e   :  { %10016 = vmatpush1.bf16.msra.mxu1 %v18306_v51 }
 0x69f   :  { %10057 = vmatpush1.bf16.msra.mxu0 %v18309_v53  ;;  %10017 = vmatprep.subr.bf16.mxu1 %v18314_v58  ;;  %v18369_v53 = vld [vmem:[#allocation4 + $0x4e0] ss:$28 sps:$4 sm:$0xff]  }
 0x6a0   :  { %10058 = vmatprep.subr.bf16.mxu0 %v18317_v60  ;;  %v18374_v60 = vld [vmem:[#allocation4 + $0x12c] ss:$28 sps:$4 sm:$0xff]  }
 0x6a2   :  { %10018 = vmatpush2.bf16.msra.mxu1 %v18312_v48 }
 0x6a3   :  { %10059 = vmatpush2.bf16.msra.mxu0 %v18315_v34  ;;  %10019 = vmatprep.subr.bf16.mxu1 %v18320_v62  ;;  %v18377_v62 = vld [vmem:[#allocation4 + $0x4ac] ss:$28 sps:$4 sm:$0xff]  }
 0x6a4   :  { %10060 = vmatprep.subr.bf16.mxu0 %v18323_v4 }
 0x6a6   :  { %10020 = vmatpush2.bf16.msra.mxu1 %v18318_v30 }
 0x6a7   :  { %10061 = vmatpush2.bf16.msra.mxu0 %v18321_v12  ;;  %10021 = vmatprep.subr.bf16.mxu1 %v18326_v27  ;;  %v18372_v12 = vld [vmem:[#allocation4 + $0x128] ss:$28 sps:$4 sm:$0xff]  }
 0x6a8   :  { %10062 = vmatprep.subr.bf16.mxu0 %v18329_v23 }
 0x6aa   :  { %10022 = vmatpush2.bf16.msra.mxu1 %v18324_v10  ;;  %v18375_v10 = vld [vmem:[#allocation4 + $0x4a8] ss:$28 sps:$4 sm:$0xff]  }
 0x6ab   :  { %10063 = vmatpush2.bf16.msra.mxu0 %v18327_v15  ;;  %10023 = vmatprep.subr.bf16.mxu1 %v18332_v19  ;;  %v18380_v19 = vld [vmem:[#allocation4 + $0xf4] ss:$28 sps:$4 sm:$0xff]  }
 0x6ac   :  { %10064 = vmatprep.subr.bf16.mxu0 %v18335_v21 }
 0x6ae   :  { %10024 = vmatpush2.bf16.msra.mxu1 %v18330_v22 }
 0x6af   :  { %10065 = vmatpush2.bf16.msra.mxu0 %v18333_v24  ;;  %10025 = vmatprep.subr.bf16.mxu1 %v18338_v50  ;;  %v18383_v24 = vld [vmem:[#allocation4 + $0x474] ss:$28 sps:$4 sm:$0xff]  }
 0x6b0   :  { %10066 = vmatprep.subr.bf16.mxu0 %v18341_v13  ;;  %v18378_v50 = vld [vmem:[#allocation4 + $0xf0] ss:$28 sps:$4 sm:$0xff]  }
 0x6b1   :  { %v18381_v13 = vld [vmem:[#allocation4 + $0x470] ss:$28 sps:$4 sm:$0xff]  }
 0x6b2   :  { %10026 = vmatpush2.bf16.msra.mxu1 %v18336_v25  ;;  %v18386_v25 = vld [vmem:[#allocation4 + $0xbc] ss:$28 sps:$4 sm:$0xff]  }
 0x6b3   :  { %10067 = vmatpush2.bf16.msra.mxu0 %v18339_v52  ;;  %10027 = vmatprep.subr.bf16.mxu1 %v18344_v29  ;;  %v18389_v52 = vld [vmem:[#allocation4 + $0x43c] ss:$28 sps:$4 sm:$0xff]  }
 0x6b4   :  { %10068 = vmatprep.subr.bf16.mxu0 %v18347_v63  ;;  %v18384_v29 = vld [vmem:[#allocation4 + $0xb8] ss:$28 sps:$4 sm:$0xff]  }
 0x6b5   :  { %v18387_v63 = vld [vmem:[#allocation4 + $0x438] ss:$28 sps:$4 sm:$0xff]  }
 0x6b6   :  { %10028 = vmatpush2.bf16.msra.mxu1 %v18342_v9  ;;  %v18392_v9 = vld [vmem:[#allocation4 + $0x84] ss:$28 sps:$4 sm:$0xff]  }
 0x6b7   :  { %10069 = vmatpush2.bf16.msra.mxu0 %v18345_v1  ;;  %10029 = vmatprep.subr.bf16.mxu1 %v18350_v36  ;;  %v18395_v1 = vld [vmem:[#allocation4 + $0x404] ss:$28 sps:$4 sm:$0xff]  }
 0x6b8   :  { %10070 = vmatprep.subr.bf16.mxu0 %v18353_v31  ;;  %v18390_v36 = vld [vmem:[#allocation4 + $0x80] ss:$28 sps:$4 sm:$0xff]  }
 0x6b9   :  { %v18393_v31 = vld [vmem:[#allocation4 + $0x400] ss:$28 sps:$4 sm:$0xff]  }
 0x6ba   :  { %10030 = vmatpush2.bf16.msra.mxu1 %v18348_v35  ;;  %v18398_v35 = vld [vmem:[#allocation4 + $0x4c] ss:$28 sps:$4 sm:$0xff]  }
 0x6bb   :  { %10071 = vmatpush2.bf16.msra.mxu0 %v18351_v45  ;;  %10031 = vmatprep.subr.bf16.mxu1 %v18356_v26  ;;  %v18401_v45 = vld [vmem:[#allocation4 + $0x3cc] ss:$28 sps:$4 sm:$0xff]  }
 0x6bc   :  { %10072 = vmatprep.subr.bf16.mxu0 %v18359_v38  ;;  %v18396_v26 = vld [vmem:[#allocation4 + $0x48] ss:$28 sps:$4 sm:$0xff]  }
 0x6bd   :  { %v18399_v38 = vld [vmem:[#allocation4 + $0x3c8] ss:$28 sps:$4 sm:$0xff]  }
 0x6be   :  { %10032 = vmatpush2.bf16.msra.mxu1 %v18354_v20  ;;  %v18402_v20 = vld [vmem:[#allocation4 + $0x10] ss:$28 sps:$4 sm:$0xff]  }
 0x6bf   :  { %10073 = vmatpush2.bf16.msra.mxu0 %v18357_v42  ;;  %10083 = vmatprep.subr.bf16.mxu1 %v18362_v43  ;;  %v18405_v42 = vld [vmem:[#allocation4 + $0x390] ss:$28 sps:$4 sm:$0xff]   ;;  %v18410_v43 = vld [vmem:[#allocation4 + $0x35c] ss:$28 sps:$4 sm:$0xff]  }
 0x6c0   :  { %10124 = vmatprep.subr.bf16.mxu0 %v18365_v61  ;;  %v18413_v61 = vld [vmem:[#allocation4 + $0x6dc] ss:$28 sps:$4 sm:$0xff]  }
 0x6c1   :  { %v9789_v8 = vpop.f32.mrf.mxu1  ;;  %10034 = vmatmul.mubr.bf16.vlgmr.msra.gmra.mxu1 %v20208_v56 }
 0x6c2   :  { %v9830_v51 = vpop.f32.mrf.mxu0  ;;  %10075 = vmatmul.mubr.bf16.vlgmr.msra.gmra.mxu0 %v20212_v57  ;;  %v9790_v58 = vadd.f32 %v9789_v8, %v7419_v39  ;;  %10084 = vmatpush1.bf16.msra.mxu1 %v18360_v11  ;;  %v18408_v11 = vld [vmem:[#allocation4 + $0x358] ss:$28 sps:$4 sm:$0xff]   ;;  %v18425_v8 = vld [vmem:[#allocation4 + $0x66c] ss:$28 sps:$4 sm:$0xff]  }
 0x6c3   :  { %10125 = vmatpush1.bf16.msra.mxu0 %v18363_v46  ;;  %v9791_v48 = vpop.f32.mrf.mxu1  ;;  %10085 = vmatprep.subr.bf16.mxu1 %v18368_v37  ;;  %v18411_v39 = vld [vmem:[#allocation4 + $0x6d8] ss:$28 sps:$4 sm:$0xff]   ;;  %v18416_v46 = vld [vmem:[#allocation4 + $0x324] ss:$28 sps:$4 sm:$0xff]  }
 0x6c4   :  { %v9832_v34 = vpop.f32.mrf.mxu0  ;;  %10126 = vmatprep.subr.bf16.mxu0 %v18371_v41  ;;  %v20230_v4 = vadd.f32 %v9830_v51, %v9790_v58  ;;  %v9792_v30 = vadd.f32 %v9791_v48, %v7423_v2  ;;  %10115 = vmatprep.mubr.bf16.mxu1 %v20178_v14  ;;  %v18419_v37 = vld [vmem:[#allocation4 + $0x6a4] ss:$28 sps:$4 sm:$0xff]   ;;  %v18428_v58 = vld [vmem:[#allocation4 + $0x2b4] ss:$28 sps:$4 sm:$0xff]  }
 0x6c5   :  { %10156 = vmatprep.mubr.bf16.mxu0 %v20182_v28  ;;  %v9793_v27 = vpop.f32.mrf.mxu1  ;;  %v18414_v41 = vld [vmem:[#allocation4 + $0x320] ss:$28 sps:$4 sm:$0xff]   ;;  %v18420_v51 = vld [vmem:[#allocation4 + $0x2e8] ss:$28 sps:$4 sm:$0xff]   ;;  %v18426_v48 = vld [vmem:[#allocation4 + $0x2b0] ss:$28 sps:$4 sm:$0xff]  }
 0x6c6   :  { %v9834_v23 = vpop.f32.mrf.mxu0  ;;  %v20234_v15 = vadd.f32 %v9832_v34, %v9792_v30  ;;  %10086 = vmatpush1.bf16.msra.mxu1 %v18366_v16  ;;  %v18417_v2 = vld [vmem:[#allocation4 + $0x6a0] ss:$28 sps:$4 sm:$0xff]   ;;  %v18422_v16 = vld [vmem:[#allocation4 + $0x2ec] ss:$28 sps:$4 sm:$0xff]   ;;  %v18435_v27 = vld [vmem:[#allocation4 + $0x5f8] ss:$28 sps:$4 sm:$0xff]  }
 0x6c7   :  { %10127 = vmatpush1.bf16.msra.mxu0 %v18369_v53  ;;  %v9794_v21 = vpop.f32.mrf.mxu1  ;;  %10087 = vmatprep.subr.bf16.mxu1 %v18374_v60  ;;  %v18423_v53 = vld [vmem:[#allocation4 + $0x668] ss:$28 sps:$4 sm:$0xff]   ;;  %v18431_v60 = vld [vmem:[#allocation4 + $0x634] ss:$28 sps:$4 sm:$0xff]   ;;  %v18437_v30 = vld [vmem:[#allocation4 + $0x5fc] ss:$28 sps:$4 sm:$0xff]  }
 0x6c8   :  { %v9835_v22 = vpop.f32.mrf.mxu0  ;;  %10128 = vmatprep.subr.bf16.mxu0 %v18377_v62  ;;  %v18429_v34 = vld [vmem:[#allocation4 + $0x630] ss:$28 sps:$4 sm:$0xff]   ;;  %v18434_v62 = vld [vmem:[#allocation4 + $0x27c] ss:$28 sps:$4 sm:$0xff]   ;;  %v18440_v23 = vld [vmem:[#allocation4 + $0x244] ss:$28 sps:$4 sm:$0xff]  }
 0x6c9   :  { %v18441_v21 = vld [vmem:[#allocation4 + $0x5c0] ss:$28 sps:$4 sm:$0xff]   ;;  %v18446_v22 = vld [vmem:[#allocation4 + $0x20c] ss:$28 sps:$4 sm:$0xff]  }
 0x6ca   :  { %10088 = vmatpush1.bf16.msra.mxu1 %v18372_v12  ;;  %v18432_v12 = vld [vmem:[#allocation4 + $0x278] ss:$28 sps:$4 sm:$0xff]  }
 0x6cb   :  { %10129 = vmatpush1.bf16.msra.mxu0 %v18375_v10  ;;  %10089 = vmatprep.subr.bf16.mxu1 %v18380_v19  ;;  %v18443_v10 = vld [vmem:[#allocation4 + $0x5c4] ss:$28 sps:$4 sm:$0xff]  }
 0x6cc   :  { %10130 = vmatprep.subr.bf16.mxu0 %v18383_v24  ;;  %v18438_v19 = vld [vmem:[#allocation4 + $0x240] ss:$28 sps:$4 sm:$0xff]   ;;  %v18449_v24 = vld [vmem:[#allocation4 + $0x58c] ss:$28 sps:$4 sm:$0xff]  }
 0x6ce   :  { %10090 = vmatpush1.bf16.msra.mxu1 %v18378_v50  ;;  %v18444_v50 = vld [vmem:[#allocation4 + $0x208] ss:$28 sps:$4 sm:$0xff]  }
 0x6cf   :  { %10131 = vmatpush1.bf16.msra.mxu0 %v18381_v13  ;;  %10091 = vmatprep.subr.bf16.mxu1 %v18386_v25  ;;  %v18447_v13 = vld [vmem:[#allocation4 + $0x588] ss:$28 sps:$4 sm:$0xff]   ;;  %v18452_v25 = vld [vmem:[#allocation4 + $0x1d4] ss:$28 sps:$4 sm:$0xff]  }
 0x6d0   :  { %10132 = vmatprep.subr.bf16.mxu0 %v18389_v52  ;;  %v18455_v52 = vld [vmem:[#allocation4 + $0x554] ss:$28 sps:$4 sm:$0xff]  }
 0x6d2   :  { %10092 = vmatpush1.bf16.msra.mxu1 %v18384_v29  ;;  %v18450_v29 = vld [vmem:[#allocation4 + $0x1d0] ss:$28 sps:$4 sm:$0xff]  }
 0x6d3   :  { %10133 = vmatpush1.bf16.msra.mxu0 %v18387_v63  ;;  %10093 = vmatprep.subr.bf16.mxu1 %v18392_v9  ;;  %v18453_v63 = vld [vmem:[#allocation4 + $0x550] ss:$28 sps:$4 sm:$0xff]   ;;  %v18458_v9 = vld [vmem:[#allocation4 + $0x89c] ss:$28 sps:$4 sm:$0xff]  }
 0x6d4   :  { %10134 = vmatprep.subr.bf16.mxu0 %v18395_v1  ;;  %v18461_v1 = vld [vmem:[#allocation4 + $0xc1c] ss:$28 sps:$4 sm:$0xff]  }
 0x6d6   :  { %10094 = vmatpush1.bf16.msra.mxu1 %v18390_v36  ;;  %v18456_v36 = vld [vmem:[#allocation4 + $0x898] ss:$28 sps:$4 sm:$0xff]  }
 0x6d7   :  { %10135 = vmatpush1.bf16.msra.mxu0 %v18393_v31  ;;  %10095 = vmatprep.subr.bf16.mxu1 %v18398_v35  ;;  %v18459_v31 = vld [vmem:[#allocation4 + $0xc18] ss:$28 sps:$4 sm:$0xff]   ;;  %v18464_v35 = vld [vmem:[#allocation4 + $0x864] ss:$28 sps:$4 sm:$0xff]  }
 0x6d8   :  { %10136 = vmatprep.subr.bf16.mxu0 %v18401_v45  ;;  %v18467_v45 = vld [vmem:[#allocation4 + $0xbe4] ss:$28 sps:$4 sm:$0xff]  }
 0x6da   :  { %10096 = vmatpush1.bf16.msra.mxu1 %v18396_v26 }
 0x6db   :  { %10137 = vmatpush1.bf16.msra.mxu0 %v18399_v38  ;;  %10097 = vmatprep.subr.bf16.mxu1 %v18404_v3 }
 0x6dc   :  { %10138 = vmatprep.subr.bf16.mxu0 %v18407_v59  ;;  %v18462_v59 = vld [vmem:[#allocation4 + $0x860] ss:$28 sps:$4 sm:$0xff]  }
 0x6de   :  { %10098 = vmatpush1.bf16.msra.mxu1 %v18402_v20  ;;  %v18465_v20 = vld [vmem:[#allocation4 + $0xbe0] ss:$28 sps:$4 sm:$0xff]  }
 0x6df   :  { %10139 = vmatpush1.bf16.msra.mxu0 %v18405_v42  ;;  %10099 = vmatprep.subr.bf16.mxu1 %v18410_v43 }
 0x6e0   :  { %10140 = vmatprep.subr.bf16.mxu0 %v18413_v61  ;;  %v18470_v61 = vld [vmem:[#allocation4 + $0x82c] ss:$28 sps:$4 sm:$0xff]  }
 0x6e2   :  { %10100 = vmatpush2.bf16.msra.mxu1 %v18408_v11  ;;  %v18473_v11 = vld [vmem:[#allocation4 + $0xbac] ss:$28 sps:$4 sm:$0xff]  }
 0x6e3   :  { %10141 = vmatpush2.bf16.msra.mxu0 %v18411_v39  ;;  %10101 = vmatprep.subr.bf16.mxu1 %v18416_v46 }
 0x6e4   :  { %10142 = vmatprep.subr.bf16.mxu0 %v18419_v37 }
 0x6e6   :  { %10102 = vmatpush2.bf16.msra.mxu1 %v18414_v41 }
 0x6e7   :  { %10143 = vmatpush2.bf16.msra.mxu0 %v18417_v2  ;;  %10103 = vmatprep.subr.bf16.mxu1 %v18422_v16  ;;  %v18468_v2 = vld [vmem:[#allocation4 + $0x828] ss:$28 sps:$4 sm:$0xff]  }
 0x6e8   :  { %10144 = vmatprep.subr.bf16.mxu0 %v18425_v8  ;;  %v18471_v16 = vld [vmem:[#allocation4 + $0xba8] ss:$28 sps:$4 sm:$0xff]  }
 0x6ea   :  { %10104 = vmatpush2.bf16.msra.mxu1 %v18420_v51 }
 0x6eb   :  { %10145 = vmatpush2.bf16.msra.mxu0 %v18423_v53  ;;  %10105 = vmatprep.subr.bf16.mxu1 %v18428_v58  ;;  %v18476_v53 = vld [vmem:[#allocation4 + $0x7f4] ss:$28 sps:$4 sm:$0xff]  }
 0x6ec   :  { %10146 = vmatprep.subr.bf16.mxu0 %v18431_v60  ;;  %v18479_v58 = vld [vmem:[#allocation4 + $0xb74] ss:$28 sps:$4 sm:$0xff]  }
 0x6ed   :  { %v18477_v60 = vld [vmem:[#allocation4 + $0xb70] ss:$28 sps:$4 sm:$0xff]  }
 0x6ee   :  { %10106 = vmatpush2.bf16.msra.mxu1 %v18426_v48  ;;  %v18482_v48 = vld [vmem:[#allocation4 + $0x7bc] ss:$28 sps:$4 sm:$0xff]  }
 0x6ef   :  { %10147 = vmatpush2.bf16.msra.mxu0 %v18429_v34  ;;  %10107 = vmatprep.subr.bf16.mxu1 %v18434_v62  ;;  %v18485_v34 = vld [vmem:[#allocation4 + $0xb3c] ss:$28 sps:$4 sm:$0xff]  }
 0x6f0   :  { %10148 = vmatprep.subr.bf16.mxu0 %v18437_v30  ;;  %v18480_v62 = vld [vmem:[#allocation4 + $0x7b8] ss:$28 sps:$4 sm:$0xff]  }
 0x6f1   :  { %v18483_v30 = vld [vmem:[#allocation4 + $0xb38] ss:$28 sps:$4 sm:$0xff]  }
 0x6f2   :  { %10108 = vmatpush2.bf16.msra.mxu1 %v18432_v12  ;;  %v18488_v12 = vld [vmem:[#allocation4 + $0x784] ss:$28 sps:$4 sm:$0xff]  }
 0x6f3   :  { %10149 = vmatpush2.bf16.msra.mxu0 %v18435_v27  ;;  %10109 = vmatprep.subr.bf16.mxu1 %v18440_v23  ;;  %v18491_v27 = vld [vmem:[#allocation4 + $0xb04] ss:$28 sps:$4 sm:$0xff]  }
 0x6f4   :  { %10150 = vmatprep.subr.bf16.mxu0 %v18443_v10  ;;  %v18486_v23 = vld [vmem:[#allocation4 + $0x780] ss:$28 sps:$4 sm:$0xff]  }
 0x6f5   :  { %v18489_v10 = vld [vmem:[#allocation4 + $0xb00] ss:$28 sps:$4 sm:$0xff]  }
 0x6f6   :  { %10110 = vmatpush2.bf16.msra.mxu1 %v18438_v19 }
 0x6f7   :  { %10151 = vmatpush2.bf16.msra.mxu0 %v18441_v21  ;;  %10111 = vmatprep.subr.bf16.mxu1 %v18446_v22  ;;  %v18494_v21 = vld [vmem:[#allocation4 + $0x74c] ss:$28 sps:$4 sm:$0xff]  }
 0x6f8   :  { %10152 = vmatprep.subr.bf16.mxu0 %v18449_v24  ;;  %v18497_v22 = vld [vmem:[#allocation4 + $0xacc] ss:$28 sps:$4 sm:$0xff]  }
 0x6fa   :  { %10112 = vmatpush2.bf16.msra.mxu1 %v18444_v50  ;;  %v18492_v50 = vld [vmem:[#allocation4 + $0x748] ss:$28 sps:$4 sm:$0xff]  }
 0x6fb   :  { %10153 = vmatpush2.bf16.msra.mxu0 %v18447_v13  ;;  %10113 = vmatprep.subr.bf16.mxu1 %v18452_v25  ;;  %v18495_v13 = vld [vmem:[#allocation4 + $0xac8] ss:$28 sps:$4 sm:$0xff]   ;;  %v18500_v25 = vld [vmem:[#allocation4 + $0x714] ss:$28 sps:$4 sm:$0xff]  }
 0x6fc   :  { %10154 = vmatprep.subr.bf16.mxu0 %v18455_v52  ;;  %v18503_v52 = vld [vmem:[#allocation4 + $0xa94] ss:$28 sps:$4 sm:$0xff]  }
 0x6fe   :  { %10114 = vmatpush2.bf16.msra.mxu1 %v18450_v29  ;;  %v18498_v29 = vld [vmem:[#allocation4 + $0x710] ss:$28 sps:$4 sm:$0xff]  }
 0x6ff   :  { %10155 = vmatpush2.bf16.msra.mxu0 %v18453_v63  ;;  %10165 = vmatprep.subr.bf16.mxu1 %v18458_v9  ;;  %v18501_v63 = vld [vmem:[#allocation4 + $0xa90] ss:$28 sps:$4 sm:$0xff]   ;;  %v18506_v9 = vld [vmem:[#allocation4 + $0xa5c] ss:$28 sps:$4 sm:$0xff]  }
 0x700   :  { %10206 = vmatprep.subr.bf16.mxu0 %v18461_v1  ;;  %v18509_v1 = vld [vmem:[#allocation4 + $0xddc] ss:$28 sps:$4 sm:$0xff]  }
 0x701   :  { %v9871_v26 = vpop.f32.mrf.mxu1  ;;  %10116 = vmatmul.mubr.bf16.vlgmr.msra.gmra.mxu1 %v20188_v40 }
 0x702   :  { %v9912_v38 = vpop.f32.mrf.mxu0  ;;  %10157 = vmatmul.mubr.bf16.vlgmr.msra.gmra.mxu0 %v20192_v18  ;;  %v9872_v3 = vadd.f32 %v9871_v26, %v20230_v4  ;;  %10166 = vmatpush1.bf16.msra.mxu1 %v18456_v36  ;;  %v18504_v36 = vld [vmem:[#allocation4 + $0xa58] ss:$28 sps:$4 sm:$0xff]   ;;  %v18510_v26 = vld [vmem:[#allocation4 + $0xa20] ss:$28 sps:$4 sm:$0xff]  }
 0x703   :  { %10207 = vmatpush1.bf16.msra.mxu0 %v18459_v31  ;;  %v9873_v42 = vpop.f32.mrf.mxu1  ;;  %10167 = vmatprep.subr.bf16.mxu1 %v18464_v35  ;;  %v18507_v31 = vld [vmem:[#allocation4 + $0xdd8] ss:$28 sps:$4 sm:$0xff]   ;;  %v18512_v35 = vld [vmem:[#allocation4 + $0xa24] ss:$28 sps:$4 sm:$0xff]  }
 0x704   :  { %v9914_v43 = vpop.f32.mrf.mxu0  ;;  %10208 = vmatprep.subr.bf16.mxu0 %v18467_v45  ;;  %v9913_v39 = vadd.f32 %v9912_v38, %v9872_v3  ;;  %v9874_v46 = vadd.f32 %v9873_v42, %v20234_v15  ;;  %10197 = vmatprep.mubr.bf16.mxu1 %v20196_v5  ;;  %v18474_v15 = vld [vmem:[#allocation4 + $0x7f0] ss:$28 sps:$4 sm:$0xff]   ;;  %v18515_v45 = vld [vmem:[#allocation4 + $0xda4] ss:$28 sps:$4 sm:$0xff]  }
 0x705   :  { %10238 = vmatprep.mubr.bf16.mxu0 %v20200_v7  ;;  %v9875_v37 = vpop.f32.mrf.mxu1  ;;  %v18513_v38 = vld [vmem:[#allocation4 + $0xda0] ss:$28 sps:$4 sm:$0xff]   ;;  %v18518_v3 = vld [vmem:[#allocation4 + $0x9ec] ss:$28 sps:$4 sm:$0xff]  }
 0x706   :  { %v9916_v41 = vpop.f32.mrf.mxu0  ;;  %18616 = vtanh.f32 %v9913_v39  ;;  %v9915_v4 = vadd.f32 %v9914_v43, %v9874_v46  ;;  %10168 = vmatpush1.bf16.msra.mxu1 %v18462_v59  ;;  %v18521_v59 = vld [vmem:[#allocation4 + $0xd6c] ss:$28 sps:$4 sm:$0xff]   ;;  %v18524_v43 = vld [vmem:[#allocation4 + $0x9b4] ss:$28 sps:$4 sm:$0xff]   ;;  %v18530_v46 = vld [vmem:[#allocation4 + $0x97c] ss:$28 sps:$4 sm:$0xff]  }
 0x707   :  { %10209 = vmatpush1.bf16.msra.mxu0 %v18465_v20  ;;  %v9876_v8 = vpop.f32.mrf.mxu1  ;;  %10169 = vmatprep.subr.bf16.mxu1 %v18470_v61  ;;  %v18516_v20 = vld [vmem:[#allocation4 + $0x9e8] ss:$28 sps:$4 sm:$0xff]   ;;  %v18527_v61 = vld [vmem:[#allocation4 + $0xd34] ss:$28 sps:$4 sm:$0xff]   ;;  %v18533_v37 = vld [vmem:[#allocation4 + $0xcfc] ss:$28 sps:$4 sm:$0xff]  }
 0x708   :  { %v9917_v51 = vpop.f32.mrf.mxu0  ;;  %10210 = vmatprep.subr.bf16.mxu0 %v18473_v11  ;;  %18618 = vtanh.f32 %v9915_v4  ;;  %v18519_v42 = vld [vmem:[#allocation4 + $0xd68] ss:$28 sps:$4 sm:$0xff]   ;;  %v18522_v11 = vld [vmem:[#allocation4 + $0x9b0] ss:$28 sps:$4 sm:$0xff]   ;;  %v18528_v41 = vld [vmem:[#allocation4 + $0x978] ss:$28 sps:$4 sm:$0xff]  }
 0x709   :  { %v18525_v39 = vld [vmem:[#allocation4 + $0xd30] ss:$28 sps:$4 sm:$0xff]   ;;  %v18531_v4 = vld [vmem:[#allocation4 + $0xcf8] ss:$28 sps:$4 sm:$0xff]   ;;  %v18534_v8 = vld [vmem:[#allocation4 + $0x940] ss:$28 sps:$4 sm:$0xff]  }
 0x70a   :  { %10170 = vmatpush1.bf16.msra.mxu1 %v18468_v2  ;;  %v18536_v2 = vld [vmem:[#allocation4 + $0x944] ss:$28 sps:$4 sm:$0xff]  }
 0x70b   :  { %10211 = vmatpush1.bf16.msra.mxu0 %v18471_v16  ;;  %10171 = vmatprep.subr.bf16.mxu1 %v18476_v53  ;;  %v18539_v16 = vld [vmem:[#allocation4 + $0xcc4] ss:$28 sps:$4 sm:$0xff]   ;;  %v18542_v53 = vld [vmem:[#allocation4 + $0x90c] ss:$28 sps:$4 sm:$0xff]  }
 0x70c   :  { %10212 = vmatprep.subr.bf16.mxu0 %v18479_v58  ;;  %v18537_v51 = vld [vmem:[#allocation4 + $0xcc0] ss:$28 sps:$4 sm:$0xff]   ;;  %v18545_v58 = vld [vmem:[#allocation4 + $0xc8c] ss:$28 sps:$4 sm:$0xff]  }
 0x70e   :  { %10172 = vmatpush1.bf16.msra.mxu1 %v18474_v15  ;;  %v18540_v15 = vld [vmem:[#allocation4 + $0x908] ss:$28 sps:$4 sm:$0xff]  }
 0x70f   :  { %10213 = vmatpush1.bf16.msra.mxu0 %v18477_v60  ;;  %10173 = vmatprep.subr.bf16.mxu1 %v18482_v48  ;;  %v18543_v60 = vld [vmem:[#allocation4 + $0xc88] ss:$28 sps:$4 sm:$0xff]   ;;  %v18548_v48 = vld [vmem:[#allocation4 + $0x8d4] ss:$28 sps:$4 sm:$0xff]  }
 0x710   :  { %10214 = vmatprep.subr.bf16.mxu0 %v18485_v34  ;;  %v18551_v34 = vld [vmem:[#allocation4 + $0xc54] ss:$28 sps:$4 sm:$0xff]  }
 0x712   :  { %10174 = vmatpush1.bf16.msra.mxu1 %v18480_v62  ;;  %v18546_v62 = vld [vmem:[#allocation4 + $0x8d0] ss:$28 sps:$4 sm:$0xff]  }
 0x713   :  { %10215 = vmatpush1.bf16.msra.mxu0 %v18483_v30  ;;  %v20242_v19 = vpop.eup %18616  ;;  %10175 = vmatprep.subr.bf16.mxu1 %v18488_v12  ;;  %v18549_v30 = vld [vmem:[#allocation4 + $0xc50] ss:$28 sps:$4 sm:$0xff]   ;;  %v18552_v12 = vld [vmem:[#allocation4 + $0x360] ss:$28 sps:$4 sm:$0xff]  }
 0x714   :  { %10216 = vmatprep.subr.bf16.mxu0 %v18491_v27  ;;  %v18553_v27 = vld [vmem:[#allocation4 + $0x6e0] ss:$28 sps:$4 sm:$0xff]  }
 0x715   :  { %v20244_v24 = vpop.eup %18618 }
 0x716   :  { %10176 = vmatpush1.bf16.msra.mxu1 %v18486_v23  ;;  %v7427_v23 = vrot.slane %v20222_v47, %v20009_v44 }
 0x717   :  { %10217 = vmatpush1.bf16.msra.mxu0 %v18489_v10  ;;  %10177 = vmatprep.subr.bf16.mxu1 %v18494_v21  ;;  %v18554_v10 = vld [vmem:[#allocation4 + $0x1a0] ss:$28 sps:$4 sm:$0xff]  }
 0x718   :  { %10218 = vmatprep.subr.bf16.mxu0 %v18497_v22  ;;  %v18555_v21 = vld [vmem:[#allocation4 + $0x520] ss:$28 sps:$4 sm:$0xff]   ;;  %v18556_v22 = vld [vmem:[#allocation4 + $0x328] ss:$28 sps:$4 sm:$0xff]  }
 0x71a   :  { %10178 = vmatpush1.bf16.msra.mxu1 %v18492_v50  ;;  %v18557_v50 = vld [vmem:[#allocation4 + $0x6a8] ss:$28 sps:$4 sm:$0xff]  }
 0x71b   :  { %10219 = vmatpush1.bf16.msra.mxu0 %v18495_v13  ;;  %10179 = vmatprep.subr.bf16.mxu1 %v18500_v25  ;;  %v7431_v13 = vrot.slane %v20222_v47, %v20014_v49 }
 0x71c   :  { %10220 = vmatprep.subr.bf16.mxu0 %v18503_v52 }
 0x71e   :  { %10180 = vmatpush1.bf16.msra.mxu1 %v18498_v29 }
 0x71f   :  { %10221 = vmatpush1.bf16.msra.mxu0 %v18501_v63  ;;  %10181 = vmatprep.subr.bf16.mxu1 %v18506_v9  ;;  %v18558_v63 = vld [vmem:[#allocation4 + $0x168] ss:$28 sps:$4 sm:$0xff]  }
 0x720   :  { %10222 = vmatprep.subr.bf16.mxu0 %v18509_v1  ;;  %v18559_v9 = vld [vmem:[#allocation4 + $0x4e8] ss:$28 sps:$4 sm:$0xff]  }
 0x722   :  { %10182 = vmatpush2.bf16.msra.mxu1 %v18504_v36 }
 0x723   :  { %10223 = vmatpush2.bf16.msra.mxu0 %v18507_v31  ;;  %10183 = vmatprep.subr.bf16.mxu1 %v18512_v35  ;;  %v18560_v31 = vld [vmem:[#allocation4 + $0x2f0] ss:$28 sps:$4 sm:$0xff]  }
 0x724   :  { %10224 = vmatprep.subr.bf16.mxu0 %v18515_v45  ;;  %v18561_v35 = vld [vmem:[#allocation4 + $0x670] ss:$28 sps:$4 sm:$0xff]  }
 0x726   :  { %10184 = vmatpush2.bf16.msra.mxu1 %v18510_v26 }
 0x727   :  { %10225 = vmatpush2.bf16.msra.mxu0 %v18513_v38  ;;  %10185 = vmatprep.subr.bf16.mxu1 %v18518_v3 }
 0x728   :  { %10226 = vmatprep.subr.bf16.mxu0 %v18521_v59 }
 0x72a   :  { %10186 = vmatpush2.bf16.msra.mxu1 %v18516_v20  ;;  %v18562_v20 = vld [vmem:[#allocation4 + $0x130] ss:$28 sps:$4 sm:$0xff]  }
 0x72b   :  { %10227 = vmatpush2.bf16.msra.mxu0 %v18519_v42  ;;  %10187 = vmatprep.subr.bf16.mxu1 %v18524_v43  ;;  %v18563_v42 = vld [vmem:[#allocation4 + $0x4b0] ss:$28 sps:$4 sm:$0xff]  }
 0x72c   :  { %10228 = vmatprep.subr.bf16.mxu0 %v18527_v61 }
 0x72e   :  { %10188 = vmatpush2.bf16.msra.mxu1 %v18522_v11  ;;  %v18564_v11 = vld [vmem:[#allocation4 + $0x2b8] ss:$28 sps:$4 sm:$0xff]  }
 0x72f   :  { %10229 = vmatpush2.bf16.msra.mxu0 %v18525_v39  ;;  %10189 = vmatprep.subr.bf16.mxu1 %v18530_v46  ;;  %v18565_v39 = vld [vmem:[#allocation4 + $0x638] ss:$28 sps:$4 sm:$0xff]  }
 0x730   :  { %10230 = vmatprep.subr.bf16.mxu0 %v18533_v37  ;;  %v18566_v46 = vld [vmem:[#allocation4 + $0xf8] ss:$28 sps:$4 sm:$0xff]   ;;  %v18569_v37 = vld [vmem:[#allocation4 + $0x600] ss:$28 sps:$4 sm:$0xff]  }
 0x732   :  { %10190 = vmatpush2.bf16.msra.mxu1 %v18528_v41  ;;  %v18570_v41 = vld [vmem:[#allocation4 + $0xc0] ss:$28 sps:$4 sm:$0xff]  }
 0x733   :  { %10231 = vmatpush2.bf16.msra.mxu0 %v18531_v4  ;;  %10191 = vmatprep.subr.bf16.mxu1 %v18536_v2  ;;  %v18571_v4 = vld [vmem:[#allocation4 + $0x440] ss:$28 sps:$4 sm:$0xff]   ;;  %v18572_v2 = vld [vmem:[#allocation4 + $0x248] ss:$28 sps:$4 sm:$0xff]  }
 0x734   :  { %10232 = vmatprep.subr.bf16.mxu0 %v18539_v16  ;;  %v18573_v16 = vld [vmem:[#allocation4 + $0x5c8] ss:$28 sps:$4 sm:$0xff]  }
 0x736   :  { %10192 = vmatpush2.bf16.msra.mxu1 %v18534_v8  ;;  %v18574_v8 = vld [vmem:[#allocation4 + $0x88] ss:$28 sps:$4 sm:$0xff]  }
 0x737   :  { %10233 = vmatpush2.bf16.msra.mxu0 %v18537_v51  ;;  %10193 = vmatprep.subr.bf16.mxu1 %v18542_v53  ;;  %v18575_v51 = vld [vmem:[#allocation4 + $0x408] ss:$28 sps:$4 sm:$0xff]   ;;  %v18576_v53 = vld [vmem:[#allocation4 + $0x210] ss:$28 sps:$4 sm:$0xff]  }
 0x738   :  { %10234 = vmatprep.subr.bf16.mxu0 %v18545_v58  ;;  %v18577_v58 = vld [vmem:[#allocation4 + $0x590] ss:$28 sps:$4 sm:$0xff]  }
 0x73a   :  { %10194 = vmatpush2.bf16.msra.mxu1 %v18540_v15  ;;  %v18578_v15 = vld [vmem:[#allocation4 + $0x50] ss:$28 sps:$4 sm:$0xff]  }
 0x73b   :  { %10235 = vmatpush2.bf16.msra.mxu0 %v18543_v60  ;;  %10195 = vmatprep.subr.bf16.mxu1 %v18548_v48  ;;  %v18579_v60 = vld [vmem:[#allocation4 + $0x3d0] ss:$28 sps:$4 sm:$0xff]   ;;  %v18580_v48 = vld [vmem:[#allocation4 + $0x1d8] ss:$28 sps:$4 sm:$0xff]  }
 0x73c   :  { %10236 = vmatprep.subr.bf16.mxu0 %v18551_v34  ;;  %v18581_v34 = vld [vmem:[#allocation4 + $0x558] ss:$28 sps:$4 sm:$0xff]  }
 0x73e   :  { %10196 = vmatpush2.bf16.msra.mxu1 %v18546_v62  ;;  %v18582_v62 = vld [vmem:[#allocation4 + $0x18] ss:$28 sps:$4 sm:$0xff]  }
 0x73f   :  { %10237 = vmatpush2.bf16.msra.mxu0 %v18549_v30  ;;  %17077 = vmatprep.subr.bf16.mxu1 %v18552_v12  ;;  %v18583_v30 = vld [vmem:[#allocation4 + $0x398] ss:$28 sps:$4 sm:$0xff]   ;;  %v18584_v12 = vld [vmem:[#allocation4 + $0xa60] ss:$28 sps:$4 sm:$0xff]  }
 0x740   :  { %17099 = vmatprep.subr.bf16.mxu0 %v18553_v27  ;;  %v18585_v27 = vld [vmem:[#allocation4 + $0xde0] ss:$28 sps:$4 sm:$0xff]  }
 0x741   :  { %v9953_v25 = vpop.f32.mrf.mxu1  ;;  %10198 = vmatmul.mubr.bf16.vlgmr.msra.gmra.mxu1 %v20208_v56 }
 0x742   :  { %v9994_v52 = vpop.f32.mrf.mxu0  ;;  %10239 = vmatmul.mubr.bf16.vlgmr.msra.gmra.mxu0 %v20212_v57  ;;  %v9954_v29 = vadd.f32 %v9953_v25, %v7427_v23  ;;  %17078 = vmatpush3.bf16.msra.mxu1 %v18554_v10  ;;  %v18586_v23 = vld [vmem:[#allocation4 + $0x8a0] ss:$28 sps:$4 sm:$0xff]   ;;  %v18592_v25 = vld [vmem:[#allocation4 + $0x9f0] ss:$28 sps:$4 sm:$0xff]  }
 0x743   :  { %17100 = vmatpush3.bf16.msra.mxu0 %v18555_v21  ;;  %v9955_v1 = vpop.f32.mrf.mxu1  ;;  %17079 = vmatprep.subr.bf16.mxu1 %v18556_v22  ;;  %v18587_v10 = vld [vmem:[#allocation4 + $0xc20] ss:$28 sps:$4 sm:$0xff]   ;;  %v18588_v21 = vld [vmem:[#allocation4 + $0xa28] ss:$28 sps:$4 sm:$0xff]  }
 0x744   :  { %v9996_v36 = vpop.f32.mrf.mxu0  ;;  %17101 = vmatprep.subr.bf16.mxu0 %v18557_v50  ;;  %v20252_v45 = vadd.f32 %v9994_v52, %v9954_v29  ;;  %v9956_v26 = vadd.f32 %v9955_v1, %v7431_v13  ;;  %10279 = vmatprep.mubr.bf16.mxu1 %v20178_v14  ;;  %v18567_v14 = vld [vmem:[#allocation4 + $0x478] ss:$28 sps:$4 sm:$0xff]   ;;  %v18589_v22 = vld [vmem:[#allocation4 + $0xda8] ss:$28 sps:$4 sm:$0xff]   ;;  %v18593_v52 = vld [vmem:[#allocation4 + $0xd70] ss:$28 sps:$4 sm:$0xff]  }
 0x745   :  { %10319 = vmatprep.mubr.bf16.mxu0 %v20182_v28  ;;  %v9957_v38 = vpop.f32.mrf.mxu1  ;;  %v18568_v28 = vld [vmem:[#allocation4 + $0x280] ss:$28 sps:$4 sm:$0xff]   ;;  %v18590_v50 = vld [vmem:[#allocation4 + $0x868] ss:$28 sps:$4 sm:$0xff]   ;;  %v18594_v29 = vld [vmem:[#allocation4 + $0x830] ss:$28 sps:$4 sm:$0xff]  }
 0x746   :  { %v9998_v3 = vpop.f32.mrf.mxu0  ;;  %v20256_v59 = vadd.f32 %v9996_v36, %v9956_v26  ;;  %17080 = vmatpush3.bf16.msra.mxu1 %v18558_v63  ;;  %v18591_v13 = vld [vmem:[#allocation4 + $0xbe8] ss:$28 sps:$4 sm:$0xff]   ;;  %v18595_v63 = vld [vmem:[#allocation4 + $0xbb0] ss:$28 sps:$4 sm:$0xff]   ;;  %v18599_v1 = vld [vmem:[#allocation4 + $0xb78] ss:$28 sps:$4 sm:$0xff]  }
 0x747   :  { %17102 = vmatpush3.bf16.msra.mxu0 %v18559_v9  ;;  %v9958_v43 = vpop.f32.mrf.mxu1  ;;  %17081 = vmatprep.subr.bf16.mxu1 %v18560_v31  ;;  %v18598_v9 = vld [vmem:[#allocation4 + $0x7f8] ss:$28 sps:$4 sm:$0xff]   ;;  %v18600_v36 = vld [vmem:[#allocation4 + $0x980] ss:$28 sps:$4 sm:$0xff]   ;;  %v18605_v26 = vld [vmem:[#allocation4 + $0xcc8] ss:$28 sps:$4 sm:$0xff]  }
 0x748   :  { %v9999_v61 = vpop.f32.mrf.mxu0  ;;  %17103 = vmatprep.subr.bf16.mxu0 %v18561_v35  ;;  %v18601_v31 = vld [vmem:[#allocation4 + $0xd00] ss:$28 sps:$4 sm:$0xff]   ;;  %v18604_v35 = vld [vmem:[#allocation4 + $0x948] ss:$28 sps:$4 sm:$0xff]   ;;  %v18610_v43 = vld [vmem:[#allocation4 + $0x750] ss:$28 sps:$4 sm:$0xff]  }
 0x749   :  { %v18606_v38 = vld [vmem:[#allocation4 + $0x788] ss:$28 sps:$4 sm:$0xff]   ;;  %v18611_v61 = vld [vmem:[#allocation4 + $0xad0] ss:$28 sps:$4 sm:$0xff]  }
 0x74a   :  { %17082 = vmatpush3.bf16.msra.mxu1 %v18562_v20  ;;  %v18607_v3 = vld [vmem:[#allocation4 + $0xb08] ss:$28 sps:$4 sm:$0xff]   ;;  %v18608_v20 = vld [vmem:[#allocation4 + $0x910] ss:$28 sps:$4 sm:$0xff]  }
 0x74b   :  { %17104 = vmatpush3.bf16.msra.mxu0 %v18563_v42  ;;  %17083 = vmatprep.subr.bf16.mxu1 %v18564_v11  ;;  %v18609_v42 = vld [vmem:[#allocation4 + $0xc90] ss:$28 sps:$4 sm:$0xff]   ;;  %v18612_v11 = vld [vmem:[#allocation4 + $0x8d8] ss:$28 sps:$4 sm:$0xff]  }
 0x74c   :  { %17105 = vmatprep.subr.bf16.mxu0 %v18565_v39  ;;  %v18613_v39 = vld [vmem:[#allocation4 + $0xc58] ss:$28 sps:$4 sm:$0xff]  }
 0x74e   :  { %17084 = vmatpush3.bf16.msra.mxu1 %v18566_v46  ;;  %v18614_v46 = vld [vmem:[#allocation4 + $0x718] ss:$28 sps:$4 sm:$0xff]  }
 0x74f   :  { %17106 = vmatpush3.bf16.msra.mxu0 %v18567_v14  ;;  %17085 = vmatprep.subr.bf16.mxu1 %v18568_v28  ;;  %v18615_v14 = vld [vmem:[#allocation4 + $0xa98] ss:$28 sps:$4 sm:$0xff]  }
 0x750   :  { %17107 = vmatprep.subr.bf16.mxu0 %v18569_v37 }
 0x752   :  { %17086 = vmatpush3.bf16.msra.mxu1 %v18570_v41 }
 0x753   :  { %17108 = vmatpush3.bf16.msra.mxu0 %v18571_v4  ;;  %17087 = vmatprep.subr.bf16.mxu1 %v18572_v2 }
 0x754   :  { %17109 = vmatprep.subr.bf16.mxu0 %v18573_v16 }
 0x756   :  { %17088 = vmatpush3.bf16.msra.mxu1 %v18574_v8 }
 0x757   :  { %17110 = vmatpush3.bf16.msra.mxu0 %v18575_v51  ;;  %17089 = vmatprep.subr.bf16.mxu1 %v18576_v53 }
 0x758   :  { %17111 = vmatprep.subr.bf16.mxu0 %v18577_v58 }
 0x75a   :  { %17090 = vmatpush3.bf16.msra.mxu1 %v18578_v15 }
 0x75b   :  { %17112 = vmatpush3.bf16.msra.mxu0 %v18579_v60  ;;  %17091 = vmatprep.subr.bf16.mxu1 %v18580_v48 }
 0x75c   :  { %17113 = vmatprep.subr.bf16.mxu0 %v18581_v34 }
 0x75e   :  { %17092 = vmatpush3.bf16.msra.mxu1 %v18582_v62 }
 0x75f   :  { %17114 = vmatpush3.bf16.msra.mxu0 %v18583_v30  ;;  %17121 = vmatprep.subr.bf16.mxu1 %v18584_v12 }
 0x760   :  { %17143 = vmatprep.subr.bf16.mxu0 %v18585_v27 }
 0x761   :  { %10280 = vmatmul.mubr.bf16.vlgmr.msra.gmra.mxu1 %v20188_v40  ;;  %v18596_v40 = vld [vmem:[#allocation4 + $0x9b8] ss:$28 sps:$4 sm:$0xff]  }
 0x762   :  { %10320 = vmatmul.mubr.bf16.vlgmr.msra.gmra.mxu0 %v20192_v18  ;;  %17122 = vmatpush3.bf16.msra.mxu1 %v18586_v23  ;;  %v18597_v18 = vld [vmem:[#allocation4 + $0xd38] ss:$28 sps:$4 sm:$0xff]  }
 0x763   :  { %17144 = vmatpush3.bf16.msra.mxu0 %v18587_v10  ;;  %17123 = vmatprep.subr.bf16.mxu1 %v18588_v21 }
 0x764   :  { %17145 = vmatprep.subr.bf16.mxu0 %v18589_v22  ;;  %10359 = vmatprep.mubr.bf16.mxu1 %v20196_v5  ;;  %v18602_v5 = vld [vmem:[#allocation4 + $0x7c0] ss:$28 sps:$4 sm:$0xff]  }
 0x765   :  { %10399 = vmatprep.mubr.bf16.mxu0 %v20200_v7  ;;  %v18603_v7 = vld [vmem:[#allocation4 + $0xb40] ss:$28 sps:$4 sm:$0xff]  }
 0x766   :  { %17124 = vmatpush3.bf16.msra.mxu1 %v18590_v50 }
 0x767   :  { %17146 = vmatpush3.bf16.msra.mxu0 %v18591_v13  ;;  %17125 = vmatprep.subr.bf16.mxu1 %v18592_v25 }
 0x768   :  { %17147 = vmatprep.subr.bf16.mxu0 %v18593_v52 }
 0x76a   :  { %17126 = vmatpush3.bf16.msra.mxu1 %v18594_v29 }
 0x76b   :  { %17148 = vmatpush3.bf16.msra.mxu0 %v18595_v63  ;;  %17127 = vmatprep.subr.bf16.mxu1 %v18596_v40 }
 0x76c   :  { %17149 = vmatprep.subr.bf16.mxu0 %v18597_v18 }
 0x76e   :  { %17128 = vmatpush3.bf16.msra.mxu1 %v18598_v9 }
 0x76f   :  { %17150 = vmatpush3.bf16.msra.mxu0 %v18599_v1  ;;  %17129 = vmatprep.subr.bf16.mxu1 %v18600_v36 }
 0x770   :  { %17151 = vmatprep.subr.bf16.mxu0 %v18601_v31 }
 0x772   :  { %17130 = vmatpush3.bf16.msra.mxu1 %v18602_v5 }
 0x773   :  { %17152 = vmatpush3.bf16.msra.mxu0 %v18603_v7  ;;  %17131 = vmatprep.subr.bf16.mxu1 %v18604_v35 }
 0x774   :  { %17153 = vmatprep.subr.bf16.mxu0 %v18605_v26 }
 0x776   :  { %17132 = vmatpush3.bf16.msra.mxu1 %v18606_v38 }
 0x777   :  { %17154 = vmatpush3.bf16.msra.mxu0 %v18607_v3  ;;  %17133 = vmatprep.subr.bf16.mxu1 %v18608_v20 }
 0x778   :  { %17155 = vmatprep.subr.bf16.mxu0 %v18609_v42 }
 0x77a   :  { %17134 = vmatpush3.bf16.msra.mxu1 %v18610_v43 }
 0x77b   :  { %17156 = vmatpush3.bf16.msra.mxu0 %v18611_v61  ;;  %17135 = vmatprep.subr.bf16.mxu1 %v18612_v11 }
 0x77c   :  { %17157 = vmatprep.subr.bf16.mxu0 %v18613_v39  ;;  %v7443_v39 = vrot.slane %v20222_v47, %v20052_v17 }
 0x77e   :  { %17136 = vmatpush3.bf16.msra.mxu1 %v18614_v46 }
 0x77f   :  { %17158 = vmatpush3.bf16.msra.mxu0 %v18615_v14 }
 0x781   :  { %v10035_v28 = vpop.f32.mrf.mxu1  ;;  %10360 = vmatmul.mubr.bf16.vlgmr.msra.gmra.mxu1 %v20208_v56  ;;  %v7435_v56 = vrot.slane %v20222_v47, %v20038_v6 }
 0x782   :  { %v10076_v37 = vpop.f32.mrf.mxu0  ;;  %10400 = vmatmul.mubr.bf16.vlgmr.msra.gmra.mxu0 %v20212_v57  ;;  %v10036_v41 = vadd.f32 %v10035_v28, %v20252_v45  ;;  %v7439_v57 = vrot.slane %v20222_v47, %v20041_v54 }
 0x783   :  { %v10037_v4 = vpop.f32.mrf.mxu1 }
 0x784   :  { %v10078_v2 = vpop.f32.mrf.mxu0  ;;  %v10077_v16 = vadd.f32 %v10076_v37, %v10036_v41  ;;  %v10038_v8 = vadd.f32 %v10037_v4, %v20256_v59 }
 0x785   :  { %v10039_v51 = vpop.f32.mrf.mxu1 }
 0x786   :  { %v10080_v53 = vpop.f32.mrf.mxu0  ;;  %18620 = vtanh.f32 %v10077_v16  ;;  %v10079_v58 = vadd.f32 %v10078_v2, %v10038_v8 }
 0x787   :  { %v10040_v15 = vpop.f32.mrf.mxu1 }
 0x788   :  { %v10081_v60 = vpop.f32.mrf.mxu0  ;;  %18622 = vtanh.f32 %v10079_v58 }
 0x793   :  { %v20266_v48 = vpop.eup %18620 }
 0x795   :  { %v18623_v34 = vpop.eup %18622 }
 0x7c1   :  { %v10117_v45 = vpop.f32.mrf.mxu1 }
 0x7c2   :  { %v10158_v62 = vpop.f32.mrf.mxu0  ;;  %v10118_v30 = vadd.f32 %v10117_v45, %v7435_v56 }
 0x7c3   :  { %v10119_v59 = vpop.f32.mrf.mxu1 }
 0x7c4   :  { %v10160_v12 = vpop.f32.mrf.mxu0  ;;  %v10159_v27 = vadd.f32 %v10158_v62, %v10118_v30  ;;  %v10120_v23 = vadd.f32 %v10119_v59, %v7439_v57 }
 0x7c5   :  { %v10121_v10 = vpop.f32.mrf.mxu1 }
 0x7c6   :  { %v10162_v21 = vpop.f32.mrf.mxu0  ;;  %v10161_v22 = vadd.f32 %v10160_v12, %v10120_v23 }
 0x7c7   :  { %v10122_v50 = vpop.f32.mrf.mxu1 }
 0x7c8   :  { %v10163_v13 = vpop.f32.mrf.mxu0 }
 0x801   :  { %v10199_v25 = vpop.f32.mrf.mxu1 }
 0x802   :  { %v10240_v52 = vpop.f32.mrf.mxu0  ;;  %v10200_v29 = vadd.f32 %v10199_v25, %v10159_v27 }
 0x803   :  { %v10201_v63 = vpop.f32.mrf.mxu1 }
 0x804   :  { %v10242_v40 = vpop.f32.mrf.mxu0  ;;  %v10241_v18 = vadd.f32 %v10240_v52, %v10200_v29  ;;  %v10202_v9 = vadd.f32 %v10201_v63, %v10161_v22 }
 0x805   :  { %v10203_v54 = vpop.f32.mrf.mxu1 }
 0x806   :  { %v10244_v1 = vpop.f32.mrf.mxu0  ;;  %18624 = vtanh.f32 %v10241_v18  ;;  %v10243_v36 = vadd.f32 %v10242_v40, %v10202_v9 }
 0x807   :  { %v10204_v31 = vpop.f32.mrf.mxu1 }
 0x808   :  { %v10245_v5 = vpop.f32.mrf.mxu0  ;;  %18626 = vtanh.f32 %v10243_v36 }
 0x813   :  { %v20272_v7 = vpop.eup %18624 }
 0x815   :  { %v20274_v35 = vpop.eup %18626 }
 0x821   :  { %v17093_v26 = vpop.f32.mrf.mxu1 }
 0x822   :  { %v17115_v38 = vpop.f32.mrf.mxu0 }
 0x823   :  { %v17094_v3 = vpop.f32.mrf.mxu1 }
 0x824   :  { %v17116_v20 = vpop.f32.mrf.mxu0  ;;  %v17095_v46 = vadd.f32 %v17094_v3, %v17093_v26 }
 0x825   :  { %v17096_v42 = vpop.f32.mrf.mxu1  ;;  %v17117_v28 = vadd.f32 %v17116_v20, %v17115_v38 }
 0x826   :  { %v17118_v43 = vpop.f32.mrf.mxu0  ;;  %v10282_v14 = vadd.f32 %v17095_v46, %v7443_v39 }
 0x827   :  { %v17097_v61 = vpop.f32.mrf.mxu1 }
 0x828   :  { %v17119_v11 = vpop.f32.mrf.mxu0  ;;  %v10322_v16 = vadd.f32 %v17117_v28, %v10282_v14 }
 0x841   :  { %v17137_v37 = vpop.f32.mrf.mxu1 }
 0x842   :  { %v17159_v41 = vpop.f32.mrf.mxu0 }
 0x843   :  { %v17138_v4 = vpop.f32.mrf.mxu1 }
 0x844   :  { %v17160_v2 = vpop.f32.mrf.mxu0  ;;  %v17139_v8 = vadd.f32 %v17138_v4, %v17137_v37 }
 0x845   :  { %v17140_v51 = vpop.f32.mrf.mxu1  ;;  %v17161_v15 = vadd.f32 %v17160_v2, %v17159_v41 }
 0x846   :  { %v17162_v53 = vpop.f32.mrf.mxu0  ;;  %v10362_v58 = vadd.f32 %v17139_v8, %v10322_v16 }
 0x847   :  { %v17141_v60 = vpop.f32.mrf.mxu1 }
 0x848   :  { %v17163_v56 = vpop.f32.mrf.mxu0  ;;  %v10402_v57 = vadd.f32 %v17161_v15, %v10362_v58 }
 0x84a   :  { %18628 = vtanh.f32 %v10402_v57 }
 0x857   :  { %v20278_v45 = vpop.eup %18628 }
 0x858   :  { %19608 = dma.done.wait [#allocation9 + $0x3], 32000 }
 0x859   :  { %19609 = vsyncadd [#allocation9 + $0x3], 4294935296  ;;  %v20282_v17 = vpack.c.bf16 %v20244_v24, %v20244_v24  ;;  %v20284_v47 = vpack.c.bf16 %v18623_v34, %v18623_v34  ;;  %v18630_v62 = vld [vmem:[#allocation5 + $0x11c] ss:$20 sps:$4 sm:$0xff]   ;;  %v18634_v59 = vld [vmem:[#allocation5 + $0x118] ss:$20 sps:$4 sm:$0xff]  }
 0x85a   :  { %v18632_v30 = vld [vmem:[#allocation5 + $0x39c] ss:$20 sps:$4 sm:$0xff]   ;;  %12246 = vmatprep.subr.bf16.mxu1 %v18630_v62  ;;  %v18635_v12 = vld [vmem:[#allocation5 + $0x398] ss:$20 sps:$4 sm:$0xff]   ;;  %v18636_v27 = vld [vmem:[#allocation5 + $0xf4] ss:$20 sps:$4 sm:$0xff]  }
 0x85b   :  { %12278 = vmatprep.mubr.bf16.mxu1 %v20282_v17  ;;  %12319 = vmatprep.mubr.bf16.mxu0 %v20284_v47  ;;  %v18638_v23 = vld [vmem:[#allocation5 + $0x374] ss:$20 sps:$4 sm:$0xff]   ;;  %v18640_v10 = vld [vmem:[#allocation5 + $0xf0] ss:$20 sps:$4 sm:$0xff]   ;;  %v18642_v34 = vld [vmem:[#allocation5 + $0xcc] ss:$20 sps:$4 sm:$0xff]  }
 0x85c   :  { %12287 = vmatprep.subr.bf16.mxu0 %v18632_v30  ;;  %12247 = vmatpush1.bf16.msra.mxu1 %v18634_v59  ;;  %v18641_v24 = vld [vmem:[#allocation5 + $0x370] ss:$20 sps:$4 sm:$0xff]   ;;  %v18644_v21 = vld [vmem:[#allocation5 + $0x34c] ss:$20 sps:$4 sm:$0xff]   ;;  %v18646_v22 = vld [vmem:[#allocation5 + $0xc8] ss:$20 sps:$4 sm:$0xff]  }
 0x85d   :  { %12288 = vmatpush1.bf16.msra.mxu0 %v18635_v12  ;;  %12248 = vmatprep.subr.bf16.mxu1 %v18636_v27  ;;  %v18647_v50 = vld [vmem:[#allocation5 + $0x348] ss:$20 sps:$4 sm:$0xff]   ;;  %v18648_v13 = vld [vmem:[#allocation5 + $0xa4] ss:$20 sps:$4 sm:$0xff]   ;;  %v18652_v52 = vld [vmem:[#allocation5 + $0xa0] ss:$20 sps:$4 sm:$0xff]  }
 0x85e   :  { %12289 = vmatprep.subr.bf16.mxu0 %v18638_v23  ;;  %v18650_v25 = vld [vmem:[#allocation5 + $0x324] ss:$20 sps:$4 sm:$0xff]   ;;  %v18653_v29 = vld [vmem:[#allocation5 + $0x320] ss:$20 sps:$4 sm:$0xff]   ;;  %v18654_v63 = vld [vmem:[#allocation5 + $0x7c] ss:$20 sps:$4 sm:$0xff]  }
 0x85f   :  { %v18656_v40 = vld [vmem:[#allocation5 + $0x2fc] ss:$20 sps:$4 sm:$0xff]   ;;  %v18658_v18 = vld [vmem:[#allocation5 + $0x78] ss:$20 sps:$4 sm:$0xff]   ;;  %v18660_v54 = vld [vmem:[#allocation5 + $0x54] ss:$20 sps:$4 sm:$0xff]  }
 0x860   :  { %12249 = vmatpush1.bf16.msra.mxu1 %v18640_v10  ;;  %v18659_v9 = vld [vmem:[#allocation5 + $0x2f8] ss:$20 sps:$4 sm:$0xff]   ;;  %v18662_v1 = vld [vmem:[#allocation5 + $0x2d4] ss:$20 sps:$4 sm:$0xff]   ;;  %v18664_v36 = vld [vmem:[#allocation5 + $0x50] ss:$20 sps:$4 sm:$0xff]  }
 0x861   :  { %12290 = vmatpush1.bf16.msra.mxu0 %v18641_v24  ;;  %12250 = vmatprep.subr.bf16.mxu1 %v18642_v34  ;;  %v18665_v31 = vld [vmem:[#allocation5 + $0x2d0] ss:$20 sps:$4 sm:$0xff]   ;;  %v18666_v5 = vld [vmem:[#allocation5 + $0x2c] ss:$20 sps:$4 sm:$0xff]   ;;  %v18670_v38 = vld [vmem:[#allocation5 + $0x28] ss:$20 sps:$4 sm:$0xff]  }
 0x862   :  { %12291 = vmatprep.subr.bf16.mxu0 %v18644_v21  ;;  %v18668_v26 = vld [vmem:[#allocation5 + $0x2ac] ss:$20 sps:$4 sm:$0xff]   ;;  %v18671_v3 = vld [vmem:[#allocation5 + $0x2a8] ss:$20 sps:$4 sm:$0xff]   ;;  %v18672_v20 = vld [vmem:[#allocation5 + $0x4] ss:$20 sps:$4 sm:$0xff]  }
 0x863   :  { %v18674_v42 = vld [vmem:[#allocation5 + $0x284] ss:$20 sps:$4 sm:$0xff]   ;;  %v18676_v43 = vld [vmem:[#allocation5] ss:$20 sps:$4 sm:$0xff]   ;;  %v18678_v11 = vld [vmem:[#allocation5 + $0x25c] ss:$20 sps:$4 sm:$0xff]  }
 0x864   :  { %12251 = vmatpush1.bf16.msra.mxu1 %v18646_v22  ;;  %v18677_v61 = vld [vmem:[#allocation5 + $0x280] ss:$20 sps:$4 sm:$0xff]   ;;  %v18680_v39 = vld [vmem:[#allocation5 + $0x4dc] ss:$20 sps:$4 sm:$0xff]   ;;  %v18682_v46 = vld [vmem:[#allocation5 + $0x258] ss:$20 sps:$4 sm:$0xff]  }
 0x865   :  { %12292 = vmatpush1.bf16.msra.mxu0 %v18647_v50  ;;  %12252 = vmatprep.subr.bf16.mxu1 %v18648_v13  ;;  %v18683_v14 = vld [vmem:[#allocation5 + $0x4d8] ss:$20 sps:$4 sm:$0xff]   ;;  %v18684_v28 = vld [vmem:[#allocation5 + $0x234] ss:$20 sps:$4 sm:$0xff]   ;;  %v18688_v41 = vld [vmem:[#allocation5 + $0x230] ss:$20 sps:$4 sm:$0xff]  }
 0x866   :  { %12293 = vmatprep.subr.bf16.mxu0 %v18650_v25  ;;  %v18686_v37 = vld [vmem:[#allocation5 + $0x4b4] ss:$20 sps:$4 sm:$0xff]   ;;  %v18689_v4 = vld [vmem:[#allocation5 + $0x4b0] ss:$20 sps:$4 sm:$0xff]   ;;  %v18690_v2 = vld [vmem:[#allocation5 + $0x20c] ss:$20 sps:$4 sm:$0xff]  }
 0x867   :  { %v18692_v16 = vld [vmem:[#allocation5 + $0x48c] ss:$20 sps:$4 sm:$0xff]   ;;  %v18694_v8 = vld [vmem:[#allocation5 + $0x208] ss:$20 sps:$4 sm:$0xff]   ;;  %v18696_v53 = vld [vmem:[#allocation5 + $0x1e4] ss:$20 sps:$4 sm:$0xff]  }
 0x868   :  { %12253 = vmatpush1.bf16.msra.mxu1 %v18652_v52  ;;  %v18695_v51 = vld [vmem:[#allocation5 + $0x488] ss:$20 sps:$4 sm:$0xff]   ;;  %v18698_v58 = vld [vmem:[#allocation5 + $0x464] ss:$20 sps:$4 sm:$0xff]   ;;  %v18700_v15 = vld [vmem:[#allocation5 + $0x1e0] ss:$20 sps:$4 sm:$0xff]  }
 0x869   :  { %12294 = vmatpush1.bf16.msra.mxu0 %v18653_v29  ;;  %12254 = vmatprep.subr.bf16.mxu1 %v18654_v63  ;;  %v18701_v60 = vld [vmem:[#allocation5 + $0x460] ss:$20 sps:$4 sm:$0xff]   ;;  %v18702_v56 = vld [vmem:[#allocation5 + $0x1bc] ss:$20 sps:$4 sm:$0xff]   ;;  %v18706_v62 = vld [vmem:[#allocation5 + $0x1b8] ss:$20 sps:$4 sm:$0xff]   ;;  %v20290_v63 = vpack.c.bf16 %v20242_v19, %v20242_v19 }
 0x86a   :  { %12295 = vmatprep.subr.bf16.mxu0 %v18656_v40  ;;  %v18704_v57 = vld [vmem:[#allocation5 + $0x43c] ss:$20 sps:$4 sm:$0xff]   ;;  %v18707_v30 = vld [vmem:[#allocation5 + $0x438] ss:$20 sps:$4 sm:$0xff]   ;;  %v18708_v59 = vld [vmem:[#allocation5 + $0x194] ss:$20 sps:$4 sm:$0xff]   ;;  %v20294_v40 = vpack.c.bf16 %v20266_v48, %v20266_v48 }
 0x86b   :  { %v18710_v12 = vld [vmem:[#allocation5 + $0x414] ss:$20 sps:$4 sm:$0xff]   ;;  %v18712_v27 = vld [vmem:[#allocation5 + $0x190] ss:$20 sps:$4 sm:$0xff]   ;;  %v18714_v10 = vld [vmem:[#allocation5 + $0x16c] ss:$20 sps:$4 sm:$0xff]  }
 0x86c   :  { %12255 = vmatpush1.bf16.msra.mxu1 %v18658_v18  ;;  %v18713_v23 = vld [vmem:[#allocation5 + $0x410] ss:$20 sps:$4 sm:$0xff]   ;;  %v18716_v24 = vld [vmem:[#allocation5 + $0x3ec] ss:$20 sps:$4 sm:$0xff]   ;;  %v18718_v34 = vld [vmem:[#allocation5 + $0x168] ss:$20 sps:$4 sm:$0xff]  }
 0x86d   :  { %12296 = vmatpush1.bf16.msra.mxu0 %v18659_v9  ;;  %12256 = vmatprep.subr.bf16.mxu1 %v18660_v54  ;;  %v18719_v21 = vld [vmem:[#allocation5 + $0x3e8] ss:$20 sps:$4 sm:$0xff]   ;;  %v18720_v22 = vld [vmem:[#allocation5 + $0x144] ss:$20 sps:$4 sm:$0xff]   ;;  %v18724_v13 = vld [vmem:[#allocation5 + $0x140] ss:$20 sps:$4 sm:$0xff]  }
 0x86e   :  { %12297 = vmatprep.subr.bf16.mxu0 %v18662_v1  ;;  %v18722_v50 = vld [vmem:[#allocation5 + $0x3c4] ss:$20 sps:$4 sm:$0xff]   ;;  %v18725_v25 = vld [vmem:[#allocation5 + $0x3c0] ss:$20 sps:$4 sm:$0xff]   ;;  %v18728_v52 = vld [vmem:[#allocation5 + $0x61c] ss:$20 sps:$4 sm:$0xff]  }
 0x86f   :  { %v18731_v29 = vld [vmem:[#allocation5 + $0x89c] ss:$20 sps:$4 sm:$0xff]   ;;  %v18726_v18 = vld [vmem:[#allocation5 + $0x618] ss:$20 sps:$4 sm:$0xff]   ;;  %v18734_v54 = vld [vmem:[#allocation5 + $0x5f4] ss:$20 sps:$4 sm:$0xff]  }
 0x870   :  { %12257 = vmatpush1.bf16.msra.mxu1 %v18664_v36  ;;  %v18729_v9 = vld [vmem:[#allocation5 + $0x898] ss:$20 sps:$4 sm:$0xff]   ;;  %v18737_v1 = vld [vmem:[#allocation5 + $0x874] ss:$20 sps:$4 sm:$0xff]   ;;  %v20298_v36 = vpack.c.bf16 %v20274_v35, %v20274_v35  ;;  %v18732_v19 = vld [vmem:[#allocation5 + $0x5f0] ss:$20 sps:$4 sm:$0xff]  }
 0x871   :  { %12298 = vmatpush1.bf16.msra.mxu0 %v18665_v31  ;;  %12258 = vmatprep.subr.bf16.mxu1 %v18666_v5  ;;  %v18735_v31 = vld [vmem:[#allocation5 + $0x870] ss:$20 sps:$4 sm:$0xff]   ;;  %v18740_v48 = vld [vmem:[#allocation5 + $0x5cc] ss:$20 sps:$4 sm:$0xff]  }
 0x872   :  { %12299 = vmatprep.subr.bf16.mxu0 %v18668_v26  ;;  %v18743_v5 = vld [vmem:[#allocation5 + $0x84c] ss:$20 sps:$4 sm:$0xff]   ;;  %v18738_v26 = vld [vmem:[#allocation5 + $0x5c8] ss:$20 sps:$4 sm:$0xff]   ;;  %v18746_v35 = vld [vmem:[#allocation5 + $0x5a4] ss:$20 sps:$4 sm:$0xff]  }
 0x874   :  { %12259 = vmatpush1.bf16.msra.mxu1 %v18670_v38  ;;  %v18741_v38 = vld [vmem:[#allocation5 + $0x848] ss:$20 sps:$4 sm:$0xff]  }
 0x875   :  { %12300 = vmatpush1.bf16.msra.mxu0 %v18671_v3  ;;  %12260 = vmatprep.subr.bf16.mxu1 %v18672_v20  ;;  %v18749_v3 = vld [vmem:[#allocation5 + $0x824] ss:$20 sps:$4 sm:$0xff]   ;;  %v18744_v20 = vld [vmem:[#allocation5 + $0x5a0] ss:$20 sps:$4 sm:$0xff]  }
 0x876   :  { %12301 = vmatprep.subr.bf16.mxu0 %v18674_v42  ;;  %v18747_v42 = vld [vmem:[#allocation5 + $0x820] ss:$20 sps:$4 sm:$0xff]  }
 0x878   :  { %12261 = vmatpush1.bf16.msra.mxu1 %v18676_v43  ;;  %v18752_v43 = vld [vmem:[#allocation5 + $0x57c] ss:$20 sps:$4 sm:$0xff]  }
 0x879   :  { %12302 = vmatpush1.bf16.msra.mxu0 %v18677_v61  ;;  %12262 = vmatprep.subr.bf16.mxu1 %v18678_v11  ;;  %v18755_v61 = vld [vmem:[#allocation5 + $0x7fc] ss:$20 sps:$4 sm:$0xff]   ;;  %v18750_v11 = vld [vmem:[#allocation5 + $0x578] ss:$20 sps:$4 sm:$0xff]  }
 0x87a   :  { %12303 = vmatprep.subr.bf16.mxu0 %v18680_v39  ;;  %v18753_v39 = vld [vmem:[#allocation5 + $0x7f8] ss:$20 sps:$4 sm:$0xff]  }
 0x87c   :  { %12263 = vmatpush2.bf16.msra.mxu1 %v18682_v46  ;;  %v18758_v46 = vld [vmem:[#allocation5 + $0x554] ss:$20 sps:$4 sm:$0xff]  }
 0x87d   :  { %12304 = vmatpush2.bf16.msra.mxu0 %v18683_v14  ;;  %12264 = vmatprep.subr.bf16.mxu1 %v18684_v28  ;;  %v18761_v14 = vld [vmem:[#allocation5 + $0x7d4] ss:$20 sps:$4 sm:$0xff]   ;;  %v18756_v28 = vld [vmem:[#allocation5 + $0x550] ss:$20 sps:$4 sm:$0xff]  }
 0x87e   :  { %12305 = vmatprep.subr.bf16.mxu0 %v18686_v37  ;;  %v18759_v37 = vld [vmem:[#allocation5 + $0x7d0] ss:$20 sps:$4 sm:$0xff]  }
 0x880   :  { %12265 = vmatpush2.bf16.msra.mxu1 %v18688_v41  ;;  %v18764_v41 = vld [vmem:[#allocation5 + $0x52c] ss:$20 sps:$4 sm:$0xff]  }
 0x881   :  { %12306 = vmatpush2.bf16.msra.mxu0 %v18689_v4  ;;  %12266 = vmatprep.subr.bf16.mxu1 %v18690_v2  ;;  %v18767_v4 = vld [vmem:[#allocation5 + $0x7ac] ss:$20 sps:$4 sm:$0xff]   ;;  %v18762_v2 = vld [vmem:[#allocation5 + $0x528] ss:$20 sps:$4 sm:$0xff]  }
 0x882   :  { %12307 = vmatprep.subr.bf16.mxu0 %v18692_v16  ;;  %v18765_v16 = vld [vmem:[#allocation5 + $0x7a8] ss:$20 sps:$4 sm:$0xff]  }
 0x884   :  { %12267 = vmatpush2.bf16.msra.mxu1 %v18694_v8  ;;  %v18770_v8 = vld [vmem:[#allocation5 + $0x504] ss:$20 sps:$4 sm:$0xff]  }
 0x885   :  { %12308 = vmatpush2.bf16.msra.mxu0 %v18695_v51  ;;  %12268 = vmatprep.subr.bf16.mxu1 %v18696_v53  ;;  %v18773_v51 = vld [vmem:[#allocation5 + $0x784] ss:$20 sps:$4 sm:$0xff]   ;;  %v18768_v53 = vld [vmem:[#allocation5 + $0x500] ss:$20 sps:$4 sm:$0xff]  }
 0x886   :  { %12309 = vmatprep.subr.bf16.mxu0 %v18698_v58  ;;  %v18771_v58 = vld [vmem:[#allocation5 + $0x780] ss:$20 sps:$4 sm:$0xff]  }
 0x888   :  { %12269 = vmatpush2.bf16.msra.mxu1 %v18700_v15  ;;  %v18776_v15 = vld [vmem:[#allocation5 + $0x75c] ss:$20 sps:$4 sm:$0xff]  }
 0x889   :  { %12310 = vmatpush2.bf16.msra.mxu0 %v18701_v60  ;;  %12270 = vmatprep.subr.bf16.mxu1 %v18702_v56  ;;  %v18779_v60 = vld [vmem:[#allocation5 + $0x124] ss:$20 sps:$4 sm:$0xff]  }
 0x88a   :  { %12311 = vmatprep.subr.bf16.mxu0 %v18704_v57  ;;  %v18774_v56 = vld [vmem:[#allocation5 + $0x758] ss:$20 sps:$4 sm:$0xff]   ;;  %v20306_v57 = vpack.c.bf16 %v20278_v45, %v20278_v45  ;;  %v18786_v45 = vld [vmem:[#allocation5 + $0x708] ss:$20 sps:$4 sm:$0xff]  }
 0x88c   :  { %12271 = vmatpush2.bf16.msra.mxu1 %v18706_v62  ;;  %v18777_v62 = vld [vmem:[#allocation5 + $0x120] ss:$20 sps:$4 sm:$0xff]  }
 0x88d   :  { %12312 = vmatpush2.bf16.msra.mxu0 %v18707_v30  ;;  %12272 = vmatprep.subr.bf16.mxu1 %v18708_v59  ;;  %v18782_v30 = vld [vmem:[#allocation5 + $0x734] ss:$20 sps:$4 sm:$0xff]   ;;  %v18785_v59 = vld [vmem:[#allocation5 + $0xfc] ss:$20 sps:$4 sm:$0xff]  }
 0x88e   :  { %12313 = vmatprep.subr.bf16.mxu0 %v18710_v12  ;;  %v18780_v12 = vld [vmem:[#allocation5 + $0x730] ss:$20 sps:$4 sm:$0xff]  }
 0x890   :  { %12273 = vmatpush2.bf16.msra.mxu1 %v18712_v27  ;;  %v18783_v27 = vld [vmem:[#allocation5 + $0xf8] ss:$20 sps:$4 sm:$0xff]  }
 0x891   :  { %12314 = vmatpush2.bf16.msra.mxu0 %v18713_v23  ;;  %12274 = vmatprep.subr.bf16.mxu1 %v18714_v10  ;;  %v18788_v23 = vld [vmem:[#allocation5 + $0x70c] ss:$20 sps:$4 sm:$0xff]   ;;  %v18791_v10 = vld [vmem:[#allocation5 + $0xd4] ss:$20 sps:$4 sm:$0xff]  }
 0x892   :  { %12315 = vmatprep.subr.bf16.mxu0 %v18716_v24  ;;  %v18789_v24 = vld [vmem:[#allocation5 + $0xd0] ss:$20 sps:$4 sm:$0xff]  }
 0x894   :  { %12275 = vmatpush2.bf16.msra.mxu1 %v18718_v34  ;;  %v18794_v34 = vld [vmem:[#allocation5 + $0x6e4] ss:$20 sps:$4 sm:$0xff]  }
 0x895   :  { %12316 = vmatpush2.bf16.msra.mxu0 %v18719_v21  ;;  %12276 = vmatprep.subr.bf16.mxu1 %v18720_v22  ;;  %v18797_v21 = vld [vmem:[#allocation5 + $0xac] ss:$20 sps:$4 sm:$0xff]  }
 0x896   :  { %12317 = vmatprep.subr.bf16.mxu0 %v18722_v50  ;;  %v18792_v22 = vld [vmem:[#allocation5 + $0x6e0] ss:$20 sps:$4 sm:$0xff]   ;;  %v18795_v50 = vld [vmem:[#allocation5 + $0xa8] ss:$20 sps:$4 sm:$0xff]  }
 0x898   :  { %12277 = vmatpush2.bf16.msra.mxu1 %v18724_v13  ;;  %v18800_v13 = vld [vmem:[#allocation5 + $0x6bc] ss:$20 sps:$4 sm:$0xff]  }
 0x899   :  { %12318 = vmatpush2.bf16.msra.mxu0 %v18725_v25  ;;  %12328 = vmatprep.subr.bf16.mxu1 %v18728_v52  ;;  %v18803_v25 = vld [vmem:[#allocation5 + $0x84] ss:$20 sps:$4 sm:$0xff]  }
 0x89a   :  { %12369 = vmatprep.subr.bf16.mxu0 %v18731_v29  ;;  %v18798_v52 = vld [vmem:[#allocation5 + $0x6b8] ss:$20 sps:$4 sm:$0xff]   ;;  %v18801_v29 = vld [vmem:[#allocation5 + $0x80] ss:$20 sps:$4 sm:$0xff]  }
 0x89b   :  { %12279 = vmatmul.mubr.bf16.vlgmr.msra.gmra.mxu1 %v20290_v63 }
 0x89c   :  { %12320 = vmatmul.mubr.bf16.vlgmr.msra.gmra.mxu0 %v20294_v40  ;;  %12329 = vmatpush1.bf16.msra.mxu1 %v18726_v18  ;;  %v18806_v18 = vld [vmem:[#allocation5 + $0x694] ss:$20 sps:$4 sm:$0xff]  }
 0x89d   :  { %12370 = vmatpush1.bf16.msra.mxu0 %v18729_v9  ;;  %12330 = vmatprep.subr.bf16.mxu1 %v18734_v54  ;;  %v18809_v9 = vld [vmem:[#allocation5 + $0x5c] ss:$20 sps:$4 sm:$0xff]  }
 0x89e   :  { %12371 = vmatprep.subr.bf16.mxu0 %v18737_v1  ;;  %12401 = vmatprep.mubr.bf16.mxu0 %v19617_v0  ;;  %v18804_v54 = vld [vmem:[#allocation5 + $0x690] ss:$20 sps:$4 sm:$0xff]   ;;  %v18807_v1 = vld [vmem:[#allocation5 + $0x58] ss:$20 sps:$4 sm:$0xff]  }
 0x89f   :  { %12360 = vmatprep.mubr.bf16.mxu1 %v20298_v36 }
 0x8a0   :  { %12331 = vmatpush1.bf16.msra.mxu1 %v18732_v19  ;;  %v18812_v19 = vld [vmem:[#allocation5 + $0x66c] ss:$20 sps:$4 sm:$0xff]  }
 0x8a1   :  { %12372 = vmatpush1.bf16.msra.mxu0 %v18735_v31  ;;  %12332 = vmatprep.subr.bf16.mxu1 %v18740_v48  ;;  %v18815_v31 = vld [vmem:[#allocation5 + $0x34] ss:$20 sps:$4 sm:$0xff]  }
 0x8a2   :  { %12373 = vmatprep.subr.bf16.mxu0 %v18743_v5  ;;  %v18810_v48 = vld [vmem:[#allocation5 + $0x668] ss:$20 sps:$4 sm:$0xff]   ;;  %v18813_v5 = vld [vmem:[#allocation5 + $0x30] ss:$20 sps:$4 sm:$0xff]  }
 0x8a4   :  { %12333 = vmatpush1.bf16.msra.mxu1 %v18738_v26  ;;  %v18818_v26 = vld [vmem:[#allocation5 + $0x644] ss:$20 sps:$4 sm:$0xff]  }
 0x8a5   :  { %12374 = vmatpush1.bf16.msra.mxu0 %v18741_v38  ;;  %12334 = vmatprep.subr.bf16.mxu1 %v18746_v35  ;;  %v18821_v38 = vld [vmem:[#allocation5 + $0xc] ss:$20 sps:$4 sm:$0xff]  }
 0x8a6   :  { %12375 = vmatprep.subr.bf16.mxu0 %v18749_v3  ;;  %v18816_v35 = vld [vmem:[#allocation5 + $0x640] ss:$20 sps:$4 sm:$0xff]   ;;  %v18819_v3 = vld [vmem:[#allocation5 + $0x8] ss:$20 sps:$4 sm:$0xff]  }
 0x8a8   :  { %12335 = vmatpush1.bf16.msra.mxu1 %v18744_v20  ;;  %v18824_v20 = vld [vmem:[#allocation5 + $0x264] ss:$20 sps:$4 sm:$0xff]  }
 0x8a9   :  { %12376 = vmatpush1.bf16.msra.mxu0 %v18747_v42  ;;  %12336 = vmatprep.subr.bf16.mxu1 %v18752_v43  ;;  %v18827_v42 = vld [vmem:[#allocation5 + $0x3a4] ss:$20 sps:$4 sm:$0xff]   ;;  %v20312_v43 = vpack.c.bf16 %v20272_v7, %v20272_v7 }
 0x8aa   :  { %12377 = vmatprep.subr.bf16.mxu0 %v18755_v61  ;;  %v18822_v61 = vld [vmem:[#allocation5 + $0x260] ss:$20 sps:$4 sm:$0xff]   ;;  %v18834_v7 = vld [vmem:[#allocation5 + $0x210] ss:$20 sps:$4 sm:$0xff]  }
 0x8ac   :  { %12337 = vmatpush1.bf16.msra.mxu1 %v18750_v11  ;;  %v18825_v11 = vld [vmem:[#allocation5 + $0x3a0] ss:$20 sps:$4 sm:$0xff]  }
 0x8ad   :  { %12378 = vmatpush1.bf16.msra.mxu0 %v18753_v39  ;;  %12338 = vmatprep.subr.bf16.mxu1 %v18758_v46  ;;  %v18830_v39 = vld [vmem:[#allocation5 + $0x23c] ss:$20 sps:$4 sm:$0xff]  }
 0x8ae   :  { %12379 = vmatprep.subr.bf16.mxu0 %v18761_v14  ;;  %v18833_v46 = vld [vmem:[#allocation5 + $0x37c] ss:$20 sps:$4 sm:$0xff]   ;;  %v18828_v14 = vld [vmem:[#allocation5 + $0x238] ss:$20 sps:$4 sm:$0xff]  }
 0x8b0   :  { %12339 = vmatpush1.bf16.msra.mxu1 %v18756_v28  ;;  %v18831_v28 = vld [vmem:[#allocation5 + $0x378] ss:$20 sps:$4 sm:$0xff]  }
 0x8b1   :  { %12380 = vmatpush1.bf16.msra.mxu0 %v18759_v37  ;;  %12340 = vmatprep.subr.bf16.mxu1 %v18764_v41  ;;  %v18836_v37 = vld [vmem:[#allocation5 + $0x214] ss:$20 sps:$4 sm:$0xff]  }
 0x8b2   :  { %12381 = vmatprep.subr.bf16.mxu0 %v18767_v4  ;;  %v18839_v41 = vld [vmem:[#allocation5 + $0x354] ss:$20 sps:$4 sm:$0xff]   ;;  %v18837_v4 = vld [vmem:[#allocation5 + $0x350] ss:$20 sps:$4 sm:$0xff]  }
 0x8b4   :  { %12341 = vmatpush1.bf16.msra.mxu1 %v18762_v2  ;;  %v18842_v2 = vld [vmem:[#allocation5 + $0x1ec] ss:$20 sps:$4 sm:$0xff]  }
 0x8b5   :  { %12382 = vmatpush1.bf16.msra.mxu0 %v18765_v16  ;;  %12342 = vmatprep.subr.bf16.mxu1 %v18770_v8  ;;  %v18845_v16 = vld [vmem:[#allocation5 + $0x32c] ss:$20 sps:$4 sm:$0xff]   ;;  %v18840_v8 = vld [vmem:[#allocation5 + $0x1e8] ss:$20 sps:$4 sm:$0xff]  }
 0x8b6   :  { %12383 = vmatprep.subr.bf16.mxu0 %v18773_v51  ;;  %v18843_v51 = vld [vmem:[#allocation5 + $0x328] ss:$20 sps:$4 sm:$0xff]  }
 0x8b8   :  { %12343 = vmatpush1.bf16.msra.mxu1 %v18768_v53  ;;  %v18848_v53 = vld [vmem:[#allocation5 + $0x1c4] ss:$20 sps:$4 sm:$0xff]  }
 0x8b9   :  { %12384 = vmatpush1.bf16.msra.mxu0 %v18771_v58  ;;  %12344 = vmatprep.subr.bf16.mxu1 %v18776_v15  ;;  %v18851_v58 = vld [vmem:[#allocation5 + $0x304] ss:$20 sps:$4 sm:$0xff]   ;;  %v18846_v15 = vld [vmem:[#allocation5 + $0x1c0] ss:$20 sps:$4 sm:$0xff]  }
 0x8ba   :  { %12410 = vmatprep.subr.bf16.mxu0 %v18779_v60  ;;  %v18849_v60 = vld [vmem:[#allocation5 + $0x300] ss:$20 sps:$4 sm:$0xff]  }
 0x8bc   :  { %12402 = vmatmul.mubr.bf16.vlgmr.msra.gmra.mxu0 %v20306_v57  ;;  %12345 = vmatpush2.bf16.msra.mxu1 %v18774_v56  ;;  %v18854_v56 = vld [vmem:[#allocation5 + $0x19c] ss:$20 sps:$4 sm:$0xff]  }
 0x8bd   :  { %12411 = vmatpush1.bf16.msra.mxu0 %v18777_v62  ;;  %12346 = vmatprep.subr.bf16.mxu1 %v18782_v30  ;;  %v18857_v62 = vld [vmem:[#allocation5 + $0x2dc] ss:$20 sps:$4 sm:$0xff]   ;;  %v18852_v30 = vld [vmem:[#allocation5 + $0x198] ss:$20 sps:$4 sm:$0xff]  }
 0x8be   :  { %12412 = vmatprep.subr.bf16.mxu0 %v18785_v59  ;;  %12442 = vmatprep.mubr.bf16.mxu0 %v20282_v17  ;;  %v18855_v59 = vld [vmem:[#allocation5 + $0x2d8] ss:$20 sps:$4 sm:$0xff]  }
 0x8c0   :  { %12347 = vmatpush2.bf16.msra.mxu1 %v18780_v12  ;;  %v18860_v12 = vld [vmem:[#allocation5 + $0x174] ss:$20 sps:$4 sm:$0xff]  }
 0x8c1   :  { %12413 = vmatpush1.bf16.msra.mxu0 %v18783_v27  ;;  %12348 = vmatprep.subr.bf16.mxu1 %v18788_v23  ;;  %v18863_v27 = vld [vmem:[#allocation5 + $0x2b4] ss:$20 sps:$4 sm:$0xff]   ;;  %v18858_v23 = vld [vmem:[#allocation5 + $0x170] ss:$20 sps:$4 sm:$0xff]  }
 0x8c2   :  { %12414 = vmatprep.subr.bf16.mxu0 %v18791_v10  ;;  %v18861_v10 = vld [vmem:[#allocation5 + $0x2b0] ss:$20 sps:$4 sm:$0xff]  }
 0x8c4   :  { %12349 = vmatpush2.bf16.msra.mxu1 %v18786_v45  ;;  %v18866_v45 = vld [vmem:[#allocation5 + $0x14c] ss:$20 sps:$4 sm:$0xff]  }
 0x8c5   :  { %12415 = vmatpush1.bf16.msra.mxu0 %v18789_v24  ;;  %12350 = vmatprep.subr.bf16.mxu1 %v18794_v34  ;;  %v18869_v24 = vld [vmem:[#allocation5 + $0x28c] ss:$20 sps:$4 sm:$0xff]   ;;  %v18864_v34 = vld [vmem:[#allocation5 + $0x148] ss:$20 sps:$4 sm:$0xff]  }
 0x8c6   :  { %12416 = vmatprep.subr.bf16.mxu0 %v18797_v21  ;;  %v18867_v21 = vld [vmem:[#allocation5 + $0x288] ss:$20 sps:$4 sm:$0xff]  }
 0x8c8   :  { %12351 = vmatpush2.bf16.msra.mxu1 %v18792_v22  ;;  %v18872_v22 = vld [vmem:[#allocation5 + $0x4e4] ss:$20 sps:$4 sm:$0xff]  }
 0x8c9   :  { %12417 = vmatpush1.bf16.msra.mxu0 %v18795_v50  ;;  %12352 = vmatprep.subr.bf16.mxu1 %v18800_v13  ;;  %v18875_v50 = vld [vmem:[#allocation5 + $0x624] ss:$20 sps:$4 sm:$0xff]   ;;  %v18870_v13 = vld [vmem:[#allocation5 + $0x4e0] ss:$20 sps:$4 sm:$0xff]  }
 0x8ca   :  { %12418 = vmatprep.subr.bf16.mxu0 %v18803_v25  ;;  %v18873_v25 = vld [vmem:[#allocation5 + $0x620] ss:$20 sps:$4 sm:$0xff]  }
 0x8cc   :  { %12353 = vmatpush2.bf16.msra.mxu1 %v18798_v52  ;;  %v18878_v52 = vld [vmem:[#allocation5 + $0x4bc] ss:$20 sps:$4 sm:$0xff]  }
 0x8cd   :  { %12419 = vmatpush1.bf16.msra.mxu0 %v18801_v29  ;;  %12354 = vmatprep.subr.bf16.mxu1 %v18806_v18  ;;  %v18881_v29 = vld [vmem:[#allocation5 + $0x5fc] ss:$20 sps:$4 sm:$0xff]   ;;  %v18876_v18 = vld [vmem:[#allocation5 + $0x4b8] ss:$20 sps:$4 sm:$0xff]  }
 0x8ce   :  { %12420 = vmatprep.subr.bf16.mxu0 %v18809_v9  ;;  %v18879_v9 = vld [vmem:[#allocation5 + $0x5f8] ss:$20 sps:$4 sm:$0xff]  }
 0x8d0   :  { %12355 = vmatpush2.bf16.msra.mxu1 %v18804_v54  ;;  %v18884_v54 = vld [vmem:[#allocation5 + $0x494] ss:$20 sps:$4 sm:$0xff]  }
 0x8d1   :  { %12421 = vmatpush1.bf16.msra.mxu0 %v18807_v1  ;;  %12356 = vmatprep.subr.bf16.mxu1 %v18812_v19  ;;  %v18887_v1 = vld [vmem:[#allocation5 + $0x5d4] ss:$20 sps:$4 sm:$0xff]   ;;  %v18882_v19 = vld [vmem:[#allocation5 + $0x490] ss:$20 sps:$4 sm:$0xff]  }
 0x8d2   :  { %12422 = vmatprep.subr.bf16.mxu0 %v18815_v31  ;;  %v18885_v31 = vld [vmem:[#allocation5 + $0x5d0] ss:$20 sps:$4 sm:$0xff]  }
 0x8d4   :  { %12357 = vmatpush2.bf16.msra.mxu1 %v18810_v48  ;;  %v18890_v48 = vld [vmem:[#allocation5 + $0x46c] ss:$20 sps:$4 sm:$0xff]  }
 0x8d5   :  { %12423 = vmatpush1.bf16.msra.mxu0 %v18813_v5  ;;  %12358 = vmatprep.subr.bf16.mxu1 %v18818_v26  ;;  %v18893_v5 = vld [vmem:[#allocation5 + $0x5ac] ss:$20 sps:$4 sm:$0xff]   ;;  %v18888_v26 = vld [vmem:[#allocation5 + $0x468] ss:$20 sps:$4 sm:$0xff]  }
 0x8d6   :  { %12424 = vmatprep.subr.bf16.mxu0 %v18821_v38  ;;  %v18891_v38 = vld [vmem:[#allocation5 + $0x5a8] ss:$20 sps:$4 sm:$0xff]  }
 0x8d8   :  { %12359 = vmatpush2.bf16.msra.mxu1 %v18816_v35  ;;  %v18896_v35 = vld [vmem:[#allocation5 + $0x444] ss:$20 sps:$4 sm:$0xff]  }
 0x8d9   :  { %12425 = vmatpush1.bf16.msra.mxu0 %v18819_v3  ;;  %12451 = vmatprep.subr.bf16.mxu1 %v18827_v42  ;;  %v18899_v3 = vld [vmem:[#allocation5 + $0x584] ss:$20 sps:$4 sm:$0xff]   ;;  %v18897_v42 = vld [vmem:[#allocation5 + $0x580] ss:$20 sps:$4 sm:$0xff]  }
 0x8da   :  { %12426 = vmatprep.subr.bf16.mxu0 %v18824_v20  ;;  %v18894_v20 = vld [vmem:[#allocation5 + $0x440] ss:$20 sps:$4 sm:$0xff]  }
 0x8db   :  { %12361 = vmatmul.mubr.bf16.vlgmr.msra.gmra.mxu1 %v20312_v43 }
 0x8dc   :  { %12452 = vmatpush1.bf16.msra.mxu1 %v18825_v11  ;;  %12483 = vmatprep.mubr.bf16.mxu1 %v20284_v47  ;;  %v18905_v11 = vld [vmem:[#allocation5 + $0x55c] ss:$20 sps:$4 sm:$0xff]  }
 0x8dd   :  { %12427 = vmatpush2.bf16.msra.mxu0 %v18822_v61  ;;  %12453 = vmatprep.subr.bf16.mxu1 %v18833_v46  ;;  %v18902_v61 = vld [vmem:[#allocation5 + $0x41c] ss:$20 sps:$4 sm:$0xff]   ;;  %v18903_v46 = vld [vmem:[#allocation5 + $0x558] ss:$20 sps:$4 sm:$0xff]  }
 0x8de   :  { %12428 = vmatprep.subr.bf16.mxu0 %v18830_v39  ;;  %v18900_v39 = vld [vmem:[#allocation5 + $0x418] ss:$20 sps:$4 sm:$0xff]  }
 0x8e0   :  { %12454 = vmatpush1.bf16.msra.mxu1 %v18831_v28  ;;  %v18911_v28 = vld [vmem:[#allocation5 + $0x534] ss:$20 sps:$4 sm:$0xff]  }
 0x8e1   :  { %12429 = vmatpush2.bf16.msra.mxu0 %v18828_v14  ;;  %12455 = vmatprep.subr.bf16.mxu1 %v18839_v41  ;;  %v18908_v14 = vld [vmem:[#allocation5 + $0x3f4] ss:$20 sps:$4 sm:$0xff]   ;;  %v18909_v41 = vld [vmem:[#allocation5 + $0x530] ss:$20 sps:$4 sm:$0xff]  }
 0x8e2   :  { %12430 = vmatprep.subr.bf16.mxu0 %v18836_v37  ;;  %v18906_v37 = vld [vmem:[#allocation5 + $0x3f0] ss:$20 sps:$4 sm:$0xff]  }
 0x8e4   :  { %12456 = vmatpush1.bf16.msra.mxu1 %v18837_v4  ;;  %v18917_v4 = vld [vmem:[#allocation5 + $0x50c] ss:$20 sps:$4 sm:$0xff]  }
 0x8e5   :  { %12431 = vmatpush2.bf16.msra.mxu0 %v18834_v7  ;;  %12457 = vmatprep.subr.bf16.mxu1 %v18845_v16  ;;  %v18914_v7 = vld [vmem:[#allocation5 + $0x3cc] ss:$20 sps:$4 sm:$0xff]   ;;  %v18915_v16 = vld [vmem:[#allocation5 + $0x508] ss:$20 sps:$4 sm:$0xff]  }
 0x8e6   :  { %12432 = vmatprep.subr.bf16.mxu0 %v18842_v2  ;;  %v18912_v2 = vld [vmem:[#allocation5 + $0x3c8] ss:$20 sps:$4 sm:$0xff]  }
 0x8e8   :  { %12458 = vmatpush1.bf16.msra.mxu1 %v18843_v51  ;;  %v18923_v51 = vld [vmem:[#allocation5 + $0x8a4] ss:$20 sps:$4 sm:$0xff]  }
 0x8e9   :  { %12433 = vmatpush2.bf16.msra.mxu0 %v18840_v8  ;;  %12459 = vmatprep.subr.bf16.mxu1 %v18851_v58  ;;  %v18920_v8 = vld [vmem:[#allocation5 + $0x764] ss:$20 sps:$4 sm:$0xff]   ;;  %v18921_v58 = vld [vmem:[#allocation5 + $0x8a0] ss:$20 sps:$4 sm:$0xff]  }
 0x8ea   :  { %12434 = vmatprep.subr.bf16.mxu0 %v18848_v53  ;;  %v18918_v53 = vld [vmem:[#allocation5 + $0x760] ss:$20 sps:$4 sm:$0xff]  }
 0x8ec   :  { %12460 = vmatpush1.bf16.msra.mxu1 %v18849_v60  ;;  %v18929_v60 = vld [vmem:[#allocation5 + $0x87c] ss:$20 sps:$4 sm:$0xff]  }
 0x8ed   :  { %12435 = vmatpush2.bf16.msra.mxu0 %v18846_v15  ;;  %12461 = vmatprep.subr.bf16.mxu1 %v18857_v62  ;;  %v18926_v15 = vld [vmem:[#allocation5 + $0x73c] ss:$20 sps:$4 sm:$0xff]   ;;  %v18927_v62 = vld [vmem:[#allocation5 + $0x878] ss:$20 sps:$4 sm:$0xff]  }
 0x8ee   :  { %12436 = vmatprep.subr.bf16.mxu0 %v18854_v56  ;;  %v18924_v56 = vld [vmem:[#allocation5 + $0x738] ss:$20 sps:$4 sm:$0xff]  }
 0x8f0   :  { %12462 = vmatpush1.bf16.msra.mxu1 %v18855_v59  ;;  %v18935_v59 = vld [vmem:[#allocation5 + $0x854] ss:$20 sps:$4 sm:$0xff]  }
 0x8f1   :  { %12437 = vmatpush2.bf16.msra.mxu0 %v18852_v30  ;;  %12463 = vmatprep.subr.bf16.mxu1 %v18863_v27  ;;  %v18932_v30 = vld [vmem:[#allocation5 + $0x714] ss:$20 sps:$4 sm:$0xff]   ;;  %v18933_v27 = vld [vmem:[#allocation5 + $0x850] ss:$20 sps:$4 sm:$0xff]  }
 0x8f2   :  { %12438 = vmatprep.subr.bf16.mxu0 %v18860_v12  ;;  %v18930_v12 = vld [vmem:[#allocation5 + $0x710] ss:$20 sps:$4 sm:$0xff]  }
 0x8f4   :  { %12464 = vmatpush1.bf16.msra.mxu1 %v18861_v10  ;;  %v18941_v10 = vld [vmem:[#allocation5 + $0x82c] ss:$20 sps:$4 sm:$0xff]  }
 0x8f5   :  { %12439 = vmatpush2.bf16.msra.mxu0 %v18858_v23  ;;  %12465 = vmatprep.subr.bf16.mxu1 %v18869_v24  ;;  %v18938_v23 = vld [vmem:[#allocation5 + $0x6ec] ss:$20 sps:$4 sm:$0xff]   ;;  %v18939_v24 = vld [vmem:[#allocation5 + $0x828] ss:$20 sps:$4 sm:$0xff]  }
 0x8f6   :  { %12440 = vmatprep.subr.bf16.mxu0 %v18866_v45  ;;  %v18936_v45 = vld [vmem:[#allocation5 + $0x6e8] ss:$20 sps:$4 sm:$0xff]  }
 0x8f8   :  { %12466 = vmatpush1.bf16.msra.mxu1 %v18867_v21  ;;  %v18947_v21 = vld [vmem:[#allocation5 + $0x804] ss:$20 sps:$4 sm:$0xff]  }
 0x8f9   :  { %12441 = vmatpush2.bf16.msra.mxu0 %v18864_v34  ;;  %12467 = vmatprep.subr.bf16.mxu1 %v18872_v22  ;;  %v18944_v34 = vld [vmem:[#allocation5 + $0x6c4] ss:$20 sps:$4 sm:$0xff]   ;;  %v18942_v22 = vld [vmem:[#allocation5 + $0x6c0] ss:$20 sps:$4 sm:$0xff]  }
 0x8fa   :  { %12492 = vmatprep.subr.bf16.mxu0 %v18875_v50  ;;  %v18945_v50 = vld [vmem:[#allocation5 + $0x800] ss:$20 sps:$4 sm:$0xff]  }
 0x8fc   :  { %12443 = vmatmul.mubr.bf16.vlgmr.msra.gmra.mxu0 %v20290_v63  ;;  %12468 = vmatpush2.bf16.msra.mxu1 %v18870_v13  ;;  %v18950_v13 = vld [vmem:[#allocation5 + $0x69c] ss:$20 sps:$4 sm:$0xff]  }
 0x8fd   :  { %12493 = vmatpush1.bf16.msra.mxu0 %v18873_v25  ;;  %12469 = vmatprep.subr.bf16.mxu1 %v18878_v52  ;;  %v18953_v25 = vld [vmem:[#allocation5 + $0x7dc] ss:$20 sps:$4 sm:$0xff]   ;;  %v18948_v52 = vld [vmem:[#allocation5 + $0x698] ss:$20 sps:$4 sm:$0xff]  }
 0x8fe   :  { %12494 = vmatprep.subr.bf16.mxu0 %v18881_v29  ;;  %12524 = vmatprep.mubr.bf16.mxu0 %v20298_v36  ;;  %v18951_v29 = vld [vmem:[#allocation5 + $0x7d8] ss:$20 sps:$4 sm:$0xff]  }
 0x900   :  { %12470 = vmatpush2.bf16.msra.mxu1 %v18876_v18  ;;  %v18956_v18 = vld [vmem:[#allocation5 + $0x674] ss:$20 sps:$4 sm:$0xff]  }
 0x901   :  { %12495 = vmatpush1.bf16.msra.mxu0 %v18879_v9  ;;  %12471 = vmatprep.subr.bf16.mxu1 %v18884_v54  ;;  %v18959_v9 = vld [vmem:[#allocation5 + $0x7b4] ss:$20 sps:$4 sm:$0xff]   ;;  %v18954_v54 = vld [vmem:[#allocation5 + $0x670] ss:$20 sps:$4 sm:$0xff]  }
 0x902   :  { %12496 = vmatprep.subr.bf16.mxu0 %v18887_v1  ;;  %v18957_v1 = vld [vmem:[#allocation5 + $0x7b0] ss:$20 sps:$4 sm:$0xff]  }
 0x904   :  { %12472 = vmatpush2.bf16.msra.mxu1 %v18882_v19  ;;  %v18962_v19 = vld [vmem:[#allocation5 + $0x64c] ss:$20 sps:$4 sm:$0xff]  }
 0x905   :  { %12497 = vmatpush1.bf16.msra.mxu0 %v18885_v31  ;;  %12473 = vmatprep.subr.bf16.mxu1 %v18890_v48  ;;  %v18965_v31 = vld [vmem:[#allocation5 + $0x78c] ss:$20 sps:$4 sm:$0xff]   ;;  %v18960_v48 = vld [vmem:[#allocation5 + $0x648] ss:$20 sps:$4 sm:$0xff]  }
 0x906   :  { %12498 = vmatprep.subr.bf16.mxu0 %v18893_v5  ;;  %v18963_v5 = vld [vmem:[#allocation5 + $0x788] ss:$20 sps:$4 sm:$0xff]  }
 0x908   :  { %12474 = vmatpush2.bf16.msra.mxu1 %v18888_v26  ;;  %v18966_v26 = vld [vmem:[#allocation5 + $0x268] ss:$20 sps:$4 sm:$0xff]  }
 0x909   :  { %12499 = vmatpush1.bf16.msra.mxu0 %v18891_v38  ;;  %12475 = vmatprep.subr.bf16.mxu1 %v18896_v35  ;;  %v18967_v38 = vld [vmem:[#allocation5 + $0x4e8] ss:$20 sps:$4 sm:$0xff]  }
 0x90a   :  { %12500 = vmatprep.subr.bf16.mxu0 %v18899_v3  ;;  %v18968_v35 = vld [vmem:[#allocation5 + $0x128] ss:$20 sps:$4 sm:$0xff]  }
 0x90b   :  { %v18969_v3 = vld [vmem:[#allocation5 + $0x3a8] ss:$20 sps:$4 sm:$0xff]  }
 0x90c   :  { %12476 = vmatpush2.bf16.msra.mxu1 %v18894_v20  ;;  %v18970_v20 = vld [vmem:[#allocation5 + $0x240] ss:$20 sps:$4 sm:$0xff]  }
 0x90d   :  { %12501 = vmatpush1.bf16.msra.mxu0 %v18897_v42  ;;  %12477 = vmatprep.subr.bf16.mxu1 %v18902_v61  ;;  %v18971_v42 = vld [vmem:[#allocation5 + $0x4c0] ss:$20 sps:$4 sm:$0xff]  }
 0x90e   :  { %12502 = vmatprep.subr.bf16.mxu0 %v18905_v11  ;;  %v18972_v61 = vld [vmem:[#allocation5 + $0x100] ss:$20 sps:$4 sm:$0xff]  }
 0x90f   :  { %v18973_v11 = vld [vmem:[#allocation5 + $0x380] ss:$20 sps:$4 sm:$0xff]  }
 0x910   :  { %12478 = vmatpush2.bf16.msra.mxu1 %v18900_v39  ;;  %v18974_v39 = vld [vmem:[#allocation5 + $0x218] ss:$20 sps:$4 sm:$0xff]  }
 0x911   :  { %12503 = vmatpush1.bf16.msra.mxu0 %v18903_v46  ;;  %12479 = vmatprep.subr.bf16.mxu1 %v18908_v14  ;;  %v18975_v46 = vld [vmem:[#allocation5 + $0x498] ss:$20 sps:$4 sm:$0xff]  }
 0x912   :  { %12504 = vmatprep.subr.bf16.mxu0 %v18911_v28  ;;  %v18976_v14 = vld [vmem:[#allocation5 + $0xd8] ss:$20 sps:$4 sm:$0xff]  }
 0x913   :  { %v18977_v28 = vld [vmem:[#allocation5 + $0x358] ss:$20 sps:$4 sm:$0xff]  }
 0x914   :  { %12480 = vmatpush2.bf16.msra.mxu1 %v18906_v37  ;;  %v18978_v37 = vld [vmem:[#allocation5 + $0x1f0] ss:$20 sps:$4 sm:$0xff]  }
 0x915   :  { %12505 = vmatpush1.bf16.msra.mxu0 %v18909_v41  ;;  %12481 = vmatprep.subr.bf16.mxu1 %v18914_v7  ;;  %v18979_v41 = vld [vmem:[#allocation5 + $0x470] ss:$20 sps:$4 sm:$0xff]  }
 0x916   :  { %12506 = vmatprep.subr.bf16.mxu0 %v18917_v4  ;;  %v18980_v7 = vld [vmem:[#allocation5 + $0xb0] ss:$20 sps:$4 sm:$0xff]  }
 0x917   :  { %v18981_v4 = vld [vmem:[#allocation5 + $0x330] ss:$20 sps:$4 sm:$0xff]  }
 0x918   :  { %12482 = vmatpush2.bf16.msra.mxu1 %v18912_v2  ;;  %v18982_v2 = vld [vmem:[#allocation5 + $0x1c8] ss:$20 sps:$4 sm:$0xff]  }
 0x919   :  { %12507 = vmatpush1.bf16.msra.mxu0 %v18915_v16  ;;  %12533 = vmatprep.subr.bf16.mxu1 %v18923_v51  ;;  %v18983_v16 = vld [vmem:[#allocation5 + $0x448] ss:$20 sps:$4 sm:$0xff]   ;;  %v18987_v51 = vld [vmem:[#allocation5 + $0x420] ss:$20 sps:$4 sm:$0xff]  }
 0x91a   :  { %12508 = vmatprep.subr.bf16.mxu0 %v18920_v8  ;;  %v18986_v8 = vld [vmem:[#allocation5 + $0x1a0] ss:$20 sps:$4 sm:$0xff]  }
 0x91b   :  { %12484 = vmatmul.mubr.bf16.vlgmr.msra.gmra.mxu1 %v20294_v40 }
 0x91c   :  { %12534 = vmatpush1.bf16.msra.mxu1 %v18921_v58  ;;  %12565 = vmatprep.mubr.bf16.mxu1 %v19617_v0  ;;  %v18989_v58 = vld [vmem:[#allocation5 + $0x2e0] ss:$20 sps:$4 sm:$0xff]  }
 0x91d   :  { %12509 = vmatpush2.bf16.msra.mxu0 %v18918_v53  ;;  %12535 = vmatprep.subr.bf16.mxu1 %v18929_v60  ;;  %v18988_v53 = vld [vmem:[#allocation5 + $0x60] ss:$20 sps:$4 sm:$0xff]   ;;  %v18991_v60 = vld [vmem:[#allocation5 + $0x3f8] ss:$20 sps:$4 sm:$0xff]  }
 0x91e   :  { %12510 = vmatprep.subr.bf16.mxu0 %v18926_v15  ;;  %v18990_v15 = vld [vmem:[#allocation5 + $0x178] ss:$20 sps:$4 sm:$0xff]  }
 0x920   :  { %12536 = vmatpush1.bf16.msra.mxu1 %v18927_v62  ;;  %v18993_v62 = vld [vmem:[#allocation5 + $0x2b8] ss:$20 sps:$4 sm:$0xff]  }
 0x921   :  { %12511 = vmatpush2.bf16.msra.mxu0 %v18924_v56  ;;  %12537 = vmatprep.subr.bf16.mxu1 %v18935_v59  ;;  %v18992_v56 = vld [vmem:[#allocation5 + $0x38] ss:$20 sps:$4 sm:$0xff]   ;;  %v18995_v59 = vld [vmem:[#allocation5 + $0x3d0] ss:$20 sps:$4 sm:$0xff]  }
 0x922   :  { %12512 = vmatprep.subr.bf16.mxu0 %v18932_v30  ;;  %v18994_v30 = vld [vmem:[#allocation5 + $0x150] ss:$20 sps:$4 sm:$0xff]  }
 0x924   :  { %12538 = vmatpush1.bf16.msra.mxu1 %v18933_v27  ;;  %v10755_v27 = vld [vmem:[#allocation10 + $0x3] ss:$8 sm:$0x10] }
 0x925   :  { %12513 = vmatpush2.bf16.msra.mxu0 %v18930_v12  ;;  %12539 = vmatprep.subr.bf16.mxu1 %v18941_v10  ;;  %v10754_v12 = vld [vmem:[#allocation10 + $0x3] ss:$8 sm:$0xf] }
 0x926   :  { %12514 = vmatprep.subr.bf16.mxu0 %v18938_v23  ;;  %v18996_v23 = vld [vmem:[#allocation5 + $0x10] ss:$20 sps:$4 sm:$0xff]  }
 0x927   :  { %v18997_v10 = vld [vmem:[#allocation5 + $0x290] ss:$20 sps:$4 sm:$0xff]  }
 0x928   :  { %12540 = vmatpush1.bf16.msra.mxu1 %v18939_v24  ;;  %v18998_v24 = vld [vmem:[#allocation5 + $0x768] ss:$20 sps:$4 sm:$0xff]  }
 0x929   :  { %12515 = vmatpush2.bf16.msra.mxu0 %v18936_v45  ;;  %12541 = vmatprep.subr.bf16.mxu1 %v18947_v21  ;;  %v20324_v45 = vor.u32 %v10755_v27, %v10754_v12  ;;  %v18999_v21 = vld [vmem:[#allocation5 + $0x628] ss:$20 sps:$4 sm:$0xff]  }
 0x92a   :  { %12516 = vmatprep.subr.bf16.mxu0 %v18944_v34 }
 0x92b   :  { %v10768_v34 = vrot.slane %v20324_v45, %v19967_v32 }
 0x92c   :  { %12542 = vmatpush1.bf16.msra.mxu1 %v18945_v50  ;;  %v19001_v50 = vld [vmem:[#allocation5 + $0x740] ss:$20 sps:$4 sm:$0xff]  }
 0x92d   :  { %12517 = vmatpush2.bf16.msra.mxu0 %v18942_v22  ;;  %12543 = vmatprep.subr.bf16.mxu1 %v18953_v25  ;;  %v19000_v22 = vld [vmem:[#allocation5 + $0x8a8] ss:$20 sps:$4 sm:$0xff]  }
 0x92e   :  { %12518 = vmatprep.subr.bf16.mxu0 %v18950_v13  ;;  %v10772_v13 = vrot.slane %v20324_v45, %v19970_v33 }
 0x930   :  { %12544 = vmatpush1.bf16.msra.mxu1 %v18951_v29 }
 0x931   :  { %12519 = vmatpush2.bf16.msra.mxu0 %v18948_v52  ;;  %12545 = vmatprep.subr.bf16.mxu1 %v18959_v9  ;;  %v19003_v9 = vld [vmem:[#allocation5 + $0x880] ss:$20 sps:$4 sm:$0xff]  }
 0x932   :  { %12520 = vmatprep.subr.bf16.mxu0 %v18956_v18  ;;  %v19002_v18 = vld [vmem:[#allocation5 + $0x600] ss:$20 sps:$4 sm:$0xff]  }
 0x934   :  { %12546 = vmatpush1.bf16.msra.mxu1 %v18957_v1 }
 0x935   :  { %12521 = vmatpush2.bf16.msra.mxu0 %v18954_v54  ;;  %12547 = vmatprep.subr.bf16.mxu1 %v18965_v31 }
 0x936   :  { %12522 = vmatprep.subr.bf16.mxu0 %v18962_v19  ;;  %v19004_v19 = vld [vmem:[#allocation5 + $0x718] ss:$20 sps:$4 sm:$0xff]  }
 0x938   :  { %12548 = vmatpush1.bf16.msra.mxu1 %v18963_v5 }
 0x939   :  { %12523 = vmatpush2.bf16.msra.mxu0 %v18960_v48  ;;  %17165 = vmatprep.subr.bf16.mxu1 %v18966_v26  ;;  %v19005_v26 = vld [vmem:[#allocation5 + $0x5d8] ss:$20 sps:$4 sm:$0xff]  }
 0x93a   :  { %17187 = vmatprep.subr.bf16.mxu0 %v18967_v38  ;;  %v19006_v38 = vld [vmem:[#allocation5 + $0x858] ss:$20 sps:$4 sm:$0xff]  }
 0x93b   :  { %12566 = vmatmul.mubr.bf16.vlgmr.msra.gmra.mxu1 %v20306_v57 }
 0x93c   :  { %12525 = vmatmul.mubr.bf16.vlgmr.msra.gmra.mxu0 %v20312_v43  ;;  %17166 = vmatpush3.bf16.msra.mxu1 %v18968_v35 }
 0x93d   :  { %17188 = vmatpush3.bf16.msra.mxu0 %v18969_v3  ;;  %17167 = vmatprep.subr.bf16.mxu1 %v18970_v20  ;;  %v19007_v20 = vld [vmem:[#allocation5 + $0x6f0] ss:$20 sps:$4 sm:$0xff]  }
 0x93e   :  { %17189 = vmatprep.subr.bf16.mxu0 %v18971_v42  ;;  %12606 = vmatprep.mubr.bf16.mxu1 %v20282_v17  ;;  %v18984_v17 = vld [vmem:[#allocation5 + $0x88] ss:$20 sps:$4 sm:$0xff]   ;;  %v19008_v42 = vld [vmem:[#allocation5 + $0x5b0] ss:$20 sps:$4 sm:$0xff]  }
 0x93f   :  { %12646 = vmatprep.mubr.bf16.mxu0 %v20284_v47  ;;  %v18985_v47 = vld [vmem:[#allocation5 + $0x308] ss:$20 sps:$4 sm:$0xff]  }
 0x940   :  { %17168 = vmatpush3.bf16.msra.mxu1 %v18972_v61  ;;  %v19010_v61 = vld [vmem:[#allocation5 + $0x6c8] ss:$20 sps:$4 sm:$0xff]  }
 0x941   :  { %17190 = vmatpush3.bf16.msra.mxu0 %v18973_v11  ;;  %17169 = vmatprep.subr.bf16.mxu1 %v18974_v39  ;;  %v19011_v11 = vld [vmem:[#allocation5 + $0x588] ss:$20 sps:$4 sm:$0xff]  }
 0x942   :  { %17191 = vmatprep.subr.bf16.mxu0 %v18975_v46  ;;  %v19012_v39 = vld [vmem:[#allocation5 + $0x808] ss:$20 sps:$4 sm:$0xff]   ;;  %v19013_v46 = vld [vmem:[#allocation5 + $0x6a0] ss:$20 sps:$4 sm:$0xff]  }
 0x944   :  { %17170 = vmatpush3.bf16.msra.mxu1 %v18976_v14  ;;  %v19014_v14 = vld [vmem:[#allocation5 + $0x560] ss:$20 sps:$4 sm:$0xff]  }
 0x945   :  { %17192 = vmatpush3.bf16.msra.mxu0 %v18977_v28  ;;  %17171 = vmatprep.subr.bf16.mxu1 %v18978_v37  ;;  %v19015_v28 = vld [vmem:[#allocation5 + $0x7e0] ss:$20 sps:$4 sm:$0xff]   ;;  %v19016_v37 = vld [vmem:[#allocation5 + $0x678] ss:$20 sps:$4 sm:$0xff]  }
 0x946   :  { %17193 = vmatprep.subr.bf16.mxu0 %v18979_v41  ;;  %v19017_v41 = vld [vmem:[#allocation5 + $0x538] ss:$20 sps:$4 sm:$0xff]  }
 0x948   :  { %17172 = vmatpush3.bf16.msra.mxu1 %v18980_v7  ;;  %v19018_v7 = vld [vmem:[#allocation5 + $0x7b8] ss:$20 sps:$4 sm:$0xff]  }
 0x949   :  { %17194 = vmatpush3.bf16.msra.mxu0 %v18981_v4  ;;  %17173 = vmatprep.subr.bf16.mxu1 %v18982_v2  ;;  %v19019_v4 = vld [vmem:[#allocation5 + $0x650] ss:$20 sps:$4 sm:$0xff]  }
 0x94a   :  { %17195 = vmatprep.subr.bf16.mxu0 %v18983_v16  ;;  %v19020_v2 = vld [vmem:[#allocation5 + $0x510] ss:$20 sps:$4 sm:$0xff]  }
 0x94b   :  { %v19021_v16 = vld [vmem:[#allocation5 + $0x790] ss:$20 sps:$4 sm:$0xff]  }
 0x94c   :  { %17174 = vmatpush3.bf16.msra.mxu1 %v18984_v17 }
 0x94d   :  { %17196 = vmatpush3.bf16.msra.mxu0 %v18985_v47  ;;  %17175 = vmatprep.subr.bf16.mxu1 %v18986_v8 }
 0x94e   :  { %17197 = vmatprep.subr.bf16.mxu0 %v18987_v51 }
 0x950   :  { %17176 = vmatpush3.bf16.msra.mxu1 %v18988_v53 }
 0x951   :  { %17198 = vmatpush3.bf16.msra.mxu0 %v18989_v58  ;;  %17177 = vmatprep.subr.bf16.mxu1 %v18990_v15 }
 0x952   :  { %17199 = vmatprep.subr.bf16.mxu0 %v18991_v60 }
 0x954   :  { %17178 = vmatpush3.bf16.msra.mxu1 %v18992_v56 }
 0x955   :  { %17200 = vmatpush3.bf16.msra.mxu0 %v18993_v62  ;;  %17179 = vmatprep.subr.bf16.mxu1 %v18994_v30 }
 0x956   :  { %17201 = vmatprep.subr.bf16.mxu0 %v18995_v59 }
 0x958   :  { %17180 = vmatpush3.bf16.msra.mxu1 %v18996_v23 }
 0x959   :  { %17202 = vmatpush3.bf16.msra.mxu0 %v18997_v10  ;;  %17209 = vmatprep.subr.bf16.mxu1 %v18998_v24  ;;  %v10776_v24 = vrot.slane %v20324_v45, %v20009_v44 }
 0x95a   :  { %17335 = vmatprep.subr.bf16.mxu0 %v19625_v55 }
 0x95b   :  { %v12280_v25 = vpop.f32.mrf.mxu1  ;;  %12607 = vmatmul.mubr.bf16.vlgmr.msra.gmra.mxu1 %v20290_v63 }
 0x95c   :  { %v12321_v52 = vpop.f32.mrf.mxu0  ;;  %12647 = vmatmul.mubr.bf16.vlgmr.msra.gmra.mxu0 %v20294_v40  ;;  %v12281_v29 = vadd.f32 %v12280_v25, %v10768_v34  ;;  %17210 = vmatpush3.bf16.msra.mxu1 %v18999_v21  ;;  %v10780_v34 = vrot.slane %v20324_v45, %v20014_v49 }
 0x95d   :  { %17336 = vmatpush3.bf16.msra.mxu0 %v19000_v22  ;;  %v12282_v54 = vpop.f32.mrf.mxu1  ;;  %17211 = vmatprep.subr.bf16.mxu1 %v19001_v50 }
 0x95e   :  { %v12323_v1 = vpop.f32.mrf.mxu0  ;;  %17337 = vmatprep.subr.bf16.mxu0 %v19625_v55  ;;  %v12322_v31 = vadd.f32 %v12321_v52, %v12281_v29  ;;  %v12283_v48 = vadd.f32 %v12282_v54, %v10772_v13  ;;  %12686 = vmatprep.mubr.bf16.mxu1 %v20298_v36  ;;  %v19009_v36 = vld [vmem:[#allocation5 + $0x830] ss:$20 sps:$4 sm:$0xff]  }
 0x95f   :  { %17351 = vmatprep.mubr.msk.bf16.mxu0 %vm19626_vm0, %v19625_v55  ;;  %v12284_v63 = vpop.f32.mrf.mxu1 }
 0x960   :  { %v12325_v40 = vpop.f32.mrf.mxu0  ;;  %v12324_v5 = vadd.f32 %v12323_v1, %v12283_v48  ;;  %17212 = vmatpush3.bf16.msra.mxu1 %v19002_v18 }
 0x961   :  { %17338 = vmatpush3.bf16.msra.mxu0 %v19003_v9  ;;  %v12285_v35 = vpop.f32.mrf.mxu1  ;;  %17213 = vmatprep.subr.bf16.mxu1 %v19004_v19 }
 0x962   :  { %v12326_v3 = vpop.f32.mrf.mxu0  ;;  %17339 = vmatprep.subr.bf16.mxu0 %v19625_v55 }
 0x964   :  { %17214 = vmatpush3.bf16.msra.mxu1 %v19005_v26 }
 0x965   :  { %17340 = vmatpush3.bf16.msra.mxu0 %v19006_v38  ;;  %17215 = vmatprep.subr.bf16.mxu1 %v19007_v20 }
 0x966   :  { %17341 = vmatprep.subr.bf16.mxu0 %v19625_v55 }
 0x968   :  { %17216 = vmatpush3.bf16.msra.mxu1 %v19008_v42 }
 0x969   :  { %17342 = vmatpush3.bf16.msra.mxu0 %v19009_v36  ;;  %17217 = vmatprep.subr.bf16.mxu1 %v19010_v61 }
 0x96a   :  { %17343 = vmatprep.subr.bf16.mxu0 %v19625_v55 }
 0x96c   :  { %17218 = vmatpush3.bf16.msra.mxu1 %v19011_v11 }
 0x96d   :  { %17344 = vmatpush3.bf16.msra.mxu0 %v19012_v39  ;;  %17219 = vmatprep.subr.bf16.mxu1 %v19013_v46 }
 0x96e   :  { %17345 = vmatprep.subr.bf16.mxu0 %v19625_v55 }
 0x970   :  { %17220 = vmatpush3.bf16.msra.mxu1 %v19014_v14 }
 0x971   :  { %17346 = vmatpush3.bf16.msra.mxu0 %v19015_v28  ;;  %17221 = vmatprep.subr.bf16.mxu1 %v19016_v37  ;;  %v10784_v37 = vrot.slane %v20324_v45, %v20038_v6 }
 0x972   :  { %17347 = vmatprep.subr.bf16.mxu0 %v19625_v55 }
 0x974   :  { %17222 = vmatpush3.bf16.msra.mxu1 %v19017_v41 }
 0x975   :  { %17348 = vmatpush3.bf16.msra.mxu0 %v19018_v7  ;;  %17223 = vmatprep.subr.bf16.mxu1 %v19019_v4 }
 0x976   :  { %17349 = vmatprep.subr.bf16.mxu0 %v19625_v55 }
 0x978   :  { %17224 = vmatpush3.bf16.msra.mxu1 %v19020_v2 }
 0x979   :  { %17350 = vmatpush3.bf16.msra.mxu0 %v19021_v16 }
 0x97b   :  { %12687 = vmatmul.mubr.bf16.vlgmr.msra.gmra.mxu1 %v20312_v43 }
 0x97c   :  { %v12403_v17 = vpop.f32.mrf.mxu0  ;;  %17352 = vmatmul.mubr.bf16.vlgmr.msra.gmra.mxu0 %v20306_v57 }
 0x97e   :  { %v12405_v47 = vpop.f32.mrf.mxu0 }
 0x980   :  { %v12407_v8 = vpop.f32.mrf.mxu0 }
 0x982   :  { %v12408_v51 = vpop.f32.mrf.mxu0 }
 0x99b   :  { %v12362_v53 = vpop.f32.mrf.mxu1 }
 0x99c   :  { %v12363_v58 = vadd.f32 %v12362_v53, %v12322_v31 }
 0x99d   :  { %v12364_v15 = vpop.f32.mrf.mxu1 }
 0x99e   :  { %v12404_v60 = vadd.f32 %v12403_v17, %v12363_v58  ;;  %v12365_v56 = vadd.f32 %v12364_v15, %v12324_v5 }
 0x99f   :  { %v12366_v62 = vpop.f32.mrf.mxu1 }
 0x9a0   :  { %19022 = vtanh.f32 %v12404_v60  ;;  %v12406_v30 = vadd.f32 %v12405_v47, %v12365_v56 }
 0x9a1   :  { %v12367_v59 = vpop.f32.mrf.mxu1 }
 0x9a2   :  { %19024 = vtanh.f32 %v12406_v30 }
 0x9ad   :  { %v20345_v12 = vpop.eup %19022 }
 0x9af   :  { %v19025_v27 = vpop.eup %19024 }
 0x9bc   :  { %v12444_v23 = vpop.f32.mrf.mxu0 }
 0x9bd   :  { %v12445_v21 = vadd.f32 %v12444_v23, %v10776_v24 }
 0x9be   :  { %v12446_v43 = vpop.f32.mrf.mxu0 }
 0x9bf   :  { %v12447_v50 = vadd.f32 %v12446_v43, %v10780_v34 }
 0x9c0   :  { %v12448_v10 = vpop.f32.mrf.mxu0 }
 0x9c2   :  { %v12449_v57 = vpop.f32.mrf.mxu0 }
 0x9db   :  { %v12485_v22 = vpop.f32.mrf.mxu1 }
 0x9dc   :  { %v12486_v13 = vadd.f32 %v12485_v22, %v12445_v21 }
 0x9dd   :  { %v12487_v25 = vpop.f32.mrf.mxu1 }
 0x9de   :  { %v12488_v52 = vadd.f32 %v12487_v25, %v12447_v50 }
 0x9df   :  { %v12489_v29 = vpop.f32.mrf.mxu1 }
 0x9e1   :  { %v12490_v18 = vpop.f32.mrf.mxu1 }
 0x9fb   :  { %v12567_v54 = vpop.f32.mrf.mxu1 }
 0x9fc   :  { %v12526_v9 = vpop.f32.mrf.mxu0 }
 0x9fd   :  { %v12527_v1 = vadd.f32 %v12526_v9, %v12486_v13  ;;  %v12569_v31 = vpop.f32.mrf.mxu1 }
 0x9fe   :  { %v12528_v19 = vpop.f32.mrf.mxu0 }
 0x9ff   :  { %v12568_v48 = vadd.f32 %v12567_v54, %v12527_v1  ;;  %v12529_v63 = vadd.f32 %v12528_v19, %v12488_v52  ;;  %v12571_v5 = vpop.f32.mrf.mxu1 }
 0xa00   :  { %v12530_v40 = vpop.f32.mrf.mxu0 }
 0xa01   :  { %19026 = vtanh.f32 %v12568_v48  ;;  %v12570_v26 = vadd.f32 %v12569_v31, %v12529_v63  ;;  %v12572_v35 = vpop.f32.mrf.mxu1 }
 0xa02   :  { %v12531_v38 = vpop.f32.mrf.mxu0 }
 0xa03   :  { %19028 = vtanh.f32 %v12570_v26 }
 0xa0e   :  { %v20351_v3 = vpop.eup %19026 }
 0xa10   :  { %v19029_v20 = vpop.eup %19028 }
 0xa1b   :  { %v17181_v42 = vpop.f32.mrf.mxu1 }
 0xa1c   :  { %v17203_v36 = vpop.f32.mrf.mxu0 }
 0xa1d   :  { %v17182_v61 = vpop.f32.mrf.mxu1 }
 0xa1e   :  { %v17204_v11 = vpop.f32.mrf.mxu0  ;;  %v17183_v41 = vadd.f32 %v17182_v61, %v17181_v42 }
 0xa1f   :  { %v17184_v39 = vpop.f32.mrf.mxu1  ;;  %v17205_v4 = vadd.f32 %v17204_v11, %v17203_v36 }
 0xa20   :  { %v17206_v46 = vpop.f32.mrf.mxu0  ;;  %v12609_v7 = vadd.f32 %v17183_v41, %v10784_v37 }
 0xa21   :  { %v17185_v14 = vpop.f32.mrf.mxu1 }
 0xa22   :  { %v17207_v28 = vpop.f32.mrf.mxu0  ;;  %v12649_v8 = vadd.f32 %v17205_v4, %v12609_v7 }
 0xa3b   :  { %v17225_v2 = vpop.f32.mrf.mxu1 }
 0xa3c   :  { %v12728_v16 = vpop.f32.mrf.mxu0 }
 0xa3d   :  { %v17226_v17 = vpop.f32.mrf.mxu1 }
 0xa3e   :  { %v17353_v47 = vpop.f32.mrf.mxu0  ;;  %v17227_v51 = vadd.f32 %v17226_v17, %v17225_v2 }
 0xa3f   :  { %v17228_v53 = vpop.f32.mrf.mxu1 }
 0xa40   :  { %v12731_v58 = vpop.f32.mrf.mxu0  ;;  %v12689_v15 = vadd.f32 %v17227_v51, %v12649_v8 }
 0xa41   :  { %v17229_v60 = vpop.f32.mrf.mxu1 }
 0xa42   :  { %v17354_v56 = vpop.f32.mrf.mxu0  ;;  %v12729_v62 = vadd.f32 %v12728_v16, %v12689_v15 }
 0xa44   :  { %19030 = vtanh.f32 %v12729_v62 }
 0xa51   :  { %v20355_v30 = vpop.eup %19030 }
 0xa52   :  { %19610 = dma.done.wait [#allocation9 + $0x4], 19456 }
 0xa53   :  { %19611 = vsyncadd [#allocation9 + $0x4], 4294947840  ;;  %v20357_v6 = vpack.c.bf16 %v19025_v27, %v19025_v27  ;;  %v20359_v45 = vpack.c.bf16 %v19029_v20, %v19029_v20  ;;  %v19032_v59 = vld [vmem:[#allocation6 + $0xe4] ss:$16 sps:$4 sm:$0xff]   ;;  %v19036_v43 = vld [vmem:[#allocation6 + $0xe0] ss:$16 sps:$4 sm:$0xff]  }
 0xa54   :  { %v19034_v23 = vld [vmem:[#allocation6 + $0x2e4] ss:$16 sps:$4 sm:$0xff]   ;;  %13731 = vmatprep.subr.bf16.mxu1 %v19032_v59  ;;  %v19037_v10 = vld [vmem:[#allocation6 + $0x2e0] ss:$16 sps:$4 sm:$0xff]  }
 0xa55   :  { %13763 = vmatprep.mubr.bf16.mxu1 %v20357_v6  ;;  %13804 = vmatprep.mubr.bf16.mxu0 %v20359_v45  ;;  %v19038_v57 = vld [vmem:[#allocation6 + $0xc4] ss:$16 sps:$4 sm:$0xff]   ;;  %v19042_v34 = vld [vmem:[#allocation6 + $0xc0] ss:$16 sps:$4 sm:$0xff]  }
 0xa56   :  { %13772 = vmatprep.subr.bf16.mxu0 %v19034_v23  ;;  %13732 = vmatpush1.bf16.msra.mxu1 %v19036_v43  ;;  %v19040_v24 = vld [vmem:[#allocation6 + $0x2c4] ss:$16 sps:$4 sm:$0xff]   ;;  %v19043_v27 = vld [vmem:[#allocation6 + $0x2c0] ss:$16 sps:$4 sm:$0xff]  }
 0xa57   :  { %13773 = vmatpush1.bf16.msra.mxu0 %v19037_v10  ;;  %13733 = vmatprep.subr.bf16.mxu1 %v19038_v57  ;;  %v19044_v21 = vld [vmem:[#allocation6 + $0xa4] ss:$16 sps:$4 sm:$0xff]   ;;  %v19048_v50 = vld [vmem:[#allocation6 + $0xa0] ss:$16 sps:$4 sm:$0xff]  }
 0xa58   :  { %13774 = vmatprep.subr.bf16.mxu0 %v19040_v24  ;;  %v19046_v22 = vld [vmem:[#allocation6 + $0x2a4] ss:$16 sps:$4 sm:$0xff]   ;;  %v19049_v13 = vld [vmem:[#allocation6 + $0x2a0] ss:$16 sps:$4 sm:$0xff]  }
 0xa59   :  { %v19050_v25 = vld [vmem:[#allocation6 + $0x84] ss:$16 sps:$4 sm:$0xff]   ;;  %v19054_v29 = vld [vmem:[#allocation6 + $0x80] ss:$16 sps:$4 sm:$0xff]  }
 0xa5a   :  { %13734 = vmatpush1.bf16.msra.mxu1 %v19042_v34  ;;  %v19052_v52 = vld [vmem:[#allocation6 + $0x284] ss:$16 sps:$4 sm:$0xff]   ;;  %v19055_v18 = vld [vmem:[#allocation6 + $0x280] ss:$16 sps:$4 sm:$0xff]  }
 0xa5b   :  { %13775 = vmatpush1.bf16.msra.mxu0 %v19043_v27  ;;  %13735 = vmatprep.subr.bf16.mxu1 %v19044_v21  ;;  %v19056_v9 = vld [vmem:[#allocation6 + $0x64] ss:$16 sps:$4 sm:$0xff]   ;;  %v19060_v1 = vld [vmem:[#allocation6 + $0x60] ss:$16 sps:$4 sm:$0xff]  }
 0xa5c   :  { %13776 = vmatprep.subr.bf16.mxu0 %v19046_v22  ;;  %v19058_v54 = vld [vmem:[#allocation6 + $0x264] ss:$16 sps:$4 sm:$0xff]   ;;  %v19061_v19 = vld [vmem:[#allocation6 + $0x260] ss:$16 sps:$4 sm:$0xff]  }
 0xa5d   :  { %v19062_v31 = vld [vmem:[#allocation6 + $0x44] ss:$16 sps:$4 sm:$0xff]   ;;  %v19066_v63 = vld [vmem:[#allocation6 + $0x40] ss:$16 sps:$4 sm:$0xff]  }
 0xa5e   :  { %13736 = vmatpush1.bf16.msra.mxu1 %v19048_v50  ;;  %v19064_v48 = vld [vmem:[#allocation6 + $0x244] ss:$16 sps:$4 sm:$0xff]   ;;  %v19067_v40 = vld [vmem:[#allocation6 + $0x240] ss:$16 sps:$4 sm:$0xff]  }
 0xa5f   :  { %13777 = vmatpush1.bf16.msra.mxu0 %v19049_v13  ;;  %13737 = vmatprep.subr.bf16.mxu1 %v19050_v25  ;;  %v19068_v5 = vld [vmem:[#allocation6 + $0x24] ss:$16 sps:$4 sm:$0xff]   ;;  %v19072_v38 = vld [vmem:[#allocation6 + $0x20] ss:$16 sps:$4 sm:$0xff]   ;;  %v19133_v25 = vld [vmem:[#allocation6 + $0xec] ss:$16 sps:$4 sm:$0xff]  }
 0xa60   :  { %13778 = vmatprep.subr.bf16.mxu0 %v19052_v52  ;;  %v19070_v26 = vld [vmem:[#allocation6 + $0x224] ss:$16 sps:$4 sm:$0xff]   ;;  %v19073_v35 = vld [vmem:[#allocation6 + $0x220] ss:$16 sps:$4 sm:$0xff]   ;;  %v20365_v52 = vpack.c.bf16 %v20345_v12, %v20345_v12 }
 0xa61   :  { %v19074_v20 = vld [vmem:[#allocation6 + $0x4] ss:$16 sps:$4 sm:$0xff]   ;;  %v19078_v36 = vld [vmem:[#allocation6] ss:$16 sps:$4 sm:$0xff]  }
 0xa62   :  { %13738 = vmatpush1.bf16.msra.mxu1 %v19054_v29  ;;  %v19076_v42 = vld [vmem:[#allocation6 + $0x204] ss:$16 sps:$4 sm:$0xff]   ;;  %v19079_v61 = vld [vmem:[#allocation6 + $0x200] ss:$16 sps:$4 sm:$0xff]   ;;  %v20369_v29 = vpack.c.bf16 %v20351_v3, %v20351_v3  ;;  %v19145_v3 = vld [vmem:[#allocation6 + $0xac] ss:$16 sps:$4 sm:$0xff]  }
 0xa63   :  { %13779 = vmatpush1.bf16.msra.mxu0 %v19055_v18  ;;  %13739 = vmatprep.subr.bf16.mxu1 %v19056_v9  ;;  %v19080_v11 = vld [vmem:[#allocation6 + $0x1e4] ss:$16 sps:$4 sm:$0xff]   ;;  %v19084_v46 = vld [vmem:[#allocation6 + $0x1e0] ss:$16 sps:$4 sm:$0xff]   ;;  %v19131_v9 = vld [vmem:[#allocation6 + $0xe8] ss:$16 sps:$4 sm:$0xff]  }
 0xa64   :  { %13780 = vmatprep.subr.bf16.mxu0 %v19058_v54  ;;  %v19082_v39 = vld [vmem:[#allocation6 + $0x3e4] ss:$16 sps:$4 sm:$0xff]   ;;  %v19085_v14 = vld [vmem:[#allocation6 + $0x3e0] ss:$16 sps:$4 sm:$0xff]  }
 0xa65   :  { %v19086_v28 = vld [vmem:[#allocation6 + $0x1c4] ss:$16 sps:$4 sm:$0xff]   ;;  %v19090_v41 = vld [vmem:[#allocation6 + $0x1c0] ss:$16 sps:$4 sm:$0xff]  }
 0xa66   :  { %13740 = vmatpush1.bf16.msra.mxu1 %v19060_v1  ;;  %v19088_v37 = vld [vmem:[#allocation6 + $0x3c4] ss:$16 sps:$4 sm:$0xff]   ;;  %v19091_v7 = vld [vmem:[#allocation6 + $0x3c0] ss:$16 sps:$4 sm:$0xff]   ;;  %v19139_v1 = vld [vmem:[#allocation6 + $0xcc] ss:$16 sps:$4 sm:$0xff]  }
 0xa67   :  { %13781 = vmatpush1.bf16.msra.mxu0 %v19061_v19  ;;  %13741 = vmatprep.subr.bf16.mxu1 %v19062_v31  ;;  %v19092_v4 = vld [vmem:[#allocation6 + $0x1a4] ss:$16 sps:$4 sm:$0xff]   ;;  %v19096_v16 = vld [vmem:[#allocation6 + $0x1a0] ss:$16 sps:$4 sm:$0xff]   ;;  %v19137_v31 = vld [vmem:[#allocation6 + $0xc8] ss:$16 sps:$4 sm:$0xff]  }
 0xa68   :  { %13782 = vmatprep.subr.bf16.mxu0 %v19064_v48  ;;  %v19094_v2 = vld [vmem:[#allocation6 + $0x3a4] ss:$16 sps:$4 sm:$0xff]   ;;  %v19097_v17 = vld [vmem:[#allocation6 + $0x3a0] ss:$16 sps:$4 sm:$0xff]  }
 0xa69   :  { %v19098_v47 = vld [vmem:[#allocation6 + $0x184] ss:$16 sps:$4 sm:$0xff]   ;;  %v19102_v51 = vld [vmem:[#allocation6 + $0x180] ss:$16 sps:$4 sm:$0xff]  }
 0xa6a   :  { %13742 = vmatpush1.bf16.msra.mxu1 %v19066_v63  ;;  %v19100_v8 = vld [vmem:[#allocation6 + $0x384] ss:$16 sps:$4 sm:$0xff]   ;;  %v19103_v53 = vld [vmem:[#allocation6 + $0x380] ss:$16 sps:$4 sm:$0xff]   ;;  %v19143_v63 = vld [vmem:[#allocation6 + $0xa8] ss:$16 sps:$4 sm:$0xff]  }
 0xa6b   :  { %13783 = vmatpush1.bf16.msra.mxu0 %v19067_v40  ;;  %13743 = vmatprep.subr.bf16.mxu1 %v19068_v5  ;;  %v19104_v58 = vld [vmem:[#allocation6 + $0x164] ss:$16 sps:$4 sm:$0xff]   ;;  %v19108_v60 = vld [vmem:[#allocation6 + $0x160] ss:$16 sps:$4 sm:$0xff]   ;;  %v19151_v5 = vld [vmem:[#allocation6 + $0x8c] ss:$16 sps:$4 sm:$0xff]  }
 0xa6c   :  { %13784 = vmatprep.subr.bf16.mxu0 %v19070_v26  ;;  %v19106_v15 = vld [vmem:[#allocation6 + $0x364] ss:$16 sps:$4 sm:$0xff]   ;;  %v19109_v56 = vld [vmem:[#allocation6 + $0x360] ss:$16 sps:$4 sm:$0xff]  }
 0xa6d   :  { %v19110_v62 = vld [vmem:[#allocation6 + $0x144] ss:$16 sps:$4 sm:$0xff]   ;;  %v19114_v23 = vld [vmem:[#allocation6 + $0x140] ss:$16 sps:$4 sm:$0xff]  }
 0xa6e   :  { %13744 = vmatpush1.bf16.msra.mxu1 %v19072_v38  ;;  %v19112_v59 = vld [vmem:[#allocation6 + $0x344] ss:$16 sps:$4 sm:$0xff]   ;;  %v19115_v43 = vld [vmem:[#allocation6 + $0x340] ss:$16 sps:$4 sm:$0xff]   ;;  %v19149_v38 = vld [vmem:[#allocation6 + $0x88] ss:$16 sps:$4 sm:$0xff]  }
 0xa6f   :  { %13785 = vmatpush1.bf16.msra.mxu0 %v19073_v35  ;;  %13745 = vmatprep.subr.bf16.mxu1 %v19074_v20  ;;  %v19116_v10 = vld [vmem:[#allocation6 + $0x124] ss:$16 sps:$4 sm:$0xff]   ;;  %v19120_v24 = vld [vmem:[#allocation6 + $0x120] ss:$16 sps:$4 sm:$0xff]   ;;  %v19157_v20 = vld [vmem:[#allocation6 + $0x6c] ss:$16 sps:$4 sm:$0xff]  }
 0xa70   :  { %13786 = vmatprep.subr.bf16.mxu0 %v19076_v42  ;;  %v19118_v57 = vld [vmem:[#allocation6 + $0x324] ss:$16 sps:$4 sm:$0xff]   ;;  %v19121_v34 = vld [vmem:[#allocation6 + $0x320] ss:$16 sps:$4 sm:$0xff]  }
 0xa71   :  { %v19122_v27 = vld [vmem:[#allocation6 + $0x104] ss:$16 sps:$4 sm:$0xff]   ;;  %v19126_v22 = vld [vmem:[#allocation6 + $0x100] ss:$16 sps:$4 sm:$0xff]  }
 0xa72   :  { %13746 = vmatpush1.bf16.msra.mxu1 %v19078_v36  ;;  %v19124_v21 = vld [vmem:[#allocation6 + $0x304] ss:$16 sps:$4 sm:$0xff]   ;;  %v19127_v50 = vld [vmem:[#allocation6 + $0x300] ss:$16 sps:$4 sm:$0xff]   ;;  %v19155_v36 = vld [vmem:[#allocation6 + $0x68] ss:$16 sps:$4 sm:$0xff]  }
 0xa73   :  { %13787 = vmatpush1.bf16.msra.mxu0 %v19079_v61  ;;  %13747 = vmatprep.subr.bf16.mxu1 %v19080_v11  ;;  %v19130_v13 = vld [vmem:[#allocation6 + $0x4e4] ss:$16 sps:$4 sm:$0xff]   ;;  %v19128_v18 = vld [vmem:[#allocation6 + $0x4e0] ss:$16 sps:$4 sm:$0xff]   ;;  %v19163_v61 = vld [vmem:[#allocation6 + $0x4c] ss:$16 sps:$4 sm:$0xff]  }
 0xa74   :  { %13788 = vmatprep.subr.bf16.mxu0 %v19082_v39  ;;  %v19136_v54 = vld [vmem:[#allocation6 + $0x4c4] ss:$16 sps:$4 sm:$0xff]   ;;  %v19134_v19 = vld [vmem:[#allocation6 + $0x4c0] ss:$16 sps:$4 sm:$0xff]   ;;  %v19161_v39 = vld [vmem:[#allocation6 + $0x48] ss:$16 sps:$4 sm:$0xff]  }
 0xa75   :  { %v19142_v12 = vld [vmem:[#allocation6 + $0x4a4] ss:$16 sps:$4 sm:$0xff]   ;;  %v19140_v48 = vld [vmem:[#allocation6 + $0x4a0] ss:$16 sps:$4 sm:$0xff]  }
 0xa76   :  { %13748 = vmatpush2.bf16.msra.mxu1 %v19084_v46  ;;  %v19148_v40 = vld [vmem:[#allocation6 + $0x484] ss:$16 sps:$4 sm:$0xff]   ;;  %v19146_v26 = vld [vmem:[#allocation6 + $0x480] ss:$16 sps:$4 sm:$0xff]  }
 0xa77   :  { %13789 = vmatpush2.bf16.msra.mxu0 %v19085_v14  ;;  %13749 = vmatprep.subr.bf16.mxu1 %v19086_v28  ;;  %v19154_v35 = vld [vmem:[#allocation6 + $0x464] ss:$16 sps:$4 sm:$0xff]   ;;  %v19152_v42 = vld [vmem:[#allocation6 + $0x460] ss:$16 sps:$4 sm:$0xff]   ;;  %v19169_v14 = vld [vmem:[#allocation6 + $0x2c] ss:$16 sps:$4 sm:$0xff]  }
 0xa78   :  { %13790 = vmatprep.subr.bf16.mxu0 %v19088_v37  ;;  %v19158_v11 = vld [vmem:[#allocation6 + $0x440] ss:$16 sps:$4 sm:$0xff]   ;;  %v19166_v46 = vld [vmem:[#allocation6 + $0x424] ss:$16 sps:$4 sm:$0xff]   ;;  %v19167_v37 = vld [vmem:[#allocation6 + $0x28] ss:$16 sps:$4 sm:$0xff]  }
 0xa79   :  { %v19164_v28 = vld [vmem:[#allocation6 + $0x420] ss:$16 sps:$4 sm:$0xff]  }
 0xa7a   :  { %13750 = vmatpush2.bf16.msra.mxu1 %v19090_v41  ;;  %v19172_v41 = vld [vmem:[#allocation6 + $0x404] ss:$16 sps:$4 sm:$0xff]  }
 0xa7b   :  { %13791 = vmatpush2.bf16.msra.mxu0 %v19091_v7  ;;  %13751 = vmatprep.subr.bf16.mxu1 %v19092_v4  ;;  %v19175_v7 = vld [vmem:[#allocation6 + $0xc] ss:$16 sps:$4 sm:$0xff]   ;;  %v19170_v4 = vld [vmem:[#allocation6 + $0x400] ss:$16 sps:$4 sm:$0xff]  }
 0xa7c   :  { %13792 = vmatprep.subr.bf16.mxu0 %v19094_v2  ;;  %v19173_v2 = vld [vmem:[#allocation6 + $0x8] ss:$16 sps:$4 sm:$0xff]  }
 0xa7e   :  { %13752 = vmatpush2.bf16.msra.mxu1 %v19096_v16  ;;  %v19178_v16 = vld [vmem:[#allocation6 + $0x1ec] ss:$16 sps:$4 sm:$0xff]  }
 0xa7f   :  { %13793 = vmatpush2.bf16.msra.mxu0 %v19097_v17  ;;  %13753 = vmatprep.subr.bf16.mxu1 %v19098_v47  ;;  %v19181_v17 = vld [vmem:[#allocation6 + $0x2ec] ss:$16 sps:$4 sm:$0xff]   ;;  %v20377_v47 = vpack.c.bf16 %v20355_v30, %v20355_v30  ;;  %v19188_v30 = vld [vmem:[#allocation6 + $0x1a8] ss:$16 sps:$4 sm:$0xff]  }
 0xa80   :  { %13794 = vmatprep.subr.bf16.mxu0 %v19100_v8  ;;  %v19176_v8 = vld [vmem:[#allocation6 + $0x1e8] ss:$16 sps:$4 sm:$0xff]  }
 0xa82   :  { %13754 = vmatpush2.bf16.msra.mxu1 %v19102_v51  ;;  %v19179_v51 = vld [vmem:[#allocation6 + $0x2e8] ss:$16 sps:$4 sm:$0xff]  }
 0xa83   :  { %13795 = vmatpush2.bf16.msra.mxu0 %v19103_v53  ;;  %13755 = vmatprep.subr.bf16.mxu1 %v19104_v58  ;;  %v19184_v53 = vld [vmem:[#allocation6 + $0x1cc] ss:$16 sps:$4 sm:$0xff]  }
 0xa84   :  { %13796 = vmatprep.subr.bf16.mxu0 %v19106_v15  ;;  %v19187_v58 = vld [vmem:[#allocation6 + $0x2cc] ss:$16 sps:$4 sm:$0xff]   ;;  %v19182_v15 = vld [vmem:[#allocation6 + $0x1c8] ss:$16 sps:$4 sm:$0xff]  }
 0xa86   :  { %13756 = vmatpush2.bf16.msra.mxu1 %v19108_v60  ;;  %v19185_v60 = vld [vmem:[#allocation6 + $0x2c8] ss:$16 sps:$4 sm:$0xff]  }
 0xa87   :  { %13797 = vmatpush2.bf16.msra.mxu0 %v19109_v56  ;;  %13757 = vmatprep.subr.bf16.mxu1 %v19110_v62  ;;  %v19190_v56 = vld [vmem:[#allocation6 + $0x1ac] ss:$16 sps:$4 sm:$0xff]  }
 0xa88   :  { %13798 = vmatprep.subr.bf16.mxu0 %v19112_v59  ;;  %v19193_v62 = vld [vmem:[#allocation6 + $0x2ac] ss:$16 sps:$4 sm:$0xff]   ;;  %v19191_v59 = vld [vmem:[#allocation6 + $0x2a8] ss:$16 sps:$4 sm:$0xff]  }
 0xa8a   :  { %13758 = vmatpush2.bf16.msra.mxu1 %v19114_v23  ;;  %v19196_v23 = vld [vmem:[#allocation6 + $0x18c] ss:$16 sps:$4 sm:$0xff]  }
 0xa8b   :  { %13799 = vmatpush2.bf16.msra.mxu0 %v19115_v43  ;;  %13759 = vmatprep.subr.bf16.mxu1 %v19116_v10  ;;  %v19199_v43 = vld [vmem:[#allocation6 + $0x28c] ss:$16 sps:$4 sm:$0xff]   ;;  %v19194_v10 = vld [vmem:[#allocation6 + $0x188] ss:$16 sps:$4 sm:$0xff]  }
 0xa8c   :  { %13800 = vmatprep.subr.bf16.mxu0 %v19118_v57  ;;  %v19197_v57 = vld [vmem:[#allocation6 + $0x288] ss:$16 sps:$4 sm:$0xff]  }
 0xa8e   :  { %13760 = vmatpush2.bf16.msra.mxu1 %v19120_v24  ;;  %v19202_v24 = vld [vmem:[#allocation6 + $0x16c] ss:$16 sps:$4 sm:$0xff]  }
 0xa8f   :  { %13801 = vmatpush2.bf16.msra.mxu0 %v19121_v34  ;;  %13761 = vmatprep.subr.bf16.mxu1 %v19122_v27  ;;  %v19205_v34 = vld [vmem:[#allocation6 + $0x26c] ss:$16 sps:$4 sm:$0xff]   ;;  %v19200_v27 = vld [vmem:[#allocation6 + $0x168] ss:$16 sps:$4 sm:$0xff]  }
 0xa90   :  { %13802 = vmatprep.subr.bf16.mxu0 %v19124_v21  ;;  %v19208_v21 = vld [vmem:[#allocation6 + $0x14c] ss:$16 sps:$4 sm:$0xff]  }
 0xa92   :  { %13762 = vmatpush2.bf16.msra.mxu1 %v19126_v22  ;;  %v19211_v22 = vld [vmem:[#allocation6 + $0x24c] ss:$16 sps:$4 sm:$0xff]  }
 0xa93   :  { %13803 = vmatpush2.bf16.msra.mxu0 %v19127_v50  ;;  %13813 = vmatprep.subr.bf16.mxu1 %v19130_v13  ;;  %v19206_v50 = vld [vmem:[#allocation6 + $0x148] ss:$16 sps:$4 sm:$0xff]  }
 0xa94   :  { %13854 = vmatprep.subr.bf16.mxu0 %v19133_v25  ;;  %v19209_v13 = vld [vmem:[#allocation6 + $0x248] ss:$16 sps:$4 sm:$0xff]   ;;  %v19214_v25 = vld [vmem:[#allocation6 + $0x12c] ss:$16 sps:$4 sm:$0xff]  }
 0xa95   :  { %13764 = vmatmul.mubr.bf16.vlgmr.msra.gmra.mxu1 %v20365_v52 }
 0xa96   :  { %13805 = vmatmul.mubr.bf16.vlgmr.msra.gmra.mxu0 %v20369_v29  ;;  %13814 = vmatpush1.bf16.msra.mxu1 %v19128_v18  ;;  %v19217_v18 = vld [vmem:[#allocation6 + $0x22c] ss:$16 sps:$4 sm:$0xff]  }
 0xa97   :  { %13855 = vmatpush1.bf16.msra.mxu0 %v19131_v9  ;;  %13815 = vmatprep.subr.bf16.mxu1 %v19136_v54  ;;  %v19212_v9 = vld [vmem:[#allocation6 + $0x128] ss:$16 sps:$4 sm:$0xff]  }
 0xa98   :  { %13856 = vmatprep.subr.bf16.mxu0 %v19139_v1  ;;  %13845 = vmatprep.mubr.bf16.mxu1 %v19617_v0  ;;  %v19215_v54 = vld [vmem:[#allocation6 + $0x228] ss:$16 sps:$4 sm:$0xff]   ;;  %v19220_v1 = vld [vmem:[#allocation6 + $0x10c] ss:$16 sps:$4 sm:$0xff]  }
 0xa99   :  { %13886 = vmatprep.mubr.bf16.mxu0 %v20357_v6  ;;  %v19160_v6 = vld [vmem:[#allocation6 + $0x444] ss:$16 sps:$4 sm:$0xff]  }
 0xa9a   :  { %13816 = vmatpush1.bf16.msra.mxu1 %v19134_v19  ;;  %v19223_v19 = vld [vmem:[#allocation6 + $0x20c] ss:$16 sps:$4 sm:$0xff]  }
 0xa9b   :  { %13857 = vmatpush1.bf16.msra.mxu0 %v19137_v31  ;;  %13817 = vmatprep.subr.bf16.mxu1 %v19142_v12  ;;  %v19218_v31 = vld [vmem:[#allocation6 + $0x108] ss:$16 sps:$4 sm:$0xff]  }
 0xa9c   :  { %13858 = vmatprep.subr.bf16.mxu0 %v19145_v3  ;;  %v19221_v12 = vld [vmem:[#allocation6 + $0x208] ss:$16 sps:$4 sm:$0xff]   ;;  %v19226_v3 = vld [vmem:[#allocation6 + $0x3ec] ss:$16 sps:$4 sm:$0xff]  }
 0xa9e   :  { %13818 = vmatpush1.bf16.msra.mxu1 %v19140_v48  ;;  %v19229_v48 = vld [vmem:[#allocation6 + $0x4ec] ss:$16 sps:$4 sm:$0xff]  }
 0xa9f   :  { %13859 = vmatpush1.bf16.msra.mxu0 %v19143_v63  ;;  %13819 = vmatprep.subr.bf16.mxu1 %v19148_v40  ;;  %v19224_v63 = vld [vmem:[#allocation6 + $0x3e8] ss:$16 sps:$4 sm:$0xff]  }
 0xaa0   :  { %13860 = vmatprep.subr.bf16.mxu0 %v19151_v5  ;;  %v19227_v40 = vld [vmem:[#allocation6 + $0x4e8] ss:$16 sps:$4 sm:$0xff]   ;;  %v19232_v5 = vld [vmem:[#allocation6 + $0x3cc] ss:$16 sps:$4 sm:$0xff]  }
 0xaa2   :  { %13820 = vmatpush1.bf16.msra.mxu1 %v19146_v26  ;;  %v19235_v26 = vld [vmem:[#allocation6 + $0x4cc] ss:$16 sps:$4 sm:$0xff]  }
 0xaa3   :  { %13861 = vmatpush1.bf16.msra.mxu0 %v19149_v38  ;;  %13821 = vmatprep.subr.bf16.mxu1 %v19154_v35  ;;  %v19230_v38 = vld [vmem:[#allocation6 + $0x3c8] ss:$16 sps:$4 sm:$0xff]  }
 0xaa4   :  { %13862 = vmatprep.subr.bf16.mxu0 %v19157_v20  ;;  %v19233_v35 = vld [vmem:[#allocation6 + $0x4c8] ss:$16 sps:$4 sm:$0xff]   ;;  %v19238_v20 = vld [vmem:[#allocation6 + $0x3ac] ss:$16 sps:$4 sm:$0xff]  }
 0xaa6   :  { %13822 = vmatpush1.bf16.msra.mxu1 %v19152_v42  ;;  %v19241_v42 = vld [vmem:[#allocation6 + $0x4ac] ss:$16 sps:$4 sm:$0xff]  }
 0xaa7   :  { %13863 = vmatpush1.bf16.msra.mxu0 %v19155_v36  ;;  %13823 = vmatprep.subr.bf16.mxu1 %v19160_v6  ;;  %v19236_v36 = vld [vmem:[#allocation6 + $0x3a8] ss:$16 sps:$4 sm:$0xff]  }
 0xaa8   :  { %13864 = vmatprep.subr.bf16.mxu0 %v19163_v61  ;;  %v19239_v6 = vld [vmem:[#allocation6 + $0x4a8] ss:$16 sps:$4 sm:$0xff]   ;;  %v19244_v61 = vld [vmem:[#allocation6 + $0x38c] ss:$16 sps:$4 sm:$0xff]  }
 0xaaa   :  { %13824 = vmatpush1.bf16.msra.mxu1 %v19158_v11  ;;  %v19247_v11 = vld [vmem:[#allocation6 + $0x48c] ss:$16 sps:$4 sm:$0xff]  }
 0xaab   :  { %13865 = vmatpush1.bf16.msra.mxu0 %v19161_v39  ;;  %13825 = vmatprep.subr.bf16.mxu1 %v19166_v46  ;;  %v19245_v39 = vld [vmem:[#allocation6 + $0x488] ss:$16 sps:$4 sm:$0xff]   ;;  %v19250_v46 = vld [vmem:[#allocation6 + $0x36c] ss:$16 sps:$4 sm:$0xff]  }
 0xaac   :  { %13866 = vmatprep.subr.bf16.mxu0 %v19169_v14  ;;  %v19253_v14 = vld [vmem:[#allocation6 + $0x46c] ss:$16 sps:$4 sm:$0xff]  }
 0xaae   :  { %13826 = vmatpush1.bf16.msra.mxu1 %v19164_v28  ;;  %v19248_v28 = vld [vmem:[#allocation6 + $0x368] ss:$16 sps:$4 sm:$0xff]  }
 0xaaf   :  { %13867 = vmatpush1.bf16.msra.mxu0 %v19167_v37  ;;  %13827 = vmatprep.subr.bf16.mxu1 %v19172_v41  ;;  %v19256_v37 = vld [vmem:[#allocation6 + $0x34c] ss:$16 sps:$4 sm:$0xff]  }
 0xab0   :  { %13868 = vmatprep.subr.bf16.mxu0 %v19175_v7  ;;  %v19259_v41 = vld [vmem:[#allocation6 + $0x44c] ss:$16 sps:$4 sm:$0xff]   ;;  %v19254_v7 = vld [vmem:[#allocation6 + $0x348] ss:$16 sps:$4 sm:$0xff]  }
 0xab2   :  { %13828 = vmatpush1.bf16.msra.mxu1 %v19170_v4  ;;  %v19257_v4 = vld [vmem:[#allocation6 + $0x448] ss:$16 sps:$4 sm:$0xff]  }
 0xab3   :  { %13869 = vmatpush1.bf16.msra.mxu0 %v19173_v2  ;;  %13895 = vmatprep.subr.bf16.mxu1 %v19181_v17  ;;  %v19262_v2 = vld [vmem:[#allocation6 + $0x32c] ss:$16 sps:$4 sm:$0xff]   ;;  %v19260_v17 = vld [vmem:[#allocation6 + $0x328] ss:$16 sps:$4 sm:$0xff]  }
 0xab4   :  { %13870 = vmatprep.subr.bf16.mxu0 %v19178_v16  ;;  %v19265_v16 = vld [vmem:[#allocation6 + $0x42c] ss:$16 sps:$4 sm:$0xff]  }
 0xab5   :  { %13846 = vmatmul.mubr.bf16.vlgmr.msra.gmra.mxu1 %v20377_v47 }
 0xab6   :  { %13896 = vmatpush1.bf16.msra.mxu1 %v19179_v51  ;;  %13927 = vmatprep.mubr.bf16.mxu1 %v20359_v45  ;;  %v19203_v45 = vld [vmem:[#allocation6 + $0x268] ss:$16 sps:$4 sm:$0xff]   ;;  %v19268_v51 = vld [vmem:[#allocation6 + $0x30c] ss:$16 sps:$4 sm:$0xff]  }
 0xab7   :  { %13871 = vmatpush2.bf16.msra.mxu0 %v19176_v8  ;;  %13897 = vmatprep.subr.bf16.mxu1 %v19187_v58  ;;  %v19263_v8 = vld [vmem:[#allocation6 + $0x428] ss:$16 sps:$4 sm:$0xff]  }
 0xab8   :  { %13872 = vmatprep.subr.bf16.mxu0 %v19184_v53  ;;  %v19271_v53 = vld [vmem:[#allocation6 + $0x40c] ss:$16 sps:$4 sm:$0xff]   ;;  %v19266_v58 = vld [vmem:[#allocation6 + $0x308] ss:$16 sps:$4 sm:$0xff]  }
 0xaba   :  { %13898 = vmatpush1.bf16.msra.mxu1 %v19185_v60  ;;  %v12904_v60 = vld [vmem:[#allocation10 + $0x4] ss:$8 sm:$0xf] }
 0xabb   :  { %13873 = vmatpush2.bf16.msra.mxu0 %v19182_v15  ;;  %13899 = vmatprep.subr.bf16.mxu1 %v19193_v62  ;;  %v19269_v15 = vld [vmem:[#allocation6 + $0x408] ss:$16 sps:$4 sm:$0xff]   ;;  %v12918_v62 = vrot.slane %v12904_v60, %v19970_v33 }
 0xabc   :  { %13874 = vmatprep.subr.bf16.mxu0 %v19190_v56  ;;  %v12914_v56 = vrot.slane %v12904_v60, %v19967_v32 }
 0xabe   :  { %13900 = vmatpush1.bf16.msra.mxu1 %v19191_v59 }
 0xabf   :  { %13875 = vmatpush2.bf16.msra.mxu0 %v19188_v30  ;;  %13901 = vmatprep.subr.bf16.mxu1 %v19199_v43 }
 0xac0   :  { %13876 = vmatprep.subr.bf16.mxu0 %v19196_v23 }
 0xac2   :  { %13902 = vmatpush1.bf16.msra.mxu1 %v19197_v57 }
 0xac3   :  { %13877 = vmatpush2.bf16.msra.mxu0 %v19194_v10  ;;  %13903 = vmatprep.subr.bf16.mxu1 %v19205_v34 }
 0xac4   :  { %13878 = vmatprep.subr.bf16.mxu0 %v19202_v24 }
 0xac6   :  { %13904 = vmatpush1.bf16.msra.mxu1 %v19203_v45 }
 0xac7   :  { %13879 = vmatpush2.bf16.msra.mxu0 %v19200_v27  ;;  %13905 = vmatprep.subr.bf16.mxu1 %v19211_v22 }
 0xac8   :  { %13880 = vmatprep.subr.bf16.mxu0 %v19208_v21 }
 0xaca   :  { %13906 = vmatpush1.bf16.msra.mxu1 %v19209_v13 }
 0xacb   :  { %13881 = vmatpush2.bf16.msra.mxu0 %v19206_v50  ;;  %13907 = vmatprep.subr.bf16.mxu1 %v19217_v18 }
 0xacc   :  { %13882 = vmatprep.subr.bf16.mxu0 %v19214_v25 }
 0xace   :  { %13908 = vmatpush1.bf16.msra.mxu1 %v19215_v54 }
 0xacf   :  { %13883 = vmatpush2.bf16.msra.mxu0 %v19212_v9  ;;  %13909 = vmatprep.subr.bf16.mxu1 %v19223_v19 }
 0xad0   :  { %13884 = vmatprep.subr.bf16.mxu0 %v19220_v1 }
 0xad2   :  { %13910 = vmatpush1.bf16.msra.mxu1 %v19221_v12 }
 0xad3   :  { %13885 = vmatpush2.bf16.msra.mxu0 %v19218_v31  ;;  %13911 = vmatprep.subr.bf16.mxu1 %v19226_v3  ;;  %v12922_v3 = vrot.slane %v12904_v60, %v20009_v44 }
 0xad4   :  { %13936 = vmatprep.subr.bf16.mxu0 %v19229_v48  ;;  %v12926_v48 = vrot.slane %v12904_v60, %v20014_v49 }
 0xad6   :  { %13887 = vmatmul.mubr.bf16.vlgmr.msra.gmra.mxu0 %v20365_v52  ;;  %13912 = vmatpush2.bf16.msra.mxu1 %v19224_v63  ;;  %v19242_v52 = vld [vmem:[#allocation6 + $0x388] ss:$16 sps:$4 sm:$0xff]  }
 0xad7   :  { %13937 = vmatpush1.bf16.msra.mxu0 %v19227_v40  ;;  %13913 = vmatprep.subr.bf16.mxu1 %v19232_v5 }
 0xad8   :  { %13938 = vmatprep.subr.bf16.mxu0 %v19235_v26  ;;  %13968 = vmatprep.mubr.bf16.mxu0 %v19617_v0  ;;  %v19251_v0 = vld [vmem:[#allocation6 + $0x468] ss:$16 sps:$4 sm:$0xff]  }
 0xada   :  { %13914 = vmatpush2.bf16.msra.mxu1 %v19230_v38 }
 0xadb   :  { %13939 = vmatpush1.bf16.msra.mxu0 %v19233_v35  ;;  %13915 = vmatprep.subr.bf16.mxu1 %v19238_v20 }
 0xadc   :  { %13940 = vmatprep.subr.bf16.mxu0 %v19241_v42 }
 0xade   :  { %13916 = vmatpush2.bf16.msra.mxu1 %v19236_v36 }
 0xadf   :  { %13941 = vmatpush1.bf16.msra.mxu0 %v19239_v6  ;;  %13917 = vmatprep.subr.bf16.mxu1 %v19244_v61 }
 0xae0   :  { %13942 = vmatprep.subr.bf16.mxu0 %v19247_v11 }
 0xae2   :  { %13918 = vmatpush2.bf16.msra.mxu1 %v19242_v52 }
 0xae3   :  { %13943 = vmatpush1.bf16.msra.mxu0 %v19245_v39  ;;  %13919 = vmatprep.subr.bf16.mxu1 %v19250_v46 }
 0xae4   :  { %13944 = vmatprep.subr.bf16.mxu0 %v19253_v14 }
 0xae6   :  { %13920 = vmatpush2.bf16.msra.mxu1 %v19248_v28 }
 0xae7   :  { %13945 = vmatpush1.bf16.msra.mxu0 %v19251_v0  ;;  %13921 = vmatprep.subr.bf16.mxu1 %v19256_v37 }
 0xae8   :  { %13946 = vmatprep.subr.bf16.mxu0 %v19259_v41 }
 0xaea   :  { %13922 = vmatpush2.bf16.msra.mxu1 %v19254_v7 }
 0xaeb   :  { %13947 = vmatpush1.bf16.msra.mxu0 %v19257_v4  ;;  %13923 = vmatprep.subr.bf16.mxu1 %v19262_v2 }
 0xaec   :  { %13948 = vmatprep.subr.bf16.mxu0 %v19265_v16 }
 0xaee   :  { %13924 = vmatpush2.bf16.msra.mxu1 %v19260_v17 }
 0xaef   :  { %13949 = vmatpush1.bf16.msra.mxu0 %v19263_v8  ;;  %13925 = vmatprep.subr.bf16.mxu1 %v19268_v51 }
 0xaf0   :  { %13950 = vmatprep.subr.bf16.mxu0 %v19271_v53 }
 0xaf2   :  { %13926 = vmatpush2.bf16.msra.mxu1 %v19266_v58 }
 0xaf3   :  { %13951 = vmatpush1.bf16.msra.mxu0 %v19269_v15 }
 0xaf5   :  { %13928 = vmatmul.mubr.bf16.vlgmr.msra.gmra.mxu1 %v20369_v29 }
 0xaf6   :  { %13969 = vmatmul.mubr.bf16.vlgmr.msra.gmra.mxu0 %v20377_v47 }
 0xb55   :  { %v13765_v30 = vpop.f32.mrf.mxu1 }
 0xb56   :  { %v13806_v59 = vpop.f32.mrf.mxu0  ;;  %v13766_v23 = vadd.f32 %v13765_v30, %v12914_v56 }
 0xb57   :  { %v13767_v43 = vpop.f32.mrf.mxu1 }
 0xb58   :  { %v13808_v10 = vpop.f32.mrf.mxu0  ;;  %v13807_v57 = vadd.f32 %v13806_v59, %v13766_v23  ;;  %v13768_v24 = vadd.f32 %v13767_v43, %v12918_v62 }
 0xb59   :  { %v13769_v34 = vpop.f32.mrf.mxu1 }
 0xb5a   :  { %v13810_v27 = vpop.f32.mrf.mxu0  ;;  %v13809_v45 = vadd.f32 %v13808_v10, %v13768_v24 }
 0xb5b   :  { %v13770_v21 = vpop.f32.mrf.mxu1 }
 0xb5c   :  { %v13811_v22 = vpop.f32.mrf.mxu0 }
 0xb75   :  { %v13847_v29 = vpop.f32.mrf.mxu1 }
 0xb76   :  { %v13848_v50 = vadd.f32 %v13847_v29, %v13807_v57 }
 0xb77   :  { %v13849_v47 = vpop.f32.mrf.mxu1 }
 0xb78   :  { %19272 = vtanh.f32 %v13848_v50  ;;  %v13850_v13 = vadd.f32 %v13849_v47, %v13809_v45 }
 0xb79   :  { %v13851_v25 = vpop.f32.mrf.mxu1 }
 0xb7a   :  { %19274 = vtanh.f32 %v13850_v13 }
 0xb7b   :  { %v13852_v18 = vpop.f32.mrf.mxu1 }
 0xb85   :  { %v20387_v9 = vpop.eup %19272 }
 0xb87   :  { %v19275_v54 = vpop.eup %19274 }
 0xb96   :  { %v13888_v1 = vpop.f32.mrf.mxu0 }
 0xb97   :  { %v13889_v63 = vadd.f32 %v13888_v1, %v12922_v3 }
 0xb98   :  { %v13890_v19 = vpop.f32.mrf.mxu0 }
 0xb99   :  { %v13891_v26 = vadd.f32 %v13890_v19, %v12926_v48 }
 0xb9a   :  { %v13892_v31 = vpop.f32.mrf.mxu0 }
 0xb9c   :  { %v13893_v12 = vpop.f32.mrf.mxu0 }
 0xbb5   :  { %v13929_v40 = vpop.f32.mrf.mxu1 }
 0xbb6   :  { %v13970_v5 = vpop.f32.mrf.mxu0  ;;  %v13930_v38 = vadd.f32 %v13929_v40, %v13889_v63 }
 0xbb7   :  { %v13931_v35 = vpop.f32.mrf.mxu1 }
 0xbb8   :  { %v13972_v20 = vpop.f32.mrf.mxu0  ;;  %v13971_v42 = vadd.f32 %v13970_v5, %v13930_v38  ;;  %v13932_v36 = vadd.f32 %v13931_v35, %v13891_v26 }
 0xbb9   :  { %v13933_v6 = vpop.f32.mrf.mxu1 }
 0xbba   :  { %v13974_v61 = vpop.f32.mrf.mxu0  ;;  %19276 = vtanh.f32 %v13971_v42  ;;  %v13973_v11 = vadd.f32 %v13972_v20, %v13932_v36 }
 0xbbb   :  { %v13934_v52 = vpop.f32.mrf.mxu1 }
 0xbbc   :  { %v13975_v39 = vpop.f32.mrf.mxu0  ;;  %19278 = vtanh.f32 %v13973_v11 }
 0xbc7   :  { %v20391_v46 = vpop.eup %19276 }
 0xbc9   :  { %v19279_v14 = vpop.eup %19278 }
 0xbca   :  { %19612 = dma.done.wait [#allocation9 + $0x5], 9600 }
 0xbcb   :  { %19613 = vsyncadd [#allocation9 + $0x5], 4294957696  ;;  %v20393_v49 = vpack.c.bf16 %v19275_v54, %v19275_v54  ;;  %v20395_v28 = vpack.c.bf16 %v19279_v14, %v19279_v14  ;;  %v19280_v0 = vld [vmem:[#allocation7 + $0xac] ss:$12 sps:$4 sm:$0xff]   ;;  %v19284_v41 = vld [vmem:[#allocation7 + $0xa8] ss:$12 sps:$4 sm:$0xff]  }
 0xbcc   :  { %v19282_v37 = vld [vmem:[#allocation7 + $0x22c] ss:$12 sps:$4 sm:$0xff]   ;;  %14647 = vmatprep.subr.bf16.mxu1 %v19280_v0  ;;  %v19285_v7 = vld [vmem:[#allocation7 + $0x228] ss:$12 sps:$4 sm:$0xff]   ;;  %v19290_v16 = vld [vmem:[#allocation7 + $0x90] ss:$12 sps:$4 sm:$0xff]  }
 0xbcd   :  { %14679 = vmatprep.mubr.bf16.mxu1 %v20393_v49  ;;  %14720 = vmatprep.mubr.bf16.mxu0 %v20395_v28  ;;  %v19286_v4 = vld [vmem:[#allocation7 + $0x94] ss:$12 sps:$4 sm:$0xff]   ;;  %v19291_v17 = vld [vmem:[#allocation7 + $0x210] ss:$12 sps:$4 sm:$0xff]   ;;  %v19296_v53 = vld [vmem:[#allocation7 + $0x78] ss:$12 sps:$4 sm:$0xff]  }
 0xbce   :  { %14688 = vmatprep.subr.bf16.mxu0 %v19282_v37  ;;  %14648 = vmatpush1.bf16.msra.mxu1 %v19284_v41  ;;  %v19288_v2 = vld [vmem:[#allocation7 + $0x214] ss:$12 sps:$4 sm:$0xff]   ;;  %v19292_v8 = vld [vmem:[#allocation7 + $0x7c] ss:$12 sps:$4 sm:$0xff]   ;;  %v19297_v58 = vld [vmem:[#allocation7 + $0x1f8] ss:$12 sps:$4 sm:$0xff]  }
 0xbcf   :  { %14689 = vmatpush1.bf16.msra.mxu0 %v19285_v7  ;;  %14649 = vmatprep.subr.bf16.mxu1 %v19286_v4  ;;  %v19294_v51 = vld [vmem:[#allocation7 + $0x1fc] ss:$12 sps:$4 sm:$0xff]   ;;  %v19298_v15 = vld [vmem:[#allocation7 + $0x64] ss:$12 sps:$4 sm:$0xff]   ;;  %v19302_v56 = vld [vmem:[#allocation7 + $0x60] ss:$12 sps:$4 sm:$0xff]  }
 0xbd0   :  { %14690 = vmatprep.subr.bf16.mxu0 %v19288_v2  ;;  %v19300_v60 = vld [vmem:[#allocation7 + $0x1e4] ss:$12 sps:$4 sm:$0xff]   ;;  %v19303_v62 = vld [vmem:[#allocation7 + $0x1e0] ss:$12 sps:$4 sm:$0xff]   ;;  %v19308_v23 = vld [vmem:[#allocation7 + $0x48] ss:$12 sps:$4 sm:$0xff]  }
 0xbd1   :  { %v19304_v30 = vld [vmem:[#allocation7 + $0x4c] ss:$12 sps:$4 sm:$0xff]   ;;  %v19309_v43 = vld [vmem:[#allocation7 + $0x1c8] ss:$12 sps:$4 sm:$0xff]   ;;  %v19314_v24 = vld [vmem:[#allocation7 + $0x30] ss:$12 sps:$4 sm:$0xff]  }
 0xbd2   :  { %14650 = vmatpush1.bf16.msra.mxu1 %v19290_v16  ;;  %v19306_v59 = vld [vmem:[#allocation7 + $0x1cc] ss:$12 sps:$4 sm:$0xff]   ;;  %v19310_v10 = vld [vmem:[#allocation7 + $0x34] ss:$12 sps:$4 sm:$0xff]   ;;  %v19315_v34 = vld [vmem:[#allocation7 + $0x1b0] ss:$12 sps:$4 sm:$0xff]  }
 0xbd3   :  { %14691 = vmatpush1.bf16.msra.mxu0 %v19291_v17  ;;  %14651 = vmatprep.subr.bf16.mxu1 %v19292_v8  ;;  %v19312_v57 = vld [vmem:[#allocation7 + $0x1b4] ss:$12 sps:$4 sm:$0xff]   ;;  %v19316_v27 = vld [vmem:[#allocation7 + $0x1c] ss:$12 sps:$4 sm:$0xff]   ;;  %v19320_v21 = vld [vmem:[#allocation7 + $0x18] ss:$12 sps:$4 sm:$0xff]  }
 0xbd4   :  { %14692 = vmatprep.subr.bf16.mxu0 %v19294_v51  ;;  %v19318_v45 = vld [vmem:[#allocation7 + $0x19c] ss:$12 sps:$4 sm:$0xff]   ;;  %v19321_v22 = vld [vmem:[#allocation7 + $0x198] ss:$12 sps:$4 sm:$0xff]   ;;  %v19326_v47 = vld [vmem:[#allocation7] ss:$12 sps:$4 sm:$0xff]  }
 0xbd5   :  { %v19322_v29 = vld [vmem:[#allocation7 + $0x4] ss:$12 sps:$4 sm:$0xff]   ;;  %v19327_v13 = vld [vmem:[#allocation7 + $0x180] ss:$12 sps:$4 sm:$0xff]   ;;  %v19332_v54 = vld [vmem:[#allocation7 + $0x168] ss:$12 sps:$4 sm:$0xff]  }
 0xbd6   :  { %14652 = vmatpush1.bf16.msra.mxu1 %v19296_v53  ;;  %v19324_v50 = vld [vmem:[#allocation7 + $0x184] ss:$12 sps:$4 sm:$0xff]   ;;  %v19328_v25 = vld [vmem:[#allocation7 + $0x16c] ss:$12 sps:$4 sm:$0xff]   ;;  %v19333_v1 = vld [vmem:[#allocation7 + $0x2e8] ss:$12 sps:$4 sm:$0xff]  }
 0xbd7   :  { %14693 = vmatpush1.bf16.msra.mxu0 %v19297_v58  ;;  %14653 = vmatprep.subr.bf16.mxu1 %v19298_v15  ;;  %v19330_v18 = vld [vmem:[#allocation7 + $0x2ec] ss:$12 sps:$4 sm:$0xff]   ;;  %v19334_v19 = vld [vmem:[#allocation7 + $0x154] ss:$12 sps:$4 sm:$0xff]   ;;  %v19338_v12 = vld [vmem:[#allocation7 + $0x150] ss:$12 sps:$4 sm:$0xff]   ;;  %v20401_v58 = vpack.c.bf16 %v20387_v9, %v20387_v9  ;;  %v20405_v15 = vpack.c.bf16 %v20391_v46, %v20391_v46 }
 0xbd8   :  { %14694 = vmatprep.subr.bf16.mxu0 %v19300_v60  ;;  %v19336_v31 = vld [vmem:[#allocation7 + $0x2d4] ss:$12 sps:$4 sm:$0xff]   ;;  %v19339_v3 = vld [vmem:[#allocation7 + $0x2d0] ss:$12 sps:$4 sm:$0xff]   ;;  %v19344_v40 = vld [vmem:[#allocation7 + $0x138] ss:$12 sps:$4 sm:$0xff]  }
 0xbd9   :  { %v19340_v48 = vld [vmem:[#allocation7 + $0x13c] ss:$12 sps:$4 sm:$0xff]   ;;  %v19345_v5 = vld [vmem:[#allocation7 + $0x2b8] ss:$12 sps:$4 sm:$0xff]   ;;  %v19350_v35 = vld [vmem:[#allocation7 + $0x120] ss:$12 sps:$4 sm:$0xff]  }
 0xbda   :  { %14654 = vmatpush1.bf16.msra.mxu1 %v19302_v56  ;;  %v19342_v63 = vld [vmem:[#allocation7 + $0x2bc] ss:$12 sps:$4 sm:$0xff]   ;;  %v19346_v26 = vld [vmem:[#allocation7 + $0x124] ss:$12 sps:$4 sm:$0xff]   ;;  %v19351_v20 = vld [vmem:[#allocation7 + $0x2a0] ss:$12 sps:$4 sm:$0xff]  }
 0xbdb   :  { %14695 = vmatpush1.bf16.msra.mxu0 %v19303_v62  ;;  %14655 = vmatprep.subr.bf16.mxu1 %v19304_v30  ;;  %v19348_v38 = vld [vmem:[#allocation7 + $0x2a4] ss:$12 sps:$4 sm:$0xff]   ;;  %v19352_v42 = vld [vmem:[#allocation7 + $0x10c] ss:$12 sps:$4 sm:$0xff]   ;;  %v19356_v6 = vld [vmem:[#allocation7 + $0x108] ss:$12 sps:$4 sm:$0xff]  }
 0xbdc   :  { %14696 = vmatprep.subr.bf16.mxu0 %v19306_v59  ;;  %v19354_v36 = vld [vmem:[#allocation7 + $0x28c] ss:$12 sps:$4 sm:$0xff]   ;;  %v19357_v61 = vld [vmem:[#allocation7 + $0x288] ss:$12 sps:$4 sm:$0xff]   ;;  %v19362_v39 = vld [vmem:[#allocation7 + $0xf0] ss:$12 sps:$4 sm:$0xff]  }
 0xbdd   :  { %v19358_v11 = vld [vmem:[#allocation7 + $0xf4] ss:$12 sps:$4 sm:$0xff]   ;;  %v19363_v14 = vld [vmem:[#allocation7 + $0x270] ss:$12 sps:$4 sm:$0xff]   ;;  %v19368_v41 = vld [vmem:[#allocation7 + $0xd8] ss:$12 sps:$4 sm:$0xff]  }
 0xbde   :  { %14656 = vmatpush1.bf16.msra.mxu1 %v19308_v23  ;;  %v19360_v52 = vld [vmem:[#allocation7 + $0x274] ss:$12 sps:$4 sm:$0xff]   ;;  %v19364_v0 = vld [vmem:[#allocation7 + $0xdc] ss:$12 sps:$4 sm:$0xff]   ;;  %v19369_v7 = vld [vmem:[#allocation7 + $0x258] ss:$12 sps:$4 sm:$0xff]  }
 0xbdf   :  { %14697 = vmatpush1.bf16.msra.mxu0 %v19309_v43  ;;  %14657 = vmatprep.subr.bf16.mxu1 %v19310_v10  ;;  %v19366_v37 = vld [vmem:[#allocation7 + $0x25c] ss:$12 sps:$4 sm:$0xff]   ;;  %v19370_v4 = vld [vmem:[#allocation7 + $0xc4] ss:$12 sps:$4 sm:$0xff]   ;;  %v19374_v16 = vld [vmem:[#allocation7 + $0xc0] ss:$12 sps:$4 sm:$0xff]  }
 0xbe0   :  { %14698 = vmatprep.subr.bf16.mxu0 %v19312_v57  ;;  %v19372_v2 = vld [vmem:[#allocation7 + $0x244] ss:$12 sps:$4 sm:$0xff]   ;;  %v19375_v17 = vld [vmem:[#allocation7 + $0x240] ss:$12 sps:$4 sm:$0xff]   ;;  %v19388_v10 = vld [vmem:[#allocation7 + $0x128] ss:$12 sps:$4 sm:$0xff]  }
 0xbe1   :  { %v19376_v8 = vld [vmem:[#allocation7 + $0x170] ss:$12 sps:$4 sm:$0xff]   ;;  %v19380_v56 = vld [vmem:[#allocation7 + $0x158] ss:$12 sps:$4 sm:$0xff]   ;;  %v19384_v9 = vld [vmem:[#allocation7 + $0x140] ss:$12 sps:$4 sm:$0xff]  }
 0xbe2   :  { %14658 = vmatpush1.bf16.msra.mxu1 %v19314_v24  ;;  %v19377_v51 = vld [vmem:[#allocation7 + $0x2f0] ss:$12 sps:$4 sm:$0xff]   ;;  %v19381_v62 = vld [vmem:[#allocation7 + $0x2d8] ss:$12 sps:$4 sm:$0xff]   ;;  %v19385_v46 = vld [vmem:[#allocation7 + $0x2c0] ss:$12 sps:$4 sm:$0xff]  }
 0xbe3   :  { %14699 = vmatpush1.bf16.msra.mxu0 %v19315_v34  ;;  %14659 = vmatprep.subr.bf16.mxu1 %v19316_v27  ;;  %v19378_v53 = vld [vmem:[#allocation7 + $0xb0] ss:$12 sps:$4 sm:$0xff]   ;;  %v19382_v30 = vld [vmem:[#allocation7 + $0x98] ss:$12 sps:$4 sm:$0xff]   ;;  %v19386_v23 = vld [vmem:[#allocation7 + $0x80] ss:$12 sps:$4 sm:$0xff]  }
 0xbe4   :  { %14700 = vmatprep.subr.bf16.mxu0 %v19318_v45  ;;  %v19379_v60 = vld [vmem:[#allocation7 + $0x230] ss:$12 sps:$4 sm:$0xff]   ;;  %v19383_v59 = vld [vmem:[#allocation7 + $0x218] ss:$12 sps:$4 sm:$0xff]   ;;  %v19387_v43 = vld [vmem:[#allocation7 + $0x200] ss:$12 sps:$4 sm:$0xff]  }
 0xbe5   :  { %v19389_v57 = vld [vmem:[#allocation7 + $0x2a8] ss:$12 sps:$4 sm:$0xff]   ;;  %v19392_v27 = vld [vmem:[#allocation7 + $0x110] ss:$12 sps:$4 sm:$0xff]  }
 0xbe6   :  { %14660 = vmatpush1.bf16.msra.mxu1 %v19320_v21  ;;  %v19390_v24 = vld [vmem:[#allocation7 + $0x68] ss:$12 sps:$4 sm:$0xff]   ;;  %v19393_v45 = vld [vmem:[#allocation7 + $0x290] ss:$12 sps:$4 sm:$0xff]  }
 0xbe7   :  { %14701 = vmatpush1.bf16.msra.mxu0 %v19321_v22  ;;  %14661 = vmatprep.subr.bf16.mxu1 %v19322_v29  ;;  %v19391_v34 = vld [vmem:[#allocation7 + $0x1e8] ss:$12 sps:$4 sm:$0xff]   ;;  %v19395_v21 = vld [vmem:[#allocation7 + $0x1d0] ss:$12 sps:$4 sm:$0xff]   ;;  %v19397_v22 = vld [vmem:[#allocation7 + $0x278] ss:$12 sps:$4 sm:$0xff]  }
 0xbe8   :  { %14702 = vmatprep.subr.bf16.mxu0 %v19324_v50  ;;  %v19398_v29 = vld [vmem:[#allocation7 + $0x38] ss:$12 sps:$4 sm:$0xff]  }
 0xbe9   :  { %v19399_v50 = vld [vmem:[#allocation7 + $0x1b8] ss:$12 sps:$4 sm:$0xff]  }
 0xbea   :  { %14662 = vmatpush1.bf16.msra.mxu1 %v19326_v47  ;;  %v19400_v47 = vld [vmem:[#allocation7 + $0xe0] ss:$12 sps:$4 sm:$0xff]  }
 0xbeb   :  { %14703 = vmatpush1.bf16.msra.mxu0 %v19327_v13  ;;  %14663 = vmatprep.subr.bf16.mxu1 %v19328_v25  ;;  %v19401_v13 = vld [vmem:[#allocation7 + $0x260] ss:$12 sps:$4 sm:$0xff]  }
 0xbec   :  { %14704 = vmatprep.subr.bf16.mxu0 %v19330_v18  ;;  %v19402_v25 = vld [vmem:[#allocation7 + $0x20] ss:$12 sps:$4 sm:$0xff]  }
 0xbed   :  { %v19403_v18 = vld [vmem:[#allocation7 + $0x1a0] ss:$12 sps:$4 sm:$0xff]  }
 0xbee   :  { %14664 = vmatpush2.bf16.msra.mxu1 %v19332_v54  ;;  %v19404_v54 = vld [vmem:[#allocation7 + $0xc8] ss:$12 sps:$4 sm:$0xff]  }
 0xbef   :  { %14705 = vmatpush2.bf16.msra.mxu0 %v19333_v1  ;;  %14665 = vmatprep.subr.bf16.mxu1 %v19334_v19  ;;  %v19405_v1 = vld [vmem:[#allocation7 + $0x248] ss:$12 sps:$4 sm:$0xff]  }
 0xbf0   :  { %14706 = vmatprep.subr.bf16.mxu0 %v19336_v31  ;;  %v19406_v19 = vld [vmem:[#allocation7 + $0x8] ss:$12 sps:$4 sm:$0xff]  }
 0xbf1   :  { %v19407_v31 = vld [vmem:[#allocation7 + $0x188] ss:$12 sps:$4 sm:$0xff]  }
 0xbf2   :  { %14666 = vmatpush2.bf16.msra.mxu1 %v19338_v12  ;;  %v14114_v12 = vld [vmem:[#allocation10 + $0x5] ss:$8 sm:$0x7] }
 0xbf3   :  { %14707 = vmatpush2.bf16.msra.mxu0 %v19339_v3  ;;  %14667 = vmatprep.subr.bf16.mxu1 %v19340_v48  ;;  %v14123_v3 = vrot.slane %v14114_v12, %v19967_v32  ;;  %v14127_v48 = vrot.slane %v14114_v12, %v19970_v33  ;;  %v14131_v33 = vrot.slane %v14114_v12, %v20009_v44 }
 0xbf4   :  { %14708 = vmatprep.subr.bf16.mxu0 %v19342_v63 }
 0xbf6   :  { %14668 = vmatpush2.bf16.msra.mxu1 %v19344_v40 }
 0xbf7   :  { %14709 = vmatpush2.bf16.msra.mxu0 %v19345_v5  ;;  %14669 = vmatprep.subr.bf16.mxu1 %v19346_v26 }
 0xbf8   :  { %14710 = vmatprep.subr.bf16.mxu0 %v19348_v38 }
 0xbfa   :  { %14670 = vmatpush2.bf16.msra.mxu1 %v19350_v35 }
 0xbfb   :  { %14711 = vmatpush2.bf16.msra.mxu0 %v19351_v20  ;;  %14671 = vmatprep.subr.bf16.mxu1 %v19352_v42 }
 0xbfc   :  { %14712 = vmatprep.subr.bf16.mxu0 %v19354_v36 }
 0xbfe   :  { %14672 = vmatpush2.bf16.msra.mxu1 %v19356_v6 }
 0xbff   :  { %14713 = vmatpush2.bf16.msra.mxu0 %v19357_v61  ;;  %14673 = vmatprep.subr.bf16.mxu1 %v19358_v11 }
 0xc00   :  { %14714 = vmatprep.subr.bf16.mxu0 %v19360_v52 }
 0xc02   :  { %14674 = vmatpush2.bf16.msra.mxu1 %v19362_v39 }
 0xc03   :  { %14715 = vmatpush2.bf16.msra.mxu0 %v19363_v14  ;;  %14675 = vmatprep.subr.bf16.mxu1 %v19364_v0 }
 0xc04   :  { %14716 = vmatprep.subr.bf16.mxu0 %v19366_v37 }
 0xc06   :  { %14676 = vmatpush2.bf16.msra.mxu1 %v19368_v41 }
 0xc07   :  { %14717 = vmatpush2.bf16.msra.mxu0 %v19369_v7  ;;  %14677 = vmatprep.subr.bf16.mxu1 %v19370_v4 }
 0xc08   :  { %14718 = vmatprep.subr.bf16.mxu0 %v19372_v2 }
 0xc0a   :  { %14678 = vmatpush2.bf16.msra.mxu1 %v19374_v16 }
 0xc0b   :  { %14719 = vmatpush2.bf16.msra.mxu0 %v19375_v17  ;;  %17240 = vmatprep.subr.bf16.mxu1 %v19376_v8 }
 0xc0c   :  { %17262 = vmatprep.subr.bf16.mxu0 %v19377_v51 }
 0xc0d   :  { %14680 = vmatmul.mubr.bf16.vlgmr.msra.gmra.mxu1 %v20401_v58 }
 0xc0e   :  { %14721 = vmatmul.mubr.bf16.vlgmr.msra.gmra.mxu0 %v20405_v15  ;;  %17241 = vmatpush3.bf16.msra.mxu1 %v19378_v53 }
 0xc0f   :  { %17263 = vmatpush3.bf16.msra.mxu0 %v19379_v60  ;;  %17242 = vmatprep.subr.bf16.mxu1 %v19380_v56 }
 0xc10   :  { %17264 = vmatprep.subr.bf16.mxu0 %v19381_v62  ;;  %14761 = vmatprep.mubr.bf16.mxu1 %v20393_v49  ;;  %v19394_v49 = vld [vmem:[#allocation7 + $0x50] ss:$12 sps:$4 sm:$0xff]  }
 0xc11   :  { %14801 = vmatprep.mubr.bf16.mxu0 %v20395_v28  ;;  %v19396_v28 = vld [vmem:[#allocation7 + $0xf8] ss:$12 sps:$4 sm:$0xff]  }
 0xc12   :  { %17243 = vmatpush3.bf16.msra.mxu1 %v19382_v30 }
 0xc13   :  { %17265 = vmatpush3.bf16.msra.mxu0 %v19383_v59  ;;  %17244 = vmatprep.subr.bf16.mxu1 %v19384_v9 }
 0xc14   :  { %17266 = vmatprep.subr.bf16.mxu0 %v19385_v46 }
 0xc16   :  { %17245 = vmatpush3.bf16.msra.mxu1 %v19386_v23 }
 0xc17   :  { %17267 = vmatpush3.bf16.msra.mxu0 %v19387_v43  ;;  %17246 = vmatprep.subr.bf16.mxu1 %v19388_v10 }
 0xc18   :  { %17268 = vmatprep.subr.bf16.mxu0 %v19389_v57 }
 0xc1a   :  { %17247 = vmatpush3.bf16.msra.mxu1 %v19390_v24 }
 0xc1b   :  { %17269 = vmatpush3.bf16.msra.mxu0 %v19391_v34  ;;  %17248 = vmatprep.subr.bf16.mxu1 %v19392_v27 }
 0xc1c   :  { %17270 = vmatprep.subr.bf16.mxu0 %v19393_v45 }
 0xc1e   :  { %17249 = vmatpush3.bf16.msra.mxu1 %v19394_v49 }
 0xc1f   :  { %17271 = vmatpush3.bf16.msra.mxu0 %v19395_v21  ;;  %17250 = vmatprep.subr.bf16.mxu1 %v19396_v28 }
 0xc20   :  { %17272 = vmatprep.subr.bf16.mxu0 %v19397_v22 }
 0xc22   :  { %17251 = vmatpush3.bf16.msra.mxu1 %v19398_v29 }
 0xc23   :  { %17273 = vmatpush3.bf16.msra.mxu0 %v19399_v50  ;;  %17252 = vmatprep.subr.bf16.mxu1 %v19400_v47 }
 0xc24   :  { %17274 = vmatprep.subr.bf16.mxu0 %v19401_v13 }
 0xc26   :  { %17253 = vmatpush3.bf16.msra.mxu1 %v19402_v25 }
 0xc27   :  { %17275 = vmatpush3.bf16.msra.mxu0 %v19403_v18  ;;  %17254 = vmatprep.subr.bf16.mxu1 %v19404_v54 }
 0xc28   :  { %17276 = vmatprep.subr.bf16.mxu0 %v19405_v1 }
 0xc2a   :  { %17255 = vmatpush3.bf16.msra.mxu1 %v19406_v19 }
 0xc2b   :  { %17277 = vmatpush3.bf16.msra.mxu0 %v19407_v31 }
 0xc2d   :  { %14762 = vmatmul.mubr.bf16.vlgmr.msra.gmra.mxu1 %v20401_v58 }
 0xc2e   :  { %14802 = vmatmul.mubr.bf16.vlgmr.msra.gmra.mxu0 %v20405_v15 }
 0xccd   :  { %v14681_v63 = vpop.f32.mrf.mxu1 }
 0xcce   :  { %v14722_v40 = vpop.f32.mrf.mxu0  ;;  %v14682_v5 = vadd.f32 %v14681_v63, %v14123_v3 }
 0xccf   :  { %v14683_v26 = vpop.f32.mrf.mxu1 }
 0xcd0   :  { %v14724_v38 = vpop.f32.mrf.mxu0  ;;  %v14723_v35 = vadd.f32 %v14722_v40, %v14682_v5  ;;  %v14684_v20 = vadd.f32 %v14683_v26, %v14127_v48 }
 0xcd1   :  { %v14685_v42 = vpop.f32.mrf.mxu1 }
 0xcd2   :  { %v14726_v36 = vpop.f32.mrf.mxu0  ;;  %19408 = vtanh.f32 %v14723_v35  ;;  %v14725_v6 = vadd.f32 %v14724_v38, %v14684_v20 }
 0xcd3   :  { %v14686_v61 = vpop.f32.mrf.mxu1 }
 0xcd4   :  { %v14727_v11 = vpop.f32.mrf.mxu0  ;;  %19410 = vtanh.f32 %v14725_v6 }
 0xcdf   :  { %v20415_v52 = vpop.eup %19408 }
 0xce1   :  { %v19411_v39 = vpop.eup %19410 }
 0xced   :  { %v17256_v32 = vpop.f32.mrf.mxu1 }
 0xcee   :  { %v17278_v14 = vpop.f32.mrf.mxu0 }
 0xcef   :  { %v17257_v0 = vpop.f32.mrf.mxu1 }
 0xcf0   :  { %v17279_v37 = vpop.f32.mrf.mxu0  ;;  %v17258_v41 = vadd.f32 %v17257_v0, %v17256_v32 }
 0xcf1   :  { %v17259_v7 = vpop.f32.mrf.mxu1  ;;  %v17280_v16 = vadd.f32 %v17279_v37, %v17278_v14 }
 0xcf2   :  { %v17281_v4 = vpop.f32.mrf.mxu0  ;;  %v14764_v2 = vadd.f32 %v17258_v41, %v14131_v33 }
 0xcf3   :  { %v17260_v17 = vpop.f32.mrf.mxu1 }
 0xcf4   :  { %v17282_v8 = vpop.f32.mrf.mxu0  ;;  %v14804_v51 = vadd.f32 %v17280_v16, %v14764_v2 }
 0xcf6   :  { %19412 = vtanh.f32 %v14804_v51 }
 0xd03   :  { %v20418_v53 = vpop.eup %19412 }
 0xd04   :  { %19614 = dma.done.wait [#allocation9 + $0x6], 2432 }
 0xd05   :  { %19615 = vsyncadd [#allocation9 + $0x6], 4294964864  ;;  %17355 = vmatprep.subr.bf16.mxu0 %v19625_v55  ;;  %v14866_v58 = vpack.c.bf16 %v19411_v39, %v19411_v39  ;;  %17371 = vmatprep.mubr.msk.bf16.mxu0 %vm19626_vm0, %v19625_v55  ;;  %v19414_v44 = vld [vmem:[#allocation8 + $0x78] sm:$0xff]   ;;  %v19417_v56 = vld [vmem:[#allocation8 + $0x70] sm:$0xff]   ;;  %v14865_v13 = vpack.c.bf16 %v20415_v52, %v20415_v52  ;;  %v14867_v25 = vpack.c.bf16 %v20418_v53, %v20418_v53 }
 0xd06   :  { %v19415_v15 = vld [vmem:[#allocation8 + $0x38] sm:$0xff]   ;;  %17284 = vmatprep.subr.bf16.mxu1 %v19414_v44  ;;  %v19418_v62 = vld [vmem:[#allocation8 + $0x30] sm:$0xff]   ;;  %v19420_v59 = vld [vmem:[#allocation8 + $0x68] sm:$0xff]  }
 0xd07   :  { %15044 = vmatprep.mubr.bf16.mxu1 %v14866_v58  ;;  %v19416_v60 = vld [vmem:[#allocation8 + $0xb8] sm:$0xff]   ;;  %17285 = vmatpush3.bf16.msra.mxu1 %v19415_v15  ;;  %v19419_v30 = vld [vmem:[#allocation8 + $0xb0] sm:$0xff]   ;;  %v19421_v9 = vld [vmem:[#allocation8 + $0x28] sm:$0xff]  }
 0xd08   :  { %17356 = vmatpush3.bf16.msra.mxu0 %v19416_v60  ;;  %17286 = vmatprep.subr.bf16.mxu1 %v19417_v56  ;;  %v19422_v46 = vld [vmem:[#allocation8 + $0xa8] sm:$0xff]   ;;  %v19423_v23 = vld [vmem:[#allocation8 + $0x60] sm:$0xff]   ;;  %v19426_v57 = vld [vmem:[#allocation8 + $0x58] sm:$0xff]  }
 0xd09   :  { %17357 = vmatprep.subr.bf16.mxu0 %v19625_v55  ;;  %v19424_v43 = vld [vmem:[#allocation8 + $0x20] sm:$0xff]   ;;  %v19427_v24 = vld [vmem:[#allocation8 + $0x18] sm:$0xff]   ;;  %v19429_v27 = vld [vmem:[#allocation8 + $0x50] sm:$0xff]  }
 0xd0a   :  { %v19425_v10 = vld [vmem:[#allocation8 + $0xa0] sm:$0xff]   ;;  %v19428_v34 = vld [vmem:[#allocation8 + $0x98] sm:$0xff]   ;;  %v19430_v45 = vld [vmem:[#allocation8 + $0x10] sm:$0xff]  }
 0xd0b   :  { %17287 = vmatpush3.bf16.msra.mxu1 %v19418_v62  ;;  %v19431_v49 = vld [vmem:[#allocation8 + $0x90] sm:$0xff]   ;;  %v19432_v21 = vld [vmem:[#allocation8 + $0x48] sm:$0xff]   ;;  %v19435_v29 = vld [vmem:[#allocation8 + $0x40] sm:$0xff]  }
 0xd0c   :  { %17358 = vmatpush3.bf16.msra.mxu0 %v19419_v30  ;;  %17288 = vmatprep.subr.bf16.mxu1 %v19420_v59  ;;  %v19433_v28 = vld [vmem:[#allocation8 + $0x8] sm:$0xff]   ;;  %v19436_v50 = vld [vmem:[#allocation8] sm:$0xff]  }
 0xd0d   :  { %17359 = vmatprep.subr.bf16.mxu0 %v19625_v55  ;;  %v19434_v22 = vld [vmem:[#allocation8 + $0x88] sm:$0xff]   ;;  %v19437_v47 = vld [vmem:[#allocation8 + $0x80] sm:$0xff]  }
 0xd0e   :  { %v14864_v1 = vld [vmem:[#allocation10 + $0x6] ss:$0 sm:$0xff] }
 0xd0f   :  { %17289 = vmatpush3.bf16.msra.mxu1 %v19421_v9 }
 0xd10   :  { %17360 = vmatpush3.bf16.msra.mxu0 %v19422_v46  ;;  %17290 = vmatprep.subr.bf16.mxu1 %v19423_v23 }
 0xd11   :  { %17361 = vmatprep.subr.bf16.mxu0 %v19625_v55 }
 0xd13   :  { %17291 = vmatpush3.bf16.msra.mxu1 %v19424_v43 }
 0xd14   :  { %17362 = vmatpush3.bf16.msra.mxu0 %v19425_v10  ;;  %17292 = vmatprep.subr.bf16.mxu1 %v19426_v57 }
 0xd15   :  { %17363 = vmatprep.subr.bf16.mxu0 %v19625_v55 }
 0xd17   :  { %17293 = vmatpush3.bf16.msra.mxu1 %v19427_v24 }
 0xd18   :  { %17364 = vmatpush3.bf16.msra.mxu0 %v19428_v34  ;;  %17294 = vmatprep.subr.bf16.mxu1 %v19429_v27 }
 0xd19   :  { %17365 = vmatprep.subr.bf16.mxu0 %v19625_v55 }
 0xd1b   :  { %17295 = vmatpush3.bf16.msra.mxu1 %v19430_v45 }
 0xd1c   :  { %17366 = vmatpush3.bf16.msra.mxu0 %v19431_v49  ;;  %17296 = vmatprep.subr.bf16.mxu1 %v19432_v21 }
 0xd1d   :  { %17367 = vmatprep.subr.bf16.mxu0 %v19625_v55 }
 0xd1f   :  { %17297 = vmatpush3.bf16.msra.mxu1 %v19433_v28 }
 0xd20   :  { %17368 = vmatpush3.bf16.msra.mxu0 %v19434_v22  ;;  %17298 = vmatprep.subr.bf16.mxu1 %v19435_v29 }
 0xd21   :  { %17369 = vmatprep.subr.bf16.mxu0 %v19625_v55 }
 0xd23   :  { %17299 = vmatpush3.bf16.msra.mxu1 %v19436_v50 }
 0xd24   :  { %17370 = vmatpush3.bf16.msra.mxu0 %v19437_v47 }
 0xd26   :  { %15045 = vmatmul.mubr.bf16.vlgmr.msra.gmra.mxu1 %v14865_v13 }
 0xd27   :  { %17372 = vmatmul.mubr.bf16.vlgmr.msra.gmra.mxu0 %v14867_v25 }
 0xde6   :  { %v17300_v18 = vpop.f32.mrf.mxu1 }
 0xde7   :  { %v15086_v54 = vpop.f32.mrf.mxu0 }
 0xde8   :  { %v17301_v19 = vpop.f32.mrf.mxu1 }
 0xde9   :  { %v17302_v31 = vadd.f32 %v17301_v19, %v17300_v18  ;;  %v17373_v12 = vpop.f32.mrf.mxu0 }
 0xdea   :  { %v17303_v3 = vpop.f32.mrf.mxu1 }
 0xdeb   :  { %v15047_v48 = vadd.f32 %v17302_v31, %v14864_v1  ;;  %v15089_v63 = vpop.f32.mrf.mxu0 }
 0xdec   :  { %v17304_v55 = vpop.f32.mrf.mxu1 }
 0xded   :  { %v15087_v40 = vadd.f32 %v15086_v54, %v15047_v48  ;;  %v17374_v5 = vpop.f32.mrf.mxu0 }
 0xdef   :  { %19438 = vtanh.f32 %v15087_v40 }
 0xdfc   :  { %v19439_v26 = vpop.eup %19438 }
 0xdfd   :  { %15093 = vst [vmem:[%s20446_s9] sm:$0xff] %v19439_v26 }
 0xdfe   :  { %15098 = vsyncpa [#allocation11], 1 }
 0xdff   :  { %15099 = vsyncmov [#allocation9] }
 0xe02   :  { %s15100_s17 = vpop.sfrf %15099 }
 0xe03   :  { %p16995_p12 = scmp.ne.s32.totalorder %s15100_s17, 0 }
 0xe05   :  { %15104 = shalt.err (%p16995_p12)  }
 0xe06   :  { %15106 = vsyncmov [#allocation9 + $0x1] }
 0xe09   :  { %s15107_s18 = vpop.sfrf %15106 }
 0xe0a   :  { %p16996_p13 = scmp.ne.s32.totalorder %s15107_s18, 0 }
 0xe0c   :  { %15111 = shalt.err (%p16996_p13)  }
 0xe0d   :  { %15113 = vsyncmov [#allocation9 + $0x2] }
 0xe10   :  { %s15114_s19 = vpop.sfrf %15113 }
 0xe11   :  { %p16997_p0 = scmp.ne.s32.totalorder %s15114_s19, 0 }
 0xe13   :  { %15118 = shalt.err (%p16997_p0)  }
 0xe14   :  { %15120 = vsyncmov [#allocation9 + $0x3] }
 0xe17   :  { %s15121_s20 = vpop.sfrf %15120 }
 0xe18   :  { %p16998_p1 = scmp.ne.s32.totalorder %s15121_s20, 0 }
 0xe1a   :  { %15125 = shalt.err (%p16998_p1)  }
 0xe1b   :  { %15127 = vsyncmov [#allocation9 + $0x4] }
 0xe1e   :  { %s15128_s21 = vpop.sfrf %15127 }
 0xe1f   :  { %p16999_p2 = scmp.ne.s32.totalorder %s15128_s21, 0 }
 0xe21   :  { %15132 = shalt.err (%p16999_p2)  }
 0xe22   :  { %15134 = vsyncmov [#allocation9 + $0x5] }
 0xe25   :  { %s15135_s9 = vpop.sfrf %15134 }
 0xe26   :  { %p17000_p3 = scmp.ne.s32.totalorder %s15135_s9, 0 }
 0xe28   :  { %15139 = shalt.err (%p17000_p3)  }
 0xe29   :  { %15141 = vsyncmov [#allocation9 + $0x6] }
 0xe2c   :  { %s15142_s22 = vpop.sfrf %15141 }
 0xe2d   :  { %p17001_p4 = scmp.ne.s32.totalorder %s15142_s22, 0 }
 0xe2f   :  { %15146 = shalt.err (%p17001_p4)  }

</bundles_post_ra>
